<compile_context>
chip_gen: v7x
topology: tpu7x:2x2x1
jax: 0.10.0
libtpu: 0.0.40
codegen_flags: <defaults>
</compile_context>

<pallas_src>
import functools

import numpy as np
import jax
import jax.numpy as jnp
from jax.experimental import pallas as pl
from jax.experimental.pallas import tpu as pltpu

LANE = 128
SUB = 8


def _round_up(v, m):
    return (v + m - 1) // m * m


# --------------------------- wrapper-side packing ----------------------------

def _im2col(x_nhwc, kh, kw, stride, padding, mp, kp):
    """PyTorch-style zero-padded im2col -> (mp, kp) bf16 patch matrix.
    Row order is (n, oh, ow); column order is (kh, kw, cin)."""
    n, h, w, c = x_nhwc.shape
    oh = (h + 2 * padding - kh) // stride + 1
    ow = (w + 2 * padding - kw) // stride + 1
    xp = jnp.pad(x_nhwc, ((0, 0), (padding, padding), (padding, padding), (0, 0)))
    cols = []
    for i in range(kh):
        for j in range(kw):
            cols.append(xp[:, i:i + stride * oh:stride,
                           j:j + stride * ow:stride, :])
    m = n * oh * ow
    k = kh * kw * c
    patches = jnp.concatenate(cols, axis=-1).reshape(m, k).astype(jnp.bfloat16)
    return jnp.pad(patches, ((0, mp - m), (0, kp - k)))


def _pack_weight(w_oihw, kp, cp):
    cout, cin, kh, kw = w_oihw.shape
    k = kh * kw * cin
    wm = jnp.transpose(w_oihw, (2, 3, 1, 0)).reshape(k, cout)
    return jnp.pad(wm, ((0, kp - k), (0, cp - cout))).astype(jnp.bfloat16)


def _pack_vec(v, cp):
    return jnp.pad(v.astype(jnp.float32), (0, cp - v.shape[0])).reshape(1, cp)


@functools.lru_cache(maxsize=None)
def _conv2_select_mats(n, oh, ow, mp):
    """S[d, mo, mi] = 1 iff input row mi is the (di,dj) neighbour of output
    row mo for a 3x3 / stride-1 / pad-1 conv on an (n, oh, ow) map.
    Compile-time constant (built with numpy, cached per geometry)."""
    sel = np.zeros((9, mp, mp), np.float32)
    d = 0
    for di in (-1, 0, 1):
        for dj in (-1, 0, 1):
            for b in range(n):
                for y in range(oh):
                    yy = y + di
                    if not 0 <= yy < oh:
                        continue
                    for x in range(ow):
                        xx = x + dj
                        if not 0 <= xx < ow:
                            continue
                        sel[d, (b * oh + y) * ow + x,
                            (b * oh + yy) * ow + xx] = 1.0
            d += 1
    return sel


@functools.lru_cache(maxsize=None)
def _pool_mat(n, hw, np_pad, mp):
    """P[b, b*hw + s] = 1/hw : per-sample adaptive-avg-pool as a matmul."""
    p = np.zeros((np_pad, mp), np.float32)
    for b in range(n):
        p[b, b * hw:(b + 1) * hw] = 1.0 / hw
    return p


# --------------------------------- stem conv ---------------------------------

def _stem_kernel(p_ref, w_ref, o_ref):
    o_ref[...] = jnp.dot(p_ref[...], w_ref[...],
                         preferred_element_type=jnp.float32).astype(o_ref.dtype)


def stem_conv7x7(x_nhwc, w_oihw):
    n, h, w, cin = x_nhwc.shape
    cout = w_oihw.shape[0]
    oh, ow = h, w                          # k=7, stride=1, pad=3
    m = n * oh * ow
    k = 49 * cin
    kp = _round_up(k, LANE)
    cp = _round_up(cout, LANE)
    tm = min(128, _round_up(m, SUB))       # grid >= 2 on the stem (v7x 2 TCs)
    mp = _round_up(m, tm)

    patches = _im2col(x_nhwc, 7, 7, 1, 3, mp, kp)
    wmat = _pack_weight(w_oihw, kp, cp)

    out = pl.pallas_call(
        _stem_kernel,
        out_shape=jax.ShapeDtypeStruct((mp, cp), jnp.bfloat16),
        grid=(mp // tm,),
        in_specs=[pl.BlockSpec((tm, kp), lambda i: (i, 0)),
                  pl.BlockSpec((kp, cp), lambda i: (0, 0))],
        out_specs=pl.BlockSpec((tm, cp), lambda i: (i, 0)),
        compiler_params=pltpu.CompilerParams(
            dimension_semantics=("parallel",)),
        cost_estimate=pl.CostEstimate(
            flops=int(2 * m * k * cout), transcendentals=0,
            bytes_accessed=int(2 * (m * k + k * cout + m * cout))),
    )(patches, wmat)
    return out[:m, :cout].reshape(n, oh, ow, cout)


# --------------------------- fused residual block ----------------------------

def _make_block_kernel(has_down, has_head):
    def kernel(p1_ref, w1_ref, s2_ref, b2_ref, sel_ref, w2_ref, *rest):
        if has_down:
            pd_ref, wd_ref, ds_ref, db_ref = rest[:4]
            rest = rest[4:]
        else:
            res_ref = rest[0]
            rest = rest[1:]
        if has_head:
            pool_ref, hs_ref, hb_ref = rest[:3]
            rest = rest[3:]
        (o_ref,) = rest

        # conv1 + bn2 + relu : the intermediate activation never leaves VMEM.
        h1 = jnp.dot(p1_ref[...], w1_ref[...],
                     preferred_element_type=jnp.float32)
        b = jnp.maximum(h1 * s2_ref[...] + b2_ref[...], 0.0).astype(jnp.bfloat16)

        # conv2 : in-kernel im2col via 9 select-matrix matmuls (MXU has slack).
        acc = jnp.zeros(h1.shape, jnp.float32)
        for d in range(9):
            shifted = jnp.dot(sel_ref[d], b,
                              preferred_element_type=jnp.float32
                              ).astype(jnp.bfloat16)
            acc = acc + jnp.dot(shifted, w2_ref[d],
                                preferred_element_type=jnp.float32)

        # residual branch
        if has_down:
            rd = jnp.dot(pd_ref[...], wd_ref[...],
                         preferred_element_type=jnp.float32)
            res = rd * ds_ref[...] + db_ref[...]
        else:
            res = res_ref[...].astype(jnp.float32)
        out = acc + res

        if has_head:
            # final BN -> adaptive avg pool (pool matrix) -> l2 normalize
            pooled = jnp.dot(pool_ref[...], out,
                             preferred_element_type=jnp.float32)
            emb = pooled * hs_ref[...] + hb_ref[...]
            nrm = jnp.sum(emb * emb, axis=-1, keepdims=True) + 1e-10
            o_ref[...] = emb * jax.lax.rsqrt(nrm)
        else:
            o_ref[...] = out.astype(o_ref.dtype)

    return kernel


def residual_block(x_nhwc, p, stride, head=None):
    """One fused pallas_call: conv1 -> bn2/relu -> conv2 (+ downsample conv/BN
    or identity residual) [+ final BN / avg-pool / l2-norm head]."""
    n, h, w, cin = x_nhwc.shape
    cout = p["conv1_w"].shape[0]
    oh = (h + 2 - 3) // stride + 1
    ow = (w + 2 - 3) // stride + 1
    m = n * oh * ow
    mp = _round_up(m, SUB)
    cp = _round_up(cout, LANE)
    k1 = 9 * cin
    k1p = _round_up(k1, LANE)

    # bn1 + relu once in the wrapper (fuses into the im2col pad/slice copy),
    # so patches are already pre-activated bf16 and padding is a true zero.
    act = jnp.maximum(x_nhwc.astype(jnp.float32) * p["bn1_s"] + p["bn1_b"], 0.0)
    p1 = _im2col(act, 3, 3, stride, 1, mp, k1p)
    w1 = _pack_weight(p["conv1_w"], k1p, cp)
    s2 = _pack_vec(p["bn2_s"], cp)
    b2 = _pack_vec(p["bn2_b"], cp)

    sel = jnp.asarray(_conv2_select_mats(n, oh, ow, mp), jnp.bfloat16)
    w2 = jnp.pad(jnp.transpose(p["conv2_w"], (2, 3, 1, 0)).reshape(9, cout, cout),
                 ((0, 0), (0, cp - cout), (0, cp - cout))).astype(jnp.bfloat16)

    args = [p1, w1, s2, b2, sel, w2]
    flops = 2 * m * k1 * cout + 2 * 9 * m * cout * cout + 2 * 9 * m * m * cout

    has_down = "down_conv_w" in p
    if has_down:
        kd = 9 * cin
        kdp = _round_up(kd, LANE)
        pd = _im2col(x_nhwc, 3, 3, stride, 1, mp, kdp)   # raw x, zero pad
        wd = _pack_weight(p["down_conv_w"], kdp, cp)
        ds = _pack_vec(p["down_bn_s"], cp)
        db = _pack_vec(p["down_bn_b"], cp)
        args += [pd, wd, ds, db]
        flops += 2 * m * kd * cout
    else:
        # identity residual (stride == 1, cin == cout by construction)
        res = jnp.pad(x_nhwc.reshape(m, cin).astype(jnp.bfloat16),
                      ((0, mp - m), (0, cp - cin)))
        args.append(res)

    has_head = head is not None
    if has_head:
        np_pad = _round_up(n, SUB)
        pool = jnp.asarray(_pool_mat(n, oh * ow, np_pad, mp), jnp.float32)
        hs = _pack_vec(head[0], cp)
        hb = _pack_vec(head[1], cp)
        args += [pool, hs, hb]
        out_sds = jax.ShapeDtypeStruct((np_pad, cp), jnp.float32)
    else:
        out_sds = jax.ShapeDtypeStruct((mp, cp), jnp.bfloat16)

    in_specs = [pl.BlockSpec(a.shape, lambda i, _nd=a.ndim: (0,) * _nd)
                for a in args]
    bytes_accessed = int(sum(int(a.size) * a.dtype.itemsize for a in args)
                         + int(np.prod(out_sds.shape)) * out_sds.dtype.itemsize)

    out = pl.pallas_call(
        _make_block_kernel(has_down, has_head),
        out_shape=out_sds,
        grid=(1,),
        in_specs=in_specs,
        out_specs=pl.BlockSpec(out_sds.shape, lambda i: (0, 0)),
        compiler_params=pltpu.CompilerParams(
            dimension_semantics=("arbitrary",)),
        cost_estimate=pl.CostEstimate(flops=int(flops),
                                      transcendentals=int(n if has_head else 0),
                                      bytes_accessed=bytes_accessed),
    )(*args)

    if has_head:
        return out[:n, :cout]
    return out[:m, :cout].reshape(n, oh, ow, cout)


# ------------------------------ model definition -----------------------------

class KeyGen:
    def __init__(self, key):
        self.key = key

    def __call__(self):
        self.key, sub = jax.random.split(self.key)
        return sub


def make_bn_params(kg, c, eps=1e-5):
    gamma = jax.random.uniform(kg(), (c,), minval=0.5, maxval=1.5)
    beta = jax.random.normal(kg(), (c,)) * 0.1
    mean = jax.random.normal(kg(), (c,)) * 0.1
    var = jax.random.uniform(kg(), (c,), minval=0.5, maxval=1.5)
    scale = gamma / jnp.sqrt(var + eps)
    bias = beta - mean * scale
    return scale.astype(jnp.float32), bias.astype(jnp.float32)


def make_conv_w(kg, cin, cout, k):
    fan_in = cin * k * k
    w = jax.random.normal(kg(), (cout, cin, k, k)) * (1.0 / fan_in ** 0.5)
    return w.astype(jnp.float32)


def init_resnet_params(key, layers, width):
    kg = KeyGen(key)
    params = {"conv_w": make_conv_w(kg, 1, width[0], 7)}
    in_ch = width[0]
    layer_params = []
    for nblocks, out_ch in zip(layers, width):
        blocks = []
        for b in range(nblocks):
            cin = in_ch if b == 0 else out_ch
            stride = 2 if b == 0 else 1
            p = {}
            p["bn1_s"], p["bn1_b"] = make_bn_params(kg, cin)
            p["conv1_w"] = make_conv_w(kg, cin, out_ch, 3)
            p["bn2_s"], p["bn2_b"] = make_bn_params(kg, out_ch)
            p["conv2_w"] = make_conv_w(kg, out_ch, out_ch, 3)
            if b == 0 and (stride != 1 or cin != out_ch):
                p["down_conv_w"] = make_conv_w(kg, cin, out_ch, 3)
                p["down_bn_s"], p["down_bn_b"] = make_bn_params(kg, out_ch)
            blocks.append(p)
        layer_params.append(blocks)
        in_ch = out_ch
    params["layers"] = layer_params
    params["bn_s"], params["bn_b"] = make_bn_params(kg, width[-1])
    return params


def resnet_v2_forward(x_nchw, params):
    x = jnp.transpose(x_nchw, (0, 2, 3, 1))             # NCHW -> NHWC
    out = stem_conv7x7(x, params["conv_w"])
    n_layers = len(params["layers"])
    for li, blocks in enumerate(params["layers"]):
        for bi, p in enumerate(blocks):
            stride = 2 if bi == 0 else 1
            is_last = (li == n_layers - 1) and (bi == len(blocks) - 1)
            head = (params["bn_s"], params["bn_b"]) if is_last else None
            out = residual_block(out, p, stride, head=head)
    return out    # (N, width[-1]) l2-normalized embedding (head fused)


# ----------------------------------- main ------------------------------------

if __name__ == "__main__":
    layers = [2, 1, 1, 1, 1]
    width = [8, 8, 16, 16, 32]

    key = jax.random.PRNGKey(0)
    pkey, xkey = jax.random.split(key)
    params = init_resnet_params(pkey, layers, width)

    # PyTorch input convention: NCHW with 1 input channel (conv7x7(1, ...)).
    x = jax.random.normal(xkey, (2, 1, 16, 16), dtype=jnp.float32)

    fwd = jax.jit(resnet_v2_forward)
    emb = jax.block_until_ready(fwd(x, params))
    assert emb.shape == (2, width[-1])
    assert bool(jnp.all(jnp.isfinite(emb)))
    print("KERNEL_OK")
</pallas_src>

<mosaic_0001>
module attributes {stable_mosaic.version = 11 : i64} {
  func.func @_stem_kernel(%arg0: i32, %arg1: memref<128x128xbf16, #tpu.memory_space<vmem>>, %arg2: memref<128x128xbf16, #tpu.memory_space<vmem>>, %arg3: memref<128x128xbf16, #tpu.memory_space<vmem>>) attributes {dimension_semantics = [#tpu.dimension_semantics<parallel>], iteration_bounds = array<i64: 4>, scalar_prefetch = 0 : i64, scratch_operands = 0 : i64, tpu.core_type = #tpu.core_type<tc>, window_params = [{transform_indices = @transform_0, window_bounds = array<i64: 128, 128>}, {pipeline_mode = #tpu.pipeline_mode<synchronous>, transform_indices = @transform_1, window_bounds = array<i64: 128, 128>}, {transform_indices = @transform_2, window_bounds = array<i64: 128, 128>}]} {
    %c0 = arith.constant 0 : index
    %c0_0 = arith.constant 0 : index
    %0 = vector.load %arg1[%c0, %c0_0] : memref<128x128xbf16, #tpu.memory_space<vmem>>, vector<128x128xbf16>
    %c0_1 = arith.constant 0 : index
    %c0_2 = arith.constant 0 : index
    %1 = vector.load %arg2[%c0_1, %c0_2] : memref<128x128xbf16, #tpu.memory_space<vmem>>, vector<128x128xbf16>
    %cst = arith.constant dense<0.000000e+00> : vector<128x128xf32>
    %2 = tpu.matmul %0, %1, %cst {dimension_numbers = #tpu.dot_dimension_numbers<[1], [0], [0], [1], [0, 0, 1, 1], [], []>} : vector<128x128xbf16>, vector<128x128xbf16>, vector<128x128xf32> -> vector<128x128xf32>
    %3 = arith.truncf %2 : vector<128x128xf32> to vector<128x128xbf16>
    %c0_3 = arith.constant 0 : index
    %c0_4 = arith.constant 0 : index
    %4 = vector.load %arg3[%c0_3, %c0_4] : memref<128x128xbf16, #tpu.memory_space<vmem>>, vector<128x128xbf16>
    tpu.vector_store %arg3[%c0_3, %c0_4], %3 {strides = array<i32>} : memref<128x128xbf16, #tpu.memory_space<vmem>>, vector<128x128xbf16>,
    return
  }
  func.func @transform_0(%arg0: i32) -> (i32, i32) {
    %c0_i32 = arith.constant 0 : i32
    %c0_i32_0 = arith.constant 0 : i32
    return %arg0, %c0_i32 : i32, i32
  }
  func.func @transform_1(%arg0: i32) -> (i32, i32) {
    %c0_i32 = arith.constant 0 : i32
    %c0_i32_0 = arith.constant 0 : i32
    %c0_i32_1 = arith.constant 0 : i32
    return %c0_i32, %c0_i32_0 : i32, i32
  }
  func.func @transform_2(%arg0: i32) -> (i32, i32) {
    %c0_i32 = arith.constant 0 : i32
    %c0_i32_0 = arith.constant 0 : i32
    return %arg0, %c0_i32 : i32, i32
  }
}

module attributes {stable_mosaic.version = 11 : i64} {
  func.func @kernel(%arg0: i32, %arg1: memref<128x128xbf16, #tpu.memory_space<vmem>>, %arg2: memref<128x128xbf16, #tpu.memory_space<vmem>>, %arg3: memref<1x128xf32, #tpu.memory_space<vmem>>, %arg4: memref<1x128xf32, #tpu.memory_space<vmem>>, %arg5: memref<9x128x128xbf16, #tpu.memory_space<vmem>>, %arg6: memref<9x128x128xbf16, #tpu.memory_space<vmem>>, %arg7: memref<128x128xbf16, #tpu.memory_space<vmem>>, %arg8: memref<128x128xbf16, #tpu.memory_space<vmem>>, %arg9: memref<1x128xf32, #tpu.memory_space<vmem>>, %arg10: memref<1x128xf32, #tpu.memory_space<vmem>>, %arg11: memref<128x128xbf16, #tpu.memory_space<vmem>>) attributes {dimension_semantics = [#tpu.dimension_semantics<arbitrary>], iteration_bounds = array<i64: 1>, scalar_prefetch = 0 : i64, scratch_operands = 0 : i64, tpu.core_type = #tpu.core_type<tc>, window_params = [{pipeline_mode = #tpu.pipeline_mode<synchronous>, transform_indices = @transform_0, window_bounds = array<i64: 128, 128>}, {pipeline_mode = #tpu.pipeline_mode<synchronous>, transform_indices = @transform_1, window_bounds = array<i64: 128, 128>}, {pipeline_mode = #tpu.pipeline_mode<synchronous>, transform_indices = @transform_2, window_bounds = array<i64: 1, 128>}, {pipeline_mode = #tpu.pipeline_mode<synchronous>, transform_indices = @transform_3, window_bounds = array<i64: 1, 128>}, {pipeline_mode = #tpu.pipeline_mode<synchronous>, transform_indices = @transform_4, window_bounds = array<i64: 9, 128, 128>}, {pipeline_mode = #tpu.pipeline_mode<synchronous>, transform_indices = @transform_5, window_bounds = array<i64: 9, 128, 128>}, {pipeline_mode = #tpu.pipeline_mode<synchronous>, transform_indices = @transform_6, window_bounds = array<i64: 128, 128>}, {pipeline_mode = #tpu.pipeline_mode<synchronous>, transform_indices = @transform_7, window_bounds = array<i64: 128, 128>}, {pipeline_mode = #tpu.pipeline_mode<synchronous>, transform_indices = @transform_8, window_bounds = array<i64: 1, 128>}, {pipeline_mode = #tpu.pipeline_mode<synchronous>, transform_indices = @transform_9, window_bounds = array<i64: 1, 128>}, {pipeline_mode = #tpu.pipeline_mode<synchronous>, transform_indices = @transform_10, window_bounds = array<i64: 128, 128>}]} {
    %c0 = arith.constant 0 : index
    %c0_0 = arith.constant 0 : index
    %0 = vector.load %arg1[%c0, %c0_0] : memref<128x128xbf16, #tpu.memory_space<vmem>>, vector<128x128xbf16>
    %c0_1 = arith.constant 0 : index
    %c0_2 = arith.constant 0 : index
    %1 = vector.load %arg2[%c0_1, %c0_2] : memref<128x128xbf16, #tpu.memory_space<vmem>>, vector<128x128xbf16>
    %cst = arith.constant dense<0.000000e+00> : vector<128x128xf32>
    %2 = tpu.matmul %0, %1, %cst {dimension_numbers = #tpu.dot_dimension_numbers<[1], [0], [0], [1], [0, 0, 1, 1], [], []>} : vector<128x128xbf16>, vector<128x128xbf16>, vector<128x128xf32> -> vector<128x128xf32>
    %c0_3 = arith.constant 0 : index
    %c0_4 = arith.constant 0 : index
    %3 = vector.load %arg3[%c0_3, %c0_4] : memref<1x128xf32, #tpu.memory_space<vmem>>, vector<1x128xf32>
    %4 = vector.broadcast %3 : vector<1x128xf32> to vector<128x128xf32>
    %5 = arith.mulf %2, %4 : vector<128x128xf32>
    %c0_5 = arith.constant 0 : index
    %c0_6 = arith.constant 0 : index
    %6 = vector.load %arg4[%c0_5, %c0_6] : memref<1x128xf32, #tpu.memory_space<vmem>>, vector<1x128xf32>
    %7 = vector.broadcast %6 : vector<1x128xf32> to vector<128x128xf32>
    %8 = arith.addf %5, %7 : vector<128x128xf32>
    %cst_7 = arith.constant 0.000000e+00 : f32
    %9 = vector.broadcast %cst_7 : f32 to vector<128x128xf32>
    %10 = arith.maximumf %8, %9 : vector<128x128xf32>
    %11 = arith.truncf %10 : vector<128x128xf32> to vector<128x128xbf16>
    %cst_8 = arith.constant 0.000000e+00 : f32
    %12 = vector.broadcast %cst_8 : f32 to vector<128x128xf32>
    %c0_9 = arith.constant 0 : index
    %c0_10 = arith.constant 0 : index
    %c0_11 = arith.constant 0 : index
    %13 = vector.load %arg5[%c0_9, %c0_10, %c0_11] : memref<9x128x128xbf16, #tpu.memory_space<vmem>>, vector<1x128x128xbf16>
    %14 = vector.shape_cast %13 : vector<1x128x128xbf16> to vector<128x128xbf16>
    %cst_12 = arith.constant dense<0.000000e+00> : vector<128x128xf32>
    %15 = tpu.matmul %14, %11, %cst_12 {dimension_numbers = #tpu.dot_dimension_numbers<[1], [0], [0], [1], [0, 0, 1, 1], [], []>} : vector<128x128xbf16>, vector<128x128xbf16>, vector<128x128xf32> -> vector<128x128xf32>
    %16 = arith.truncf %15 : vector<128x128xf32> to vector<128x128xbf16>
    %c0_13 = arith.constant 0 : index
    %c0_14 = arith.constant 0 : index
    %c0_15 = arith.constant 0 : index
    %17 = vector.load %arg6[%c0_13, %c0_14, %c0_15] : memref<9x128x128xbf16, #tpu.memory_space<vmem>>, vector<1x128x128xbf16>
    %18 = vector.shape_cast %17 : vector<1x128x128xbf16> to vector<128x128xbf16>
    %cst_16 = arith.constant dense<0.000000e+00> : vector<128x128xf32>
    %19 = tpu.matmul %16, %18, %cst_16 {dimension_numbers = #tpu.dot_dimension_numbers<[1], [0], [0], [1], [0, 0, 1, 1], [], []>} : vector<128x128xbf16>, vector<128x128xbf16>, vector<128x128xf32> -> vector<128x128xf32>
    %20 = arith.addf %12, %19 : vector<128x128xf32>
    %c1 = arith.constant 1 : index
    %c0_17 = arith.constant 0 : index
    %c0_18 = arith.constant 0 : index
    %21 = vector.load %arg5[%c1, %c0_17, %c0_18] : memref<9x128x128xbf16, #tpu.memory_space<vmem>>, vector<1x128x128xbf16>
    %22 = vector.shape_cast %21 : vector<1x128x128xbf16> to vector<128x128xbf16>
    %cst_19 = arith.constant dense<0.000000e+00> : vector<128x128xf32>
    %23 = tpu.matmul %22, %11, %cst_19 {dimension_numbers = #tpu.dot_dimension_numbers<[1], [0], [0], [1], [0, 0, 1, 1], [], []>} : vector<128x128xbf16>, vector<128x128xbf16>, vector<128x128xf32> -> vector<128x128xf32>
    %24 = arith.truncf %23 : vector<128x128xf32> to vector<128x128xbf16>
    %c1_20 = arith.constant 1 : index
    %c0_21 = arith.constant 0 : index
    %c0_22 = arith.constant 0 : index
    %25 = vector.load %arg6[%c1_20, %c0_21, %c0_22] : memref<9x128x128xbf16, #tpu.memory_space<vmem>>, vector<1x128x128xbf16>
    %26 = vector.shape_cast %25 : vector<1x128x128xbf16> to vector<128x128xbf16>
    %cst_23 = arith.constant dense<0.000000e+00> : vector<128x128xf32>
    %27 = tpu.matmul %24, %26, %cst_23 {dimension_numbers = #tpu.dot_dimension_numbers<[1], [0], [0], [1], [0, 0, 1, 1], [], []>} : vector<128x128xbf16>, vector<128x128xbf16>, vector<128x128xf32> -> vector<128x128xf32>
    %28 = arith.addf %20, %27 : vector<128x128xf32>
    %c2 = arith.constant 2 : index
    %c0_24 = arith.constant 0 : index
    %c0_25 = arith.constant 0 : index
    %29 = vector.load %arg5[%c2, %c0_24, %c0_25] : memref<9x128x128xbf16, #tpu.memory_space<vmem>>, vector<1x128x128xbf16>
    %30 = vector.shape_cast %29 : vector<1x128x128xbf16> to vector<128x128xbf16>
    %cst_26 = arith.constant dense<0.000000e+00> : vector<128x128xf32>
    %31 = tpu.matmul %30, %11, %cst_26 {dimension_numbers = #tpu.dot_dimension_numbers<[1], [0], [0], [1], [0, 0, 1, 1], [], []>} : vector<128x128xbf16>, vector<128x128xbf16>, vector<128x128xf32> -> vector<128x128xf32>
    %32 = arith.truncf %31 : vector<128x128xf32> to vector<128x128xbf16>
    %c2_27 = arith.constant 2 : index
    %c0_28 = arith.constant 0 : index
    %c0_29 = arith.constant 0 : index
    %33 = vector.load %arg6[%c2_27, %c0_28, %c0_29] : memref<9x128x128xbf16, #tpu.memory_space<vmem>>, vector<1x128x128xbf16>
    %34 = vector.shape_cast %33 : vector<1x128x128xbf16> to vector<128x128xbf16>
    %cst_30 = arith.constant dense<0.000000e+00> : vector<128x128xf32>
    %35 = tpu.matmul %32, %34, %cst_30 {dimension_numbers = #tpu.dot_dimension_numbers<[1], [0], [0], [1], [0, 0, 1, 1], [], []>} : vector<128x128xbf16>, vector<128x128xbf16>, vector<128x128xf32> -> vector<128x128xf32>
    %36 = arith.addf %28, %35 : vector<128x128xf32>
    %c3 = arith.constant 3 : index
    %c0_31 = arith.constant 0 : index
    %c0_32 = arith.constant 0 : index
    %37 = vector.load %arg5[%c3, %c0_31, %c0_32] : memref<9x128x128xbf16, #tpu.memory_space<vmem>>, vector<1x128x128xbf16>
    %38 = vector.shape_cast %37 : vector<1x128x128xbf16> to vector<128x128xbf16>
    %cst_33 = arith.constant dense<0.000000e+00> : vector<128x128xf32>
    %39 = tpu.matmul %38, %11, %cst_33 {dimension_numbers = #tpu.dot_dimension_numbers<[1], [0], [0], [1], [0, 0, 1, 1], [], []>} : vector<128x128xbf16>, vector<128x128xbf16>, vector<128x128xf32> -> vector<128x128xf32>
    %40 = arith.truncf %39 : vector<128x128xf32> to vector<128x128xbf16>
    %c3_34 = arith.constant 3 : index
    %c0_35 = arith.constant 0 : index
    %c0_36 = arith.constant 0 : index
    %41 = vector.load %arg6[%c3_34, %c0_35, %c0_36] : memref<9x128x128xbf16, #tpu.memory_space<vmem>>, vector<1x128x128xbf16>
    %42 = vector.shape_cast %41 : vector<1x128x128xbf16> to vector<128x128xbf16>
    %cst_37 = arith.constant dense<0.000000e+00> : vector<128x128xf32>
    %43 = tpu.matmul %40, %42, %cst_37 {dimension_numbers = #tpu.dot_dimension_numbers<[1], [0], [0], [1], [0, 0, 1, 1], [], []>} : vector<128x128xbf16>, vector<128x128xbf16>, vector<128x128xf32> -> vector<128x128xf32>
    %44 = arith.addf %36, %43 : vector<128x128xf32>
    %c4 = arith.constant 4 : index
    %c0_38 = arith.constant 0 : index
    %c0_39 = arith.constant 0 : index
    %45 = vector.load %arg5[%c4, %c0_38, %c0_39] : memref<9x128x128xbf16, #tpu.memory_space<vmem>>, vector<1x128x128xbf16>
    %46 = vector.shape_cast %45 : vector<1x128x128xbf16> to vector<128x128xbf16>
    %cst_40 = arith.constant dense<0.000000e+00> : vector<128x128xf32>
    %47 = tpu.matmul %46, %11, %cst_40 {dimension_numbers = #tpu.dot_dimension_numbers<[1], [0], [0], [1], [0, 0, 1, 1], [], []>} : vector<128x128xbf16>, vector<128x128xbf16>, vector<128x128xf32> -> vector<128x128xf32>
    %48 = arith.truncf %47 : vector<128x128xf32> to vector<128x128xbf16>
    %c4_41 = arith.constant 4 : index
    %c0_42 = arith.constant 0 : index
    %c0_43 = arith.constant 0 : index
    %49 = vector.load %arg6[%c4_41, %c0_42, %c0_43] : memref<9x128x128xbf16, #tpu.memory_space<vmem>>, vector<1x128x128xbf16>
    %50 = vector.shape_cast %49 : vector<1x128x128xbf16> to vector<128x128xbf16>
    %cst_44 = arith.constant dense<0.000000e+00> : vector<128x128xf32>
    %51 = tpu.matmul %48, %50, %cst_44 {dimension_numbers = #tpu.dot_dimension_numbers<[1], [0], [0], [1], [0, 0, 1, 1], [], []>} : vector<128x128xbf16>, vector<128x128xbf16>, vector<128x128xf32> -> vector<128x128xf32>
    %52 = arith.addf %44, %51 : vector<128x128xf32>
    %c5 = arith.constant 5 : index
    %c0_45 = arith.constant 0 : index
    %c0_46 = arith.constant 0 : index
    %53 = vector.load %arg5[%c5, %c0_45, %c0_46] : memref<9x128x128xbf16, #tpu.memory_space<vmem>>, vector<1x128x128xbf16>
    %54 = vector.shape_cast %53 : vector<1x128x128xbf16> to vector<128x128xbf16>
    %cst_47 = arith.constant dense<0.000000e+00> : vector<128x128xf32>
    %55 = tpu.matmul %54, %11, %cst_47 {dimension_numbers = #tpu.dot_dimension_numbers<[1], [0], [0], [1], [0, 0, 1, 1], [], []>} : vector<128x128xbf16>, vector<128x128xbf16>, vector<128x128xf32> -> vector<128x128xf32>
    %56 = arith.truncf %55 : vector<128x128xf32> to vector<128x128xbf16>
    %c5_48 = arith.constant 5 : index
    %c0_49 = arith.constant 0 : index
    %c0_50 = arith.constant 0 : index
    %57 = vector.load %arg6[%c5_48, %c0_49, %c0_50] : memref<9x128x128xbf16, #tpu.memory_space<vmem>>, vector<1x128x128xbf16>
    %58 = vector.shape_cast %57 : vector<1x128x128xbf16> to vector<128x128xbf16>
    %cst_51 = arith.constant dense<0.000000e+00> : vector<128x128xf32>
    %59 = tpu.matmul %56, %58, %cst_51 {dimension_numbers = #tpu.dot_dimension_numbers<[1], [0], [0], [1], [0, 0, 1, 1], [], []>} : vector<128x128xbf16>, vector<128x128xbf16>, vector<128x128xf32> -> vector<128x128xf32>
    %60 = arith.addf %52, %59 : vector<128x128xf32>
    %c6 = arith.constant 6 : index
    %c0_52 = arith.constant 0 : index
    %c0_53 = arith.constant 0 : index
    %61 = vector.load %arg5[%c6, %c0_52, %c0_53] : memref<9x128x128xbf16, #tpu.memory_space<vmem>>, vector<1x128x128xbf16>
    %62 = vector.shape_cast %61 : vector<1x128x128xbf16> to vector<128x128xbf16>
    %cst_54 = arith.constant dense<0.000000e+00> : vector<128x128xf32>
    %63 = tpu.matmul %62, %11, %cst_54 {dimension_numbers = #tpu.dot_dimension_numbers<[1], [0], [0], [1], [0, 0, 1, 1], [], []>} : vector<128x128xbf16>, vector<128x128xbf16>, vector<128x128xf32> -> vector<128x128xf32>
    %64 = arith.truncf %63 : vector<128x128xf32> to vector<128x128xbf16>
    %c6_55 = arith.constant 6 : index
    %c0_56 = arith.constant 0 : index
    %c0_57 = arith.constant 0 : index
    %65 = vector.load %arg6[%c6_55, %c0_56, %c0_57] : memref<9x128x128xbf16, #tpu.memory_space<vmem>>, vector<1x128x128xbf16>
    %66 = vector.shape_cast %65 : vector<1x128x128xbf16> to vector<128x128xbf16>
    %cst_58 = arith.constant dense<0.000000e+00> : vector<128x128xf32>
    %67 = tpu.matmul %64, %66, %cst_58 {dimension_numbers = #tpu.dot_dimension_numbers<[1], [0], [0], [1], [0, 0, 1, 1], [], []>} : vector<128x128xbf16>, vector<128x128xbf16>, vector<128x128xf32> -> vector<128x128xf32>
    %68 = arith.addf %60, %67 : vector<128x128xf32>
    %c7 = arith.constant 7 : index
    %c0_59 = arith.constant 0 : index
    %c0_60 = arith.constant 0 : index
    %69 = vector.load %arg5[%c7, %c0_59, %c0_60] : memref<9x128x128xbf16, #tpu.memory_space<vmem>>, vector<1x128x128xbf16>
    %70 = vector.shape_cast %69 : vector<1x128x128xbf16> to vector<128x128xbf16>
    %cst_61 = arith.constant dense<0.000000e+00> : vector<128x128xf32>
    %71 = tpu.matmul %70, %11, %cst_61 {dimension_numbers = #tpu.dot_dimension_numbers<[1], [0], [0], [1], [0, 0, 1, 1], [], []>} : vector<128x128xbf16>, vector<128x128xbf16>, vector<128x128xf32> -> vector<128x128xf32>
    %72 = arith.truncf %71 : vector<128x128xf32> to vector<128x128xbf16>
    %c7_62 = arith.constant 7 : index
    %c0_63 = arith.constant 0 : index
    %c0_64 = arith.constant 0 : index
    %73 = vector.load %arg6[%c7_62, %c0_63, %c0_64] : memref<9x128x128xbf16, #tpu.memory_space<vmem>>, vector<1x128x128xbf16>
    %74 = vector.shape_cast %73 : vector<1x128x128xbf16> to vector<128x128xbf16>
    %cst_65 = arith.constant dense<0.000000e+00> : vector<128x128xf32>
    %75 = tpu.matmul %72, %74, %cst_65 {dimension_numbers = #tpu.dot_dimension_numbers<[1], [0], [0], [1], [0, 0, 1, 1], [], []>} : vector<128x128xbf16>, vector<128x128xbf16>, vector<128x128xf32> -> vector<128x128xf32>
    %76 = arith.addf %68, %75 : vector<128x128xf32>
    %c8 = arith.constant 8 : index
    %c0_66 = arith.constant 0 : index
    %c0_67 = arith.constant 0 : index
    %77 = vector.load %arg5[%c8, %c0_66, %c0_67] : memref<9x128x128xbf16, #tpu.memory_space<vmem>>, vector<1x128x128xbf16>
    %78 = vector.shape_cast %77 : vector<1x128x128xbf16> to vector<128x128xbf16>
    %cst_68 = arith.constant dense<0.000000e+00> : vector<128x128xf32>
    %79 = tpu.matmul %78, %11, %cst_68 {dimension_numbers = #tpu.dot_dimension_numbers<[1], [0], [0], [1], [0, 0, 1, 1], [], []>} : vector<128x128xbf16>, vector<128x128xbf16>, vector<128x128xf32> -> vector<128x128xf32>
    %80 = arith.truncf %79 : vector<128x128xf32> to vector<128x128xbf16>
    %c8_69 = arith.constant 8 : index
    %c0_70 = arith.constant 0 : index
    %c0_71 = arith.constant 0 : index
    %81 = vector.load %arg6[%c8_69, %c0_70, %c0_71] : memref<9x128x128xbf16, #tpu.memory_space<vmem>>, vector<1x128x128xbf16>
    %82 = vector.shape_cast %81 : vector<1x128x128xbf16> to vector<128x128xbf16>
    %cst_72 = arith.constant dense<0.000000e+00> : vector<128x128xf32>
    %83 = tpu.matmul %80, %82, %cst_72 {dimension_numbers = #tpu.dot_dimension_numbers<[1], [0], [0], [1], [0, 0, 1, 1], [], []>} : vector<128x128xbf16>, vector<128x128xbf16>, vector<128x128xf32> -> vector<128x128xf32>
    %84 = arith.addf %76, %83 : vector<128x128xf32>
    %c0_73 = arith.constant 0 : index
    %c0_74 = arith.constant 0 : index
    %85 = vector.load %arg7[%c0_73, %c0_74] : memref<128x128xbf16, #tpu.memory_space<vmem>>, vector<128x128xbf16>
    %c0_75 = arith.constant 0 : index
    %c0_76 = arith.constant 0 : index
    %86 = vector.load %arg8[%c0_75, %c0_76] : memref<128x128xbf16, #tpu.memory_space<vmem>>, vector<128x128xbf16>
    %cst_77 = arith.constant dense<0.000000e+00> : vector<128x128xf32>
    %87 = tpu.matmul %85, %86, %cst_77 {dimension_numbers = #tpu.dot_dimension_numbers<[1], [0], [0], [1], [0, 0, 1, 1], [], []>} : vector<128x128xbf16>, vector<128x128xbf16>, vector<128x128xf32> -> vector<128x128xf32>
    %c0_78 = arith.constant 0 : index
    %c0_79 = arith.constant 0 : index
    %88 = vector.load %arg9[%c0_78, %c0_79] : memref<1x128xf32, #tpu.memory_space<vmem>>, vector<1x128xf32>
    %89 = vector.broadcast %88 : vector<1x128xf32> to vector<128x128xf32>
    %90 = arith.mulf %87, %89 : vector<128x128xf32>
    %c0_80 = arith.constant 0 : index
    %c0_81 = arith.constant 0 : index
    %91 = vector.load %arg10[%c0_80, %c0_81] : memref<1x128xf32, #tpu.memory_space<vmem>>, vector<1x128xf32>
    %92 = vector.broadcast %91 : vector<1x128xf32> to vector<128x128xf32>
    %93 = arith.addf %90, %92 : vector<128x128xf32>
    %94 = arith.addf %84, %93 : vector<128x128xf32>
    %95 = arith.truncf %94 : vector<128x128xf32> to vector<128x128xbf16>
    %c0_82 = arith.constant 0 : index
    %c0_83 = arith.constant 0 : index
    %96 = vector.load %arg11[%c0_82, %c0_83] : memref<128x128xbf16, #tpu.memory_space<vmem>>, vector<128x128xbf16>
    tpu.vector_store %arg11[%c0_82, %c0_83], %95 {strides = array<i32>} : memref<128x128xbf16, #tpu.memory_space<vmem>>, vector<128x128xbf16>,
    return
  }
  func.func @transform_0(%arg0: i32) -> (i32, i32) {
    %c0_i32 = arith.constant 0 : i32
    %c0_i32_0 = arith.constant 0 : i32
    %c0_i32_1 = arith.constant 0 : i32
    return %c0_i32, %c0_i32_0 : i32, i32
  }
  func.func @transform_1(%arg0: i32) -> (i32, i32) {
    %c0_i32 = arith.constant 0 : i32
    %c0_i32_0 = arith.constant 0 : i32
    %c0_i32_1 = arith.constant 0 : i32
    return %c0_i32, %c0_i32_0 : i32, i32
  }
  func.func @transform_2(%arg0: i32) -> (i32, i32) {
    %c0_i32 = arith.constant 0 : i32
    %c0_i32_0 = arith.constant 0 : i32
    %c0_i32_1 = arith.constant 0 : i32
    return %c0_i32, %c0_i32_0 : i32, i32
  }
  func.func @transform_3(%arg0: i32) -> (i32, i32) {
    %c0_i32 = arith.constant 0 : i32
    %c0_i32_0 = arith.constant 0 : i32
    %c0_i32_1 = arith.constant 0 : i32
    return %c0_i32, %c0_i32_0 : i32, i32
  }
  func.func @transform_4(%arg0: i32) -> (i32, i32, i32) {
    %c0_i32 = arith.constant 0 : i32
    %c0_i32_0 = arith.constant 0 : i32
    %c0_i32_1 = arith.constant 0 : i32
    %c0_i32_2 = arith.constant 0 : i32
    return %c0_i32, %c0_i32_0, %c0_i32_1 : i32, i32, i32
  }
  func.func @transform_5(%arg0: i32) -> (i32, i32, i32) {
    %c0_i32 = arith.constant 0 : i32
    %c0_i32_0 = arith.constant 0 : i32
    %c0_i32_1 = arith.constant 0 : i32
    %c0_i32_2 = arith.constant 0 : i32
    return %c0_i32, %c0_i32_0, %c0_i32_1 : i32, i32, i32
  }
  func.func @transform_6(%arg0: i32) -> (i32, i32) {
    %c0_i32 = arith.constant 0 : i32
    %c0_i32_0 = arith.constant 0 : i32
    %c0_i32_1 = arith.constant 0 : i32
    return %c0_i32, %c0_i32_0 : i32, i32
  }
  func.func @transform_7(%arg0: i32) -> (i32, i32) {
    %c0_i32 = arith.constant 0 : i32
    %c0_i32_0 = arith.constant 0 : i32
    %c0_i32_1 = arith.constant 0 : i32
    return %c0_i32, %c0_i32_0 : i32, i32
  }
  func.func @transform_8(%arg0: i32) -> (i32, i32) {
    %c0_i32 = arith.constant 0 : i32
    %c0_i32_0 = arith.constant 0 : i32
    %c0_i32_1 = arith.constant 0 : i32
    return %c0_i32, %c0_i32_0 : i32, i32
  }
  func.func @transform_9(%arg0: i32) -> (i32, i32) {
    %c0_i32 = arith.constant 0 : i32
    %c0_i32_0 = arith.constant 0 : i32
    %c0_i32_1 = arith.constant 0 : i32
    return %c0_i32, %c0_i32_0 : i32, i32
  }
  func.func @transform_10(%arg0: i32) -> (i32, i32) {
    %c0_i32 = arith.constant 0 : i32
    %c0_i32_0 = arith.constant 0 : i32
    %c0_i32_1 = arith.constant 0 : i32
    return %c0_i32, %c0_i32_0 : i32, i32
  }
}

module attributes {stable_mosaic.version = 11 : i64} {
  func.func @kernel(%arg0: i32, %arg1: memref<128x128xbf16, #tpu.memory_space<vmem>>, %arg2: memref<128x128xbf16, #tpu.memory_space<vmem>>, %arg3: memref<1x128xf32, #tpu.memory_space<vmem>>, %arg4: memref<1x128xf32, #tpu.memory_space<vmem>>, %arg5: memref<9x128x128xbf16, #tpu.memory_space<vmem>>, %arg6: memref<9x128x128xbf16, #tpu.memory_space<vmem>>, %arg7: memref<128x128xbf16, #tpu.memory_space<vmem>>, %arg8: memref<128x128xbf16, #tpu.memory_space<vmem>>) attributes {dimension_semantics = [#tpu.dimension_semantics<arbitrary>], iteration_bounds = array<i64: 1>, scalar_prefetch = 0 : i64, scratch_operands = 0 : i64, tpu.core_type = #tpu.core_type<tc>, window_params = [{pipeline_mode = #tpu.pipeline_mode<synchronous>, transform_indices = @transform_0, window_bounds = array<i64: 128, 128>}, {pipeline_mode = #tpu.pipeline_mode<synchronous>, transform_indices = @transform_1, window_bounds = array<i64: 128, 128>}, {pipeline_mode = #tpu.pipeline_mode<synchronous>, transform_indices = @transform_2, window_bounds = array<i64: 1, 128>}, {pipeline_mode = #tpu.pipeline_mode<synchronous>, transform_indices = @transform_3, window_bounds = array<i64: 1, 128>}, {pipeline_mode = #tpu.pipeline_mode<synchronous>, transform_indices = @transform_4, window_bounds = array<i64: 9, 128, 128>}, {pipeline_mode = #tpu.pipeline_mode<synchronous>, transform_indices = @transform_5, window_bounds = array<i64: 9, 128, 128>}, {pipeline_mode = #tpu.pipeline_mode<synchronous>, transform_indices = @transform_6, window_bounds = array<i64: 128, 128>}, {pipeline_mode = #tpu.pipeline_mode<synchronous>, transform_indices = @transform_7, window_bounds = array<i64: 128, 128>}]} {
    %c0 = arith.constant 0 : index
    %c0_0 = arith.constant 0 : index
    %0 = vector.load %arg1[%c0, %c0_0] : memref<128x128xbf16, #tpu.memory_space<vmem>>, vector<128x128xbf16>
    %c0_1 = arith.constant 0 : index
    %c0_2 = arith.constant 0 : index
    %1 = vector.load %arg2[%c0_1, %c0_2] : memref<128x128xbf16, #tpu.memory_space<vmem>>, vector<128x128xbf16>
    %cst = arith.constant dense<0.000000e+00> : vector<128x128xf32>
    %2 = tpu.matmul %0, %1, %cst {dimension_numbers = #tpu.dot_dimension_numbers<[1], [0], [0], [1], [0, 0, 1, 1], [], []>} : vector<128x128xbf16>, vector<128x128xbf16>, vector<128x128xf32> -> vector<128x128xf32>
    %c0_3 = arith.constant 0 : index
    %c0_4 = arith.constant 0 : index
    %3 = vector.load %arg3[%c0_3, %c0_4] : memref<1x128xf32, #tpu.memory_space<vmem>>, vector<1x128xf32>
    %4 = vector.broadcast %3 : vector<1x128xf32> to vector<128x128xf32>
    %5 = arith.mulf %2, %4 : vector<128x128xf32>
    %c0_5 = arith.constant 0 : index
    %c0_6 = arith.constant 0 : index
    %6 = vector.load %arg4[%c0_5, %c0_6] : memref<1x128xf32, #tpu.memory_space<vmem>>, vector<1x128xf32>
    %7 = vector.broadcast %6 : vector<1x128xf32> to vector<128x128xf32>
    %8 = arith.addf %5, %7 : vector<128x128xf32>
    %cst_7 = arith.constant 0.000000e+00 : f32
    %9 = vector.broadcast %cst_7 : f32 to vector<128x128xf32>
    %10 = arith.maximumf %8, %9 : vector<128x128xf32>
    %11 = arith.truncf %10 : vector<128x128xf32> to vector<128x128xbf16>
    %cst_8 = arith.constant 0.000000e+00 : f32
    %12 = vector.broadcast %cst_8 : f32 to vector<128x128xf32>
    %c0_9 = arith.constant 0 : index
    %c0_10 = arith.constant 0 : index
    %c0_11 = arith.constant 0 : index
    %13 = vector.load %arg5[%c0_9, %c0_10, %c0_11] : memref<9x128x128xbf16, #tpu.memory_space<vmem>>, vector<1x128x128xbf16>
    %14 = vector.shape_cast %13 : vector<1x128x128xbf16> to vector<128x128xbf16>
    %cst_12 = arith.constant dense<0.000000e+00> : vector<128x128xf32>
    %15 = tpu.matmul %14, %11, %cst_12 {dimension_numbers = #tpu.dot_dimension_numbers<[1], [0], [0], [1], [0, 0, 1, 1], [], []>} : vector<128x128xbf16>, vector<128x128xbf16>, vector<128x128xf32> -> vector<128x128xf32>
    %16 = arith.truncf %15 : vector<128x128xf32> to vector<128x128xbf16>
    %c0_13 = arith.constant 0 : index
    %c0_14 = arith.constant 0 : index
    %c0_15 = arith.constant 0 : index
    %17 = vector.load %arg6[%c0_13, %c0_14, %c0_15] : memref<9x128x128xbf16, #tpu.memory_space<vmem>>, vector<1x128x128xbf16>
    %18 = vector.shape_cast %17 : vector<1x128x128xbf16> to vector<128x128xbf16>
    %cst_16 = arith.constant dense<0.000000e+00> : vector<128x128xf32>
    %19 = tpu.matmul %16, %18, %cst_16 {dimension_numbers = #tpu.dot_dimension_numbers<[1], [0], [0], [1], [0, 0, 1, 1], [], []>} : vector<128x128xbf16>, vector<128x128xbf16>, vector<128x128xf32> -> vector<128x128xf32>
    %20 = arith.addf %12, %19 : vector<128x128xf32>
    %c1 = arith.constant 1 : index
    %c0_17 = arith.constant 0 : index
    %c0_18 = arith.constant 0 : index
    %21 = vector.load %arg5[%c1, %c0_17, %c0_18] : memref<9x128x128xbf16, #tpu.memory_space<vmem>>, vector<1x128x128xbf16>
    %22 = vector.shape_cast %21 : vector<1x128x128xbf16> to vector<128x128xbf16>
    %cst_19 = arith.constant dense<0.000000e+00> : vector<128x128xf32>
    %23 = tpu.matmul %22, %11, %cst_19 {dimension_numbers = #tpu.dot_dimension_numbers<[1], [0], [0], [1], [0, 0, 1, 1], [], []>} : vector<128x128xbf16>, vector<128x128xbf16>, vector<128x128xf32> -> vector<128x128xf32>
    %24 = arith.truncf %23 : vector<128x128xf32> to vector<128x128xbf16>
    %c1_20 = arith.constant 1 : index
    %c0_21 = arith.constant 0 : index
    %c0_22 = arith.constant 0 : index
    %25 = vector.load %arg6[%c1_20, %c0_21, %c0_22] : memref<9x128x128xbf16, #tpu.memory_space<vmem>>, vector<1x128x128xbf16>
    %26 = vector.shape_cast %25 : vector<1x128x128xbf16> to vector<128x128xbf16>
    %cst_23 = arith.constant dense<0.000000e+00> : vector<128x128xf32>
    %27 = tpu.matmul %24, %26, %cst_23 {dimension_numbers = #tpu.dot_dimension_numbers<[1], [0], [0], [1], [0, 0, 1, 1], [], []>} : vector<128x128xbf16>, vector<128x128xbf16>, vector<128x128xf32> -> vector<128x128xf32>
    %28 = arith.addf %20, %27 : vector<128x128xf32>
    %c2 = arith.constant 2 : index
    %c0_24 = arith.constant 0 : index
    %c0_25 = arith.constant 0 : index
    %29 = vector.load %arg5[%c2, %c0_24, %c0_25] : memref<9x128x128xbf16, #tpu.memory_space<vmem>>, vector<1x128x128xbf16>
    %30 = vector.shape_cast %29 : vector<1x128x128xbf16> to vector<128x128xbf16>
    %cst_26 = arith.constant dense<0.000000e+00> : vector<128x128xf32>
    %31 = tpu.matmul %30, %11, %cst_26 {dimension_numbers = #tpu.dot_dimension_numbers<[1], [0], [0], [1], [0, 0, 1, 1], [], []>} : vector<128x128xbf16>, vector<128x128xbf16>, vector<128x128xf32> -> vector<128x128xf32>
    %32 = arith.truncf %31 : vector<128x128xf32> to vector<128x128xbf16>
    %c2_27 = arith.constant 2 : index
    %c0_28 = arith.constant 0 : index
    %c0_29 = arith.constant 0 : index
    %33 = vector.load %arg6[%c2_27, %c0_28, %c0_29] : memref<9x128x128xbf16, #tpu.memory_space<vmem>>, vector<1x128x128xbf16>
    %34 = vector.shape_cast %33 : vector<1x128x128xbf16> to vector<128x128xbf16>
    %cst_30 = arith.constant dense<0.000000e+00> : vector<128x128xf32>
    %35 = tpu.matmul %32, %34, %cst_30 {dimension_numbers = #tpu.dot_dimension_numbers<[1], [0], [0], [1], [0, 0, 1, 1], [], []>} : vector<128x128xbf16>, vector<128x128xbf16>, vector<128x128xf32> -> vector<128x128xf32>
    %36 = arith.addf %28, %35 : vector<128x128xf32>
    %c3 = arith.constant 3 : index
    %c0_31 = arith.constant 0 : index
    %c0_32 = arith.constant 0 : index
    %37 = vector.load %arg5[%c3, %c0_31, %c0_32] : memref<9x128x128xbf16, #tpu.memory_space<vmem>>, vector<1x128x128xbf16>
    %38 = vector.shape_cast %37 : vector<1x128x128xbf16> to vector<128x128xbf16>
    %cst_33 = arith.constant dense<0.000000e+00> : vector<128x128xf32>
    %39 = tpu.matmul %38, %11, %cst_33 {dimension_numbers = #tpu.dot_dimension_numbers<[1], [0], [0], [1], [0, 0, 1, 1], [], []>} : vector<128x128xbf16>, vector<128x128xbf16>, vector<128x128xf32> -> vector<128x128xf32>
    %40 = arith.truncf %39 : vector<128x128xf32> to vector<128x128xbf16>
    %c3_34 = arith.constant 3 : index
    %c0_35 = arith.constant 0 : index
    %c0_36 = arith.constant 0 : index
    %41 = vector.load %arg6[%c3_34, %c0_35, %c0_36] : memref<9x128x128xbf16, #tpu.memory_space<vmem>>, vector<1x128x128xbf16>
    %42 = vector.shape_cast %41 : vector<1x128x128xbf16> to vector<128x128xbf16>
    %cst_37 = arith.constant dense<0.000000e+00> : vector<128x128xf32>
    %43 = tpu.matmul %40, %42, %cst_37 {dimension_numbers = #tpu.dot_dimension_numbers<[1], [0], [0], [1], [0, 0, 1, 1], [], []>} : vector<128x128xbf16>, vector<128x128xbf16>, vector<128x128xf32> -> vector<128x128xf32>
    %44 = arith.addf %36, %43 : vector<128x128xf32>
    %c4 = arith.constant 4 : index
    %c0_38 = arith.constant 0 : index
    %c0_39 = arith.constant 0 : index
    %45 = vector.load %arg5[%c4, %c0_38, %c0_39] : memref<9x128x128xbf16, #tpu.memory_space<vmem>>, vector<1x128x128xbf16>
    %46 = vector.shape_cast %45 : vector<1x128x128xbf16> to vector<128x128xbf16>
    %cst_40 = arith.constant dense<0.000000e+00> : vector<128x128xf32>
    %47 = tpu.matmul %46, %11, %cst_40 {dimension_numbers = #tpu.dot_dimension_numbers<[1], [0], [0], [1], [0, 0, 1, 1], [], []>} : vector<128x128xbf16>, vector<128x128xbf16>, vector<128x128xf32> -> vector<128x128xf32>
    %48 = arith.truncf %47 : vector<128x128xf32> to vector<128x128xbf16>
    %c4_41 = arith.constant 4 : index
    %c0_42 = arith.constant 0 : index
    %c0_43 = arith.constant 0 : index
    %49 = vector.load %arg6[%c4_41, %c0_42, %c0_43] : memref<9x128x128xbf16, #tpu.memory_space<vmem>>, vector<1x128x128xbf16>
    %50 = vector.shape_cast %49 : vector<1x128x128xbf16> to vector<128x128xbf16>
    %cst_44 = arith.constant dense<0.000000e+00> : vector<128x128xf32>
    %51 = tpu.matmul %48, %50, %cst_44 {dimension_numbers = #tpu.dot_dimension_numbers<[1], [0], [0], [1], [0, 0, 1, 1], [], []>} : vector<128x128xbf16>, vector<128x128xbf16>, vector<128x128xf32> -> vector<128x128xf32>
    %52 = arith.addf %44, %51 : vector<128x128xf32>
    %c5 = arith.constant 5 : index
    %c0_45 = arith.constant 0 : index
    %c0_46 = arith.constant 0 : index
    %53 = vector.load %arg5[%c5, %c0_45, %c0_46] : memref<9x128x128xbf16, #tpu.memory_space<vmem>>, vector<1x128x128xbf16>
    %54 = vector.shape_cast %53 : vector<1x128x128xbf16> to vector<128x128xbf16>
    %cst_47 = arith.constant dense<0.000000e+00> : vector<128x128xf32>
    %55 = tpu.matmul %54, %11, %cst_47 {dimension_numbers = #tpu.dot_dimension_numbers<[1], [0], [0], [1], [0, 0, 1, 1], [], []>} : vector<128x128xbf16>, vector<128x128xbf16>, vector<128x128xf32> -> vector<128x128xf32>
    %56 = arith.truncf %55 : vector<128x128xf32> to vector<128x128xbf16>
    %c5_48 = arith.constant 5 : index
    %c0_49 = arith.constant 0 : index
    %c0_50 = arith.constant 0 : index
    %57 = vector.load %arg6[%c5_48, %c0_49, %c0_50] : memref<9x128x128xbf16, #tpu.memory_space<vmem>>, vector<1x128x128xbf16>
    %58 = vector.shape_cast %57 : vector<1x128x128xbf16> to vector<128x128xbf16>
    %cst_51 = arith.constant dense<0.000000e+00> : vector<128x128xf32>
    %59 = tpu.matmul %56, %58, %cst_51 {dimension_numbers = #tpu.dot_dimension_numbers<[1], [0], [0], [1], [0, 0, 1, 1], [], []>} : vector<128x128xbf16>, vector<128x128xbf16>, vector<128x128xf32> -> vector<128x128xf32>
    %60 = arith.addf %52, %59 : vector<128x128xf32>
    %c6 = arith.constant 6 : index
    %c0_52 = arith.constant 0 : index
    %c0_53 = arith.constant 0 : index
    %61 = vector.load %arg5[%c6, %c0_52, %c0_53] : memref<9x128x128xbf16, #tpu.memory_space<vmem>>, vector<1x128x128xbf16>
    %62 = vector.shape_cast %61 : vector<1x128x128xbf16> to vector<128x128xbf16>
    %cst_54 = arith.constant dense<0.000000e+00> : vector<128x128xf32>
    %63 = tpu.matmul %62, %11, %cst_54 {dimension_numbers = #tpu.dot_dimension_numbers<[1], [0], [0], [1], [0, 0, 1, 1], [], []>} : vector<128x128xbf16>, vector<128x128xbf16>, vector<128x128xf32> -> vector<128x128xf32>
    %64 = arith.truncf %63 : vector<128x128xf32> to vector<128x128xbf16>
    %c6_55 = arith.constant 6 : index
    %c0_56 = arith.constant 0 : index
    %c0_57 = arith.constant 0 : index
    %65 = vector.load %arg6[%c6_55, %c0_56, %c0_57] : memref<9x128x128xbf16, #tpu.memory_space<vmem>>, vector<1x128x128xbf16>
    %66 = vector.shape_cast %65 : vector<1x128x128xbf16> to vector<128x128xbf16>
    %cst_58 = arith.constant dense<0.000000e+00> : vector<128x128xf32>
    %67 = tpu.matmul %64, %66, %cst_58 {dimension_numbers = #tpu.dot_dimension_numbers<[1], [0], [0], [1], [0, 0, 1, 1], [], []>} : vector<128x128xbf16>, vector<128x128xbf16>, vector<128x128xf32> -> vector<128x128xf32>
    %68 = arith.addf %60, %67 : vector<128x128xf32>
    %c7 = arith.constant 7 : index
    %c0_59 = arith.constant 0 : index
    %c0_60 = arith.constant 0 : index
    %69 = vector.load %arg5[%c7, %c0_59, %c0_60] : memref<9x128x128xbf16, #tpu.memory_space<vmem>>, vector<1x128x128xbf16>
    %70 = vector.shape_cast %69 : vector<1x128x128xbf16> to vector<128x128xbf16>
    %cst_61 = arith.constant dense<0.000000e+00> : vector<128x128xf32>
    %71 = tpu.matmul %70, %11, %cst_61 {dimension_numbers = #tpu.dot_dimension_numbers<[1], [0], [0], [1], [0, 0, 1, 1], [], []>} : vector<128x128xbf16>, vector<128x128xbf16>, vector<128x128xf32> -> vector<128x128xf32>
    %72 = arith.truncf %71 : vector<128x128xf32> to vector<128x128xbf16>
    %c7_62 = arith.constant 7 : index
    %c0_63 = arith.constant 0 : index
    %c0_64 = arith.constant 0 : index
    %73 = vector.load %arg6[%c7_62, %c0_63, %c0_64] : memref<9x128x128xbf16, #tpu.memory_space<vmem>>, vector<1x128x128xbf16>
    %74 = vector.shape_cast %73 : vector<1x128x128xbf16> to vector<128x128xbf16>
    %cst_65 = arith.constant dense<0.000000e+00> : vector<128x128xf32>
    %75 = tpu.matmul %72, %74, %cst_65 {dimension_numbers = #tpu.dot_dimension_numbers<[1], [0], [0], [1], [0, 0, 1, 1], [], []>} : vector<128x128xbf16>, vector<128x128xbf16>, vector<128x128xf32> -> vector<128x128xf32>
    %76 = arith.addf %68, %75 : vector<128x128xf32>
    %c8 = arith.constant 8 : index
    %c0_66 = arith.constant 0 : index
    %c0_67 = arith.constant 0 : index
    %77 = vector.load %arg5[%c8, %c0_66, %c0_67] : memref<9x128x128xbf16, #tpu.memory_space<vmem>>, vector<1x128x128xbf16>
    %78 = vector.shape_cast %77 : vector<1x128x128xbf16> to vector<128x128xbf16>
    %cst_68 = arith.constant dense<0.000000e+00> : vector<128x128xf32>
    %79 = tpu.matmul %78, %11, %cst_68 {dimension_numbers = #tpu.dot_dimension_numbers<[1], [0], [0], [1], [0, 0, 1, 1], [], []>} : vector<128x128xbf16>, vector<128x128xbf16>, vector<128x128xf32> -> vector<128x128xf32>
    %80 = arith.truncf %79 : vector<128x128xf32> to vector<128x128xbf16>
    %c8_69 = arith.constant 8 : index
    %c0_70 = arith.constant 0 : index
    %c0_71 = arith.constant 0 : index
    %81 = vector.load %arg6[%c8_69, %c0_70, %c0_71] : memref<9x128x128xbf16, #tpu.memory_space<vmem>>, vector<1x128x128xbf16>
    %82 = vector.shape_cast %81 : vector<1x128x128xbf16> to vector<128x128xbf16>
    %cst_72 = arith.constant dense<0.000000e+00> : vector<128x128xf32>
    %83 = tpu.matmul %80, %82, %cst_72 {dimension_numbers = #tpu.dot_dimension_numbers<[1], [0], [0], [1], [0, 0, 1, 1], [], []>} : vector<128x128xbf16>, vector<128x128xbf16>, vector<128x128xf32> -> vector<128x128xf32>
    %84 = arith.addf %76, %83 : vector<128x128xf32>
    %c0_73 = arith.constant 0 : index
    %c0_74 = arith.constant 0 : index
    %85 = vector.load %arg7[%c0_73, %c0_74] : memref<128x128xbf16, #tpu.memory_space<vmem>>, vector<128x128xbf16>
    %86 = arith.extf %85 : vector<128x128xbf16> to vector<128x128xf32>
    %87 = arith.addf %84, %86 : vector<128x128xf32>
    %88 = arith.truncf %87 : vector<128x128xf32> to vector<128x128xbf16>
    %c0_75 = arith.constant 0 : index
    %c0_76 = arith.constant 0 : index
    %89 = vector.load %arg8[%c0_75, %c0_76] : memref<128x128xbf16, #tpu.memory_space<vmem>>, vector<128x128xbf16>
    tpu.vector_store %arg8[%c0_75, %c0_76], %88 {strides = array<i32>} : memref<128x128xbf16, #tpu.memory_space<vmem>>, vector<128x128xbf16>,
    return
  }
  func.func @transform_0(%arg0: i32) -> (i32, i32) {
    %c0_i32 = arith.constant 0 : i32
    %c0_i32_0 = arith.constant 0 : i32
    %c0_i32_1 = arith.constant 0 : i32
    return %c0_i32, %c0_i32_0 : i32, i32
  }
  func.func @transform_1(%arg0: i32) -> (i32, i32) {
    %c0_i32 = arith.constant 0 : i32
    %c0_i32_0 = arith.constant 0 : i32
    %c0_i32_1 = arith.constant 0 : i32
    return %c0_i32, %c0_i32_0 : i32, i32
  }
  func.func @transform_2(%arg0: i32) -> (i32, i32) {
    %c0_i32 = arith.constant 0 : i32
    %c0_i32_0 = arith.constant 0 : i32
    %c0_i32_1 = arith.constant 0 : i32
    return %c0_i32, %c0_i32_0 : i32, i32
  }
  func.func @transform_3(%arg0: i32) -> (i32, i32) {
    %c0_i32 = arith.constant 0 : i32
    %c0_i32_0 = arith.constant 0 : i32
    %c0_i32_1 = arith.constant 0 : i32
    return %c0_i32, %c0_i32_0 : i32, i32
  }
  func.func @transform_4(%arg0: i32) -> (i32, i32, i32) {
    %c0_i32 = arith.constant 0 : i32
    %c0_i32_0 = arith.constant 0 : i32
    %c0_i32_1 = arith.constant 0 : i32
    %c0_i32_2 = arith.constant 0 : i32
    return %c0_i32, %c0_i32_0, %c0_i32_1 : i32, i32, i32
  }
  func.func @transform_5(%arg0: i32) -> (i32, i32, i32) {
    %c0_i32 = arith.constant 0 : i32
    %c0_i32_0 = arith.constant 0 : i32
    %c0_i32_1 = arith.constant 0 : i32
    %c0_i32_2 = arith.constant 0 : i32
    return %c0_i32, %c0_i32_0, %c0_i32_1 : i32, i32, i32
  }
  func.func @transform_6(%arg0: i32) -> (i32, i32) {
    %c0_i32 = arith.constant 0 : i32
    %c0_i32_0 = arith.constant 0 : i32
    %c0_i32_1 = arith.constant 0 : i32
    return %c0_i32, %c0_i32_0 : i32, i32
  }
  func.func @transform_7(%arg0: i32) -> (i32, i32) {
    %c0_i32 = arith.constant 0 : i32
    %c0_i32_0 = arith.constant 0 : i32
    %c0_i32_1 = arith.constant 0 : i32
    return %c0_i32, %c0_i32_0 : i32, i32
  }
}

module attributes {stable_mosaic.version = 11 : i64} {
  func.func @kernel(%arg0: i32, %arg1: memref<32x128xbf16, #tpu.memory_space<vmem>>, %arg2: memref<128x128xbf16, #tpu.memory_space<vmem>>, %arg3: memref<1x128xf32, #tpu.memory_space<vmem>>, %arg4: memref<1x128xf32, #tpu.memory_space<vmem>>, %arg5: memref<9x32x32xbf16, #tpu.memory_space<vmem>>, %arg6: memref<9x128x128xbf16, #tpu.memory_space<vmem>>, %arg7: memref<32x128xbf16, #tpu.memory_space<vmem>>, %arg8: memref<128x128xbf16, #tpu.memory_space<vmem>>, %arg9: memref<1x128xf32, #tpu.memory_space<vmem>>, %arg10: memref<1x128xf32, #tpu.memory_space<vmem>>, %arg11: memref<32x128xbf16, #tpu.memory_space<vmem>>) attributes {dimension_semantics = [#tpu.dimension_semantics<arbitrary>], iteration_bounds = array<i64: 1>, scalar_prefetch = 0 : i64, scratch_operands = 0 : i64, tpu.core_type = #tpu.core_type<tc>, window_params = [{pipeline_mode = #tpu.pipeline_mode<synchronous>, transform_indices = @transform_0, window_bounds = array<i64: 32, 128>}, {pipeline_mode = #tpu.pipeline_mode<synchronous>, transform_indices = @transform_1, window_bounds = array<i64: 128, 128>}, {pipeline_mode = #tpu.pipeline_mode<synchronous>, transform_indices = @transform_2, window_bounds = array<i64: 1, 128>}, {pipeline_mode = #tpu.pipeline_mode<synchronous>, transform_indices = @transform_3, window_bounds = array<i64: 1, 128>}, {pipeline_mode = #tpu.pipeline_mode<synchronous>, transform_indices = @transform_4, window_bounds = array<i64: 9, 32, 32>}, {pipeline_mode = #tpu.pipeline_mode<synchronous>, transform_indices = @transform_5, window_bounds = array<i64: 9, 128, 128>}, {pipeline_mode = #tpu.pipeline_mode<synchronous>, transform_indices = @transform_6, window_bounds = array<i64: 32, 128>}, {pipeline_mode = #tpu.pipeline_mode<synchronous>, transform_indices = @transform_7, window_bounds = array<i64: 128, 128>}, {pipeline_mode = #tpu.pipeline_mode<synchronous>, transform_indices = @transform_8, window_bounds = array<i64: 1, 128>}, {pipeline_mode = #tpu.pipeline_mode<synchronous>, transform_indices = @transform_9, window_bounds = array<i64: 1, 128>}, {pipeline_mode = #tpu.pipeline_mode<synchronous>, transform_indices = @transform_10, window_bounds = array<i64: 32, 128>}]} {
    %c0 = arith.constant 0 : index
    %c0_0 = arith.constant 0 : index
    %0 = vector.load %arg1[%c0, %c0_0] : memref<32x128xbf16, #tpu.memory_space<vmem>>, vector<32x128xbf16>
    %c0_1 = arith.constant 0 : index
    %c0_2 = arith.constant 0 : index
    %1 = vector.load %arg2[%c0_1, %c0_2] : memref<128x128xbf16, #tpu.memory_space<vmem>>, vector<128x128xbf16>
    %cst = arith.constant dense<0.000000e+00> : vector<32x128xf32>
    %2 = tpu.matmul %0, %1, %cst {dimension_numbers = #tpu.dot_dimension_numbers<[1], [0], [0], [1], [0, 0, 1, 1], [], []>} : vector<32x128xbf16>, vector<128x128xbf16>, vector<32x128xf32> -> vector<32x128xf32>
    %c0_3 = arith.constant 0 : index
    %c0_4 = arith.constant 0 : index
    %3 = vector.load %arg3[%c0_3, %c0_4] : memref<1x128xf32, #tpu.memory_space<vmem>>, vector<1x128xf32>
    %4 = vector.broadcast %3 : vector<1x128xf32> to vector<32x128xf32>
    %5 = arith.mulf %2, %4 : vector<32x128xf32>
    %c0_5 = arith.constant 0 : index
    %c0_6 = arith.constant 0 : index
    %6 = vector.load %arg4[%c0_5, %c0_6] : memref<1x128xf32, #tpu.memory_space<vmem>>, vector<1x128xf32>
    %7 = vector.broadcast %6 : vector<1x128xf32> to vector<32x128xf32>
    %8 = arith.addf %5, %7 : vector<32x128xf32>
    %cst_7 = arith.constant 0.000000e+00 : f32
    %9 = vector.broadcast %cst_7 : f32 to vector<32x128xf32>
    %10 = arith.maximumf %8, %9 : vector<32x128xf32>
    %11 = arith.truncf %10 : vector<32x128xf32> to vector<32x128xbf16>
    %cst_8 = arith.constant 0.000000e+00 : f32
    %12 = vector.broadcast %cst_8 : f32 to vector<32x128xf32>
    %c0_9 = arith.constant 0 : index
    %c0_10 = arith.constant 0 : index
    %c0_11 = arith.constant 0 : index
    %13 = vector.load %arg5[%c0_9, %c0_10, %c0_11] : memref<9x32x32xbf16, #tpu.memory_space<vmem>>, vector<1x32x32xbf16>
    %14 = vector.shape_cast %13 : vector<1x32x32xbf16> to vector<32x32xbf16>
    %cst_12 = arith.constant dense<0.000000e+00> : vector<32x128xf32>
    %15 = tpu.matmul %14, %11, %cst_12 {dimension_numbers = #tpu.dot_dimension_numbers<[1], [0], [0], [1], [0, 0, 1, 1], [], []>} : vector<32x32xbf16>, vector<32x128xbf16>, vector<32x128xf32> -> vector<32x128xf32>
    %16 = arith.truncf %15 : vector<32x128xf32> to vector<32x128xbf16>
    %c0_13 = arith.constant 0 : index
    %c0_14 = arith.constant 0 : index
    %c0_15 = arith.constant 0 : index
    %17 = vector.load %arg6[%c0_13, %c0_14, %c0_15] : memref<9x128x128xbf16, #tpu.memory_space<vmem>>, vector<1x128x128xbf16>
    %18 = vector.shape_cast %17 : vector<1x128x128xbf16> to vector<128x128xbf16>
    %cst_16 = arith.constant dense<0.000000e+00> : vector<32x128xf32>
    %19 = tpu.matmul %16, %18, %cst_16 {dimension_numbers = #tpu.dot_dimension_numbers<[1], [0], [0], [1], [0, 0, 1, 1], [], []>} : vector<32x128xbf16>, vector<128x128xbf16>, vector<32x128xf32> -> vector<32x128xf32>
    %20 = arith.addf %12, %19 : vector<32x128xf32>
    %c1 = arith.constant 1 : index
    %c0_17 = arith.constant 0 : index
    %c0_18 = arith.constant 0 : index
    %21 = vector.load %arg5[%c1, %c0_17, %c0_18] : memref<9x32x32xbf16, #tpu.memory_space<vmem>>, vector<1x32x32xbf16>
    %22 = vector.shape_cast %21 : vector<1x32x32xbf16> to vector<32x32xbf16>
    %cst_19 = arith.constant dense<0.000000e+00> : vector<32x128xf32>
    %23 = tpu.matmul %22, %11, %cst_19 {dimension_numbers = #tpu.dot_dimension_numbers<[1], [0], [0], [1], [0, 0, 1, 1], [], []>} : vector<32x32xbf16>, vector<32x128xbf16>, vector<32x128xf32> -> vector<32x128xf32>
    %24 = arith.truncf %23 : vector<32x128xf32> to vector<32x128xbf16>
    %c1_20 = arith.constant 1 : index
    %c0_21 = arith.constant 0 : index
    %c0_22 = arith.constant 0 : index
    %25 = vector.load %arg6[%c1_20, %c0_21, %c0_22] : memref<9x128x128xbf16, #tpu.memory_space<vmem>>, vector<1x128x128xbf16>
    %26 = vector.shape_cast %25 : vector<1x128x128xbf16> to vector<128x128xbf16>
    %cst_23 = arith.constant dense<0.000000e+00> : vector<32x128xf32>
    %27 = tpu.matmul %24, %26, %cst_23 {dimension_numbers = #tpu.dot_dimension_numbers<[1], [0], [0], [1], [0, 0, 1, 1], [], []>} : vector<32x128xbf16>, vector<128x128xbf16>, vector<32x128xf32> -> vector<32x128xf32>
    %28 = arith.addf %20, %27 : vector<32x128xf32>
    %c2 = arith.constant 2 : index
    %c0_24 = arith.constant 0 : index
    %c0_25 = arith.constant 0 : index
    %29 = vector.load %arg5[%c2, %c0_24, %c0_25] : memref<9x32x32xbf16, #tpu.memory_space<vmem>>, vector<1x32x32xbf16>
    %30 = vector.shape_cast %29 : vector<1x32x32xbf16> to vector<32x32xbf16>
    %cst_26 = arith.constant dense<0.000000e+00> : vector<32x128xf32>
    %31 = tpu.matmul %30, %11, %cst_26 {dimension_numbers = #tpu.dot_dimension_numbers<[1], [0], [0], [1], [0, 0, 1, 1], [], []>} : vector<32x32xbf16>, vector<32x128xbf16>, vector<32x128xf32> -> vector<32x128xf32>
    %32 = arith.truncf %31 : vector<32x128xf32> to vector<32x128xbf16>
    %c2_27 = arith.constant 2 : index
    %c0_28 = arith.constant 0 : index
    %c0_29 = arith.constant 0 : index
    %33 = vector.load %arg6[%c2_27, %c0_28, %c0_29] : memref<9x128x128xbf16, #tpu.memory_space<vmem>>, vector<1x128x128xbf16>
    %34 = vector.shape_cast %33 : vector<1x128x128xbf16> to vector<128x128xbf16>
    %cst_30 = arith.constant dense<0.000000e+00> : vector<32x128xf32>
    %35 = tpu.matmul %32, %34, %cst_30 {dimension_numbers = #tpu.dot_dimension_numbers<[1], [0], [0], [1], [0, 0, 1, 1], [], []>} : vector<32x128xbf16>, vector<128x128xbf16>, vector<32x128xf32> -> vector<32x128xf32>
    %36 = arith.addf %28, %35 : vector<32x128xf32>
    %c3 = arith.constant 3 : index
    %c0_31 = arith.constant 0 : index
    %c0_32 = arith.constant 0 : index
    %37 = vector.load %arg5[%c3, %c0_31, %c0_32] : memref<9x32x32xbf16, #tpu.memory_space<vmem>>, vector<1x32x32xbf16>
    %38 = vector.shape_cast %37 : vector<1x32x32xbf16> to vector<32x32xbf16>
    %cst_33 = arith.constant dense<0.000000e+00> : vector<32x128xf32>
    %39 = tpu.matmul %38, %11, %cst_33 {dimension_numbers = #tpu.dot_dimension_numbers<[1], [0], [0], [1], [0, 0, 1, 1], [], []>} : vector<32x32xbf16>, vector<32x128xbf16>, vector<32x128xf32> -> vector<32x128xf32>
    %40 = arith.truncf %39 : vector<32x128xf32> to vector<32x128xbf16>
    %c3_34 = arith.constant 3 : index
    %c0_35 = arith.constant 0 : index
    %c0_36 = arith.constant 0 : index
    %41 = vector.load %arg6[%c3_34, %c0_35, %c0_36] : memref<9x128x128xbf16, #tpu.memory_space<vmem>>, vector<1x128x128xbf16>
    %42 = vector.shape_cast %41 : vector<1x128x128xbf16> to vector<128x128xbf16>
    %cst_37 = arith.constant dense<0.000000e+00> : vector<32x128xf32>
    %43 = tpu.matmul %40, %42, %cst_37 {dimension_numbers = #tpu.dot_dimension_numbers<[1], [0], [0], [1], [0, 0, 1, 1], [], []>} : vector<32x128xbf16>, vector<128x128xbf16>, vector<32x128xf32> -> vector<32x128xf32>
    %44 = arith.addf %36, %43 : vector<32x128xf32>
    %c4 = arith.constant 4 : index
    %c0_38 = arith.constant 0 : index
    %c0_39 = arith.constant 0 : index
    %45 = vector.load %arg5[%c4, %c0_38, %c0_39] : memref<9x32x32xbf16, #tpu.memory_space<vmem>>, vector<1x32x32xbf16>
    %46 = vector.shape_cast %45 : vector<1x32x32xbf16> to vector<32x32xbf16>
    %cst_40 = arith.constant dense<0.000000e+00> : vector<32x128xf32>
    %47 = tpu.matmul %46, %11, %cst_40 {dimension_numbers = #tpu.dot_dimension_numbers<[1], [0], [0], [1], [0, 0, 1, 1], [], []>} : vector<32x32xbf16>, vector<32x128xbf16>, vector<32x128xf32> -> vector<32x128xf32>
    %48 = arith.truncf %47 : vector<32x128xf32> to vector<32x128xbf16>
    %c4_41 = arith.constant 4 : index
    %c0_42 = arith.constant 0 : index
    %c0_43 = arith.constant 0 : index
    %49 = vector.load %arg6[%c4_41, %c0_42, %c0_43] : memref<9x128x128xbf16, #tpu.memory_space<vmem>>, vector<1x128x128xbf16>
    %50 = vector.shape_cast %49 : vector<1x128x128xbf16> to vector<128x128xbf16>
    %cst_44 = arith.constant dense<0.000000e+00> : vector<32x128xf32>
    %51 = tpu.matmul %48, %50, %cst_44 {dimension_numbers = #tpu.dot_dimension_numbers<[1], [0], [0], [1], [0, 0, 1, 1], [], []>} : vector<32x128xbf16>, vector<128x128xbf16>, vector<32x128xf32> -> vector<32x128xf32>
    %52 = arith.addf %44, %51 : vector<32x128xf32>
    %c5 = arith.constant 5 : index
    %c0_45 = arith.constant 0 : index
    %c0_46 = arith.constant 0 : index
    %53 = vector.load %arg5[%c5, %c0_45, %c0_46] : memref<9x32x32xbf16, #tpu.memory_space<vmem>>, vector<1x32x32xbf16>
    %54 = vector.shape_cast %53 : vector<1x32x32xbf16> to vector<32x32xbf16>
    %cst_47 = arith.constant dense<0.000000e+00> : vector<32x128xf32>
    %55 = tpu.matmul %54, %11, %cst_47 {dimension_numbers = #tpu.dot_dimension_numbers<[1], [0], [0], [1], [0, 0, 1, 1], [], []>} : vector<32x32xbf16>, vector<32x128xbf16>, vector<32x128xf32> -> vector<32x128xf32>
    %56 = arith.truncf %55 : vector<32x128xf32> to vector<32x128xbf16>
    %c5_48 = arith.constant 5 : index
    %c0_49 = arith.constant 0 : index
    %c0_50 = arith.constant 0 : index
    %57 = vector.load %arg6[%c5_48, %c0_49, %c0_50] : memref<9x128x128xbf16, #tpu.memory_space<vmem>>, vector<1x128x128xbf16>
    %58 = vector.shape_cast %57 : vector<1x128x128xbf16> to vector<128x128xbf16>
    %cst_51 = arith.constant dense<0.000000e+00> : vector<32x128xf32>
    %59 = tpu.matmul %56, %58, %cst_51 {dimension_numbers = #tpu.dot_dimension_numbers<[1], [0], [0], [1], [0, 0, 1, 1], [], []>} : vector<32x128xbf16>, vector<128x128xbf16>, vector<32x128xf32> -> vector<32x128xf32>
    %60 = arith.addf %52, %59 : vector<32x128xf32>
    %c6 = arith.constant 6 : index
    %c0_52 = arith.constant 0 : index
    %c0_53 = arith.constant 0 : index
    %61 = vector.load %arg5[%c6, %c0_52, %c0_53] : memref<9x32x32xbf16, #tpu.memory_space<vmem>>, vector<1x32x32xbf16>
    %62 = vector.shape_cast %61 : vector<1x32x32xbf16> to vector<32x32xbf16>
    %cst_54 = arith.constant dense<0.000000e+00> : vector<32x128xf32>
    %63 = tpu.matmul %62, %11, %cst_54 {dimension_numbers = #tpu.dot_dimension_numbers<[1], [0], [0], [1], [0, 0, 1, 1], [], []>} : vector<32x32xbf16>, vector<32x128xbf16>, vector<32x128xf32> -> vector<32x128xf32>
    %64 = arith.truncf %63 : vector<32x128xf32> to vector<32x128xbf16>
    %c6_55 = arith.constant 6 : index
    %c0_56 = arith.constant 0 : index
    %c0_57 = arith.constant 0 : index
    %65 = vector.load %arg6[%c6_55, %c0_56, %c0_57] : memref<9x128x128xbf16, #tpu.memory_space<vmem>>, vector<1x128x128xbf16>
    %66 = vector.shape_cast %65 : vector<1x128x128xbf16> to vector<128x128xbf16>
    %cst_58 = arith.constant dense<0.000000e+00> : vector<32x128xf32>
    %67 = tpu.matmul %64, %66, %cst_58 {dimension_numbers = #tpu.dot_dimension_numbers<[1], [0], [0], [1], [0, 0, 1, 1], [], []>} : vector<32x128xbf16>, vector<128x128xbf16>, vector<32x128xf32> -> vector<32x128xf32>
    %68 = arith.addf %60, %67 : vector<32x128xf32>
    %c7 = arith.constant 7 : index
    %c0_59 = arith.constant 0 : index
    %c0_60 = arith.constant 0 : index
    %69 = vector.load %arg5[%c7, %c0_59, %c0_60] : memref<9x32x32xbf16, #tpu.memory_space<vmem>>, vector<1x32x32xbf16>
    %70 = vector.shape_cast %69 : vector<1x32x32xbf16> to vector<32x32xbf16>
    %cst_61 = arith.constant dense<0.000000e+00> : vector<32x128xf32>
    %71 = tpu.matmul %70, %11, %cst_61 {dimension_numbers = #tpu.dot_dimension_numbers<[1], [0], [0], [1], [0, 0, 1, 1], [], []>} : vector<32x32xbf16>, vector<32x128xbf16>, vector<32x128xf32> -> vector<32x128xf32>
    %72 = arith.truncf %71 : vector<32x128xf32> to vector<32x128xbf16>
    %c7_62 = arith.constant 7 : index
    %c0_63 = arith.constant 0 : index
    %c0_64 = arith.constant 0 : index
    %73 = vector.load %arg6[%c7_62, %c0_63, %c0_64] : memref<9x128x128xbf16, #tpu.memory_space<vmem>>, vector<1x128x128xbf16>
    %74 = vector.shape_cast %73 : vector<1x128x128xbf16> to vector<128x128xbf16>
    %cst_65 = arith.constant dense<0.000000e+00> : vector<32x128xf32>
    %75 = tpu.matmul %72, %74, %cst_65 {dimension_numbers = #tpu.dot_dimension_numbers<[1], [0], [0], [1], [0, 0, 1, 1], [], []>} : vector<32x128xbf16>, vector<128x128xbf16>, vector<32x128xf32> -> vector<32x128xf32>
    %76 = arith.addf %68, %75 : vector<32x128xf32>
    %c8 = arith.constant 8 : index
    %c0_66 = arith.constant 0 : index
    %c0_67 = arith.constant 0 : index
    %77 = vector.load %arg5[%c8, %c0_66, %c0_67] : memref<9x32x32xbf16, #tpu.memory_space<vmem>>, vector<1x32x32xbf16>
    %78 = vector.shape_cast %77 : vector<1x32x32xbf16> to vector<32x32xbf16>
    %cst_68 = arith.constant dense<0.000000e+00> : vector<32x128xf32>
    %79 = tpu.matmul %78, %11, %cst_68 {dimension_numbers = #tpu.dot_dimension_numbers<[1], [0], [0], [1], [0, 0, 1, 1], [], []>} : vector<32x32xbf16>, vector<32x128xbf16>, vector<32x128xf32> -> vector<32x128xf32>
    %80 = arith.truncf %79 : vector<32x128xf32> to vector<32x128xbf16>
    %c8_69 = arith.constant 8 : index
    %c0_70 = arith.constant 0 : index
    %c0_71 = arith.constant 0 : index
    %81 = vector.load %arg6[%c8_69, %c0_70, %c0_71] : memref<9x128x128xbf16, #tpu.memory_space<vmem>>, vector<1x128x128xbf16>
    %82 = vector.shape_cast %81 : vector<1x128x128xbf16> to vector<128x128xbf16>
    %cst_72 = arith.constant dense<0.000000e+00> : vector<32x128xf32>
    %83 = tpu.matmul %80, %82, %cst_72 {dimension_numbers = #tpu.dot_dimension_numbers<[1], [0], [0], [1], [0, 0, 1, 1], [], []>} : vector<32x128xbf16>, vector<128x128xbf16>, vector<32x128xf32> -> vector<32x128xf32>
    %84 = arith.addf %76, %83 : vector<32x128xf32>
    %c0_73 = arith.constant 0 : index
    %c0_74 = arith.constant 0 : index
    %85 = vector.load %arg7[%c0_73, %c0_74] : memref<32x128xbf16, #tpu.memory_space<vmem>>, vector<32x128xbf16>
    %c0_75 = arith.constant 0 : index
    %c0_76 = arith.constant 0 : index
    %86 = vector.load %arg8[%c0_75, %c0_76] : memref<128x128xbf16, #tpu.memory_space<vmem>>, vector<128x128xbf16>
    %cst_77 = arith.constant dense<0.000000e+00> : vector<32x128xf32>
    %87 = tpu.matmul %85, %86, %cst_77 {dimension_numbers = #tpu.dot_dimension_numbers<[1], [0], [0], [1], [0, 0, 1, 1], [], []>} : vector<32x128xbf16>, vector<128x128xbf16>, vector<32x128xf32> -> vector<32x128xf32>
    %c0_78 = arith.constant 0 : index
    %c0_79 = arith.constant 0 : index
    %88 = vector.load %arg9[%c0_78, %c0_79] : memref<1x128xf32, #tpu.memory_space<vmem>>, vector<1x128xf32>
    %89 = vector.broadcast %88 : vector<1x128xf32> to vector<32x128xf32>
    %90 = arith.mulf %87, %89 : vector<32x128xf32>
    %c0_80 = arith.constant 0 : index
    %c0_81 = arith.constant 0 : index
    %91 = vector.load %arg10[%c0_80, %c0_81] : memref<1x128xf32, #tpu.memory_space<vmem>>, vector<1x128xf32>
    %92 = vector.broadcast %91 : vector<1x128xf32> to vector<32x128xf32>
    %93 = arith.addf %90, %92 : vector<32x128xf32>
    %94 = arith.addf %84, %93 : vector<32x128xf32>
    %95 = arith.truncf %94 : vector<32x128xf32> to vector<32x128xbf16>
    %c0_82 = arith.constant 0 : index
    %c0_83 = arith.constant 0 : index
    %96 = vector.load %arg11[%c0_82, %c0_83] : memref<32x128xbf16, #tpu.memory_space<vmem>>, vector<32x128xbf16>
    tpu.vector_store %arg11[%c0_82, %c0_83], %95 {strides = array<i32>} : memref<32x128xbf16, #tpu.memory_space<vmem>>, vector<32x128xbf16>,
    return
  }
  func.func @transform_0(%arg0: i32) -> (i32, i32) {
    %c0_i32 = arith.constant 0 : i32
    %c0_i32_0 = arith.constant 0 : i32
    %c0_i32_1 = arith.constant 0 : i32
    return %c0_i32, %c0_i32_0 : i32, i32
  }
  func.func @transform_1(%arg0: i32) -> (i32, i32) {
    %c0_i32 = arith.constant 0 : i32
    %c0_i32_0 = arith.constant 0 : i32
    %c0_i32_1 = arith.constant 0 : i32
    return %c0_i32, %c0_i32_0 : i32, i32
  }
  func.func @transform_2(%arg0: i32) -> (i32, i32) {
    %c0_i32 = arith.constant 0 : i32
    %c0_i32_0 = arith.constant 0 : i32
    %c0_i32_1 = arith.constant 0 : i32
    return %c0_i32, %c0_i32_0 : i32, i32
  }
  func.func @transform_3(%arg0: i32) -> (i32, i32) {
    %c0_i32 = arith.constant 0 : i32
    %c0_i32_0 = arith.constant 0 : i32
    %c0_i32_1 = arith.constant 0 : i32
    return %c0_i32, %c0_i32_0 : i32, i32
  }
  func.func @transform_4(%arg0: i32) -> (i32, i32, i32) {
    %c0_i32 = arith.constant 0 : i32
    %c0_i32_0 = arith.constant 0 : i32
    %c0_i32_1 = arith.constant 0 : i32
    %c0_i32_2 = arith.constant 0 : i32
    return %c0_i32, %c0_i32_0, %c0_i32_1 : i32, i32, i32
  }
  func.func @transform_5(%arg0: i32) -> (i32, i32, i32) {
    %c0_i32 = arith.constant 0 : i32
    %c0_i32_0 = arith.constant 0 : i32
    %c0_i32_1 = arith.constant 0 : i32
    %c0_i32_2 = arith.constant 0 : i32
    return %c0_i32, %c0_i32_0, %c0_i32_1 : i32, i32, i32
  }
  func.func @transform_6(%arg0: i32) -> (i32, i32) {
    %c0_i32 = arith.constant 0 : i32
    %c0_i32_0 = arith.constant 0 : i32
    %c0_i32_1 = arith.constant 0 : i32
    return %c0_i32, %c0_i32_0 : i32, i32
  }
  func.func @transform_7(%arg0: i32) -> (i32, i32) {
    %c0_i32 = arith.constant 0 : i32
    %c0_i32_0 = arith.constant 0 : i32
    %c0_i32_1 = arith.constant 0 : i32
    return %c0_i32, %c0_i32_0 : i32, i32
  }
  func.func @transform_8(%arg0: i32) -> (i32, i32) {
    %c0_i32 = arith.constant 0 : i32
    %c0_i32_0 = arith.constant 0 : i32
    %c0_i32_1 = arith.constant 0 : i32
    return %c0_i32, %c0_i32_0 : i32, i32
  }
  func.func @transform_9(%arg0: i32) -> (i32, i32) {
    %c0_i32 = arith.constant 0 : i32
    %c0_i32_0 = arith.constant 0 : i32
    %c0_i32_1 = arith.constant 0 : i32
    return %c0_i32, %c0_i32_0 : i32, i32
  }
  func.func @transform_10(%arg0: i32) -> (i32, i32) {
    %c0_i32 = arith.constant 0 : i32
    %c0_i32_0 = arith.constant 0 : i32
    %c0_i32_1 = arith.constant 0 : i32
    return %c0_i32, %c0_i32_0 : i32, i32
  }
}

module attributes {stable_mosaic.version = 11 : i64} {
  func.func @kernel(%arg0: i32, %arg1: memref<8x128xbf16, #tpu.memory_space<vmem>>, %arg2: memref<128x128xbf16, #tpu.memory_space<vmem>>, %arg3: memref<1x128xf32, #tpu.memory_space<vmem>>, %arg4: memref<1x128xf32, #tpu.memory_space<vmem>>, %arg5: memref<9x8x8xbf16, #tpu.memory_space<vmem>>, %arg6: memref<9x128x128xbf16, #tpu.memory_space<vmem>>, %arg7: memref<8x128xbf16, #tpu.memory_space<vmem>>, %arg8: memref<128x128xbf16, #tpu.memory_space<vmem>>, %arg9: memref<1x128xf32, #tpu.memory_space<vmem>>, %arg10: memref<1x128xf32, #tpu.memory_space<vmem>>, %arg11: memref<8x128xbf16, #tpu.memory_space<vmem>>) attributes {dimension_semantics = [#tpu.dimension_semantics<arbitrary>], iteration_bounds = array<i64: 1>, scalar_prefetch = 0 : i64, scratch_operands = 0 : i64, tpu.core_type = #tpu.core_type<tc>, window_params = [{pipeline_mode = #tpu.pipeline_mode<synchronous>, transform_indices = @transform_0, window_bounds = array<i64: 8, 128>}, {pipeline_mode = #tpu.pipeline_mode<synchronous>, transform_indices = @transform_1, window_bounds = array<i64: 128, 128>}, {pipeline_mode = #tpu.pipeline_mode<synchronous>, transform_indices = @transform_2, window_bounds = array<i64: 1, 128>}, {pipeline_mode = #tpu.pipeline_mode<synchronous>, transform_indices = @transform_3, window_bounds = array<i64: 1, 128>}, {pipeline_mode = #tpu.pipeline_mode<synchronous>, transform_indices = @transform_4, window_bounds = array<i64: 9, 8, 8>}, {pipeline_mode = #tpu.pipeline_mode<synchronous>, transform_indices = @transform_5, window_bounds = array<i64: 9, 128, 128>}, {pipeline_mode = #tpu.pipeline_mode<synchronous>, transform_indices = @transform_6, window_bounds = array<i64: 8, 128>}, {pipeline_mode = #tpu.pipeline_mode<synchronous>, transform_indices = @transform_7, window_bounds = array<i64: 128, 128>}, {pipeline_mode = #tpu.pipeline_mode<synchronous>, transform_indices = @transform_8, window_bounds = array<i64: 1, 128>}, {pipeline_mode = #tpu.pipeline_mode<synchronous>, transform_indices = @transform_9, window_bounds = array<i64: 1, 128>}, {pipeline_mode = #tpu.pipeline_mode<synchronous>, transform_indices = @transform_10, window_bounds = array<i64: 8, 128>}]} {
    %c0 = arith.constant 0 : index
    %c0_0 = arith.constant 0 : index
    %0 = vector.load %arg1[%c0, %c0_0] : memref<8x128xbf16, #tpu.memory_space<vmem>>, vector<8x128xbf16>
    %c0_1 = arith.constant 0 : index
    %c0_2 = arith.constant 0 : index
    %1 = vector.load %arg2[%c0_1, %c0_2] : memref<128x128xbf16, #tpu.memory_space<vmem>>, vector<128x128xbf16>
    %cst = arith.constant dense<0.000000e+00> : vector<8x128xf32>
    %2 = tpu.matmul %0, %1, %cst {dimension_numbers = #tpu.dot_dimension_numbers<[1], [0], [0], [1], [0, 0, 1, 1], [], []>} : vector<8x128xbf16>, vector<128x128xbf16>, vector<8x128xf32> -> vector<8x128xf32>
    %c0_3 = arith.constant 0 : index
    %c0_4 = arith.constant 0 : index
    %3 = vector.load %arg3[%c0_3, %c0_4] : memref<1x128xf32, #tpu.memory_space<vmem>>, vector<1x128xf32>
    %4 = vector.broadcast %3 : vector<1x128xf32> to vector<8x128xf32>
    %5 = arith.mulf %2, %4 : vector<8x128xf32>
    %c0_5 = arith.constant 0 : index
    %c0_6 = arith.constant 0 : index
    %6 = vector.load %arg4[%c0_5, %c0_6] : memref<1x128xf32, #tpu.memory_space<vmem>>, vector<1x128xf32>
    %7 = vector.broadcast %6 : vector<1x128xf32> to vector<8x128xf32>
    %8 = arith.addf %5, %7 : vector<8x128xf32>
    %cst_7 = arith.constant 0.000000e+00 : f32
    %9 = vector.broadcast %cst_7 : f32 to vector<8x128xf32>
    %10 = arith.maximumf %8, %9 : vector<8x128xf32>
    %11 = arith.truncf %10 : vector<8x128xf32> to vector<8x128xbf16>
    %cst_8 = arith.constant 0.000000e+00 : f32
    %12 = vector.broadcast %cst_8 : f32 to vector<8x128xf32>
    %c0_9 = arith.constant 0 : index
    %c0_10 = arith.constant 0 : index
    %c0_11 = arith.constant 0 : index
    %13 = vector.load %arg5[%c0_9, %c0_10, %c0_11] : memref<9x8x8xbf16, #tpu.memory_space<vmem>>, vector<1x8x8xbf16>
    %14 = vector.shape_cast %13 : vector<1x8x8xbf16> to vector<8x8xbf16>
    %cst_12 = arith.constant dense<0.000000e+00> : vector<8x128xf32>
    %15 = tpu.matmul %14, %11, %cst_12 {dimension_numbers = #tpu.dot_dimension_numbers<[1], [0], [0], [1], [0, 0, 1, 1], [], []>} : vector<8x8xbf16>, vector<8x128xbf16>, vector<8x128xf32> -> vector<8x128xf32>
    %16 = arith.truncf %15 : vector<8x128xf32> to vector<8x128xbf16>
    %c0_13 = arith.constant 0 : index
    %c0_14 = arith.constant 0 : index
    %c0_15 = arith.constant 0 : index
    %17 = vector.load %arg6[%c0_13, %c0_14, %c0_15] : memref<9x128x128xbf16, #tpu.memory_space<vmem>>, vector<1x128x128xbf16>
    %18 = vector.shape_cast %17 : vector<1x128x128xbf16> to vector<128x128xbf16>
    %cst_16 = arith.constant dense<0.000000e+00> : vector<8x128xf32>
    %19 = tpu.matmul %16, %18, %cst_16 {dimension_numbers = #tpu.dot_dimension_numbers<[1], [0], [0], [1], [0, 0, 1, 1], [], []>} : vector<8x128xbf16>, vector<128x128xbf16>, vector<8x128xf32> -> vector<8x128xf32>
    %20 = arith.addf %12, %19 : vector<8x128xf32>
    %c1 = arith.constant 1 : index
    %c0_17 = arith.constant 0 : index
    %c0_18 = arith.constant 0 : index
    %21 = vector.load %arg5[%c1, %c0_17, %c0_18] : memref<9x8x8xbf16, #tpu.memory_space<vmem>>, vector<1x8x8xbf16>
    %22 = vector.shape_cast %21 : vector<1x8x8xbf16> to vector<8x8xbf16>
    %cst_19 = arith.constant dense<0.000000e+00> : vector<8x128xf32>
    %23 = tpu.matmul %22, %11, %cst_19 {dimension_numbers = #tpu.dot_dimension_numbers<[1], [0], [0], [1], [0, 0, 1, 1], [], []>} : vector<8x8xbf16>, vector<8x128xbf16>, vector<8x128xf32> -> vector<8x128xf32>
    %24 = arith.truncf %23 : vector<8x128xf32> to vector<8x128xbf16>
    %c1_20 = arith.constant 1 : index
    %c0_21 = arith.constant 0 : index
    %c0_22 = arith.constant 0 : index
    %25 = vector.load %arg6[%c1_20, %c0_21, %c0_22] : memref<9x128x128xbf16, #tpu.memory_space<vmem>>, vector<1x128x128xbf16>
    %26 = vector.shape_cast %25 : vector<1x128x128xbf16> to vector<128x128xbf16>
    %cst_23 = arith.constant dense<0.000000e+00> : vector<8x128xf32>
    %27 = tpu.matmul %24, %26, %cst_23 {dimension_numbers = #tpu.dot_dimension_numbers<[1], [0], [0], [1], [0, 0, 1, 1], [], []>} : vector<8x128xbf16>, vector<128x128xbf16>, vector<8x128xf32> -> vector<8x128xf32>
    %28 = arith.addf %20, %27 : vector<8x128xf32>
    %c2 = arith.constant 2 : index
    %c0_24 = arith.constant 0 : index
    %c0_25 = arith.constant 0 : index
    %29 = vector.load %arg5[%c2, %c0_24, %c0_25] : memref<9x8x8xbf16, #tpu.memory_space<vmem>>, vector<1x8x8xbf16>
    %30 = vector.shape_cast %29 : vector<1x8x8xbf16> to vector<8x8xbf16>
    %cst_26 = arith.constant dense<0.000000e+00> : vector<8x128xf32>
    %31 = tpu.matmul %30, %11, %cst_26 {dimension_numbers = #tpu.dot_dimension_numbers<[1], [0], [0], [1], [0, 0, 1, 1], [], []>} : vector<8x8xbf16>, vector<8x128xbf16>, vector<8x128xf32> -> vector<8x128xf32>
    %32 = arith.truncf %31 : vector<8x128xf32> to vector<8x128xbf16>
    %c2_27 = arith.constant 2 : index
    %c0_28 = arith.constant 0 : index
    %c0_29 = arith.constant 0 : index
    %33 = vector.load %arg6[%c2_27, %c0_28, %c0_29] : memref<9x128x128xbf16, #tpu.memory_space<vmem>>, vector<1x128x128xbf16>
    %34 = vector.shape_cast %33 : vector<1x128x128xbf16> to vector<128x128xbf16>
    %cst_30 = arith.constant dense<0.000000e+00> : vector<8x128xf32>
    %35 = tpu.matmul %32, %34, %cst_30 {dimension_numbers = #tpu.dot_dimension_numbers<[1], [0], [0], [1], [0, 0, 1, 1], [], []>} : vector<8x128xbf16>, vector<128x128xbf16>, vector<8x128xf32> -> vector<8x128xf32>
    %36 = arith.addf %28, %35 : vector<8x128xf32>
    %c3 = arith.constant 3 : index
    %c0_31 = arith.constant 0 : index
    %c0_32 = arith.constant 0 : index
    %37 = vector.load %arg5[%c3, %c0_31, %c0_32] : memref<9x8x8xbf16, #tpu.memory_space<vmem>>, vector<1x8x8xbf16>
    %38 = vector.shape_cast %37 : vector<1x8x8xbf16> to vector<8x8xbf16>
    %cst_33 = arith.constant dense<0.000000e+00> : vector<8x128xf32>
    %39 = tpu.matmul %38, %11, %cst_33 {dimension_numbers = #tpu.dot_dimension_numbers<[1], [0], [0], [1], [0, 0, 1, 1], [], []>} : vector<8x8xbf16>, vector<8x128xbf16>, vector<8x128xf32> -> vector<8x128xf32>
    %40 = arith.truncf %39 : vector<8x128xf32> to vector<8x128xbf16>
    %c3_34 = arith.constant 3 : index
    %c0_35 = arith.constant 0 : index
    %c0_36 = arith.constant 0 : index
    %41 = vector.load %arg6[%c3_34, %c0_35, %c0_36] : memref<9x128x128xbf16, #tpu.memory_space<vmem>>, vector<1x128x128xbf16>
    %42 = vector.shape_cast %41 : vector<1x128x128xbf16> to vector<128x128xbf16>
    %cst_37 = arith.constant dense<0.000000e+00> : vector<8x128xf32>
    %43 = tpu.matmul %40, %42, %cst_37 {dimension_numbers = #tpu.dot_dimension_numbers<[1], [0], [0], [1], [0, 0, 1, 1], [], []>} : vector<8x128xbf16>, vector<128x128xbf16>, vector<8x128xf32> -> vector<8x128xf32>
    %44 = arith.addf %36, %43 : vector<8x128xf32>
    %c4 = arith.constant 4 : index
    %c0_38 = arith.constant 0 : index
    %c0_39 = arith.constant 0 : index
    %45 = vector.load %arg5[%c4, %c0_38, %c0_39] : memref<9x8x8xbf16, #tpu.memory_space<vmem>>, vector<1x8x8xbf16>
    %46 = vector.shape_cast %45 : vector<1x8x8xbf16> to vector<8x8xbf16>
    %cst_40 = arith.constant dense<0.000000e+00> : vector<8x128xf32>
    %47 = tpu.matmul %46, %11, %cst_40 {dimension_numbers = #tpu.dot_dimension_numbers<[1], [0], [0], [1], [0, 0, 1, 1], [], []>} : vector<8x8xbf16>, vector<8x128xbf16>, vector<8x128xf32> -> vector<8x128xf32>
    %48 = arith.truncf %47 : vector<8x128xf32> to vector<8x128xbf16>
    %c4_41 = arith.constant 4 : index
    %c0_42 = arith.constant 0 : index
    %c0_43 = arith.constant 0 : index
    %49 = vector.load %arg6[%c4_41, %c0_42, %c0_43] : memref<9x128x128xbf16, #tpu.memory_space<vmem>>, vector<1x128x128xbf16>
    %50 = vector.shape_cast %49 : vector<1x128x128xbf16> to vector<128x128xbf16>
    %cst_44 = arith.constant dense<0.000000e+00> : vector<8x128xf32>
    %51 = tpu.matmul %48, %50, %cst_44 {dimension_numbers = #tpu.dot_dimension_numbers<[1], [0], [0], [1], [0, 0, 1, 1], [], []>} : vector<8x128xbf16>, vector<128x128xbf16>, vector<8x128xf32> -> vector<8x128xf32>
    %52 = arith.addf %44, %51 : vector<8x128xf32>
    %c5 = arith.constant 5 : index
    %c0_45 = arith.constant 0 : index
    %c0_46 = arith.constant 0 : index
    %53 = vector.load %arg5[%c5, %c0_45, %c0_46] : memref<9x8x8xbf16, #tpu.memory_space<vmem>>, vector<1x8x8xbf16>
    %54 = vector.shape_cast %53 : vector<1x8x8xbf16> to vector<8x8xbf16>
    %cst_47 = arith.constant dense<0.000000e+00> : vector<8x128xf32>
    %55 = tpu.matmul %54, %11, %cst_47 {dimension_numbers = #tpu.dot_dimension_numbers<[1], [0], [0], [1], [0, 0, 1, 1], [], []>} : vector<8x8xbf16>, vector<8x128xbf16>, vector<8x128xf32> -> vector<8x128xf32>
    %56 = arith.truncf %55 : vector<8x128xf32> to vector<8x128xbf16>
    %c5_48 = arith.constant 5 : index
    %c0_49 = arith.constant 0 : index
    %c0_50 = arith.constant 0 : index
    %57 = vector.load %arg6[%c5_48, %c0_49, %c0_50] : memref<9x128x128xbf16, #tpu.memory_space<vmem>>, vector<1x128x128xbf16>
    %58 = vector.shape_cast %57 : vector<1x128x128xbf16> to vector<128x128xbf16>
    %cst_51 = arith.constant dense<0.000000e+00> : vector<8x128xf32>
    %59 = tpu.matmul %56, %58, %cst_51 {dimension_numbers = #tpu.dot_dimension_numbers<[1], [0], [0], [1], [0, 0, 1, 1], [], []>} : vector<8x128xbf16>, vector<128x128xbf16>, vector<8x128xf32> -> vector<8x128xf32>
    %60 = arith.addf %52, %59 : vector<8x128xf32>
    %c6 = arith.constant 6 : index
    %c0_52 = arith.constant 0 : index
    %c0_53 = arith.constant 0 : index
    %61 = vector.load %arg5[%c6, %c0_52, %c0_53] : memref<9x8x8xbf16, #tpu.memory_space<vmem>>, vector<1x8x8xbf16>
    %62 = vector.shape_cast %61 : vector<1x8x8xbf16> to vector<8x8xbf16>
    %cst_54 = arith.constant dense<0.000000e+00> : vector<8x128xf32>
    %63 = tpu.matmul %62, %11, %cst_54 {dimension_numbers = #tpu.dot_dimension_numbers<[1], [0], [0], [1], [0, 0, 1, 1], [], []>} : vector<8x8xbf16>, vector<8x128xbf16>, vector<8x128xf32> -> vector<8x128xf32>
    %64 = arith.truncf %63 : vector<8x128xf32> to vector<8x128xbf16>
    %c6_55 = arith.constant 6 : index
    %c0_56 = arith.constant 0 : index
    %c0_57 = arith.constant 0 : index
    %65 = vector.load %arg6[%c6_55, %c0_56, %c0_57] : memref<9x128x128xbf16, #tpu.memory_space<vmem>>, vector<1x128x128xbf16>
    %66 = vector.shape_cast %65 : vector<1x128x128xbf16> to vector<128x128xbf16>
    %cst_58 = arith.constant dense<0.000000e+00> : vector<8x128xf32>
    %67 = tpu.matmul %64, %66, %cst_58 {dimension_numbers = #tpu.dot_dimension_numbers<[1], [0], [0], [1], [0, 0, 1, 1], [], []>} : vector<8x128xbf16>, vector<128x128xbf16>, vector<8x128xf32> -> vector<8x128xf32>
    %68 = arith.addf %60, %67 : vector<8x128xf32>
    %c7 = arith.constant 7 : index
    %c0_59 = arith.constant 0 : index
    %c0_60 = arith.constant 0 : index
    %69 = vector.load %arg5[%c7, %c0_59, %c0_60] : memref<9x8x8xbf16, #tpu.memory_space<vmem>>, vector<1x8x8xbf16>
    %70 = vector.shape_cast %69 : vector<1x8x8xbf16> to vector<8x8xbf16>
    %cst_61 = arith.constant dense<0.000000e+00> : vector<8x128xf32>
    %71 = tpu.matmul %70, %11, %cst_61 {dimension_numbers = #tpu.dot_dimension_numbers<[1], [0], [0], [1], [0, 0, 1, 1], [], []>} : vector<8x8xbf16>, vector<8x128xbf16>, vector<8x128xf32> -> vector<8x128xf32>
    %72 = arith.truncf %71 : vector<8x128xf32> to vector<8x128xbf16>
    %c7_62 = arith.constant 7 : index
    %c0_63 = arith.constant 0 : index
    %c0_64 = arith.constant 0 : index
    %73 = vector.load %arg6[%c7_62, %c0_63, %c0_64] : memref<9x128x128xbf16, #tpu.memory_space<vmem>>, vector<1x128x128xbf16>
    %74 = vector.shape_cast %73 : vector<1x128x128xbf16> to vector<128x128xbf16>
    %cst_65 = arith.constant dense<0.000000e+00> : vector<8x128xf32>
    %75 = tpu.matmul %72, %74, %cst_65 {dimension_numbers = #tpu.dot_dimension_numbers<[1], [0], [0], [1], [0, 0, 1, 1], [], []>} : vector<8x128xbf16>, vector<128x128xbf16>, vector<8x128xf32> -> vector<8x128xf32>
    %76 = arith.addf %68, %75 : vector<8x128xf32>
    %c8 = arith.constant 8 : index
    %c0_66 = arith.constant 0 : index
    %c0_67 = arith.constant 0 : index
    %77 = vector.load %arg5[%c8, %c0_66, %c0_67] : memref<9x8x8xbf16, #tpu.memory_space<vmem>>, vector<1x8x8xbf16>
    %78 = vector.shape_cast %77 : vector<1x8x8xbf16> to vector<8x8xbf16>
    %cst_68 = arith.constant dense<0.000000e+00> : vector<8x128xf32>
    %79 = tpu.matmul %78, %11, %cst_68 {dimension_numbers = #tpu.dot_dimension_numbers<[1], [0], [0], [1], [0, 0, 1, 1], [], []>} : vector<8x8xbf16>, vector<8x128xbf16>, vector<8x128xf32> -> vector<8x128xf32>
    %80 = arith.truncf %79 : vector<8x128xf32> to vector<8x128xbf16>
    %c8_69 = arith.constant 8 : index
    %c0_70 = arith.constant 0 : index
    %c0_71 = arith.constant 0 : index
    %81 = vector.load %arg6[%c8_69, %c0_70, %c0_71] : memref<9x128x128xbf16, #tpu.memory_space<vmem>>, vector<1x128x128xbf16>
    %82 = vector.shape_cast %81 : vector<1x128x128xbf16> to vector<128x128xbf16>
    %cst_72 = arith.constant dense<0.000000e+00> : vector<8x128xf32>
    %83 = tpu.matmul %80, %82, %cst_72 {dimension_numbers = #tpu.dot_dimension_numbers<[1], [0], [0], [1], [0, 0, 1, 1], [], []>} : vector<8x128xbf16>, vector<128x128xbf16>, vector<8x128xf32> -> vector<8x128xf32>
    %84 = arith.addf %76, %83 : vector<8x128xf32>
    %c0_73 = arith.constant 0 : index
    %c0_74 = arith.constant 0 : index
    %85 = vector.load %arg7[%c0_73, %c0_74] : memref<8x128xbf16, #tpu.memory_space<vmem>>, vector<8x128xbf16>
    %c0_75 = arith.constant 0 : index
    %c0_76 = arith.constant 0 : index
    %86 = vector.load %arg8[%c0_75, %c0_76] : memref<128x128xbf16, #tpu.memory_space<vmem>>, vector<128x128xbf16>
    %cst_77 = arith.constant dense<0.000000e+00> : vector<8x128xf32>
    %87 = tpu.matmul %85, %86, %cst_77 {dimension_numbers = #tpu.dot_dimension_numbers<[1], [0], [0], [1], [0, 0, 1, 1], [], []>} : vector<8x128xbf16>, vector<128x128xbf16>, vector<8x128xf32> -> vector<8x128xf32>
    %c0_78 = arith.constant 0 : index
    %c0_79 = arith.constant 0 : index
    %88 = vector.load %arg9[%c0_78, %c0_79] : memref<1x128xf32, #tpu.memory_space<vmem>>, vector<1x128xf32>
    %89 = vector.broadcast %88 : vector<1x128xf32> to vector<8x128xf32>
    %90 = arith.mulf %87, %89 : vector<8x128xf32>
    %c0_80 = arith.constant 0 : index
    %c0_81 = arith.constant 0 : index
    %91 = vector.load %arg10[%c0_80, %c0_81] : memref<1x128xf32, #tpu.memory_space<vmem>>, vector<1x128xf32>
    %92 = vector.broadcast %91 : vector<1x128xf32> to vector<8x128xf32>
    %93 = arith.addf %90, %92 : vector<8x128xf32>
    %94 = arith.addf %84, %93 : vector<8x128xf32>
    %95 = arith.truncf %94 : vector<8x128xf32> to vector<8x128xbf16>
    %c0_82 = arith.constant 0 : index
    %c0_83 = arith.constant 0 : index
    %96 = vector.load %arg11[%c0_82, %c0_83] : memref<8x128xbf16, #tpu.memory_space<vmem>>, vector<8x128xbf16>
    tpu.vector_store %arg11[%c0_82, %c0_83], %95 {strides = array<i32>} : memref<8x128xbf16, #tpu.memory_space<vmem>>, vector<8x128xbf16>,
    return
  }
  func.func @transform_0(%arg0: i32) -> (i32, i32) {
    %c0_i32 = arith.constant 0 : i32
    %c0_i32_0 = arith.constant 0 : i32
    %c0_i32_1 = arith.constant 0 : i32
    return %c0_i32, %c0_i32_0 : i32, i32
  }
  func.func @transform_1(%arg0: i32) -> (i32, i32) {
    %c0_i32 = arith.constant 0 : i32
    %c0_i32_0 = arith.constant 0 : i32
    %c0_i32_1 = arith.constant 0 : i32
    return %c0_i32, %c0_i32_0 : i32, i32
  }
  func.func @transform_2(%arg0: i32) -> (i32, i32) {
    %c0_i32 = arith.constant 0 : i32
    %c0_i32_0 = arith.constant 0 : i32
    %c0_i32_1 = arith.constant 0 : i32
    return %c0_i32, %c0_i32_0 : i32, i32
  }
  func.func @transform_3(%arg0: i32) -> (i32, i32) {
    %c0_i32 = arith.constant 0 : i32
    %c0_i32_0 = arith.constant 0 : i32
    %c0_i32_1 = arith.constant 0 : i32
    return %c0_i32, %c0_i32_0 : i32, i32
  }
  func.func @transform_4(%arg0: i32) -> (i32, i32, i32) {
    %c0_i32 = arith.constant 0 : i32
    %c0_i32_0 = arith.constant 0 : i32
    %c0_i32_1 = arith.constant 0 : i32
    %c0_i32_2 = arith.constant 0 : i32
    return %c0_i32, %c0_i32_0, %c0_i32_1 : i32, i32, i32
  }
  func.func @transform_5(%arg0: i32) -> (i32, i32, i32) {
    %c0_i32 = arith.constant 0 : i32
    %c0_i32_0 = arith.constant 0 : i32
    %c0_i32_1 = arith.constant 0 : i32
    %c0_i32_2 = arith.constant 0 : i32
    return %c0_i32, %c0_i32_0, %c0_i32_1 : i32, i32, i32
  }
  func.func @transform_6(%arg0: i32) -> (i32, i32) {
    %c0_i32 = arith.constant 0 : i32
    %c0_i32_0 = arith.constant 0 : i32
    %c0_i32_1 = arith.constant 0 : i32
    return %c0_i32, %c0_i32_0 : i32, i32
  }
  func.func @transform_7(%arg0: i32) -> (i32, i32) {
    %c0_i32 = arith.constant 0 : i32
    %c0_i32_0 = arith.constant 0 : i32
    %c0_i32_1 = arith.constant 0 : i32
    return %c0_i32, %c0_i32_0 : i32, i32
  }
  func.func @transform_8(%arg0: i32) -> (i32, i32) {
    %c0_i32 = arith.constant 0 : i32
    %c0_i32_0 = arith.constant 0 : i32
    %c0_i32_1 = arith.constant 0 : i32
    return %c0_i32, %c0_i32_0 : i32, i32
  }
  func.func @transform_9(%arg0: i32) -> (i32, i32) {
    %c0_i32 = arith.constant 0 : i32
    %c0_i32_0 = arith.constant 0 : i32
    %c0_i32_1 = arith.constant 0 : i32
    return %c0_i32, %c0_i32_0 : i32, i32
  }
  func.func @transform_10(%arg0: i32) -> (i32, i32) {
    %c0_i32 = arith.constant 0 : i32
    %c0_i32_0 = arith.constant 0 : i32
    %c0_i32_1 = arith.constant 0 : i32
    return %c0_i32, %c0_i32_0 : i32, i32
  }
}

module attributes {stable_mosaic.version = 11 : i64} {
  func.func @kernel(%arg0: i32, %arg1: memref<8x256xbf16, #tpu.memory_space<vmem>>, %arg2: memref<256x128xbf16, #tpu.memory_space<vmem>>, %arg3: memref<1x128xf32, #tpu.memory_space<vmem>>, %arg4: memref<1x128xf32, #tpu.memory_space<vmem>>, %arg5: memref<9x8x8xbf16, #tpu.memory_space<vmem>>, %arg6: memref<9x128x128xbf16, #tpu.memory_space<vmem>>, %arg7: memref<8x256xbf16, #tpu.memory_space<vmem>>, %arg8: memref<256x128xbf16, #tpu.memory_space<vmem>>, %arg9: memref<1x128xf32, #tpu.memory_space<vmem>>, %arg10: memref<1x128xf32, #tpu.memory_space<vmem>>, %arg11: memref<8x128xbf16, #tpu.memory_space<vmem>>) attributes {dimension_semantics = [#tpu.dimension_semantics<arbitrary>], iteration_bounds = array<i64: 1>, scalar_prefetch = 0 : i64, scratch_operands = 0 : i64, tpu.core_type = #tpu.core_type<tc>, window_params = [{pipeline_mode = #tpu.pipeline_mode<synchronous>, transform_indices = @transform_0, window_bounds = array<i64: 8, 256>}, {pipeline_mode = #tpu.pipeline_mode<synchronous>, transform_indices = @transform_1, window_bounds = array<i64: 256, 128>}, {pipeline_mode = #tpu.pipeline_mode<synchronous>, transform_indices = @transform_2, window_bounds = array<i64: 1, 128>}, {pipeline_mode = #tpu.pipeline_mode<synchronous>, transform_indices = @transform_3, window_bounds = array<i64: 1, 128>}, {pipeline_mode = #tpu.pipeline_mode<synchronous>, transform_indices = @transform_4, window_bounds = array<i64: 9, 8, 8>}, {pipeline_mode = #tpu.pipeline_mode<synchronous>, transform_indices = @transform_5, window_bounds = array<i64: 9, 128, 128>}, {pipeline_mode = #tpu.pipeline_mode<synchronous>, transform_indices = @transform_6, window_bounds = array<i64: 8, 256>}, {pipeline_mode = #tpu.pipeline_mode<synchronous>, transform_indices = @transform_7, window_bounds = array<i64: 256, 128>}, {pipeline_mode = #tpu.pipeline_mode<synchronous>, transform_indices = @transform_8, window_bounds = array<i64: 1, 128>}, {pipeline_mode = #tpu.pipeline_mode<synchronous>, transform_indices = @transform_9, window_bounds = array<i64: 1, 128>}, {pipeline_mode = #tpu.pipeline_mode<synchronous>, transform_indices = @transform_10, window_bounds = array<i64: 8, 128>}]} {
    %c0 = arith.constant 0 : index
    %c0_0 = arith.constant 0 : index
    %0 = vector.load %arg1[%c0, %c0_0] : memref<8x256xbf16, #tpu.memory_space<vmem>>, vector<8x256xbf16>
    %c0_1 = arith.constant 0 : index
    %c0_2 = arith.constant 0 : index
    %1 = vector.load %arg2[%c0_1, %c0_2] : memref<256x128xbf16, #tpu.memory_space<vmem>>, vector<256x128xbf16>
    %cst = arith.constant dense<0.000000e+00> : vector<8x128xf32>
    %2 = tpu.matmul %0, %1, %cst {dimension_numbers = #tpu.dot_dimension_numbers<[1], [0], [0], [1], [0, 0, 1, 1], [], []>} : vector<8x256xbf16>, vector<256x128xbf16>, vector<8x128xf32> -> vector<8x128xf32>
    %c0_3 = arith.constant 0 : index
    %c0_4 = arith.constant 0 : index
    %3 = vector.load %arg3[%c0_3, %c0_4] : memref<1x128xf32, #tpu.memory_space<vmem>>, vector<1x128xf32>
    %4 = vector.broadcast %3 : vector<1x128xf32> to vector<8x128xf32>
    %5 = arith.mulf %2, %4 : vector<8x128xf32>
    %c0_5 = arith.constant 0 : index
    %c0_6 = arith.constant 0 : index
    %6 = vector.load %arg4[%c0_5, %c0_6] : memref<1x128xf32, #tpu.memory_space<vmem>>, vector<1x128xf32>
    %7 = vector.broadcast %6 : vector<1x128xf32> to vector<8x128xf32>
    %8 = arith.addf %5, %7 : vector<8x128xf32>
    %cst_7 = arith.constant 0.000000e+00 : f32
    %9 = vector.broadcast %cst_7 : f32 to vector<8x128xf32>
    %10 = arith.maximumf %8, %9 : vector<8x128xf32>
    %11 = arith.truncf %10 : vector<8x128xf32> to vector<8x128xbf16>
    %cst_8 = arith.constant 0.000000e+00 : f32
    %12 = vector.broadcast %cst_8 : f32 to vector<8x128xf32>
    %c0_9 = arith.constant 0 : index
    %c0_10 = arith.constant 0 : index
    %c0_11 = arith.constant 0 : index
    %13 = vector.load %arg5[%c0_9, %c0_10, %c0_11] : memref<9x8x8xbf16, #tpu.memory_space<vmem>>, vector<1x8x8xbf16>
    %14 = vector.shape_cast %13 : vector<1x8x8xbf16> to vector<8x8xbf16>
    %cst_12 = arith.constant dense<0.000000e+00> : vector<8x128xf32>
    %15 = tpu.matmul %14, %11, %cst_12 {dimension_numbers = #tpu.dot_dimension_numbers<[1], [0], [0], [1], [0, 0, 1, 1], [], []>} : vector<8x8xbf16>, vector<8x128xbf16>, vector<8x128xf32> -> vector<8x128xf32>
    %16 = arith.truncf %15 : vector<8x128xf32> to vector<8x128xbf16>
    %c0_13 = arith.constant 0 : index
    %c0_14 = arith.constant 0 : index
    %c0_15 = arith.constant 0 : index
    %17 = vector.load %arg6[%c0_13, %c0_14, %c0_15] : memref<9x128x128xbf16, #tpu.memory_space<vmem>>, vector<1x128x128xbf16>
    %18 = vector.shape_cast %17 : vector<1x128x128xbf16> to vector<128x128xbf16>
    %cst_16 = arith.constant dense<0.000000e+00> : vector<8x128xf32>
    %19 = tpu.matmul %16, %18, %cst_16 {dimension_numbers = #tpu.dot_dimension_numbers<[1], [0], [0], [1], [0, 0, 1, 1], [], []>} : vector<8x128xbf16>, vector<128x128xbf16>, vector<8x128xf32> -> vector<8x128xf32>
    %20 = arith.addf %12, %19 : vector<8x128xf32>
    %c1 = arith.constant 1 : index
    %c0_17 = arith.constant 0 : index
    %c0_18 = arith.constant 0 : index
    %21 = vector.load %arg5[%c1, %c0_17, %c0_18] : memref<9x8x8xbf16, #tpu.memory_space<vmem>>, vector<1x8x8xbf16>
    %22 = vector.shape_cast %21 : vector<1x8x8xbf16> to vector<8x8xbf16>
    %cst_19 = arith.constant dense<0.000000e+00> : vector<8x128xf32>
    %23 = tpu.matmul %22, %11, %cst_19 {dimension_numbers = #tpu.dot_dimension_numbers<[1], [0], [0], [1], [0, 0, 1, 1], [], []>} : vector<8x8xbf16>, vector<8x128xbf16>, vector<8x128xf32> -> vector<8x128xf32>
    %24 = arith.truncf %23 : vector<8x128xf32> to vector<8x128xbf16>
    %c1_20 = arith.constant 1 : index
    %c0_21 = arith.constant 0 : index
    %c0_22 = arith.constant 0 : index
    %25 = vector.load %arg6[%c1_20, %c0_21, %c0_22] : memref<9x128x128xbf16, #tpu.memory_space<vmem>>, vector<1x128x128xbf16>
    %26 = vector.shape_cast %25 : vector<1x128x128xbf16> to vector<128x128xbf16>
    %cst_23 = arith.constant dense<0.000000e+00> : vector<8x128xf32>
    %27 = tpu.matmul %24, %26, %cst_23 {dimension_numbers = #tpu.dot_dimension_numbers<[1], [0], [0], [1], [0, 0, 1, 1], [], []>} : vector<8x128xbf16>, vector<128x128xbf16>, vector<8x128xf32> -> vector<8x128xf32>
    %28 = arith.addf %20, %27 : vector<8x128xf32>
    %c2 = arith.constant 2 : index
    %c0_24 = arith.constant 0 : index
    %c0_25 = arith.constant 0 : index
    %29 = vector.load %arg5[%c2, %c0_24, %c0_25] : memref<9x8x8xbf16, #tpu.memory_space<vmem>>, vector<1x8x8xbf16>
    %30 = vector.shape_cast %29 : vector<1x8x8xbf16> to vector<8x8xbf16>
    %cst_26 = arith.constant dense<0.000000e+00> : vector<8x128xf32>
    %31 = tpu.matmul %30, %11, %cst_26 {dimension_numbers = #tpu.dot_dimension_numbers<[1], [0], [0], [1], [0, 0, 1, 1], [], []>} : vector<8x8xbf16>, vector<8x128xbf16>, vector<8x128xf32> -> vector<8x128xf32>
    %32 = arith.truncf %31 : vector<8x128xf32> to vector<8x128xbf16>
    %c2_27 = arith.constant 2 : index
    %c0_28 = arith.constant 0 : index
    %c0_29 = arith.constant 0 : index
    %33 = vector.load %arg6[%c2_27, %c0_28, %c0_29] : memref<9x128x128xbf16, #tpu.memory_space<vmem>>, vector<1x128x128xbf16>
    %34 = vector.shape_cast %33 : vector<1x128x128xbf16> to vector<128x128xbf16>
    %cst_30 = arith.constant dense<0.000000e+00> : vector<8x128xf32>
    %35 = tpu.matmul %32, %34, %cst_30 {dimension_numbers = #tpu.dot_dimension_numbers<[1], [0], [0], [1], [0, 0, 1, 1], [], []>} : vector<8x128xbf16>, vector<128x128xbf16>, vector<8x128xf32> -> vector<8x128xf32>
    %36 = arith.addf %28, %35 : vector<8x128xf32>
    %c3 = arith.constant 3 : index
    %c0_31 = arith.constant 0 : index
    %c0_32 = arith.constant 0 : index
    %37 = vector.load %arg5[%c3, %c0_31, %c0_32] : memref<9x8x8xbf16, #tpu.memory_space<vmem>>, vector<1x8x8xbf16>
    %38 = vector.shape_cast %37 : vector<1x8x8xbf16> to vector<8x8xbf16>
    %cst_33 = arith.constant dense<0.000000e+00> : vector<8x128xf32>
    %39 = tpu.matmul %38, %11, %cst_33 {dimension_numbers = #tpu.dot_dimension_numbers<[1], [0], [0], [1], [0, 0, 1, 1], [], []>} : vector<8x8xbf16>, vector<8x128xbf16>, vector<8x128xf32> -> vector<8x128xf32>
    %40 = arith.truncf %39 : vector<8x128xf32> to vector<8x128xbf16>
    %c3_34 = arith.constant 3 : index
    %c0_35 = arith.constant 0 : index
    %c0_36 = arith.constant 0 : index
    %41 = vector.load %arg6[%c3_34, %c0_35, %c0_36] : memref<9x128x128xbf16, #tpu.memory_space<vmem>>, vector<1x128x128xbf16>
    %42 = vector.shape_cast %41 : vector<1x128x128xbf16> to vector<128x128xbf16>
    %cst_37 = arith.constant dense<0.000000e+00> : vector<8x128xf32>
    %43 = tpu.matmul %40, %42, %cst_37 {dimension_numbers = #tpu.dot_dimension_numbers<[1], [0], [0], [1], [0, 0, 1, 1], [], []>} : vector<8x128xbf16>, vector<128x128xbf16>, vector<8x128xf32> -> vector<8x128xf32>
    %44 = arith.addf %36, %43 : vector<8x128xf32>
    %c4 = arith.constant 4 : index
    %c0_38 = arith.constant 0 : index
    %c0_39 = arith.constant 0 : index
    %45 = vector.load %arg5[%c4, %c0_38, %c0_39] : memref<9x8x8xbf16, #tpu.memory_space<vmem>>, vector<1x8x8xbf16>
    %46 = vector.shape_cast %45 : vector<1x8x8xbf16> to vector<8x8xbf16>
    %cst_40 = arith.constant dense<0.000000e+00> : vector<8x128xf32>
    %47 = tpu.matmul %46, %11, %cst_40 {dimension_numbers = #tpu.dot_dimension_numbers<[1], [0], [0], [1], [0, 0, 1, 1], [], []>} : vector<8x8xbf16>, vector<8x128xbf16>, vector<8x128xf32> -> vector<8x128xf32>
    %48 = arith.truncf %47 : vector<8x128xf32> to vector<8x128xbf16>
    %c4_41 = arith.constant 4 : index
    %c0_42 = arith.constant 0 : index
    %c0_43 = arith.constant 0 : index
    %49 = vector.load %arg6[%c4_41, %c0_42, %c0_43] : memref<9x128x128xbf16, #tpu.memory_space<vmem>>, vector<1x128x128xbf16>
    %50 = vector.shape_cast %49 : vector<1x128x128xbf16> to vector<128x128xbf16>
    %cst_44 = arith.constant dense<0.000000e+00> : vector<8x128xf32>
    %51 = tpu.matmul %48, %50, %cst_44 {dimension_numbers = #tpu.dot_dimension_numbers<[1], [0], [0], [1], [0, 0, 1, 1], [], []>} : vector<8x128xbf16>, vector<128x128xbf16>, vector<8x128xf32> -> vector<8x128xf32>
    %52 = arith.addf %44, %51 : vector<8x128xf32>
    %c5 = arith.constant 5 : index
    %c0_45 = arith.constant 0 : index
    %c0_46 = arith.constant 0 : index
    %53 = vector.load %arg5[%c5, %c0_45, %c0_46] : memref<9x8x8xbf16, #tpu.memory_space<vmem>>, vector<1x8x8xbf16>
    %54 = vector.shape_cast %53 : vector<1x8x8xbf16> to vector<8x8xbf16>
    %cst_47 = arith.constant dense<0.000000e+00> : vector<8x128xf32>
    %55 = tpu.matmul %54, %11, %cst_47 {dimension_numbers = #tpu.dot_dimension_numbers<[1], [0], [0], [1], [0, 0, 1, 1], [], []>} : vector<8x8xbf16>, vector<8x128xbf16>, vector<8x128xf32> -> vector<8x128xf32>
    %56 = arith.truncf %55 : vector<8x128xf32> to vector<8x128xbf16>
    %c5_48 = arith.constant 5 : index
    %c0_49 = arith.constant 0 : index
    %c0_50 = arith.constant 0 : index
    %57 = vector.load %arg6[%c5_48, %c0_49, %c0_50] : memref<9x128x128xbf16, #tpu.memory_space<vmem>>, vector<1x128x128xbf16>
    %58 = vector.shape_cast %57 : vector<1x128x128xbf16> to vector<128x128xbf16>
    %cst_51 = arith.constant dense<0.000000e+00> : vector<8x128xf32>
    %59 = tpu.matmul %56, %58, %cst_51 {dimension_numbers = #tpu.dot_dimension_numbers<[1], [0], [0], [1], [0, 0, 1, 1], [], []>} : vector<8x128xbf16>, vector<128x128xbf16>, vector<8x128xf32> -> vector<8x128xf32>
    %60 = arith.addf %52, %59 : vector<8x128xf32>
    %c6 = arith.constant 6 : index
    %c0_52 = arith.constant 0 : index
    %c0_53 = arith.constant 0 : index
    %61 = vector.load %arg5[%c6, %c0_52, %c0_53] : memref<9x8x8xbf16, #tpu.memory_space<vmem>>, vector<1x8x8xbf16>
    %62 = vector.shape_cast %61 : vector<1x8x8xbf16> to vector<8x8xbf16>
    %cst_54 = arith.constant dense<0.000000e+00> : vector<8x128xf32>
    %63 = tpu.matmul %62, %11, %cst_54 {dimension_numbers = #tpu.dot_dimension_numbers<[1], [0], [0], [1], [0, 0, 1, 1], [], []>} : vector<8x8xbf16>, vector<8x128xbf16>, vector<8x128xf32> -> vector<8x128xf32>
    %64 = arith.truncf %63 : vector<8x128xf32> to vector<8x128xbf16>
    %c6_55 = arith.constant 6 : index
    %c0_56 = arith.constant 0 : index
    %c0_57 = arith.constant 0 : index
    %65 = vector.load %arg6[%c6_55, %c0_56, %c0_57] : memref<9x128x128xbf16, #tpu.memory_space<vmem>>, vector<1x128x128xbf16>
    %66 = vector.shape_cast %65 : vector<1x128x128xbf16> to vector<128x128xbf16>
    %cst_58 = arith.constant dense<0.000000e+00> : vector<8x128xf32>
    %67 = tpu.matmul %64, %66, %cst_58 {dimension_numbers = #tpu.dot_dimension_numbers<[1], [0], [0], [1], [0, 0, 1, 1], [], []>} : vector<8x128xbf16>, vector<128x128xbf16>, vector<8x128xf32> -> vector<8x128xf32>
    %68 = arith.addf %60, %67 : vector<8x128xf32>
    %c7 = arith.constant 7 : index
    %c0_59 = arith.constant 0 : index
    %c0_60 = arith.constant 0 : index
    %69 = vector.load %arg5[%c7, %c0_59, %c0_60] : memref<9x8x8xbf16, #tpu.memory_space<vmem>>, vector<1x8x8xbf16>
    %70 = vector.shape_cast %69 : vector<1x8x8xbf16> to vector<8x8xbf16>
    %cst_61 = arith.constant dense<0.000000e+00> : vector<8x128xf32>
    %71 = tpu.matmul %70, %11, %cst_61 {dimension_numbers = #tpu.dot_dimension_numbers<[1], [0], [0], [1], [0, 0, 1, 1], [], []>} : vector<8x8xbf16>, vector<8x128xbf16>, vector<8x128xf32> -> vector<8x128xf32>
    %72 = arith.truncf %71 : vector<8x128xf32> to vector<8x128xbf16>
    %c7_62 = arith.constant 7 : index
    %c0_63 = arith.constant 0 : index
    %c0_64 = arith.constant 0 : index
    %73 = vector.load %arg6[%c7_62, %c0_63, %c0_64] : memref<9x128x128xbf16, #tpu.memory_space<vmem>>, vector<1x128x128xbf16>
    %74 = vector.shape_cast %73 : vector<1x128x128xbf16> to vector<128x128xbf16>
    %cst_65 = arith.constant dense<0.000000e+00> : vector<8x128xf32>
    %75 = tpu.matmul %72, %74, %cst_65 {dimension_numbers = #tpu.dot_dimension_numbers<[1], [0], [0], [1], [0, 0, 1, 1], [], []>} : vector<8x128xbf16>, vector<128x128xbf16>, vector<8x128xf32> -> vector<8x128xf32>
    %76 = arith.addf %68, %75 : vector<8x128xf32>
    %c8 = arith.constant 8 : index
    %c0_66 = arith.constant 0 : index
    %c0_67 = arith.constant 0 : index
    %77 = vector.load %arg5[%c8, %c0_66, %c0_67] : memref<9x8x8xbf16, #tpu.memory_space<vmem>>, vector<1x8x8xbf16>
    %78 = vector.shape_cast %77 : vector<1x8x8xbf16> to vector<8x8xbf16>
    %cst_68 = arith.constant dense<0.000000e+00> : vector<8x128xf32>
    %79 = tpu.matmul %78, %11, %cst_68 {dimension_numbers = #tpu.dot_dimension_numbers<[1], [0], [0], [1], [0, 0, 1, 1], [], []>} : vector<8x8xbf16>, vector<8x128xbf16>, vector<8x128xf32> -> vector<8x128xf32>
    %80 = arith.truncf %79 : vector<8x128xf32> to vector<8x128xbf16>
    %c8_69 = arith.constant 8 : index
    %c0_70 = arith.constant 0 : index
    %c0_71 = arith.constant 0 : index
    %81 = vector.load %arg6[%c8_69, %c0_70, %c0_71] : memref<9x128x128xbf16, #tpu.memory_space<vmem>>, vector<1x128x128xbf16>
    %82 = vector.shape_cast %81 : vector<1x128x128xbf16> to vector<128x128xbf16>
    %cst_72 = arith.constant dense<0.000000e+00> : vector<8x128xf32>
    %83 = tpu.matmul %80, %82, %cst_72 {dimension_numbers = #tpu.dot_dimension_numbers<[1], [0], [0], [1], [0, 0, 1, 1], [], []>} : vector<8x128xbf16>, vector<128x128xbf16>, vector<8x128xf32> -> vector<8x128xf32>
    %84 = arith.addf %76, %83 : vector<8x128xf32>
    %c0_73 = arith.constant 0 : index
    %c0_74 = arith.constant 0 : index
    %85 = vector.load %arg7[%c0_73, %c0_74] : memref<8x256xbf16, #tpu.memory_space<vmem>>, vector<8x256xbf16>
    %c0_75 = arith.constant 0 : index
    %c0_76 = arith.constant 0 : index
    %86 = vector.load %arg8[%c0_75, %c0_76] : memref<256x128xbf16, #tpu.memory_space<vmem>>, vector<256x128xbf16>
    %cst_77 = arith.constant dense<0.000000e+00> : vector<8x128xf32>
    %87 = tpu.matmul %85, %86, %cst_77 {dimension_numbers = #tpu.dot_dimension_numbers<[1], [0], [0], [1], [0, 0, 1, 1], [], []>} : vector<8x256xbf16>, vector<256x128xbf16>, vector<8x128xf32> -> vector<8x128xf32>
    %c0_78 = arith.constant 0 : index
    %c0_79 = arith.constant 0 : index
    %88 = vector.load %arg9[%c0_78, %c0_79] : memref<1x128xf32, #tpu.memory_space<vmem>>, vector<1x128xf32>
    %89 = vector.broadcast %88 : vector<1x128xf32> to vector<8x128xf32>
    %90 = arith.mulf %87, %89 : vector<8x128xf32>
    %c0_80 = arith.constant 0 : index
    %c0_81 = arith.constant 0 : index
    %91 = vector.load %arg10[%c0_80, %c0_81] : memref<1x128xf32, #tpu.memory_space<vmem>>, vector<1x128xf32>
    %92 = vector.broadcast %91 : vector<1x128xf32> to vector<8x128xf32>
    %93 = arith.addf %90, %92 : vector<8x128xf32>
    %94 = arith.addf %84, %93 : vector<8x128xf32>
    %95 = arith.truncf %94 : vector<8x128xf32> to vector<8x128xbf16>
    %c0_82 = arith.constant 0 : index
    %c0_83 = arith.constant 0 : index
    %96 = vector.load %arg11[%c0_82, %c0_83] : memref<8x128xbf16, #tpu.memory_space<vmem>>, vector<8x128xbf16>
    tpu.vector_store %arg11[%c0_82, %c0_83], %95 {strides = array<i32>} : memref<8x128xbf16, #tpu.memory_space<vmem>>, vector<8x128xbf16>,
    return
  }
  func.func @transform_0(%arg0: i32) -> (i32, i32) {
    %c0_i32 = arith.constant 0 : i32
    %c0_i32_0 = arith.constant 0 : i32
    %c0_i32_1 = arith.constant 0 : i32
    return %c0_i32, %c0_i32_0 : i32, i32
  }
  func.func @transform_1(%arg0: i32) -> (i32, i32) {
    %c0_i32 = arith.constant 0 : i32
    %c0_i32_0 = arith.constant 0 : i32
    %c0_i32_1 = arith.constant 0 : i32
    return %c0_i32, %c0_i32_0 : i32, i32
  }
  func.func @transform_2(%arg0: i32) -> (i32, i32) {
    %c0_i32 = arith.constant 0 : i32
    %c0_i32_0 = arith.constant 0 : i32
    %c0_i32_1 = arith.constant 0 : i32
    return %c0_i32, %c0_i32_0 : i32, i32
  }
  func.func @transform_3(%arg0: i32) -> (i32, i32) {
    %c0_i32 = arith.constant 0 : i32
    %c0_i32_0 = arith.constant 0 : i32
    %c0_i32_1 = arith.constant 0 : i32
    return %c0_i32, %c0_i32_0 : i32, i32
  }
  func.func @transform_4(%arg0: i32) -> (i32, i32, i32) {
    %c0_i32 = arith.constant 0 : i32
    %c0_i32_0 = arith.constant 0 : i32
    %c0_i32_1 = arith.constant 0 : i32
    %c0_i32_2 = arith.constant 0 : i32
    return %c0_i32, %c0_i32_0, %c0_i32_1 : i32, i32, i32
  }
  func.func @transform_5(%arg0: i32) -> (i32, i32, i32) {
    %c0_i32 = arith.constant 0 : i32
    %c0_i32_0 = arith.constant 0 : i32
    %c0_i32_1 = arith.constant 0 : i32
    %c0_i32_2 = arith.constant 0 : i32
    return %c0_i32, %c0_i32_0, %c0_i32_1 : i32, i32, i32
  }
  func.func @transform_6(%arg0: i32) -> (i32, i32) {
    %c0_i32 = arith.constant 0 : i32
    %c0_i32_0 = arith.constant 0 : i32
    %c0_i32_1 = arith.constant 0 : i32
    return %c0_i32, %c0_i32_0 : i32, i32
  }
  func.func @transform_7(%arg0: i32) -> (i32, i32) {
    %c0_i32 = arith.constant 0 : i32
    %c0_i32_0 = arith.constant 0 : i32
    %c0_i32_1 = arith.constant 0 : i32
    return %c0_i32, %c0_i32_0 : i32, i32
  }
  func.func @transform_8(%arg0: i32) -> (i32, i32) {
    %c0_i32 = arith.constant 0 : i32
    %c0_i32_0 = arith.constant 0 : i32
    %c0_i32_1 = arith.constant 0 : i32
    return %c0_i32, %c0_i32_0 : i32, i32
  }
  func.func @transform_9(%arg0: i32) -> (i32, i32) {
    %c0_i32 = arith.constant 0 : i32
    %c0_i32_0 = arith.constant 0 : i32
    %c0_i32_1 = arith.constant 0 : i32
    return %c0_i32, %c0_i32_0 : i32, i32
  }
  func.func @transform_10(%arg0: i32) -> (i32, i32) {
    %c0_i32 = arith.constant 0 : i32
    %c0_i32_0 = arith.constant 0 : i32
    %c0_i32_1 = arith.constant 0 : i32
    return %c0_i32, %c0_i32_0 : i32, i32
  }
}

module attributes {stable_mosaic.version = 11 : i64} {
  func.func @kernel(%arg0: i32, %arg1: memref<8x256xbf16, #tpu.memory_space<vmem>>, %arg2: memref<256x128xbf16, #tpu.memory_space<vmem>>, %arg3: memref<1x128xf32, #tpu.memory_space<vmem>>, %arg4: memref<1x128xf32, #tpu.memory_space<vmem>>, %arg5: memref<9x8x8xbf16, #tpu.memory_space<vmem>>, %arg6: memref<9x128x128xbf16, #tpu.memory_space<vmem>>, %arg7: memref<8x256xbf16, #tpu.memory_space<vmem>>, %arg8: memref<256x128xbf16, #tpu.memory_space<vmem>>, %arg9: memref<1x128xf32, #tpu.memory_space<vmem>>, %arg10: memref<1x128xf32, #tpu.memory_space<vmem>>, %arg11: memref<8x8xf32, #tpu.memory_space<vmem>>, %arg12: memref<1x128xf32, #tpu.memory_space<vmem>>, %arg13: memref<1x128xf32, #tpu.memory_space<vmem>>, %arg14: memref<8x128xf32, #tpu.memory_space<vmem>>) attributes {dimension_semantics = [#tpu.dimension_semantics<arbitrary>], iteration_bounds = array<i64: 1>, scalar_prefetch = 0 : i64, scratch_operands = 0 : i64, tpu.core_type = #tpu.core_type<tc>, window_params = [{pipeline_mode = #tpu.pipeline_mode<synchronous>, transform_indices = @transform_0, window_bounds = array<i64: 8, 256>}, {pipeline_mode = #tpu.pipeline_mode<synchronous>, transform_indices = @transform_1, window_bounds = array<i64: 256, 128>}, {pipeline_mode = #tpu.pipeline_mode<synchronous>, transform_indices = @transform_2, window_bounds = array<i64: 1, 128>}, {pipeline_mode = #tpu.pipeline_mode<synchronous>, transform_indices = @transform_3, window_bounds = array<i64: 1, 128>}, {pipeline_mode = #tpu.pipeline_mode<synchronous>, transform_indices = @transform_4, window_bounds = array<i64: 9, 8, 8>}, {pipeline_mode = #tpu.pipeline_mode<synchronous>, transform_indices = @transform_5, window_bounds = array<i64: 9, 128, 128>}, {pipeline_mode = #tpu.pipeline_mode<synchronous>, transform_indices = @transform_6, window_bounds = array<i64: 8, 256>}, {pipeline_mode = #tpu.pipeline_mode<synchronous>, transform_indices = @transform_7, window_bounds = array<i64: 256, 128>}, {pipeline_mode = #tpu.pipeline_mode<synchronous>, transform_indices = @transform_8, window_bounds = array<i64: 1, 128>}, {pipeline_mode = #tpu.pipeline_mode<synchronous>, transform_indices = @transform_9, window_bounds = array<i64: 1, 128>}, {pipeline_mode = #tpu.pipeline_mode<synchronous>, transform_indices = @transform_10, window_bounds = array<i64: 8, 8>}, {pipeline_mode = #tpu.pipeline_mode<synchronous>, transform_indices = @transform_11, window_bounds = array<i64: 1, 128>}, {pipeline_mode = #tpu.pipeline_mode<synchronous>, transform_indices = @transform_12, window_bounds = array<i64: 1, 128>}, {pipeline_mode = #tpu.pipeline_mode<synchronous>, transform_indices = @transform_13, window_bounds = array<i64: 8, 128>}]} {
    %c0 = arith.constant 0 : index
    %c0_0 = arith.constant 0 : index
    %0 = vector.load %arg1[%c0, %c0_0] : memref<8x256xbf16, #tpu.memory_space<vmem>>, vector<8x256xbf16>
    %c0_1 = arith.constant 0 : index
    %c0_2 = arith.constant 0 : index
    %1 = vector.load %arg2[%c0_1, %c0_2] : memref<256x128xbf16, #tpu.memory_space<vmem>>, vector<256x128xbf16>
    %cst = arith.constant dense<0.000000e+00> : vector<8x128xf32>
    %2 = tpu.matmul %0, %1, %cst {dimension_numbers = #tpu.dot_dimension_numbers<[1], [0], [0], [1], [0, 0, 1, 1], [], []>} : vector<8x256xbf16>, vector<256x128xbf16>, vector<8x128xf32> -> vector<8x128xf32>
    %c0_3 = arith.constant 0 : index
    %c0_4 = arith.constant 0 : index
    %3 = vector.load %arg3[%c0_3, %c0_4] : memref<1x128xf32, #tpu.memory_space<vmem>>, vector<1x128xf32>
    %4 = vector.broadcast %3 : vector<1x128xf32> to vector<8x128xf32>
    %5 = arith.mulf %2, %4 : vector<8x128xf32>
    %c0_5 = arith.constant 0 : index
    %c0_6 = arith.constant 0 : index
    %6 = vector.load %arg4[%c0_5, %c0_6] : memref<1x128xf32, #tpu.memory_space<vmem>>, vector<1x128xf32>
    %7 = vector.broadcast %6 : vector<1x128xf32> to vector<8x128xf32>
    %8 = arith.addf %5, %7 : vector<8x128xf32>
    %cst_7 = arith.constant 0.000000e+00 : f32
    %9 = vector.broadcast %cst_7 : f32 to vector<8x128xf32>
    %10 = arith.maximumf %8, %9 : vector<8x128xf32>
    %11 = arith.truncf %10 : vector<8x128xf32> to vector<8x128xbf16>
    %cst_8 = arith.constant 0.000000e+00 : f32
    %12 = vector.broadcast %cst_8 : f32 to vector<8x128xf32>
    %c0_9 = arith.constant 0 : index
    %c0_10 = arith.constant 0 : index
    %c0_11 = arith.constant 0 : index
    %13 = vector.load %arg5[%c0_9, %c0_10, %c0_11] : memref<9x8x8xbf16, #tpu.memory_space<vmem>>, vector<1x8x8xbf16>
    %14 = vector.shape_cast %13 : vector<1x8x8xbf16> to vector<8x8xbf16>
    %cst_12 = arith.constant dense<0.000000e+00> : vector<8x128xf32>
    %15 = tpu.matmul %14, %11, %cst_12 {dimension_numbers = #tpu.dot_dimension_numbers<[1], [0], [0], [1], [0, 0, 1, 1], [], []>} : vector<8x8xbf16>, vector<8x128xbf16>, vector<8x128xf32> -> vector<8x128xf32>
    %16 = arith.truncf %15 : vector<8x128xf32> to vector<8x128xbf16>
    %c0_13 = arith.constant 0 : index
    %c0_14 = arith.constant 0 : index
    %c0_15 = arith.constant 0 : index
    %17 = vector.load %arg6[%c0_13, %c0_14, %c0_15] : memref<9x128x128xbf16, #tpu.memory_space<vmem>>, vector<1x128x128xbf16>
    %18 = vector.shape_cast %17 : vector<1x128x128xbf16> to vector<128x128xbf16>
    %cst_16 = arith.constant dense<0.000000e+00> : vector<8x128xf32>
    %19 = tpu.matmul %16, %18, %cst_16 {dimension_numbers = #tpu.dot_dimension_numbers<[1], [0], [0], [1], [0, 0, 1, 1], [], []>} : vector<8x128xbf16>, vector<128x128xbf16>, vector<8x128xf32> -> vector<8x128xf32>
    %20 = arith.addf %12, %19 : vector<8x128xf32>
    %c1 = arith.constant 1 : index
    %c0_17 = arith.constant 0 : index
    %c0_18 = arith.constant 0 : index
    %21 = vector.load %arg5[%c1, %c0_17, %c0_18] : memref<9x8x8xbf16, #tpu.memory_space<vmem>>, vector<1x8x8xbf16>
    %22 = vector.shape_cast %21 : vector<1x8x8xbf16> to vector<8x8xbf16>
    %cst_19 = arith.constant dense<0.000000e+00> : vector<8x128xf32>
    %23 = tpu.matmul %22, %11, %cst_19 {dimension_numbers = #tpu.dot_dimension_numbers<[1], [0], [0], [1], [0, 0, 1, 1], [], []>} : vector<8x8xbf16>, vector<8x128xbf16>, vector<8x128xf32> -> vector<8x128xf32>
    %24 = arith.truncf %23 : vector<8x128xf32> to vector<8x128xbf16>
    %c1_20 = arith.constant 1 : index
    %c0_21 = arith.constant 0 : index
    %c0_22 = arith.constant 0 : index
    %25 = vector.load %arg6[%c1_20, %c0_21, %c0_22] : memref<9x128x128xbf16, #tpu.memory_space<vmem>>, vector<1x128x128xbf16>
    %26 = vector.shape_cast %25 : vector<1x128x128xbf16> to vector<128x128xbf16>
    %cst_23 = arith.constant dense<0.000000e+00> : vector<8x128xf32>
    %27 = tpu.matmul %24, %26, %cst_23 {dimension_numbers = #tpu.dot_dimension_numbers<[1], [0], [0], [1], [0, 0, 1, 1], [], []>} : vector<8x128xbf16>, vector<128x128xbf16>, vector<8x128xf32> -> vector<8x128xf32>
    %28 = arith.addf %20, %27 : vector<8x128xf32>
    %c2 = arith.constant 2 : index
    %c0_24 = arith.constant 0 : index
    %c0_25 = arith.constant 0 : index
    %29 = vector.load %arg5[%c2, %c0_24, %c0_25] : memref<9x8x8xbf16, #tpu.memory_space<vmem>>, vector<1x8x8xbf16>
    %30 = vector.shape_cast %29 : vector<1x8x8xbf16> to vector<8x8xbf16>
    %cst_26 = arith.constant dense<0.000000e+00> : vector<8x128xf32>
    %31 = tpu.matmul %30, %11, %cst_26 {dimension_numbers = #tpu.dot_dimension_numbers<[1], [0], [0], [1], [0, 0, 1, 1], [], []>} : vector<8x8xbf16>, vector<8x128xbf16>, vector<8x128xf32> -> vector<8x128xf32>
    %32 = arith.truncf %31 : vector<8x128xf32> to vector<8x128xbf16>
    %c2_27 = arith.constant 2 : index
    %c0_28 = arith.constant 0 : index
    %c0_29 = arith.constant 0 : index
    %33 = vector.load %arg6[%c2_27, %c0_28, %c0_29] : memref<9x128x128xbf16, #tpu.memory_space<vmem>>, vector<1x128x128xbf16>
    %34 = vector.shape_cast %33 : vector<1x128x128xbf16> to vector<128x128xbf16>
    %cst_30 = arith.constant dense<0.000000e+00> : vector<8x128xf32>
    %35 = tpu.matmul %32, %34, %cst_30 {dimension_numbers = #tpu.dot_dimension_numbers<[1], [0], [0], [1], [0, 0, 1, 1], [], []>} : vector<8x128xbf16>, vector<128x128xbf16>, vector<8x128xf32> -> vector<8x128xf32>
    %36 = arith.addf %28, %35 : vector<8x128xf32>
    %c3 = arith.constant 3 : index
    %c0_31 = arith.constant 0 : index
    %c0_32 = arith.constant 0 : index
    %37 = vector.load %arg5[%c3, %c0_31, %c0_32] : memref<9x8x8xbf16, #tpu.memory_space<vmem>>, vector<1x8x8xbf16>
    %38 = vector.shape_cast %37 : vector<1x8x8xbf16> to vector<8x8xbf16>
    %cst_33 = arith.constant dense<0.000000e+00> : vector<8x128xf32>
    %39 = tpu.matmul %38, %11, %cst_33 {dimension_numbers = #tpu.dot_dimension_numbers<[1], [0], [0], [1], [0, 0, 1, 1], [], []>} : vector<8x8xbf16>, vector<8x128xbf16>, vector<8x128xf32> -> vector<8x128xf32>
    %40 = arith.truncf %39 : vector<8x128xf32> to vector<8x128xbf16>
    %c3_34 = arith.constant 3 : index
    %c0_35 = arith.constant 0 : index
    %c0_36 = arith.constant 0 : index
    %41 = vector.load %arg6[%c3_34, %c0_35, %c0_36] : memref<9x128x128xbf16, #tpu.memory_space<vmem>>, vector<1x128x128xbf16>
    %42 = vector.shape_cast %41 : vector<1x128x128xbf16> to vector<128x128xbf16>
    %cst_37 = arith.constant dense<0.000000e+00> : vector<8x128xf32>
    %43 = tpu.matmul %40, %42, %cst_37 {dimension_numbers = #tpu.dot_dimension_numbers<[1], [0], [0], [1], [0, 0, 1, 1], [], []>} : vector<8x128xbf16>, vector<128x128xbf16>, vector<8x128xf32> -> vector<8x128xf32>
    %44 = arith.addf %36, %43 : vector<8x128xf32>
    %c4 = arith.constant 4 : index
    %c0_38 = arith.constant 0 : index
    %c0_39 = arith.constant 0 : index
    %45 = vector.load %arg5[%c4, %c0_38, %c0_39] : memref<9x8x8xbf16, #tpu.memory_space<vmem>>, vector<1x8x8xbf16>
    %46 = vector.shape_cast %45 : vector<1x8x8xbf16> to vector<8x8xbf16>
    %cst_40 = arith.constant dense<0.000000e+00> : vector<8x128xf32>
    %47 = tpu.matmul %46, %11, %cst_40 {dimension_numbers = #tpu.dot_dimension_numbers<[1], [0], [0], [1], [0, 0, 1, 1], [], []>} : vector<8x8xbf16>, vector<8x128xbf16>, vector<8x128xf32> -> vector<8x128xf32>
    %48 = arith.truncf %47 : vector<8x128xf32> to vector<8x128xbf16>
    %c4_41 = arith.constant 4 : index
    %c0_42 = arith.constant 0 : index
    %c0_43 = arith.constant 0 : index
    %49 = vector.load %arg6[%c4_41, %c0_42, %c0_43] : memref<9x128x128xbf16, #tpu.memory_space<vmem>>, vector<1x128x128xbf16>
    %50 = vector.shape_cast %49 : vector<1x128x128xbf16> to vector<128x128xbf16>
    %cst_44 = arith.constant dense<0.000000e+00> : vector<8x128xf32>
    %51 = tpu.matmul %48, %50, %cst_44 {dimension_numbers = #tpu.dot_dimension_numbers<[1], [0], [0], [1], [0, 0, 1, 1], [], []>} : vector<8x128xbf16>, vector<128x128xbf16>, vector<8x128xf32> -> vector<8x128xf32>
    %52 = arith.addf %44, %51 : vector<8x128xf32>
    %c5 = arith.constant 5 : index
    %c0_45 = arith.constant 0 : index
    %c0_46 = arith.constant 0 : index
    %53 = vector.load %arg5[%c5, %c0_45, %c0_46] : memref<9x8x8xbf16, #tpu.memory_space<vmem>>, vector<1x8x8xbf16>
    %54 = vector.shape_cast %53 : vector<1x8x8xbf16> to vector<8x8xbf16>
    %cst_47 = arith.constant dense<0.000000e+00> : vector<8x128xf32>
    %55 = tpu.matmul %54, %11, %cst_47 {dimension_numbers = #tpu.dot_dimension_numbers<[1], [0], [0], [1], [0, 0, 1, 1], [], []>} : vector<8x8xbf16>, vector<8x128xbf16>, vector<8x128xf32> -> vector<8x128xf32>
    %56 = arith.truncf %55 : vector<8x128xf32> to vector<8x128xbf16>
    %c5_48 = arith.constant 5 : index
    %c0_49 = arith.constant 0 : index
    %c0_50 = arith.constant 0 : index
    %57 = vector.load %arg6[%c5_48, %c0_49, %c0_50] : memref<9x128x128xbf16, #tpu.memory_space<vmem>>, vector<1x128x128xbf16>
    %58 = vector.shape_cast %57 : vector<1x128x128xbf16> to vector<128x128xbf16>
    %cst_51 = arith.constant dense<0.000000e+00> : vector<8x128xf32>
    %59 = tpu.matmul %56, %58, %cst_51 {dimension_numbers = #tpu.dot_dimension_numbers<[1], [0], [0], [1], [0, 0, 1, 1], [], []>} : vector<8x128xbf16>, vector<128x128xbf16>, vector<8x128xf32> -> vector<8x128xf32>
    %60 = arith.addf %52, %59 : vector<8x128xf32>
    %c6 = arith.constant 6 : index
    %c0_52 = arith.constant 0 : index
    %c0_53 = arith.constant 0 : index
    %61 = vector.load %arg5[%c6, %c0_52, %c0_53] : memref<9x8x8xbf16, #tpu.memory_space<vmem>>, vector<1x8x8xbf16>
    %62 = vector.shape_cast %61 : vector<1x8x8xbf16> to vector<8x8xbf16>
    %cst_54 = arith.constant dense<0.000000e+00> : vector<8x128xf32>
    %63 = tpu.matmul %62, %11, %cst_54 {dimension_numbers = #tpu.dot_dimension_numbers<[1], [0], [0], [1], [0, 0, 1, 1], [], []>} : vector<8x8xbf16>, vector<8x128xbf16>, vector<8x128xf32> -> vector<8x128xf32>
    %64 = arith.truncf %63 : vector<8x128xf32> to vector<8x128xbf16>
    %c6_55 = arith.constant 6 : index
    %c0_56 = arith.constant 0 : index
    %c0_57 = arith.constant 0 : index
    %65 = vector.load %arg6[%c6_55, %c0_56, %c0_57] : memref<9x128x128xbf16, #tpu.memory_space<vmem>>, vector<1x128x128xbf16>
    %66 = vector.shape_cast %65 : vector<1x128x128xbf16> to vector<128x128xbf16>
    %cst_58 = arith.constant dense<0.000000e+00> : vector<8x128xf32>
    %67 = tpu.matmul %64, %66, %cst_58 {dimension_numbers = #tpu.dot_dimension_numbers<[1], [0], [0], [1], [0, 0, 1, 1], [], []>} : vector<8x128xbf16>, vector<128x128xbf16>, vector<8x128xf32> -> vector<8x128xf32>
    %68 = arith.addf %60, %67 : vector<8x128xf32>
    %c7 = arith.constant 7 : index
    %c0_59 = arith.constant 0 : index
    %c0_60 = arith.constant 0 : index
    %69 = vector.load %arg5[%c7, %c0_59, %c0_60] : memref<9x8x8xbf16, #tpu.memory_space<vmem>>, vector<1x8x8xbf16>
    %70 = vector.shape_cast %69 : vector<1x8x8xbf16> to vector<8x8xbf16>
    %cst_61 = arith.constant dense<0.000000e+00> : vector<8x128xf32>
    %71 = tpu.matmul %70, %11, %cst_61 {dimension_numbers = #tpu.dot_dimension_numbers<[1], [0], [0], [1], [0, 0, 1, 1], [], []>} : vector<8x8xbf16>, vector<8x128xbf16>, vector<8x128xf32> -> vector<8x128xf32>
    %72 = arith.truncf %71 : vector<8x128xf32> to vector<8x128xbf16>
    %c7_62 = arith.constant 7 : index
    %c0_63 = arith.constant 0 : index
    %c0_64 = arith.constant 0 : index
    %73 = vector.load %arg6[%c7_62, %c0_63, %c0_64] : memref<9x128x128xbf16, #tpu.memory_space<vmem>>, vector<1x128x128xbf16>
    %74 = vector.shape_cast %73 : vector<1x128x128xbf16> to vector<128x128xbf16>
    %cst_65 = arith.constant dense<0.000000e+00> : vector<8x128xf32>
    %75 = tpu.matmul %72, %74, %cst_65 {dimension_numbers = #tpu.dot_dimension_numbers<[1], [0], [0], [1], [0, 0, 1, 1], [], []>} : vector<8x128xbf16>, vector<128x128xbf16>, vector<8x128xf32> -> vector<8x128xf32>
    %76 = arith.addf %68, %75 : vector<8x128xf32>
    %c8 = arith.constant 8 : index
    %c0_66 = arith.constant 0 : index
    %c0_67 = arith.constant 0 : index
    %77 = vector.load %arg5[%c8, %c0_66, %c0_67] : memref<9x8x8xbf16, #tpu.memory_space<vmem>>, vector<1x8x8xbf16>
    %78 = vector.shape_cast %77 : vector<1x8x8xbf16> to vector<8x8xbf16>
    %cst_68 = arith.constant dense<0.000000e+00> : vector<8x128xf32>
    %79 = tpu.matmul %78, %11, %cst_68 {dimension_numbers = #tpu.dot_dimension_numbers<[1], [0], [0], [1], [0, 0, 1, 1], [], []>} : vector<8x8xbf16>, vector<8x128xbf16>, vector<8x128xf32> -> vector<8x128xf32>
    %80 = arith.truncf %79 : vector<8x128xf32> to vector<8x128xbf16>
    %c8_69 = arith.constant 8 : index
    %c0_70 = arith.constant 0 : index
    %c0_71 = arith.constant 0 : index
    %81 = vector.load %arg6[%c8_69, %c0_70, %c0_71] : memref<9x128x128xbf16, #tpu.memory_space<vmem>>, vector<1x128x128xbf16>
    %82 = vector.shape_cast %81 : vector<1x128x128xbf16> to vector<128x128xbf16>
    %cst_72 = arith.constant dense<0.000000e+00> : vector<8x128xf32>
    %83 = tpu.matmul %80, %82, %cst_72 {dimension_numbers = #tpu.dot_dimension_numbers<[1], [0], [0], [1], [0, 0, 1, 1], [], []>} : vector<8x128xbf16>, vector<128x128xbf16>, vector<8x128xf32> -> vector<8x128xf32>
    %84 = arith.addf %76, %83 : vector<8x128xf32>
    %c0_73 = arith.constant 0 : index
    %c0_74 = arith.constant 0 : index
    %85 = vector.load %arg7[%c0_73, %c0_74] : memref<8x256xbf16, #tpu.memory_space<vmem>>, vector<8x256xbf16>
    %c0_75 = arith.constant 0 : index
    %c0_76 = arith.constant 0 : index
    %86 = vector.load %arg8[%c0_75, %c0_76] : memref<256x128xbf16, #tpu.memory_space<vmem>>, vector<256x128xbf16>
    %cst_77 = arith.constant dense<0.000000e+00> : vector<8x128xf32>
    %87 = tpu.matmul %85, %86, %cst_77 {dimension_numbers = #tpu.dot_dimension_numbers<[1], [0], [0], [1], [0, 0, 1, 1], [], []>} : vector<8x256xbf16>, vector<256x128xbf16>, vector<8x128xf32> -> vector<8x128xf32>
    %c0_78 = arith.constant 0 : index
    %c0_79 = arith.constant 0 : index
    %88 = vector.load %arg9[%c0_78, %c0_79] : memref<1x128xf32, #tpu.memory_space<vmem>>, vector<1x128xf32>
    %89 = vector.broadcast %88 : vector<1x128xf32> to vector<8x128xf32>
    %90 = arith.mulf %87, %89 : vector<8x128xf32>
    %c0_80 = arith.constant 0 : index
    %c0_81 = arith.constant 0 : index
    %91 = vector.load %arg10[%c0_80, %c0_81] : memref<1x128xf32, #tpu.memory_space<vmem>>, vector<1x128xf32>
    %92 = vector.broadcast %91 : vector<1x128xf32> to vector<8x128xf32>
    %93 = arith.addf %90, %92 : vector<8x128xf32>
    %94 = arith.addf %84, %93 : vector<8x128xf32>
    %c0_82 = arith.constant 0 : index
    %c0_83 = arith.constant 0 : index
    %95 = vector.load %arg11[%c0_82, %c0_83] : memref<8x8xf32, #tpu.memory_space<vmem>>, vector<8x8xf32>
    %cst_84 = arith.constant dense<0.000000e+00> : vector<8x128xf32>
    %96 = tpu.matmul %95, %94, %cst_84 {dimension_numbers = #tpu.dot_dimension_numbers<[1], [0], [0], [1], [0, 0, 1, 1], [], []>} : vector<8x8xf32>, vector<8x128xf32>, vector<8x128xf32> -> vector<8x128xf32>
    %c0_85 = arith.constant 0 : index
    %c0_86 = arith.constant 0 : index
    %97 = vector.load %arg12[%c0_85, %c0_86] : memref<1x128xf32, #tpu.memory_space<vmem>>, vector<1x128xf32>
    %98 = vector.broadcast %97 : vector<1x128xf32> to vector<8x128xf32>
    %99 = arith.mulf %96, %98 : vector<8x128xf32>
    %c0_87 = arith.constant 0 : index
    %c0_88 = arith.constant 0 : index
    %100 = vector.load %arg13[%c0_87, %c0_88] : memref<1x128xf32, #tpu.memory_space<vmem>>, vector<1x128xf32>
    %101 = vector.broadcast %100 : vector<1x128xf32> to vector<8x128xf32>
    %102 = arith.addf %99, %101 : vector<8x128xf32>
    %103 = arith.mulf %102, %102 : vector<8x128xf32>
    %cst_89 = arith.constant dense<0.000000e+00> : vector<8xf32>
    %104 = vector.multi_reduction <add>, %103, %cst_89 [1] : vector<8x128xf32> to vector<8xf32>
    %105 = vector.shape_cast %104 : vector<8xf32> to vector<8x1xf32>
    %cst_90 = arith.constant 1.000000e-10 : f32
    %106 = vector.broadcast %cst_90 : f32 to vector<8x1xf32>
    %107 = arith.addf %105, %106 : vector<8x1xf32>
    %108 = math.rsqrt %107 : vector<8x1xf32>
    %109 = vector.broadcast %108 : vector<8x1xf32> to vector<8x128xf32>
    %110 = arith.mulf %102, %109 : vector<8x128xf32>
    %c0_91 = arith.constant 0 : index
    %c0_92 = arith.constant 0 : index
    %111 = vector.load %arg14[%c0_91, %c0_92] : memref<8x128xf32, #tpu.memory_space<vmem>>, vector<8x128xf32>
    tpu.vector_store %arg14[%c0_91, %c0_92], %110 {strides = array<i32>} : memref<8x128xf32, #tpu.memory_space<vmem>>, vector<8x128xf32>,
    return
  }
  func.func @transform_0(%arg0: i32) -> (i32, i32) {
    %c0_i32 = arith.constant 0 : i32
    %c0_i32_0 = arith.constant 0 : i32
    %c0_i32_1 = arith.constant 0 : i32
    return %c0_i32, %c0_i32_0 : i32, i32
  }
  func.func @transform_1(%arg0: i32) -> (i32, i32) {
    %c0_i32 = arith.constant 0 : i32
    %c0_i32_0 = arith.constant 0 : i32
    %c0_i32_1 = arith.constant 0 : i32
    return %c0_i32, %c0_i32_0 : i32, i32
  }
  func.func @transform_2(%arg0: i32) -> (i32, i32) {
    %c0_i32 = arith.constant 0 : i32
    %c0_i32_0 = arith.constant 0 : i32
    %c0_i32_1 = arith.constant 0 : i32
    return %c0_i32, %c0_i32_0 : i32, i32
  }
  func.func @transform_3(%arg0: i32) -> (i32, i32) {
    %c0_i32 = arith.constant 0 : i32
    %c0_i32_0 = arith.constant 0 : i32
    %c0_i32_1 = arith.constant 0 : i32
    return %c0_i32, %c0_i32_0 : i32, i32
  }
  func.func @transform_4(%arg0: i32) -> (i32, i32, i32) {
    %c0_i32 = arith.constant 0 : i32
    %c0_i32_0 = arith.constant 0 : i32
    %c0_i32_1 = arith.constant 0 : i32
    %c0_i32_2 = arith.constant 0 : i32
    return %c0_i32, %c0_i32_0, %c0_i32_1 : i32, i32, i32
  }
  func.func @transform_5(%arg0: i32) -> (i32, i32, i32) {
    %c0_i32 = arith.constant 0 : i32
    %c0_i32_0 = arith.constant 0 : i32
    %c0_i32_1 = arith.constant 0 : i32
    %c0_i32_2 = arith.constant 0 : i32
    return %c0_i32, %c0_i32_0, %c0_i32_1 : i32, i32, i32
  }
  func.func @transform_6(%arg0: i32) -> (i32, i32) {
    %c0_i32 = arith.constant 0 : i32
    %c0_i32_0 = arith.constant 0 : i32
    %c0_i32_1 = arith.constant 0 : i32
    return %c0_i32, %c0_i32_0 : i32, i32
  }
  func.func @transform_7(%arg0: i32) -> (i32, i32) {
    %c0_i32 = arith.constant 0 : i32
    %c0_i32_0 = arith.constant 0 : i32
    %c0_i32_1 = arith.constant 0 : i32
    return %c0_i32, %c0_i32_0 : i32, i32
  }
  func.func @transform_8(%arg0: i32) -> (i32, i32) {
    %c0_i32 = arith.constant 0 : i32
    %c0_i32_0 = arith.constant 0 : i32
    %c0_i32_1 = arith.constant 0 : i32
    return %c0_i32, %c0_i32_0 : i32, i32
  }
  func.func @transform_9(%arg0: i32) -> (i32, i32) {
    %c0_i32 = arith.constant 0 : i32
    %c0_i32_0 = arith.constant 0 : i32
    %c0_i32_1 = arith.constant 0 : i32
    return %c0_i32, %c0_i32_0 : i32, i32
  }
  func.func @transform_10(%arg0: i32) -> (i32, i32) {
    %c0_i32 = arith.constant 0 : i32
    %c0_i32_0 = arith.constant 0 : i32
    %c0_i32_1 = arith.constant 0 : i32
    return %c0_i32, %c0_i32_0 : i32, i32
  }
  func.func @transform_11(%arg0: i32) -> (i32, i32) {
    %c0_i32 = arith.constant 0 : i32
    %c0_i32_0 = arith.constant 0 : i32
    %c0_i32_1 = arith.constant 0 : i32
    return %c0_i32, %c0_i32_0 : i32, i32
  }
  func.func @transform_12(%arg0: i32) -> (i32, i32) {
    %c0_i32 = arith.constant 0 : i32
    %c0_i32_0 = arith.constant 0 : i32
    %c0_i32_1 = arith.constant 0 : i32
    return %c0_i32, %c0_i32_0 : i32, i32
  }
  func.func @transform_13(%arg0: i32) -> (i32, i32) {
    %c0_i32 = arith.constant 0 : i32
    %c0_i32_0 = arith.constant 0 : i32
    %c0_i32_1 = arith.constant 0 : i32
    return %c0_i32, %c0_i32_0 : i32, i32
  }
}

</mosaic_0001>

<bundles_post_ra>
// kernel: resnet_v2_forward.7
= control target key start
LH: loop header
LB: loop body
LE: loop exit
PB: predicated region body
PF: predicated region fallthrough
CT: control target
= control target key end

     0   :  { %s726_s9 = smov 0   ;;  %s784_s0 = inlined_call_operand.vmem [shape: bf16[512,128], index: 0, kind: input, shape index: {}]   ;;  %s785_s1 = inlined_call_operand.vmem [shape: bf16[128,128], index: 1, kind: input, shape index: {}]   ;;  %s786_s2 = inlined_call_operand.vmem [shape: bf16[512,128], index: 2, kind: output, shape index: {}]  }
   0x1 LB: > { %s509_s10 = sadd.s32 4294967295, %s709_s9   ;;  %p513_p0 = scmp.ge.s32.totalorder %s709_s9, 1  ;;  %s709_s9 = sphi %s726_s9, %s12_s9  }
   0x2   : > { %p113_p1 = scmp.lt.s32.totalorder %s709_s9, 5 }
   0x4   : > { %p114_p2 = pnand %p513_p0, %p113_p1 }
   0x5   : > { %v687_v0 = vld [vmem:[%s785_s1] sm:$0xff] (!%p114_p2)   ;;  %s514_s13 = sshll.u32 (!%p114_p2), %s509_s10, 4  ;;  %v688_v1 = vld [vmem:[%s785_s1 + $0x8] sm:$0xff] (!%p114_p2)   ;;  %v689_v2 = vld [vmem:[%s785_s1 + $0x10] sm:$0xff] (!%p114_p2)  }
   0x6   : > { %117 = sbr.rel (%p114_p2) target bundleno = 264 (0x108), region = 28  ;;  %p136_p3 = scmp.lt.s32.totalorder (!%p114_p2), %s514_s13, 63  ;;  %631 = vmatprep.subr.bf16.mxu0 (!%p114_p2), %v687_v0  ;;  %663 = vmatprep.subr.bf16.mxu1 (!%p114_p2), %v687_v0  ;;  %v690_v3 = vld [vmem:[%s785_s1 + $0x18] sm:$0xff] (!%p114_p2)   ;;  %v691_v6 = vld [vmem:[%s785_s1 + $0x20] sm:$0xff] (!%p114_p2)   ;;  %v692_v7 = vld [vmem:[%s785_s1 + $0x28] sm:$0xff] (!%p114_p2)  }
   0x7   : > { %632 = vmatpush3.bf16.msra.mxu0 (!%p114_p2), %v687_v0  ;;  %671 = vmatpush3.bf16.msra.mxu1 (!%p114_p2), %v687_v0  ;;  %v693_v8 = vld [vmem:[%s785_s1 + $0x30] sm:$0xff] (!%p114_p2)   ;;  %v694_v9 = vld [vmem:[%s785_s1 + $0x38] sm:$0xff] (!%p114_p2)  }
   0x8   : > { %633 = vmatprep.subr.bf16.mxu0 (!%p114_p2), %v688_v1  ;;  %664 = vmatprep.subr.bf16.mxu1 (!%p114_p2), %v688_v1 }
   0xb   : > { %634 = vmatpush3.bf16.msra.mxu0 (!%p114_p2), %v688_v1  ;;  %672 = vmatpush3.bf16.msra.mxu1 (!%p114_p2), %v688_v1 }
   0xc   : > { %635 = vmatprep.subr.bf16.mxu0 (!%p114_p2), %v689_v2  ;;  %665 = vmatprep.subr.bf16.mxu1 (!%p114_p2), %v689_v2 }
   0xd   : > { %s788_s13 = smov (!%p136_p3, %s514_s13), 63 }
   0xe   : > { %s515_s18 = sshll.u32 %s788_s13, 2 }
   0xf   : > { %s751_s21 = scalar_lea.vmem %s784_s0, %s515_s18  ;;  %636 = vmatpush3.bf16.msra.mxu0 %v689_v2  ;;  %673 = vmatpush3.bf16.msra.mxu1 %v689_v2  ;;  %s145_s6 = scalar_lea.vmem %s786_s2, %s515_s18 }
  0x10   : > { %v695_v4 = vld [vmem:[%s751_s21] sm:$0xff]   ;;  %637 = vmatprep.subr.bf16.mxu0 %v690_v3  ;;  %666 = vmatprep.subr.bf16.mxu1 %v690_v3  ;;  %v697_v10 = vld [vmem:[%s751_s21 + $0x8] sm:$0xff]   ;;  %v699_v12 = vld [vmem:[%s751_s21 + $0x10] sm:$0xff]  }
  0x11   : > { %v696_v5 = vld [vmem:[%s751_s21 + $0x20] sm:$0xff]   ;;  %647 = vmatprep.mubr.bf16.mxu0 %v695_v4  ;;  %v698_v11 = vld [vmem:[%s751_s21 + $0x28] sm:$0xff]   ;;  %v700_v13 = vld [vmem:[%s751_s21 + $0x30] sm:$0xff]  }
  0x12   : > { %655 = vmatprep.mubr.bf16.mxu1 %v696_v5  ;;  %v701_v14 = vld [vmem:[%s751_s21 + $0x18] sm:$0xff]  }
  0x13   : > { %638 = vmatpush3.bf16.msra.mxu0 %v690_v3  ;;  %674 = vmatpush3.bf16.msra.mxu1 %v690_v3  ;;  %v702_v15 = vld [vmem:[%s751_s21 + $0x38] sm:$0xff]  }
  0x14   : > { %639 = vmatprep.subr.bf16.mxu0 %v691_v6  ;;  %667 = vmatprep.subr.bf16.mxu1 %v691_v6 }
  0x17   : > { %640 = vmatpush3.bf16.msra.mxu0 %v691_v6  ;;  %675 = vmatpush3.bf16.msra.mxu1 %v691_v6 }
  0x18   : > { %641 = vmatprep.subr.bf16.mxu0 %v692_v7  ;;  %668 = vmatprep.subr.bf16.mxu1 %v692_v7 }
  0x1b   : > { %642 = vmatpush3.bf16.msra.mxu0 %v692_v7  ;;  %676 = vmatpush3.bf16.msra.mxu1 %v692_v7 }
  0x1c   : > { %643 = vmatprep.subr.bf16.mxu0 %v693_v8  ;;  %669 = vmatprep.subr.bf16.mxu1 %v693_v8 }
  0x1f   : > { %644 = vmatpush3.bf16.msra.mxu0 %v693_v8  ;;  %677 = vmatpush3.bf16.msra.mxu1 %v693_v8 }
  0x20   : > { %645 = vmatprep.subr.bf16.mxu0 %v694_v9  ;;  %670 = vmatprep.subr.bf16.mxu1 %v694_v9 }
  0x23   : > { %646 = vmatpush3.bf16.msra.mxu0 %v694_v9  ;;  %678 = vmatpush3.bf16.msra.mxu1 %v694_v9 }
  0x26   : > { %648 = vmatmul.mubr.bf16.vlgmr.msra.gmra.mrb[0].mxu0 %v697_v10  ;;  %656 = vmatmul.mubr.bf16.vlgmr.msra.gmra.mrb[0].mxu1 %v698_v11 }
  0x27   : > { %651 = vmatprep.mubr.bf16.mxu0 %v699_v12  ;;  %659 = vmatprep.mubr.bf16.mxu1 %v700_v13 }
  0x2e   : > { %652 = vmatmul.mubr.bf16.gmra.mrb[4].mxu0 %v701_v14  ;;  %660 = vmatmul.mubr.bf16.gmra.mrb[4].mxu1 %v702_v15 }
  0xf9   : > { %v649_v16 = vpop.f32.mrb[0].mxu0  ;;  %v657_v17 = vpop.f32.mrb[0].mxu1 }
  0xfa   : > { %v310_v18 = vpop.f32.mrb[1].mxu0  ;;  %v342_v19 = vpop.f32.mrb[1].mxu1 }
  0xfb   : > { %v650_v20 = vpop.f32.mrb[2].mxu0  ;;  %v658_v21 = vpop.f32.mrb[2].mxu1 }
  0xfc   : > { %v576_v22 = vpack.c.bf16 %v650_v20, %v649_v16  ;;  %v596_v23 = vpack.c.bf16 %v658_v21, %v657_v17  ;;  %v313_v24 = vpop.f32.mrb[3].mxu0  ;;  %v345_v25 = vpop.f32.mrb[3].mxu1 }
  0xfd   : > { %v571_v26 = vpack.c.bf16 %v313_v24, %v310_v18  ;;  %v591_v27 = vpack.c.bf16 %v345_v25, %v342_v19 }
  0xfe   : > { %608 = vst [vmem:[%s145_s6 + $0x8] sm:$0xff] %v576_v22   ;;  %612 = vst [vmem:[%s145_s6 + $0x28] sm:$0xff] %v596_v23  }
  0xff   : > { %572 = vst [vmem:[%s145_s6] sm:$0xff] %v571_v26   ;;  %611 = vst [vmem:[%s145_s6 + $0x20] sm:$0xff] %v591_v27  }
 0x101   : > { %v653_v28 = vpop.f32.mrb[4].mxu0  ;;  %v661_v29 = vpop.f32.mrb[4].mxu1 }
 0x102   : > { %v326_v30 = vpop.f32.mrb[5].mxu0  ;;  %v358_v31 = vpop.f32.mrb[5].mxu1 }
 0x103   : > { %v654_v32 = vpop.f32.mrb[6].mxu0  ;;  %v662_v33 = vpop.f32.mrb[6].mxu1 }
 0x104   : > { %v586_v34 = vpack.c.bf16 %v654_v32, %v653_v28  ;;  %v606_v35 = vpack.c.bf16 %v662_v33, %v661_v29  ;;  %v329_v36 = vpop.f32.mrb[7].mxu0  ;;  %v361_v37 = vpop.f32.mrb[7].mxu1 }
 0x105   : > { %v581_v38 = vpack.c.bf16 %v329_v36, %v326_v30  ;;  %v601_v39 = vpack.c.bf16 %v361_v37, %v358_v31 }
 0x106   : > { %610 = vst [vmem:[%s145_s6 + $0x18] sm:$0xff] %v586_v34   ;;  %614 = vst [vmem:[%s145_s6 + $0x38] sm:$0xff] %v606_v35  }
 0x107   : > { %609 = vst [vmem:[%s145_s6 + $0x10] sm:$0xff] %v581_v38   ;;  %613 = vst [vmem:[%s145_s6 + $0x30] sm:$0xff] %v601_v39  }
 0x108 PF: > { %s12_s9 = sadd.s32 1, %s709_s9  }
 0x109   : > { %p9_p4 = scmp.ge.s32.totalorder %s12_s9, 6  }
 0x10b   :  { %11 = sbr.rel (!%p9_p4) target bundleno = 1 (0x1), region = 58 }

// kernel: resnet_v2_forward.10
= control target key start
LH: loop header
LB: loop body
LE: loop exit
PB: predicated region body
PF: predicated region fallthrough
CT: control target
= control target key end

     0   :  { %vm207_vm0 = vcmask 261120   ;;  %s3500_s1 = inlined_call_operand.vmem [shape: bf16[128,128], index: 1, kind: input, shape index: {}]   ;;  %s3501_s0 = inlined_call_operand.vmem [shape: bf16[32,128], index: 0, kind: input, shape index: {}]   ;;  %s3502_s4 = inlined_call_operand.vmem [shape: bf16[9,32,32], index: 4, kind: input, shape index: {}]   ;;  %s3503_s5 = inlined_call_operand.vmem [shape: bf16[9,128,128], index: 5, kind: input, shape index: {}]   ;;  %s3504_s2 = inlined_call_operand.vmem [shape: f32[1,128], index: 2, kind: input, shape index: {}]   ;;  %s3505_s3 = inlined_call_operand.vmem [shape: f32[1,128], index: 3, kind: input, shape index: {}]   ;;  %s3506_s7 = inlined_call_operand.vmem [shape: bf16[128,128], index: 7, kind: input, shape index: {}]   ;;  %s3507_s6 = inlined_call_operand.vmem [shape: bf16[32,128], index: 6, kind: input, shape index: {}]   ;;  %s3508_s8 = inlined_call_operand.vmem [shape: f32[1,128], index: 8, kind: input, shape index: {}]   ;;  %s3509_s9 = inlined_call_operand.vmem [shape: f32[1,128], index: 9, kind: input, shape index: {}]   ;;  %s3510_s10 = inlined_call_operand.vmem [shape: bf16[32,128], index: 10, kind: output, shape index: {}]  }
   0x1   :  { %v2854_v0 = vld [vmem:[%s3500_s1] sm:$0xff]   ;;  %v2855_v1 = vld [vmem:[%s3500_s1 + $0x8] sm:$0xff]   ;;  %v2856_v2 = vld [vmem:[%s3500_s1 + $0x10] sm:$0xff]  }
   0x2   :  { %2530 = vmatprep.subr.bf16.mxu0 %v2854_v0  ;;  %v2857_v3 = vld [vmem:[%s3500_s1 + $0x18] sm:$0xff]   ;;  %v2862_v4 = vld [vmem:[%s3501_s0] sm:$0xff]   ;;  %v2859_v6 = vld [vmem:[%s3500_s1 + $0x28] sm:$0xff]  }
   0x3   :  { %2531 = vmatpush3.bf16.msra.mxu0 %v2854_v0  ;;  %2546 = vmatprep.mubr.bf16.mxu0 %v2862_v4  ;;  %v2858_v5 = vld [vmem:[%s3500_s1 + $0x20] sm:$0xff]   ;;  %v2860_v7 = vld [vmem:[%s3500_s1 + $0x30] sm:$0xff]   ;;  %v2861_v8 = vld [vmem:[%s3500_s1 + $0x38] sm:$0xff]  }
   0x4   :  { %2532 = vmatprep.subr.bf16.mxu0 %v2855_v1  ;;  %v2863_v9 = vld [vmem:[%s3501_s0 + $0x8] sm:$0xff]   ;;  %v2864_v10 = vld [vmem:[%s3502_s4] sm:$0xff]   ;;  %v2870_v13 = vld [vmem:[%s3503_s5 + $0x50] sm:$0xff]  }
   0x5   :  { %2554 = vmatprep.mubr.msk.bf16.mxu1 %vm207_vm0, %v2864_v10  ;;  %v2868_v11 = vld [vmem:[%s3503_s5 + $0x40] sm:$0xff]   ;;  %v2869_v12 = vld [vmem:[%s3503_s5 + $0x48] sm:$0xff]   ;;  %v2871_v14 = vld [vmem:[%s3503_s5 + $0x58] sm:$0xff]  }
   0x6   :  { %v2872_v15 = vld [vmem:[%s3503_s5 + $0x60] sm:$0xff]   ;;  %v2865_v36 = vld [vmem:[%s3502_s4 + $0x8] sm:$0xff]   ;;  %v2866_v37 = vld [vmem:[%s3502_s4 + $0x10] sm:$0xff]  }
   0x7   :  { %2533 = vmatpush3.bf16.msra.mxu0 %v2855_v1  ;;  %v2083_v16 = vld [vmem:[%s3504_s2] ss:$0 sm:$0xff]  ;;  %v2867_v38 = vld [vmem:[%s3502_s4 + $0x18] sm:$0xff]   ;;  %v2873_v39 = vld [vmem:[%s3503_s5 + $0x68] sm:$0xff]  }
   0x8   :  { %2534 = vmatprep.subr.bf16.mxu0 %v2856_v2  ;;  %v2084_v18 = vld [vmem:[%s3505_s3] ss:$0 sm:$0xff]  ;;  %v2874_v40 = vld [vmem:[%s3503_s5 + $0x70] sm:$0xff]   ;;  %v2875_v41 = vld [vmem:[%s3503_s5 + $0x78] sm:$0xff]  }
   0x9   :  { %v2876_v42 = vld [vmem:[%s3503_s5] sm:$0xff]   ;;  %v2877_v55 = vld [vmem:[%s3503_s5 + $0x8] sm:$0xff]   ;;  %v2878_v56 = vld [vmem:[%s3503_s5 + $0x10] sm:$0xff]  }
   0xa   :  { %v2879_v57 = vld [vmem:[%s3503_s5 + $0x18] sm:$0xff]   ;;  %v2880_v58 = vld [vmem:[%s3503_s5 + $0x20] sm:$0xff]   ;;  %v2881_v59 = vld [vmem:[%s3503_s5 + $0x28] sm:$0xff]  }
   0xb   :  { %2535 = vmatpush3.bf16.msra.mxu0 %v2856_v2  ;;  %v2882_v60 = vld [vmem:[%s3503_s5 + $0x30] sm:$0xff]   ;;  %v2883_v61 = vld [vmem:[%s3503_s5 + $0x38] sm:$0xff]   ;;  %v2884_v62 = vld [vmem:[%s3502_s4 + $0x20] sm:$0xff]  }
   0xc   :  { %2536 = vmatprep.subr.bf16.mxu0 %v2857_v3  ;;  %v2886_v63 = vld [vmem:[%s3503_s5 + $0x80] sm:$0xff]   ;;  %v2885_v0 = vld [vmem:[%s3502_s4 + $0x28] sm:$0xff]   ;;  %v2888_v2 = vld [vmem:[%s3503_s5 + $0x90] sm:$0xff]  }
   0xd   :  { %v2887_v1 = vld [vmem:[%s3503_s5 + $0x88] sm:$0xff]   ;;  %v2890_v4 = vld [vmem:[%s3503_s5 + $0xa0] sm:$0xff]   ;;  %v2908_v10 = vld [vmem:[%s3503_s5 + $0xd0] sm:$0xff]  }
   0xf   :  { %2537 = vmatpush3.bf16.msra.mxu0 %v2857_v3  ;;  %v2889_v3 = vld [vmem:[%s3503_s5 + $0x98] sm:$0xff]  }
  0x10   :  { %2538 = vmatprep.subr.bf16.mxu0 %v2858_v5 }
  0x13   :  { %2539 = vmatpush3.bf16.msra.mxu0 %v2858_v5  ;;  %v2891_v5 = vld [vmem:[%s3503_s5 + $0xa8] sm:$0xff]  }
  0x14   :  { %2540 = vmatprep.subr.bf16.mxu0 %v2859_v6 }
  0x17   :  { %2541 = vmatpush3.bf16.msra.mxu0 %v2859_v6  ;;  %v2892_v6 = vld [vmem:[%s3503_s5 + $0xb0] sm:$0xff]  }
  0x18   :  { %2542 = vmatprep.subr.bf16.mxu0 %v2860_v7 }
  0x1b   :  { %2543 = vmatpush3.bf16.msra.mxu0 %v2860_v7  ;;  %v2893_v7 = vld [vmem:[%s3503_s5 + $0xb8] sm:$0xff]  }
  0x1c   :  { %2544 = vmatprep.subr.bf16.mxu0 %v2861_v8 }
  0x1f   :  { %2545 = vmatpush3.bf16.msra.mxu0 %v2861_v8  ;;  %v2906_v8 = vld [vmem:[%s3503_s5 + $0xc0] sm:$0xff]  }
  0x20   :  { %2566 = vmatprep.subr.bf16.mxu0 %v2868_v11 }
  0x22   :  { %2547 = vmatmul.mubr.bf16.vlgmr.msra.gmra.mrb[0].mxu0 %v2863_v9  ;;  %v2907_v9 = vld [vmem:[%s3503_s5 + $0xc8] sm:$0xff]  }
  0x23   :  { %2567 = vmatpush3.bf16.msra.mxu0 %v2868_v11  ;;  %v2909_v11 = vld [vmem:[%s3503_s5 + $0xd8] sm:$0xff]  }
  0x24   :  { %2568 = vmatprep.subr.bf16.mxu0 %v2869_v12 }
  0x27   :  { %2569 = vmatpush3.bf16.msra.mxu0 %v2869_v12  ;;  %v2910_v12 = vld [vmem:[%s3503_s5 + $0xe0] sm:$0xff]  }
  0x28   :  { %2570 = vmatprep.subr.bf16.mxu0 %v2870_v13 }
  0x2b   :  { %2571 = vmatpush3.bf16.msra.mxu0 %v2870_v13 }
  0x2c   :  { %2572 = vmatprep.subr.bf16.mxu0 %v2871_v14 }
  0x2f   :  { %2573 = vmatpush3.bf16.msra.mxu0 %v2871_v14 }
  0x30   :  { %2574 = vmatprep.subr.bf16.mxu0 %v2872_v15 }
  0x33   :  { %2575 = vmatpush3.bf16.msra.mxu0 %v2872_v15 }
  0x34   :  { %2576 = vmatprep.subr.bf16.mxu0 %v2873_v39 }
  0x37   :  { %2577 = vmatpush3.bf16.msra.mxu0 %v2873_v39 }
  0x38   :  { %2578 = vmatprep.subr.bf16.mxu0 %v2874_v40 }
  0x3b   :  { %2579 = vmatpush3.bf16.msra.mxu0 %v2874_v40 }
  0x3c   :  { %2580 = vmatprep.subr.bf16.mxu0 %v2875_v41 }
  0x3f   :  { %2581 = vmatpush3.bf16.msra.mxu0 %v2875_v41  ;;  %v2946_v41 = vld [vmem:[%s3506_s7] sm:$0xff]  }
  0x40   :  { %2586 = vmatprep.subr.bf16.mxu0 %v2876_v42 }
  0xf5   :  { %v2548_v17 = vpop.f32.mrb[0].mxu0 }
  0xf6   :  { %v174_v19 = vmul.f32 %v2548_v17, %v2083_v16  ;;  %v150_v20 = vpop.f32.mrb[1].mxu0 }
  0xf7   :  { %v172_v21 = vmul.f32 %v2083_v16, %v150_v20  ;;  %v2549_v22 = vpop.f32.mrb[2].mxu0  ;;  %v2895_v20 = vld [vmem:[%s3502_s4 + $0x38] sm:$0xff]  }
  0xf8   :  { %v185_v23 = vadd.f32 %v2084_v18, %v174_v19  ;;  %v175_v24 = vmul.f32 %v2549_v22, %v2083_v16  ;;  %v153_v25 = vpop.f32.mrb[3].mxu0  ;;  %v2894_v19 = vld [vmem:[%s3502_s4 + $0x30] sm:$0xff]   ;;  %v2897_v22 = vld [vmem:[%s3502_s4 + $0x48] sm:$0xff]  }
  0xf9   :  { %v183_v26 = vadd.f32 %v2084_v18, %v172_v21  ;;  %v173_v27 = vmul.f32 %v2083_v16, %v153_v25  ;;  %v2896_v21 = vld [vmem:[%s3502_s4 + $0x40] sm:$0xff]  }
  0xfa   :  { %v186_v28 = vadd.f32 %v2084_v18, %v175_v24  ;;  %v189_v30 = vmax.f32 %v185_v23, 0.0  ;;  %v2898_v23 = vld [vmem:[%s3502_s4 + $0x50] sm:$0xff]   ;;  %v2899_v24 = vld [vmem:[%s3502_s4 + $0x58] sm:$0xff]   ;;  %v2900_v25 = vld [vmem:[%s3502_s4 + $0x60] sm:$0xff]  }
  0xfb   :  { %v184_v29 = vadd.f32 %v2084_v18, %v173_v27  ;;  %v187_v32 = vmax.f32 %v183_v26, 0.0  ;;  %v2901_v26 = vld [vmem:[%s3502_s4 + $0x68] sm:$0xff]   ;;  %v2902_v27 = vld [vmem:[%s3502_s4 + $0x70] sm:$0xff]  }
  0xfc   :  { %v190_v31 = vmax.f32 %v186_v28, 0.0  ;;  %v2903_v28 = vld [vmem:[%s3502_s4 + $0x78] sm:$0xff]  }
  0xfd   :  { %v188_v33 = vmax.f32 %v184_v29, 0.0  ;;  %v2904_v29 = vld [vmem:[%s3502_s4 + $0x80] sm:$0xff]  }
  0xfe   :  { %v3074_v34 = vpack.c.bf16 %v190_v31, %v189_v30  ;;  %v2905_v30 = vld [vmem:[%s3502_s4 + $0x88] sm:$0xff]  }
  0xff   :  { %v3076_v35 = vpack.c.bf16 %v188_v33, %v187_v32  ;;  %v2911_v31 = vld [vmem:[%s3503_s5 + $0xe8] sm:$0xff]   ;;  %v2912_v32 = vld [vmem:[%s3503_s5 + $0xf0] sm:$0xff]   ;;  %v2913_v33 = vld [vmem:[%s3503_s5 + $0xf8] sm:$0xff]  }
 0x101   :  { %2550 = vmatprep.subr.bf16.mxu1 %v3076_v35 }
 0x102   :  { %2551 = vmatpush3.bf16.msra.mxu1 %v3076_v35 }
 0x103   :  { %2552 = vmatprep.subr.bf16.mxu1 %v3074_v34 }
 0x106   :  { %2553 = vmatpush3.bf16.msra.mxu1 %v3074_v34 }
 0x107   :  { %2558 = vmatprep.subr.bf16.mxu1 %v3076_v35 }
 0x109   :  { %2555 = vmatmul.mubr.msk.bf16.vlgmr.msra.gmra.mrb[0].mxu1 %vm207_vm0, %v2865_v36 }
 0x10a   :  { %2559 = vmatpush3.bf16.msra.mxu1 %v3076_v35  ;;  %2562 = vmatprep.mubr.msk.bf16.mxu1 %vm207_vm0, %v2866_v37 }
 0x10b   :  { %2560 = vmatprep.subr.bf16.mxu1 %v3074_v34 }
 0x10e   :  { %2561 = vmatpush3.bf16.msra.mxu1 %v3074_v34 }
 0x10f   :  { %2642 = vmatprep.subr.bf16.mxu1 %v2906_v8 }
 0x111   :  { %2563 = vmatmul.mubr.msk.bf16.vlgmr.msra.gmra.mrb[4].mxu1 %vm207_vm0, %v2867_v38 }
 0x112   :  { %2643 = vmatpush3.bf16.msra.mxu1 %v2906_v8 }
 0x113   :  { %2644 = vmatprep.subr.bf16.mxu1 %v2907_v9 }
 0x116   :  { %2645 = vmatpush3.bf16.msra.mxu1 %v2907_v9 }
 0x117   :  { %2646 = vmatprep.subr.bf16.mxu1 %v2908_v10 }
 0x11a   :  { %2647 = vmatpush3.bf16.msra.mxu1 %v2908_v10 }
 0x11b   :  { %2648 = vmatprep.subr.bf16.mxu1 %v2909_v11 }
 0x11e   :  { %2649 = vmatpush3.bf16.msra.mxu1 %v2909_v11 }
 0x11f   :  { %2650 = vmatprep.subr.bf16.mxu1 %v2910_v12 }
 0x122   :  { %2651 = vmatpush3.bf16.msra.mxu1 %v2910_v12  ;;  %v2960_v12 = vld [vmem:[%s3506_s7 + $0x38] sm:$0xff]  }
 0x123   :  { %2652 = vmatprep.subr.bf16.mxu1 %v2911_v31 }
 0x126   :  { %2653 = vmatpush3.bf16.msra.mxu1 %v2911_v31  ;;  %v2925_v31 = vld [vmem:[%s3503_s5 + $0x158] sm:$0xff]  }
 0x127   :  { %2654 = vmatprep.subr.bf16.mxu1 %v2912_v32 }
 0x12a   :  { %2655 = vmatpush3.bf16.msra.mxu1 %v2912_v32  ;;  %v2926_v32 = vld [vmem:[%s3503_s5 + $0x160] sm:$0xff]  }
 0x12b   :  { %2656 = vmatprep.subr.bf16.mxu1 %v2913_v33 }
 0x12e   :  { %2657 = vmatpush3.bf16.msra.mxu1 %v2913_v33  ;;  %v2927_v33 = vld [vmem:[%s3503_s5 + $0x168] sm:$0xff]  }
 0x1dc   :  { %v2556_v43 = vpop.f32.mrb[0].mxu1 }
 0x1dd   :  { %v248_v44 = vpop.f32.mrb[1].mxu1 }
 0x1de   :  { %v2557_v45 = vpop.f32.mrb[2].mxu1 }
 0x1df   :  { %v264_v46 = vpack.c.bf16 %v2557_v45, %v2556_v43  ;;  %v251_v47 = vpop.f32.mrb[3].mxu1 }
 0x1e0   :  { %v263_v48 = vpack.c.bf16 %v251_v47, %v248_v44  ;;  %v2915_v47 = vld [vmem:[%s3503_s5 + $0x108] sm:$0xff]  }
 0x1e4   :  { %v2564_v49 = vpop.f32.mrb[4].mxu1 }
 0x1e5   :  { %v336_v50 = vpop.f32.mrb[5].mxu1 }
 0x1e6   :  { %v2565_v51 = vpop.f32.mrb[6].mxu1 }
 0x1e7   :  { %v352_v52 = vpack.c.bf16 %v2565_v51, %v2564_v49  ;;  %v339_v53 = vpop.f32.mrb[7].mxu1  ;;  %v2950_v49 = vld [vmem:[%s3506_s7 + $0x10] sm:$0xff]  }
 0x1e8   :  { %v351_v54 = vpack.c.bf16 %v339_v53, %v336_v50  ;;  %v2916_v50 = vld [vmem:[%s3503_s5 + $0x110] sm:$0xff]  }
 0x1ea   :  { %2582 = vmatprep.mubr.bf16.mxu0 %v351_v54 }
 0x1eb   :  { %2583 = vmatmul.mubr.bf16.vlgmr.msra.gmra.mrb[4].mxu0 %v352_v52 }
 0x1ec   :  { %2587 = vmatpush3.bf16.msra.mxu0 %v2876_v42  ;;  %2602 = vmatprep.mubr.bf16.mxu0 %v263_v48 }
 0x1ed   :  { %2588 = vmatprep.subr.bf16.mxu0 %v2877_v55 }
 0x1f0   :  { %2589 = vmatpush3.bf16.msra.mxu0 %v2877_v55 }
 0x1f1   :  { %2590 = vmatprep.subr.bf16.mxu0 %v2878_v56 }
 0x1f4   :  { %2591 = vmatpush3.bf16.msra.mxu0 %v2878_v56  ;;  %v2952_v56 = vld [vmem:[%s3506_s7 + $0x18] sm:$0xff]  }
 0x1f5   :  { %2592 = vmatprep.subr.bf16.mxu0 %v2879_v57 }
 0x1f8   :  { %2593 = vmatpush3.bf16.msra.mxu0 %v2879_v57  ;;  %v2917_v57 = vld [vmem:[%s3503_s5 + $0x118] sm:$0xff]  }
 0x1f9   :  { %2594 = vmatprep.subr.bf16.mxu0 %v2880_v58 }
 0x1fc   :  { %2595 = vmatpush3.bf16.msra.mxu0 %v2880_v58 }
 0x1fd   :  { %2596 = vmatprep.subr.bf16.mxu0 %v2881_v59 }
 0x200   :  { %2597 = vmatpush3.bf16.msra.mxu0 %v2881_v59  ;;  %v2954_v59 = vld [vmem:[%s3506_s7 + $0x20] sm:$0xff]  }
 0x201   :  { %2598 = vmatprep.subr.bf16.mxu0 %v2882_v60 }
 0x204   :  { %2599 = vmatpush3.bf16.msra.mxu0 %v2882_v60  ;;  %v2918_v60 = vld [vmem:[%s3503_s5 + $0x120] sm:$0xff]  }
 0x205   :  { %2600 = vmatprep.subr.bf16.mxu0 %v2883_v61 }
 0x208   :  { %2601 = vmatpush3.bf16.msra.mxu0 %v2883_v61 }
 0x209   :  { %2606 = vmatprep.subr.bf16.mxu0 %v3076_v35 }
 0x20b   :  { %2603 = vmatmul.mubr.bf16.vlgmr.msra.gmra.mrb[4].mxu0 %v264_v46  ;;  %v2948_v46 = vld [vmem:[%s3506_s7 + $0x8] sm:$0xff]  }
 0x20c   :  { %2607 = vmatpush3.bf16.msra.mxu0 %v3076_v35  ;;  %2610 = vmatprep.mubr.msk.bf16.mxu0 %vm207_vm0, %v2884_v62 }
 0x20d   :  { %2608 = vmatprep.subr.bf16.mxu0 %v3074_v34 }
 0x210   :  { %2609 = vmatpush3.bf16.msra.mxu0 %v3074_v34 }
 0x211   :  { %2614 = vmatprep.subr.bf16.mxu0 %v2886_v63 }
 0x213   :  { %2611 = vmatmul.mubr.msk.bf16.vlgmr.msra.gmra.mrb[8].mxu0 %vm207_vm0, %v2885_v0 }
 0x214   :  { %2615 = vmatpush3.bf16.msra.mxu0 %v2886_v63 }
 0x215   :  { %2616 = vmatprep.subr.bf16.mxu0 %v2887_v1 }
 0x218   :  { %2617 = vmatpush3.bf16.msra.mxu0 %v2887_v1 }
 0x219   :  { %2618 = vmatprep.subr.bf16.mxu0 %v2888_v2 }
 0x21c   :  { %2619 = vmatpush3.bf16.msra.mxu0 %v2888_v2  ;;  %v2956_v2 = vld [vmem:[%s3506_s7 + $0x28] sm:$0xff]  }
 0x21d   :  { %2620 = vmatprep.subr.bf16.mxu0 %v2889_v3 }
 0x220   :  { %2621 = vmatpush3.bf16.msra.mxu0 %v2889_v3  ;;  %v2919_v3 = vld [vmem:[%s3503_s5 + $0x128] sm:$0xff]  }
 0x221   :  { %2622 = vmatprep.subr.bf16.mxu0 %v2890_v4 }
 0x224   :  { %2623 = vmatpush3.bf16.msra.mxu0 %v2890_v4 }
 0x225   :  { %2624 = vmatprep.subr.bf16.mxu0 %v2891_v5 }
 0x228   :  { %2625 = vmatpush3.bf16.msra.mxu0 %v2891_v5  ;;  %v2958_v5 = vld [vmem:[%s3506_s7 + $0x30] sm:$0xff]  }
 0x229   :  { %2626 = vmatprep.subr.bf16.mxu0 %v2892_v6 }
 0x22c   :  { %2627 = vmatpush3.bf16.msra.mxu0 %v2892_v6  ;;  %v2920_v6 = vld [vmem:[%s3503_s5 + $0x130] sm:$0xff]  }
 0x22d   :  { %2628 = vmatprep.subr.bf16.mxu0 %v2893_v7 }
 0x230   :  { %2629 = vmatpush3.bf16.msra.mxu0 %v2893_v7 }
 0x231   :  { %2634 = vmatprep.subr.bf16.mxu0 %v3076_v35 }
 0x2e6   :  { %v2612_v13 = vpop.f32.mrb[8].mxu0 }
 0x2e7   :  { %v619_v14 = vpop.f32.mrb[9].mxu0 }
 0x2e8   :  { %v2613_v15 = vpop.f32.mrb[10].mxu0 }
 0x2e9   :  { %v635_v16 = vpack.c.bf16 %v2613_v15, %v2612_v13  ;;  %v622_v17 = vpop.f32.mrb[11].mxu0  ;;  %v2921_v13 = vld [vmem:[%s3503_s5 + $0x138] sm:$0xff]  }
 0x2ea   :  { %v634_v18 = vpack.c.bf16 %v622_v17, %v619_v14  ;;  %v2961_v14 = vld [vmem:[%s3507_s6] sm:$0xff]  }
 0x2ec   :  { %2630 = vmatprep.mubr.bf16.mxu0 %v634_v18  ;;  %v2963_v18 = vld [vmem:[%s3507_s6 + $0x8] sm:$0xff]  }
 0x2ed   :  { %2631 = vmatmul.mubr.bf16.vlgmr.msra.gmra.mrb[4].mxu0 %v635_v16  ;;  %v2922_v16 = vld [vmem:[%s3503_s5 + $0x140] sm:$0xff]  }
 0x2ee   :  { %2635 = vmatpush3.bf16.msra.mxu0 %v3076_v35  ;;  %2638 = vmatprep.mubr.msk.bf16.mxu0 %vm207_vm0, %v2894_v19 }
 0x2ef   :  { %2636 = vmatprep.subr.bf16.mxu0 %v3074_v34 }
 0x2f2   :  { %2637 = vmatpush3.bf16.msra.mxu0 %v3074_v34 }
 0x2f3   :  { %2662 = vmatprep.subr.bf16.mxu0 %v3076_v35 }
 0x2f5   :  { %2639 = vmatmul.mubr.msk.bf16.vlgmr.msra.gmra.mrb[12].mxu0 %vm207_vm0, %v2895_v20 }
 0x2f6   :  { %2663 = vmatpush3.bf16.msra.mxu0 %v3076_v35  ;;  %2666 = vmatprep.mubr.msk.bf16.mxu0 %vm207_vm0, %v2896_v21 }
 0x2f7   :  { %2664 = vmatprep.subr.bf16.mxu0 %v3074_v34 }
 0x2fa   :  { %2665 = vmatpush3.bf16.msra.mxu0 %v3074_v34 }
 0x2fb   :  { %2690 = vmatprep.subr.bf16.mxu0 %v3076_v35 }
 0x2fd   :  { %2667 = vmatmul.mubr.msk.bf16.vlgmr.msra.gmra.mrb[16].mxu0 %vm207_vm0, %v2897_v22 }
 0x2fe   :  { %2691 = vmatpush3.bf16.msra.mxu0 %v3076_v35  ;;  %2694 = vmatprep.mubr.msk.bf16.mxu0 %vm207_vm0, %v2898_v23  ;;  %v2923_v23 = vld [vmem:[%s3503_s5 + $0x148] sm:$0xff]  }
 0x2ff   :  { %2692 = vmatprep.subr.bf16.mxu0 %v3074_v34 }
 0x302   :  { %2693 = vmatpush3.bf16.msra.mxu0 %v3074_v34 }
 0x303   :  { %2718 = vmatprep.subr.bf16.mxu0 %v3076_v35 }
 0x305   :  { %2695 = vmatmul.mubr.msk.bf16.vlgmr.msra.gmra.mrb[20].mxu0 %vm207_vm0, %v2899_v24 }
 0x306   :  { %2719 = vmatpush3.bf16.msra.mxu0 %v3076_v35  ;;  %2722 = vmatprep.mubr.msk.bf16.mxu0 %vm207_vm0, %v2900_v25  ;;  %v2924_v25 = vld [vmem:[%s3503_s5 + $0x150] sm:$0xff]  }
 0x307   :  { %2720 = vmatprep.subr.bf16.mxu0 %v3074_v34 }
 0x30a   :  { %2721 = vmatpush3.bf16.msra.mxu0 %v3074_v34 }
 0x30b   :  { %2746 = vmatprep.subr.bf16.mxu0 %v3076_v35 }
 0x30d   :  { %2723 = vmatmul.mubr.msk.bf16.vlgmr.msra.gmra.mrb[24].mxu0 %vm207_vm0, %v2901_v26 }
 0x30e   :  { %2747 = vmatpush3.bf16.msra.mxu0 %v3076_v35  ;;  %2750 = vmatprep.mubr.msk.bf16.mxu0 %vm207_vm0, %v2902_v27 }
 0x30f   :  { %2748 = vmatprep.subr.bf16.mxu0 %v3074_v34 }
 0x312   :  { %2749 = vmatpush3.bf16.msra.mxu0 %v3074_v34 }
 0x313   :  { %2774 = vmatprep.subr.bf16.mxu0 %v3076_v35 }
 0x315   :  { %2751 = vmatmul.mubr.msk.bf16.vlgmr.msra.gmra.mrb[28].mxu0 %vm207_vm0, %v2903_v28 }
 0x316   :  { %2775 = vmatpush3.bf16.msra.mxu0 %v3076_v35  ;;  %2778 = vmatprep.mubr.msk.bf16.mxu0 %vm207_vm0, %v2904_v29 }
 0x317   :  { %2776 = vmatprep.subr.bf16.mxu0 %v3074_v34 }
 0x31a   :  { %2777 = vmatpush3.bf16.msra.mxu0 %v3074_v34  ;;  %v2914_v34 = vld [vmem:[%s3503_s5 + $0x100] sm:$0xff]  }
 0x31b   :  { %2670 = vmatprep.subr.bf16.mxu1 %v2914_v34  ;;  %2802 = vmatprep.subr.bf16.mxu0 %v2946_v41 }
 0x31d   :  { %2779 = vmatmul.mubr.msk.bf16.vlgmr.msra.gmra.mrb[32].mxu0 %vm207_vm0, %v2905_v30 }
 0x31e   :  { %2803 = vmatpush3.bf16.msra.mxu0 %v2946_v41  ;;  %2818 = vmatprep.mubr.bf16.mxu0 %v2961_v14  ;;  %v2931_v41 = vld [vmem:[%s3503_s5 + $0x188] sm:$0xff]  }
 0x31f   :  { %2804 = vmatprep.subr.bf16.mxu0 %v2948_v46 }
 0x322   :  { %2805 = vmatpush3.bf16.msra.mxu0 %v2948_v46  ;;  %v2936_v46 = vld [vmem:[%s3503_s5 + $0x1b0] sm:$0xff]  }
 0x323   :  { %2806 = vmatprep.subr.bf16.mxu0 %v2950_v49 }
 0x326   :  { %2807 = vmatpush3.bf16.msra.mxu0 %v2950_v49  ;;  %v2939_v49 = vld [vmem:[%s3503_s5 + $0x1c8] sm:$0xff]  }
 0x327   :  { %2808 = vmatprep.subr.bf16.mxu0 %v2952_v56 }
 0x32a   :  { %2809 = vmatpush3.bf16.msra.mxu0 %v2952_v56  ;;  %v2947_v56 = vld [vmem:[%s3503_s5 + $0x200] sm:$0xff]  }
 0x32b   :  { %2810 = vmatprep.subr.bf16.mxu0 %v2954_v59 }
 0x32e   :  { %2811 = vmatpush3.bf16.msra.mxu0 %v2954_v59  ;;  %v2953_v59 = vld [vmem:[%s3503_s5 + $0x218] sm:$0xff]  }
 0x32f   :  { %2812 = vmatprep.subr.bf16.mxu0 %v2956_v2 }
 0x332   :  { %2813 = vmatpush3.bf16.msra.mxu0 %v2956_v2 }
 0x333   :  { %2814 = vmatprep.subr.bf16.mxu0 %v2958_v5 }
 0x336   :  { %2815 = vmatpush3.bf16.msra.mxu0 %v2958_v5 }
 0x337   :  { %2816 = vmatprep.subr.bf16.mxu0 %v2960_v12 }
 0x33a   :  { %2817 = vmatpush3.bf16.msra.mxu0 %v2960_v12 }
 0x33d   :  { %2819 = vmatmul.mubr.bf16.vlgmr.msra.gmra.mrb[36].mxu0 %v2963_v18 }
 0x3c0   :  { %v3266_v35 = vpop.f32.mrb[4].mxu0 }
 0x3c1   :  { %v3268_v36 = vpop.f32.mrb[5].mxu0 }
 0x3c2   :  { %v3270_v37 = vpop.f32.mrb[6].mxu0 }
 0x3c3   :  { %v3272_v38 = vpop.f32.mrb[7].mxu0 }
 0x3c8   :  { %v2640_v39 = vpop.f32.mrb[12].mxu0 }
 0x3c9   :  { %v809_v40 = vpop.f32.mrb[13].mxu0 }
 0x3ca   :  { %v2641_v42 = vpop.f32.mrb[14].mxu0 }
 0x3cb   :  { %v825_v43 = vpack.c.bf16 %v2641_v42, %v2640_v39  ;;  %v812_v44 = vpop.f32.mrb[15].mxu0  ;;  %v2929_v39 = vld [vmem:[%s3503_s5 + $0x178] sm:$0xff]   ;;  %v2932_v42 = vld [vmem:[%s3503_s5 + $0x190] sm:$0xff]  }
 0x3cc   :  { %v824_v45 = vpack.c.bf16 %v812_v44, %v809_v40  ;;  %v2930_v40 = vld [vmem:[%s3503_s5 + $0x180] sm:$0xff]  }
 0x3cd   :  { %v2934_v44 = vld [vmem:[%s3503_s5 + $0x1a0] sm:$0xff]  }
 0x3ce   :  { %2658 = vmatprep.mubr.bf16.mxu1 %v824_v45  ;;  %v2935_v45 = vld [vmem:[%s3503_s5 + $0x1a8] sm:$0xff]  }
 0x3cf   :  { %2659 = vmatmul.mubr.bf16.vlgmr.msra.gmra.mrb[8].mxu1 %v825_v43  ;;  %v2933_v43 = vld [vmem:[%s3503_s5 + $0x198] sm:$0xff]  }
 0x3d0   :  { %2671 = vmatpush3.bf16.msra.mxu1 %v2914_v34  ;;  %v3283_v48 = vpop.f32.mrb[16].mxu0  ;;  %v2928_v34 = vld [vmem:[%s3503_s5 + $0x170] sm:$0xff]  }
 0x3d1   :  { %2672 = vmatprep.subr.bf16.mxu1 %v2915_v47  ;;  %v999_v51 = vpop.f32.mrb[17].mxu0 }
 0x3d2   :  { %v3291_v52 = vpop.f32.mrb[18].mxu0 }
 0x3d3   :  { %v1015_v53 = vpack.c.bf16 %v3291_v52, %v3283_v48  ;;  %v1002_v54 = vpop.f32.mrb[19].mxu0  ;;  %v2938_v48 = vld [vmem:[%s3503_s5 + $0x1c0] sm:$0xff]  }
 0x3d4   :  { %2673 = vmatpush3.bf16.msra.mxu1 %v2915_v47  ;;  %v1014_v55 = vpack.c.bf16 %v1002_v54, %v999_v51  ;;  %v2937_v47 = vld [vmem:[%s3503_s5 + $0x1b8] sm:$0xff]   ;;  %v2942_v52 = vld [vmem:[%s3503_s5 + $0x1e0] sm:$0xff]   ;;  %v2944_v54 = vld [vmem:[%s3503_s5 + $0x1f0] sm:$0xff]  }
 0x3d5   :  { %2674 = vmatprep.subr.bf16.mxu1 %v2916_v50  ;;  %v2941_v51 = vld [vmem:[%s3503_s5 + $0x1d8] sm:$0xff]  }
 0x3d6   :  { %2686 = vmatprep.mubr.bf16.mxu1 %v1014_v55  ;;  %v2945_v55 = vld [vmem:[%s3503_s5 + $0x1f8] sm:$0xff]  }
 0x3d8   :  { %2675 = vmatpush3.bf16.msra.mxu1 %v2916_v50  ;;  %v3301_v58 = vpop.f32.mrb[20].mxu0  ;;  %v2940_v50 = vld [vmem:[%s3503_s5 + $0x1d0] sm:$0xff]  }
 0x3d9   :  { %2676 = vmatprep.subr.bf16.mxu1 %v2917_v57  ;;  %v1189_v61 = vpop.f32.mrb[21].mxu0 }
 0x3da   :  { %v3309_v62 = vpop.f32.mrb[22].mxu0 }
 0x3db   :  { %v1205_v63 = vpack.c.bf16 %v3309_v62, %v3301_v58  ;;  %v1192_v0 = vpop.f32.mrb[23].mxu0  ;;  %v2951_v58 = vld [vmem:[%s3503_s5 + $0x210] sm:$0xff]  }
 0x3dc   :  { %2677 = vmatpush3.bf16.msra.mxu1 %v2917_v57  ;;  %v1204_v1 = vpack.c.bf16 %v1192_v0, %v1189_v61  ;;  %v2949_v57 = vld [vmem:[%s3503_s5 + $0x208] sm:$0xff]   ;;  %v2959_v62 = vld [vmem:[%s3503_s5 + $0x230] sm:$0xff]  }
 0x3dd   :  { %2678 = vmatprep.subr.bf16.mxu1 %v2918_v60  ;;  %v2957_v61 = vld [vmem:[%s3503_s5 + $0x228] sm:$0xff]  }
 0x3e0   :  { %2679 = vmatpush3.bf16.msra.mxu1 %v2918_v60  ;;  %v3319_v4 = vpop.f32.mrb[24].mxu0  ;;  %v2955_v60 = vld [vmem:[%s3503_s5 + $0x220] sm:$0xff]  }
 0x3e1   :  { %2680 = vmatprep.subr.bf16.mxu1 %v2919_v3  ;;  %v3327_v7 = vpop.f32.mrb[25].mxu0 }
 0x3e2   :  { %v3329_v8 = vpop.f32.mrb[26].mxu0 }
 0x3e3   :  { %v1395_v9 = vpack.c.bf16 %v3329_v8, %v3319_v4  ;;  %v1382_v10 = vpop.f32.mrb[27].mxu0  ;;  %v2363_v4 = vld [vmem:[%s3508_s8] ss:$0 sm:$0xff] }
 0x3e4   :  { %2681 = vmatpush3.bf16.msra.mxu1 %v2919_v3  ;;  %v1394_v11 = vpack.c.bf16 %v1382_v10, %v3327_v7 }
 0x3e5   :  { %2682 = vmatprep.subr.bf16.mxu1 %v2920_v6 }
 0x3e8   :  { %2683 = vmatpush3.bf16.msra.mxu1 %v2920_v6  ;;  %v3343_v15 = vpop.f32.mrb[28].mxu0  ;;  %v2364_v6 = vld [vmem:[%s3509_s9] ss:$0 sm:$0xff] }
 0x3e9   :  { %2684 = vmatprep.subr.bf16.mxu1 %v2921_v13  ;;  %v3348_v17 = vpop.f32.mrb[29].mxu0 }
 0x3ea   :  { %v3353_v19 = vpop.f32.mrb[30].mxu0 }
 0x3eb   :  { %v1585_v20 = vpack.c.bf16 %v3353_v19, %v3343_v15  ;;  %v3357_v21 = vpop.f32.mrb[31].mxu0 }
 0x3ec   :  { %2685 = vmatpush3.bf16.msra.mxu1 %v2921_v13  ;;  %v1584_v22 = vpack.c.bf16 %v3357_v21, %v3348_v17 }
 0x3ed   :  { %2698 = vmatprep.subr.bf16.mxu1 %v2922_v16 }
 0x3ef   :  { %2687 = vmatmul.mubr.bf16.vlgmr.msra.gmra.mrb[8].mxu1 %v1015_v53  ;;  %v2943_v53 = vld [vmem:[%s3503_s5 + $0x1e8] sm:$0xff]  }
 0x3f0   :  { %2699 = vmatpush3.bf16.msra.mxu1 %v2922_v16  ;;  %2714 = vmatprep.mubr.bf16.mxu1 %v1204_v1  ;;  %v3367_v24 = vpop.f32.mrb[32].mxu0 }
 0x3f1   :  { %2700 = vmatprep.subr.bf16.mxu1 %v2923_v23  ;;  %v3372_v26 = vpop.f32.mrb[33].mxu0 }
 0x3f2   :  { %v3374_v27 = vpop.f32.mrb[34].mxu0 }
 0x3f3   :  { %v1775_v28 = vpack.c.bf16 %v3374_v27, %v3367_v24  ;;  %v3378_v29 = vpop.f32.mrb[35].mxu0 }
 0x3f4   :  { %2701 = vmatpush3.bf16.msra.mxu1 %v2923_v23  ;;  %v1774_v30 = vpack.c.bf16 %v3378_v29, %v3372_v26 }
 0x3f5   :  { %2702 = vmatprep.subr.bf16.mxu1 %v2924_v25 }
 0x3f8   :  { %2703 = vmatpush3.bf16.msra.mxu1 %v2924_v25 }
 0x3f9   :  { %2704 = vmatprep.subr.bf16.mxu1 %v2925_v31 }
 0x3fc   :  { %2705 = vmatpush3.bf16.msra.mxu1 %v2925_v31 }
 0x3fd   :  { %2706 = vmatprep.subr.bf16.mxu1 %v2926_v32 }
 0x400   :  { %2707 = vmatpush3.bf16.msra.mxu1 %v2926_v32 }
 0x401   :  { %2708 = vmatprep.subr.bf16.mxu1 %v2927_v33 }
 0x404   :  { %2709 = vmatpush3.bf16.msra.mxu1 %v2927_v33 }
 0x405   :  { %2710 = vmatprep.subr.bf16.mxu1 %v2928_v34 }
 0x408   :  { %2711 = vmatpush3.bf16.msra.mxu1 %v2928_v34 }
 0x409   :  { %2712 = vmatprep.subr.bf16.mxu1 %v2929_v39 }
 0x40c   :  { %2713 = vmatpush3.bf16.msra.mxu1 %v2929_v39 }
 0x40d   :  { %2726 = vmatprep.subr.bf16.mxu1 %v2930_v40 }
 0x40f   :  { %2715 = vmatmul.mubr.bf16.vlgmr.msra.gmra.mrb[8].mxu1 %v1205_v63  ;;  %v2962_v63 = vld [vmem:[%s3503_s5 + $0x238] sm:$0xff]  }
 0x410   :  { %2727 = vmatpush3.bf16.msra.mxu1 %v2930_v40  ;;  %2742 = vmatprep.mubr.bf16.mxu1 %v1394_v11  ;;  %v2820_v0 = vpop.f32.mrb[36].mxu0 }
 0x411   :  { %2728 = vmatprep.subr.bf16.mxu1 %v2931_v41  ;;  %v2008_v1 = vpop.f32.mrb[37].mxu0  ;;  %v2032_v5 = vmul.f32 %v2820_v0, %v2363_v4 }
 0x412   :  { %v2821_v2 = vpop.f32.mrb[38].mxu0  ;;  %v2030_v7 = vmul.f32 %v2363_v4, %v2008_v1 }
 0x413   :  { %v2011_v3 = vpop.f32.mrb[39].mxu0  ;;  %v2043_v8 = vadd.f32 %v2364_v6, %v2032_v5 }
 0x414   :  { %2729 = vmatpush3.bf16.msra.mxu1 %v2931_v41  ;;  %v2041_v10 = vadd.f32 %v2364_v6, %v2030_v7  ;;  %v2031_v11 = vmul.f32 %v2363_v4, %v2011_v3 }
 0x415   :  { %2730 = vmatprep.subr.bf16.mxu1 %v2932_v42 }
 0x416   :  { %v2042_v21 = vadd.f32 %v2364_v6, %v2031_v11 }
 0x418   :  { %2731 = vmatpush3.bf16.msra.mxu1 %v2932_v42 }
 0x419   :  { %2732 = vmatprep.subr.bf16.mxu1 %v2933_v43 }
 0x41c   :  { %2733 = vmatpush3.bf16.msra.mxu1 %v2933_v43 }
 0x41d   :  { %2734 = vmatprep.subr.bf16.mxu1 %v2934_v44 }
 0x420   :  { %2735 = vmatpush3.bf16.msra.mxu1 %v2934_v44 }
 0x421   :  { %2736 = vmatprep.subr.bf16.mxu1 %v2935_v45 }
 0x424   :  { %2737 = vmatpush3.bf16.msra.mxu1 %v2935_v45 }
 0x425   :  { %2738 = vmatprep.subr.bf16.mxu1 %v2936_v46 }
 0x428   :  { %2739 = vmatpush3.bf16.msra.mxu1 %v2936_v46 }
 0x429   :  { %2740 = vmatprep.subr.bf16.mxu1 %v2937_v47 }
 0x42c   :  { %2741 = vmatpush3.bf16.msra.mxu1 %v2937_v47 }
 0x42d   :  { %2754 = vmatprep.subr.bf16.mxu1 %v2938_v48 }
 0x42f   :  { %2743 = vmatmul.mubr.bf16.vlgmr.msra.gmra.mrb[8].mxu1 %v1395_v9  ;;  %v2033_v9 = vmul.f32 %v2821_v2, %v2363_v4 }
 0x430   :  { %2755 = vmatpush3.bf16.msra.mxu1 %v2938_v48  ;;  %2770 = vmatprep.mubr.bf16.mxu1 %v1584_v22 }
 0x431   :  { %2756 = vmatprep.subr.bf16.mxu1 %v2939_v49  ;;  %v2044_v17 = vadd.f32 %v2364_v6, %v2033_v9 }
 0x434   :  { %2757 = vmatpush3.bf16.msra.mxu1 %v2939_v49 }
 0x435   :  { %2758 = vmatprep.subr.bf16.mxu1 %v2940_v50 }
 0x438   :  { %2759 = vmatpush3.bf16.msra.mxu1 %v2940_v50 }
 0x439   :  { %2760 = vmatprep.subr.bf16.mxu1 %v2941_v51 }
 0x43c   :  { %2761 = vmatpush3.bf16.msra.mxu1 %v2941_v51 }
 0x43d   :  { %2762 = vmatprep.subr.bf16.mxu1 %v2942_v52 }
 0x440   :  { %2763 = vmatpush3.bf16.msra.mxu1 %v2942_v52 }
 0x441   :  { %2764 = vmatprep.subr.bf16.mxu1 %v2943_v53 }
 0x444   :  { %2765 = vmatpush3.bf16.msra.mxu1 %v2943_v53 }
 0x445   :  { %2766 = vmatprep.subr.bf16.mxu1 %v2944_v54 }
 0x448   :  { %2767 = vmatpush3.bf16.msra.mxu1 %v2944_v54 }
 0x449   :  { %2768 = vmatprep.subr.bf16.mxu1 %v2945_v55 }
 0x44c   :  { %2769 = vmatpush3.bf16.msra.mxu1 %v2945_v55 }
 0x44d   :  { %2782 = vmatprep.subr.bf16.mxu1 %v2947_v56 }
 0x44f   :  { %2771 = vmatmul.mubr.bf16.vlgmr.msra.gmra.mrb[8].mxu1 %v1585_v20 }
 0x450   :  { %2783 = vmatpush3.bf16.msra.mxu1 %v2947_v56  ;;  %2798 = vmatprep.mubr.bf16.mxu1 %v1774_v30 }
 0x451   :  { %2784 = vmatprep.subr.bf16.mxu1 %v2949_v57 }
 0x454   :  { %2785 = vmatpush3.bf16.msra.mxu1 %v2949_v57 }
 0x455   :  { %2786 = vmatprep.subr.bf16.mxu1 %v2951_v58 }
 0x458   :  { %2787 = vmatpush3.bf16.msra.mxu1 %v2951_v58 }
 0x459   :  { %2788 = vmatprep.subr.bf16.mxu1 %v2953_v59 }
 0x45c   :  { %2789 = vmatpush3.bf16.msra.mxu1 %v2953_v59 }
 0x45d   :  { %2790 = vmatprep.subr.bf16.mxu1 %v2955_v60 }
 0x460   :  { %2791 = vmatpush3.bf16.msra.mxu1 %v2955_v60 }
 0x461   :  { %2792 = vmatprep.subr.bf16.mxu1 %v2957_v61 }
 0x464   :  { %2793 = vmatpush3.bf16.msra.mxu1 %v2957_v61 }
 0x465   :  { %2794 = vmatprep.subr.bf16.mxu1 %v2959_v62 }
 0x468   :  { %2795 = vmatpush3.bf16.msra.mxu1 %v2959_v62 }
 0x469   :  { %2796 = vmatprep.subr.bf16.mxu1 %v2962_v63 }
 0x46c   :  { %2797 = vmatpush3.bf16.msra.mxu1 %v2962_v63 }
 0x46f   :  { %2799 = vmatmul.mubr.bf16.vlgmr.msra.gmra.mrb[8].mxu1 %v1775_v28 }
 0x542   :  { %v2800_v12 = vpop.f32.mrb[8].mxu1 }
 0x543   :  { %v2822_v13 = vadd.f32 %v2800_v12, %v3266_v35  ;;  %v1875_v14 = vpop.f32.mrb[9].mxu1 }
 0x544   :  { %v2823_v15 = vadd.f32 %v1875_v14, %v3268_v36  ;;  %v2801_v16 = vpop.f32.mrb[10].mxu1 }
 0x545   :  { %v2047_v18 = vadd.f32 %v2822_v13, %v2043_v8  ;;  %v2824_v19 = vadd.f32 %v2801_v16, %v3270_v37  ;;  %v1878_v20 = vpop.f32.mrb[11].mxu1 }
 0x546   :  { %v2045_v22 = vadd.f32 %v2823_v15, %v2041_v10  ;;  %v2825_v23 = vadd.f32 %v1878_v20, %v3272_v38 }
 0x547   :  { %v2048_v24 = vadd.f32 %v2824_v19, %v2044_v17 }
 0x548   :  { %v2046_v25 = vadd.f32 %v2825_v23, %v2042_v21 }
 0x549   :  { %v2381_v26 = vpack.c.bf16 %v2048_v24, %v2047_v18 }
 0x54a   :  { %v2376_v27 = vpack.c.bf16 %v2046_v25, %v2045_v22 }
 0x54b   :  { %2383 = vst [vmem:[%s3510_s10 + $0x8] sm:$0xff] %v2381_v26  }
 0x54c   :  { %2377 = vst [vmem:[%s3510_s10] sm:$0xff] %v2376_v27  }

// kernel: resnet_v2_forward.8
= control target key start
LH: loop header
LB: loop body
LE: loop exit
PB: predicated region body
PF: predicated region fallthrough
CT: control target
= control target key end

     0   :  { %s6737_s1 = inlined_call_operand.vmem [shape: bf16[128,128], index: 1, kind: input, shape index: {}]   ;;  %s6738_s0 = inlined_call_operand.vmem [shape: bf16[128,128], index: 0, kind: input, shape index: {}]   ;;  %s6739_s4 = inlined_call_operand.vmem [shape: bf16[9,128,128], index: 4, kind: input, shape index: {}]   ;;  %s6740_s2 = inlined_call_operand.vmem [shape: f32[1,128], index: 2, kind: input, shape index: {}]   ;;  %s6741_s3 = inlined_call_operand.vmem [shape: f32[1,128], index: 3, kind: input, shape index: {}]   ;;  %s6742_s5 = inlined_call_operand.vmem [shape: bf16[9,128,128], index: 5, kind: input, shape index: {}]   ;;  %s6743_s7 = inlined_call_operand.vmem [shape: bf16[128,128], index: 7, kind: input, shape index: {}]   ;;  %s6744_s6 = inlined_call_operand.vmem [shape: bf16[128,128], index: 6, kind: input, shape index: {}]   ;;  %s6745_s8 = inlined_call_operand.vmem [shape: f32[1,128], index: 8, kind: input, shape index: {}]   ;;  %s6746_s9 = inlined_call_operand.vmem [shape: f32[1,128], index: 9, kind: input, shape index: {}]   ;;  %s6747_s10 = inlined_call_operand.vmem [shape: bf16[128,128], index: 10, kind: output, shape index: {}]  }
   0x1   :  { %v5403_v0 = vld [vmem:[%s6737_s1] sm:$0xff]   ;;  %v5404_v1 = vld [vmem:[%s6737_s1 + $0x8] sm:$0xff]   ;;  %v5405_v2 = vld [vmem:[%s6737_s1 + $0x10] sm:$0xff]  }
   0x2   :  { %4635 = vmatprep.subr.bf16.mxu0 %v5403_v0  ;;  %v5406_v3 = vld [vmem:[%s6737_s1 + $0x18] sm:$0xff]   ;;  %v5411_v4 = vld [vmem:[%s6738_s0] sm:$0xff]   ;;  %v5408_v6 = vld [vmem:[%s6737_s1 + $0x28] sm:$0xff]  }
   0x3   :  { %4636 = vmatpush3.bf16.msra.mxu0 %v5403_v0  ;;  %4651 = vmatprep.mubr.bf16.mxu0 %v5411_v4  ;;  %v5407_v5 = vld [vmem:[%s6737_s1 + $0x20] sm:$0xff]   ;;  %v5409_v7 = vld [vmem:[%s6737_s1 + $0x30] sm:$0xff]   ;;  %v5410_v8 = vld [vmem:[%s6737_s1 + $0x38] sm:$0xff]  }
   0x4   :  { %4637 = vmatprep.subr.bf16.mxu0 %v5404_v1  ;;  %v5412_v9 = vld [vmem:[%s6738_s0 + $0x8] sm:$0xff]   ;;  %v5413_v10 = vld [vmem:[%s6738_s0 + $0x10] sm:$0xff]   ;;  %v5414_v11 = vld [vmem:[%s6738_s0 + $0x18] sm:$0xff]  }
   0x5   :  { %v5415_v12 = vld [vmem:[%s6738_s0 + $0x20] sm:$0xff]   ;;  %v5416_v13 = vld [vmem:[%s6738_s0 + $0x28] sm:$0xff]   ;;  %v5417_v14 = vld [vmem:[%s6738_s0 + $0x30] sm:$0xff]  }
   0x6   :  { %v5418_v15 = vld [vmem:[%s6738_s0 + $0x38] sm:$0xff]   ;;  %v5419_v16 = vld [vmem:[%s6739_s4 + $0x40] sm:$0xff]  }
   0x7   :  { %4638 = vmatpush3.bf16.msra.mxu0 %v5404_v1  ;;  %v5427_v17 = vld [vmem:[%s6739_s4] sm:$0xff]  }
   0x8   :  { %4639 = vmatprep.subr.bf16.mxu0 %v5405_v2  ;;  %4683 = vmatprep.mubr.bf16.mxu1 %v5427_v17  ;;  %v5691_v18 = vld [vmem:[%s6740_s2] ss:$0 sm:$0xff] }
   0x9   :  { %v5696_v20 = vld [vmem:[%s6741_s3] ss:$0 sm:$0xff] }
   0xb   :  { %4640 = vmatpush3.bf16.msra.mxu0 %v5405_v2 }
   0xc   :  { %4641 = vmatprep.subr.bf16.mxu0 %v5406_v3 }
   0xf   :  { %4642 = vmatpush3.bf16.msra.mxu0 %v5406_v3 }
  0x10   :  { %4643 = vmatprep.subr.bf16.mxu0 %v5407_v5 }
  0x13   :  { %4644 = vmatpush3.bf16.msra.mxu0 %v5407_v5 }
  0x14   :  { %4645 = vmatprep.subr.bf16.mxu0 %v5408_v6 }
  0x17   :  { %4646 = vmatpush3.bf16.msra.mxu0 %v5408_v6 }
  0x18   :  { %4647 = vmatprep.subr.bf16.mxu0 %v5409_v7 }
  0x1b   :  { %4648 = vmatpush3.bf16.msra.mxu0 %v5409_v7 }
  0x1c   :  { %4649 = vmatprep.subr.bf16.mxu0 %v5410_v8 }
  0x1f   :  { %4650 = vmatpush3.bf16.msra.mxu0 %v5410_v8 }
  0x22   :  { %4652 = vmatmul.mubr.bf16.vlgmr.msra.gmra.mrb[0].mxu0 %v5412_v9 }
  0x23   :  { %4655 = vmatprep.mubr.bf16.mxu0 %v5413_v10 }
  0x2a   :  { %4656 = vmatmul.mubr.bf16.gmra.mrb[4].mxu0 %v5414_v11 }
  0x2b   :  { %4659 = vmatprep.mubr.bf16.mxu0 %v5415_v12 }
  0x32   :  { %4660 = vmatmul.mubr.bf16.gmra.mrb[8].mxu0 %v5416_v13 }
  0x33   :  { %4663 = vmatprep.mubr.bf16.mxu0 %v5417_v14 }
  0x3a   :  { %4664 = vmatmul.mubr.bf16.gmra.mrb[12].mxu0 %v5418_v15 }
  0x3b   :  { %4715 = vmatprep.mubr.bf16.mxu0 %v5419_v16 }
  0xf5   :  { %v4653_v19 = vpop.f32.mrb[0].mxu0 }
  0xf6   :  { %v270_v21 = vmul.f32 %v4653_v19, %v5691_v18  ;;  %v198_v22 = vpop.f32.mrb[1].mxu0 }
  0xf7   :  { %v268_v23 = vmul.f32 %v5691_v18, %v198_v22  ;;  %v4654_v24 = vpop.f32.mrb[2].mxu0 }
  0xf8   :  { %v293_v25 = vadd.f32 %v5696_v20, %v270_v21  ;;  %v271_v26 = vmul.f32 %v4654_v24, %v5691_v18  ;;  %v201_v27 = vpop.f32.mrb[3].mxu0 }
  0xf9   :  { %v291_v28 = vadd.f32 %v5696_v20, %v268_v23  ;;  %v269_v29 = vmul.f32 %v5691_v18, %v201_v27 }
  0xfa   :  { %v294_v30 = vadd.f32 %v5696_v20, %v271_v26  ;;  %v309_v32 = vmax.f32 %v293_v25, 0.0 }
  0xfb   :  { %v292_v31 = vadd.f32 %v5696_v20, %v269_v29  ;;  %v307_v34 = vmax.f32 %v291_v28, 0.0  ;;  %v5428_v29 = vld [vmem:[%s6739_s4 + $0x8] sm:$0xff]  }
  0xfc   :  { %v310_v33 = vmax.f32 %v294_v30, 0.0  ;;  %v5421_v30 = vld [vmem:[%s6739_s4 + $0x50] sm:$0xff]  }
  0xfd   :  { %v308_v35 = vmax.f32 %v292_v31, 0.0  ;;  %v4657_v36 = vpop.f32.mrb[4].mxu0  ;;  %v5431_v31 = vld [vmem:[%s6739_s4 + $0x10] sm:$0xff]  }
  0xfe   :  { %v5706_v37 = vpack.c.bf16 %v310_v33, %v309_v32  ;;  %v274_v38 = vmul.f32 %v4657_v36, %v5691_v18  ;;  %v214_v39 = vpop.f32.mrb[5].mxu0  ;;  %v5422_v32 = vld [vmem:[%s6739_s4 + $0x58] sm:$0xff]   ;;  %v5424_v36 = vld [vmem:[%s6739_s4 + $0x68] sm:$0xff]  }
  0xff   :  { %v5709_v40 = vpack.c.bf16 %v308_v35, %v307_v34  ;;  %v272_v41 = vmul.f32 %v5691_v18, %v214_v39  ;;  %v4658_v42 = vpop.f32.mrb[6].mxu0  ;;  %v5432_v33 = vld [vmem:[%s6739_s4 + $0x18] sm:$0xff]   ;;  %v5423_v34 = vld [vmem:[%s6739_s4 + $0x60] sm:$0xff]   ;;  %v5425_v39 = vld [vmem:[%s6739_s4 + $0x70] sm:$0xff]  }
 0x100   :  { %v297_v43 = vadd.f32 %v5696_v20, %v274_v38  ;;  %v275_v44 = vmul.f32 %v4658_v42, %v5691_v18  ;;  %v217_v45 = vpop.f32.mrb[7].mxu0  ;;  %v5435_v35 = vld [vmem:[%s6739_s4 + $0x20] sm:$0xff]   ;;  %v5436_v38 = vld [vmem:[%s6739_s4 + $0x28] sm:$0xff]   ;;  %v5426_v42 = vld [vmem:[%s6739_s4 + $0x78] sm:$0xff]  }
 0x101   :  { %v295_v46 = vadd.f32 %v5696_v20, %v272_v41  ;;  %v273_v47 = vmul.f32 %v5691_v18, %v217_v45  ;;  %4667 = vmatprep.subr.bf16.mxu1 %v5709_v40  ;;  %4699 = vmatprep.subr.bf16.mxu0 %v5709_v40  ;;  %v5439_v41 = vld [vmem:[%s6739_s4 + $0x30] sm:$0xff]   ;;  %v5430_v45 = vld [vmem:[%s6739_s4 + $0x88] sm:$0xff]  }
 0x102   :  { %v298_v48 = vadd.f32 %v5696_v20, %v275_v44  ;;  %4668 = vmatpush3.bf16.msra.mxu1 %v5709_v40  ;;  %4700 = vmatpush3.bf16.msra.mxu0 %v5709_v40  ;;  %v313_v50 = vmax.f32 %v297_v43, 0.0  ;;  %v5440_v43 = vld [vmem:[%s6739_s4 + $0x38] sm:$0xff]   ;;  %v5429_v44 = vld [vmem:[%s6739_s4 + $0x80] sm:$0xff]  }
 0x103   :  { %v296_v49 = vadd.f32 %v5696_v20, %v273_v47  ;;  %4669 = vmatprep.subr.bf16.mxu1 %v5706_v37  ;;  %4701 = vmatprep.subr.bf16.mxu0 %v5706_v37  ;;  %v311_v52 = vmax.f32 %v295_v46, 0.0  ;;  %v5433_v46 = vld [vmem:[%s6739_s4 + $0x90] sm:$0xff]   ;;  %v5434_v47 = vld [vmem:[%s6739_s4 + $0x98] sm:$0xff]  }
 0x104   :  { %v314_v51 = vmax.f32 %v298_v48, 0.0  ;;  %v5437_v48 = vld [vmem:[%s6739_s4 + $0xa0] sm:$0xff]  }
 0x105   :  { %v312_v53 = vmax.f32 %v296_v49, 0.0  ;;  %v4661_v54 = vpop.f32.mrb[8].mxu0  ;;  %v5438_v49 = vld [vmem:[%s6739_s4 + $0xa8] sm:$0xff]  }
 0x106   :  { %v5724_v55 = vpack.c.bf16 %v314_v51, %v313_v50  ;;  %v278_v56 = vmul.f32 %v4661_v54, %v5691_v18  ;;  %v230_v57 = vpop.f32.mrb[9].mxu0  ;;  %4670 = vmatpush3.bf16.msra.mxu1 %v5706_v37  ;;  %4702 = vmatpush3.bf16.msra.mxu0 %v5706_v37  ;;  %v5441_v50 = vld [vmem:[%s6739_s4 + $0xb0] sm:$0xff]   ;;  %v5442_v51 = vld [vmem:[%s6739_s4 + $0xb8] sm:$0xff]   ;;  %v5444_v54 = vld [vmem:[%s6739_s4 + $0xc8] sm:$0xff]  }
 0x107   :  { %v5729_v58 = vpack.c.bf16 %v312_v53, %v311_v52  ;;  %v276_v59 = vmul.f32 %v5691_v18, %v230_v57  ;;  %v4662_v60 = vpop.f32.mrb[10].mxu0  ;;  %v5443_v52 = vld [vmem:[%s6739_s4 + $0xc0] sm:$0xff]   ;;  %v5476_v57 = vld [vmem:[%s6742_s5 + $0x48] sm:$0xff]  }
 0x108   :  { %v301_v61 = vadd.f32 %v5696_v20, %v278_v56  ;;  %v279_v62 = vmul.f32 %v4662_v60, %v5691_v18  ;;  %v233_v63 = vpop.f32.mrb[11].mxu0  ;;  %v5475_v53 = vld [vmem:[%s6742_s5 + $0x40] sm:$0xff]   ;;  %v5445_v56 = vld [vmem:[%s6739_s4 + $0xd0] sm:$0xff]   ;;  %v5446_v60 = vld [vmem:[%s6739_s4 + $0xd8] sm:$0xff]  }
 0x109   :  { %v299_v0 = vadd.f32 %v5696_v20, %v276_v59  ;;  %v277_v1 = vmul.f32 %v5691_v18, %v233_v63  ;;  %4671 = vmatprep.subr.bf16.mxu1 %v5729_v58  ;;  %4703 = vmatprep.subr.bf16.mxu0 %v5729_v58  ;;  %v5479_v59 = vld [vmem:[%s6742_s5 + $0x50] sm:$0xff]   ;;  %v5481_v63 = vld [vmem:[%s6742_s5 + $0x60] sm:$0xff]  }
 0x10a   :  { %v302_v2 = vadd.f32 %v5696_v20, %v279_v62  ;;  %4672 = vmatpush3.bf16.msra.mxu1 %v5729_v58  ;;  %4704 = vmatpush3.bf16.msra.mxu0 %v5729_v58  ;;  %v317_v4 = vmax.f32 %v301_v61, 0.0  ;;  %v5447_v61 = vld [vmem:[%s6739_s4 + $0xe0] sm:$0xff]   ;;  %v5480_v62 = vld [vmem:[%s6742_s5 + $0x58] sm:$0xff]  }
 0x10b   :  { %v300_v3 = vadd.f32 %v5696_v20, %v277_v1  ;;  %4673 = vmatprep.subr.bf16.mxu1 %v5724_v55  ;;  %4705 = vmatprep.subr.bf16.mxu0 %v5724_v55  ;;  %v315_v6 = vmax.f32 %v299_v0, 0.0  ;;  %v5448_v0 = vld [vmem:[%s6739_s4 + $0xe8] sm:$0xff]   ;;  %v5449_v1 = vld [vmem:[%s6739_s4 + $0xf0] sm:$0xff]  }
 0x10c   :  { %v318_v5 = vmax.f32 %v302_v2, 0.0  ;;  %v5482_v2 = vld [vmem:[%s6742_s5 + $0x68] sm:$0xff]  }
 0x10d   :  { %v316_v7 = vmax.f32 %v300_v3, 0.0  ;;  %v4665_v8 = vpop.f32.mrb[12].mxu0  ;;  %v5483_v3 = vld [vmem:[%s6742_s5 + $0x70] sm:$0xff]  }
 0x10e   :  { %v5744_v9 = vpack.c.bf16 %v318_v5, %v317_v4  ;;  %v282_v10 = vmul.f32 %v4665_v8, %v5691_v18  ;;  %v246_v11 = vpop.f32.mrb[13].mxu0  ;;  %4674 = vmatpush3.bf16.msra.mxu1 %v5724_v55  ;;  %4706 = vmatpush3.bf16.msra.mxu0 %v5724_v55  ;;  %v5450_v4 = vld [vmem:[%s6739_s4 + $0xf8] sm:$0xff]   ;;  %v5451_v5 = vld [vmem:[%s6739_s4 + $0x100] sm:$0xff]   ;;  %v5452_v8 = vld [vmem:[%s6739_s4 + $0x108] sm:$0xff]  }
 0x10f   :  { %v5749_v12 = vpack.c.bf16 %v316_v7, %v315_v6  ;;  %v280_v13 = vmul.f32 %v5691_v18, %v246_v11  ;;  %v4666_v14 = vpop.f32.mrb[14].mxu0  ;;  %v5484_v6 = vld [vmem:[%s6742_s5 + $0x78] sm:$0xff]   ;;  %v5943_v7 = vld [vmem:[%s6742_s5] sm:$0xff]  }
 0x110   :  { %v305_v15 = vadd.f32 %v5696_v20, %v282_v10  ;;  %v283_v16 = vmul.f32 %v4666_v14, %v5691_v18  ;;  %v249_v17 = vpop.f32.mrb[15].mxu0  ;;  %v5453_v10 = vld [vmem:[%s6739_s4 + $0x110] sm:$0xff]   ;;  %v5454_v11 = vld [vmem:[%s6739_s4 + $0x118] sm:$0xff]   ;;  %v5456_v14 = vld [vmem:[%s6739_s4 + $0x128] sm:$0xff]  }
 0x111   :  { %v303_v19 = vadd.f32 %v5696_v20, %v280_v13  ;;  %v281_v21 = vmul.f32 %v5691_v18, %v249_v17  ;;  %4675 = vmatprep.subr.bf16.mxu1 %v5749_v12  ;;  %4707 = vmatprep.subr.bf16.mxu0 %v5749_v12  ;;  %v5455_v13 = vld [vmem:[%s6739_s4 + $0x120] sm:$0xff]  }
 0x112   :  { %v306_v22 = vadd.f32 %v5696_v20, %v283_v16  ;;  %4676 = vmatpush3.bf16.msra.mxu1 %v5749_v12  ;;  %4708 = vmatpush3.bf16.msra.mxu0 %v5749_v12  ;;  %v321_v24 = vmax.f32 %v305_v15, 0.0  ;;  %v5457_v15 = vld [vmem:[%s6739_s4 + $0x130] sm:$0xff]   ;;  %v5458_v16 = vld [vmem:[%s6739_s4 + $0x138] sm:$0xff]   ;;  %v5459_v17 = vld [vmem:[%s6739_s4 + $0x140] sm:$0xff]  }
 0x113   :  { %v304_v23 = vadd.f32 %v5696_v20, %v281_v21  ;;  %4677 = vmatprep.subr.bf16.mxu1 %v5744_v9  ;;  %4709 = vmatprep.subr.bf16.mxu0 %v5744_v9  ;;  %v319_v26 = vmax.f32 %v303_v19, 0.0  ;;  %v5420_v20 = vld [vmem:[%s6739_s4 + $0x48] sm:$0xff]   ;;  %v5461_v21 = vld [vmem:[%s6739_s4 + $0x150] sm:$0xff]  }
 0x114   :  { %v322_v25 = vmax.f32 %v306_v22, 0.0  ;;  %v5460_v19 = vld [vmem:[%s6739_s4 + $0x148] sm:$0xff]   ;;  %v5462_v22 = vld [vmem:[%s6739_s4 + $0x158] sm:$0xff]  }
 0x115   :  { %v320_v18 = vmax.f32 %v304_v23, 0.0  ;;  %v5463_v23 = vld [vmem:[%s6739_s4 + $0x160] sm:$0xff]  }
 0x116   :  { %v5764_v27 = vpack.c.bf16 %v322_v25, %v321_v24  ;;  %4678 = vmatpush3.bf16.msra.mxu1 %v5744_v9  ;;  %4710 = vmatpush3.bf16.msra.mxu0 %v5744_v9  ;;  %v5464_v24 = vld [vmem:[%s6739_s4 + $0x168] sm:$0xff]   ;;  %v5465_v25 = vld [vmem:[%s6739_s4 + $0x170] sm:$0xff]  }
 0x117   :  { %v5768_v28 = vpack.c.bf16 %v320_v18, %v319_v26  ;;  %v5466_v26 = vld [vmem:[%s6739_s4 + $0x178] sm:$0xff]   ;;  %v5467_v18 = vld [vmem:[%s6739_s4 + $0x180] sm:$0xff]  }
 0x119   :  { %4679 = vmatprep.subr.bf16.mxu1 %v5768_v28  ;;  %4711 = vmatprep.subr.bf16.mxu0 %v5768_v28 }
 0x11a   :  { %4680 = vmatpush3.bf16.msra.mxu1 %v5768_v28  ;;  %4712 = vmatpush3.bf16.msra.mxu0 %v5768_v28 }
 0x11b   :  { %4681 = vmatprep.subr.bf16.mxu1 %v5764_v27  ;;  %4713 = vmatprep.subr.bf16.mxu0 %v5764_v27 }
 0x11e   :  { %4682 = vmatpush3.bf16.msra.mxu1 %v5764_v27  ;;  %4714 = vmatpush3.bf16.msra.mxu0 %v5764_v27 }
 0x11f   :  { %4795 = vmatprep.subr.bf16.mxu0 %v5709_v40  ;;  %4731 = vmatprep.subr.bf16.mxu1 %v5475_v53 }
 0x121   :  { %4716 = vmatmul.mubr.bf16.vlgmr.msra.gmra.mrb[16].mxu0 %v5420_v20  ;;  %4684 = vmatmul.mubr.bf16.vlgmr.msra.gmra.mrb[0].mxu1 %v5428_v29  ;;  %v5468_v20 = vld [vmem:[%s6739_s4 + $0x188] sm:$0xff]   ;;  %v5469_v29 = vld [vmem:[%s6739_s4 + $0x190] sm:$0xff]  }
 0x122   :  { %4796 = vmatpush3.bf16.msra.mxu0 %v5709_v40  ;;  %4719 = vmatprep.mubr.bf16.mxu0 %v5421_v30  ;;  %v5470_v30 = vld [vmem:[%s6739_s4 + $0x198] sm:$0xff]  }
 0x123   :  { %4797 = vmatprep.subr.bf16.mxu0 %v5706_v37  ;;  %4687 = vmatprep.mubr.bf16.mxu1 %v5431_v31  ;;  %v5471_v31 = vld [vmem:[%s6739_s4 + $0x1a0] sm:$0xff]  }
 0x124   :  { %4732 = vmatpush3.bf16.msra.mxu1 %v5475_v53 }
 0x125   :  { %4733 = vmatprep.subr.bf16.mxu1 %v5476_v57 }
 0x126   :  { %4798 = vmatpush3.bf16.msra.mxu0 %v5706_v37 }
 0x127   :  { %4799 = vmatprep.subr.bf16.mxu0 %v5729_v58 }
 0x128   :  { %4734 = vmatpush3.bf16.msra.mxu1 %v5476_v57  ;;  %v5487_v57 = vld [vmem:[%s6742_s5 + $0x10] sm:$0xff]  }
 0x129   :  { %4720 = vmatmul.mubr.bf16.gmra.mrb[20].mxu0 %v5422_v32  ;;  %4688 = vmatmul.mubr.bf16.gmra.mrb[4].mxu1 %v5432_v33  ;;  %v5472_v32 = vld [vmem:[%s6739_s4 + $0x1a8] sm:$0xff]   ;;  %v5473_v33 = vld [vmem:[%s6739_s4 + $0x1b0] sm:$0xff]  }
 0x12a   :  { %4800 = vmatpush3.bf16.msra.mxu0 %v5729_v58  ;;  %4723 = vmatprep.mubr.bf16.mxu0 %v5423_v34  ;;  %v5474_v34 = vld [vmem:[%s6739_s4 + $0x1b8] sm:$0xff]  }
 0x12b   :  { %4801 = vmatprep.subr.bf16.mxu0 %v5724_v55  ;;  %4691 = vmatprep.mubr.bf16.mxu1 %v5435_v35  ;;  %v5477_v35 = vld [vmem:[%s6739_s4 + $0x1c0] sm:$0xff]  }
 0x12c   :  { %4735 = vmatprep.subr.bf16.mxu1 %v5479_v59 }
 0x12d   :  { %4736 = vmatpush3.bf16.msra.mxu1 %v5479_v59 }
 0x12e   :  { %4802 = vmatpush3.bf16.msra.mxu0 %v5724_v55  ;;  %4737 = vmatprep.subr.bf16.mxu1 %v5480_v62 }
 0x12f   :  { %4803 = vmatprep.subr.bf16.mxu0 %v5749_v12 }
 0x131   :  { %4724 = vmatmul.mubr.bf16.gmra.mrb[24].mxu0 %v5424_v36  ;;  %4692 = vmatmul.mubr.bf16.gmra.mrb[8].mxu1 %v5436_v38  ;;  %v5478_v36 = vld [vmem:[%s6739_s4 + $0x1c8] sm:$0xff]   ;;  %v5488_v38 = vld [vmem:[%s6739_s4 + $0x1d0] sm:$0xff]  }
 0x132   :  { %4804 = vmatpush3.bf16.msra.mxu0 %v5749_v12  ;;  %4727 = vmatprep.mubr.bf16.mxu0 %v5425_v39  ;;  %v5490_v39 = vld [vmem:[%s6739_s4 + $0x1d8] sm:$0xff]  }
 0x133   :  { %4805 = vmatprep.subr.bf16.mxu0 %v5744_v9  ;;  %4695 = vmatprep.mubr.bf16.mxu1 %v5439_v41  ;;  %v5492_v41 = vld [vmem:[%s6739_s4 + $0x1e0] sm:$0xff]  }
 0x134   :  { %4738 = vmatpush3.bf16.msra.mxu1 %v5480_v62  ;;  %v5504_v62 = vld [vmem:[%s6739_s4 + $0x210] sm:$0xff]  }
 0x135   :  { %4739 = vmatprep.subr.bf16.mxu1 %v5481_v63 }
 0x136   :  { %4806 = vmatpush3.bf16.msra.mxu0 %v5744_v9 }
 0x137   :  { %4807 = vmatprep.subr.bf16.mxu0 %v5768_v28 }
 0x138   :  { %4740 = vmatpush3.bf16.msra.mxu1 %v5481_v63 }
 0x139   :  { %4728 = vmatmul.mubr.bf16.gmra.mrb[28].mxu0 %v5426_v42  ;;  %4696 = vmatmul.mubr.bf16.gmra.mrb[12].mxu1 %v5440_v43 }
 0x13a   :  { %4808 = vmatpush3.bf16.msra.mxu0 %v5768_v28  ;;  %4811 = vmatprep.mubr.bf16.mxu0 %v5429_v44 }
 0x13b   :  { %4809 = vmatprep.subr.bf16.mxu0 %v5764_v27  ;;  %4741 = vmatprep.subr.bf16.mxu1 %v5482_v2 }
 0x13c   :  { %4742 = vmatpush3.bf16.msra.mxu1 %v5482_v2 }
 0x13d   :  { %4743 = vmatprep.subr.bf16.mxu1 %v5483_v3 }
 0x13e   :  { %4810 = vmatpush3.bf16.msra.mxu0 %v5764_v27 }
 0x13f   :  { %4859 = vmatprep.subr.bf16.mxu0 %v5709_v40 }
 0x140   :  { %4744 = vmatpush3.bf16.msra.mxu1 %v5483_v3 }
 0x141   :  { %4812 = vmatmul.mubr.bf16.vlgmr.msra.gmra.mrb[32].mxu0 %v5430_v45  ;;  %4745 = vmatprep.subr.bf16.mxu1 %v5484_v6 }
 0x142   :  { %4860 = vmatpush3.bf16.msra.mxu0 %v5709_v40  ;;  %4815 = vmatprep.mubr.bf16.mxu0 %v5433_v46 }
 0x143   :  { %4861 = vmatprep.subr.bf16.mxu0 %v5706_v37 }
 0x144   :  { %4746 = vmatpush3.bf16.msra.mxu1 %v5484_v6 }
 0x145   :  { %4763 = vmatprep.subr.bf16.mxu1 %v5943_v7 }
 0x146   :  { %4862 = vmatpush3.bf16.msra.mxu0 %v5706_v37 }
 0x147   :  { %4863 = vmatprep.subr.bf16.mxu0 %v5729_v58 }
 0x149   :  { %4816 = vmatmul.mubr.bf16.gmra.mrb[36].mxu0 %v5434_v47 }
 0x14a   :  { %4864 = vmatpush3.bf16.msra.mxu0 %v5729_v58  ;;  %4819 = vmatprep.mubr.bf16.mxu0 %v5437_v48 }
 0x14b   :  { %4865 = vmatprep.subr.bf16.mxu0 %v5724_v55 }
 0x14e   :  { %4866 = vmatpush3.bf16.msra.mxu0 %v5724_v55 }
 0x14f   :  { %4867 = vmatprep.subr.bf16.mxu0 %v5749_v12 }
 0x151   :  { %4820 = vmatmul.mubr.bf16.gmra.mrb[40].mxu0 %v5438_v49 }
 0x152   :  { %4868 = vmatpush3.bf16.msra.mxu0 %v5749_v12  ;;  %4823 = vmatprep.mubr.bf16.mxu0 %v5441_v50 }
 0x153   :  { %4869 = vmatprep.subr.bf16.mxu0 %v5744_v9 }
 0x156   :  { %4870 = vmatpush3.bf16.msra.mxu0 %v5744_v9 }
 0x157   :  { %4871 = vmatprep.subr.bf16.mxu0 %v5768_v28 }
 0x159   :  { %4824 = vmatmul.mubr.bf16.gmra.mrb[44].mxu0 %v5442_v51 }
 0x15a   :  { %4872 = vmatpush3.bf16.msra.mxu0 %v5768_v28  ;;  %4875 = vmatprep.mubr.bf16.mxu0 %v5443_v52  ;;  %v5500_v52 = vld [vmem:[%s6739_s4 + $0x200] sm:$0xff]  }
 0x15b   :  { %4873 = vmatprep.subr.bf16.mxu0 %v5764_v27 }
 0x15e   :  { %4874 = vmatpush3.bf16.msra.mxu0 %v5764_v27 }
 0x15f   :  { %4923 = vmatprep.subr.bf16.mxu0 %v5709_v40 }
 0x161   :  { %4876 = vmatmul.mubr.bf16.vlgmr.msra.gmra.mrb[48].mxu0 %v5444_v54 }
 0x162   :  { %4924 = vmatpush3.bf16.msra.mxu0 %v5709_v40  ;;  %4879 = vmatprep.mubr.bf16.mxu0 %v5445_v56 }
 0x163   :  { %4925 = vmatprep.subr.bf16.mxu0 %v5706_v37 }
 0x166   :  { %4926 = vmatpush3.bf16.msra.mxu0 %v5706_v37 }
 0x167   :  { %4927 = vmatprep.subr.bf16.mxu0 %v5729_v58 }
 0x169   :  { %4880 = vmatmul.mubr.bf16.gmra.mrb[52].mxu0 %v5446_v60 }
 0x16a   :  { %4928 = vmatpush3.bf16.msra.mxu0 %v5729_v58  ;;  %4883 = vmatprep.mubr.bf16.mxu0 %v5447_v61 }
 0x16b   :  { %4929 = vmatprep.subr.bf16.mxu0 %v5724_v55 }
 0x16e   :  { %4930 = vmatpush3.bf16.msra.mxu0 %v5724_v55 }
 0x16f   :  { %4931 = vmatprep.subr.bf16.mxu0 %v5749_v12 }
 0x171   :  { %4884 = vmatmul.mubr.bf16.gmra.mrb[56].mxu0 %v5448_v0 }
 0x172   :  { %4932 = vmatpush3.bf16.msra.mxu0 %v5749_v12  ;;  %4887 = vmatprep.mubr.bf16.mxu0 %v5449_v1 }
 0x173   :  { %4933 = vmatprep.subr.bf16.mxu0 %v5744_v9 }
 0x176   :  { %4934 = vmatpush3.bf16.msra.mxu0 %v5744_v9 }
 0x177   :  { %4935 = vmatprep.subr.bf16.mxu0 %v5768_v28 }
 0x179   :  { %4888 = vmatmul.mubr.bf16.gmra.mrb[60].mxu0 %v5450_v4 }
 0x17a   :  { %4936 = vmatpush3.bf16.msra.mxu0 %v5768_v28  ;;  %4939 = vmatprep.mubr.bf16.mxu0 %v5451_v5 }
 0x17b   :  { %4937 = vmatprep.subr.bf16.mxu0 %v5764_v27 }
 0x17e   :  { %4938 = vmatpush3.bf16.msra.mxu0 %v5764_v27 }
 0x17f   :  { %4987 = vmatprep.subr.bf16.mxu0 %v5709_v40 }
 0x181   :  { %4940 = vmatmul.mubr.bf16.vlgmr.msra.gmra.mrb[64].mxu0 %v5452_v8  ;;  %v5491_v8 = vld [vmem:[%s6742_s5 + $0x20] sm:$0xff]  }
 0x182   :  { %4988 = vmatpush3.bf16.msra.mxu0 %v5709_v40  ;;  %4943 = vmatprep.mubr.bf16.mxu0 %v5453_v10 }
 0x183   :  { %4989 = vmatprep.subr.bf16.mxu0 %v5706_v37 }
 0x186   :  { %4990 = vmatpush3.bf16.msra.mxu0 %v5706_v37 }
 0x187   :  { %4991 = vmatprep.subr.bf16.mxu0 %v5729_v58 }
 0x189   :  { %4944 = vmatmul.mubr.bf16.gmra.mrb[68].mxu0 %v5454_v11  ;;  %v5506_v11 = vld [vmem:[%s6739_s4 + $0x218] sm:$0xff]  }
 0x18a   :  { %4992 = vmatpush3.bf16.msra.mxu0 %v5729_v58  ;;  %4947 = vmatprep.mubr.bf16.mxu0 %v5455_v13 }
 0x18b   :  { %4993 = vmatprep.subr.bf16.mxu0 %v5724_v55 }
 0x18e   :  { %4994 = vmatpush3.bf16.msra.mxu0 %v5724_v55 }
 0x18f   :  { %4995 = vmatprep.subr.bf16.mxu0 %v5749_v12 }
 0x191   :  { %4948 = vmatmul.mubr.bf16.gmra.mrb[72].mxu0 %v5456_v14 }
 0x192   :  { %4996 = vmatpush3.bf16.msra.mxu0 %v5749_v12  ;;  %4951 = vmatprep.mubr.bf16.mxu0 %v5457_v15  ;;  %v5508_v15 = vld [vmem:[%s6739_s4 + $0x220] sm:$0xff]  }
 0x193   :  { %4997 = vmatprep.subr.bf16.mxu0 %v5744_v9 }
 0x196   :  { %4998 = vmatpush3.bf16.msra.mxu0 %v5744_v9 }
 0x197   :  { %4999 = vmatprep.subr.bf16.mxu0 %v5768_v28 }
 0x199   :  { %4952 = vmatmul.mubr.bf16.gmra.mrb[76].mxu0 %v5458_v16 }
 0x19a   :  { %5000 = vmatpush3.bf16.msra.mxu0 %v5768_v28  ;;  %5003 = vmatprep.mubr.bf16.mxu0 %v5459_v17 }
 0x19b   :  { %5001 = vmatprep.subr.bf16.mxu0 %v5764_v27 }
 0x19e   :  { %5002 = vmatpush3.bf16.msra.mxu0 %v5764_v27 }
 0x19f   :  { %5051 = vmatprep.subr.bf16.mxu0 %v5709_v40 }
 0x1a1   :  { %5004 = vmatmul.mubr.bf16.vlgmr.msra.gmra.mrb[80].mxu0 %v5460_v19 }
 0x1a2   :  { %5052 = vmatpush3.bf16.msra.mxu0 %v5709_v40  ;;  %5007 = vmatprep.mubr.bf16.mxu0 %v5461_v21 }
 0x1a3   :  { %5053 = vmatprep.subr.bf16.mxu0 %v5706_v37 }
 0x1a6   :  { %5054 = vmatpush3.bf16.msra.mxu0 %v5706_v37 }
 0x1a7   :  { %5055 = vmatprep.subr.bf16.mxu0 %v5729_v58 }
 0x1a9   :  { %5008 = vmatmul.mubr.bf16.gmra.mrb[84].mxu0 %v5462_v22 }
 0x1aa   :  { %5056 = vmatpush3.bf16.msra.mxu0 %v5729_v58  ;;  %5011 = vmatprep.mubr.bf16.mxu0 %v5463_v23 }
 0x1ab   :  { %5057 = vmatprep.subr.bf16.mxu0 %v5724_v55 }
 0x1ae   :  { %5058 = vmatpush3.bf16.msra.mxu0 %v5724_v55 }
 0x1af   :  { %5059 = vmatprep.subr.bf16.mxu0 %v5749_v12 }
 0x1b1   :  { %5012 = vmatmul.mubr.bf16.gmra.mrb[88].mxu0 %v5464_v24  ;;  %v5493_v24 = vld [vmem:[%s6742_s5 + $0x28] sm:$0xff]  }
 0x1b2   :  { %5060 = vmatpush3.bf16.msra.mxu0 %v5749_v12  ;;  %5015 = vmatprep.mubr.bf16.mxu0 %v5465_v25 }
 0x1b3   :  { %5061 = vmatprep.subr.bf16.mxu0 %v5744_v9 }
 0x1b6   :  { %5062 = vmatpush3.bf16.msra.mxu0 %v5744_v9 }
 0x1b7   :  { %5063 = vmatprep.subr.bf16.mxu0 %v5768_v28 }
 0x1b9   :  { %5016 = vmatmul.mubr.bf16.gmra.mrb[92].mxu0 %v5466_v26 }
 0x1ba   :  { %5064 = vmatpush3.bf16.msra.mxu0 %v5768_v28  ;;  %5067 = vmatprep.mubr.bf16.mxu0 %v5467_v18 }
 0x1bb   :  { %5065 = vmatprep.subr.bf16.mxu0 %v5764_v27 }
 0x1be   :  { %5066 = vmatpush3.bf16.msra.mxu0 %v5764_v27 }
 0x1bf   :  { %5115 = vmatprep.subr.bf16.mxu0 %v5709_v40 }
 0x1c1   :  { %5068 = vmatmul.mubr.bf16.vlgmr.msra.gmra.mrb[96].mxu0 %v5468_v20  ;;  %v5495_v20 = vld [vmem:[%s6742_s5 + $0x30] sm:$0xff]  }
 0x1c2   :  { %5116 = vmatpush3.bf16.msra.mxu0 %v5709_v40  ;;  %5071 = vmatprep.mubr.bf16.mxu0 %v5469_v29 }
 0x1c3   :  { %5117 = vmatprep.subr.bf16.mxu0 %v5706_v37 }
 0x1c6   :  { %5118 = vmatpush3.bf16.msra.mxu0 %v5706_v37 }
 0x1c7   :  { %5119 = vmatprep.subr.bf16.mxu0 %v5729_v58 }
 0x1c9   :  { %5072 = vmatmul.mubr.bf16.gmra.mrb[100].mxu0 %v5470_v30  ;;  %v5510_v30 = vld [vmem:[%s6739_s4 + $0x228] sm:$0xff]  }
 0x1ca   :  { %5120 = vmatpush3.bf16.msra.mxu0 %v5729_v58  ;;  %5075 = vmatprep.mubr.bf16.mxu0 %v5471_v31 }
 0x1cb   :  { %5121 = vmatprep.subr.bf16.mxu0 %v5724_v55 }
 0x1ce   :  { %5122 = vmatpush3.bf16.msra.mxu0 %v5724_v55 }
 0x1cf   :  { %5123 = vmatprep.subr.bf16.mxu0 %v5749_v12 }
 0x1d1   :  { %5076 = vmatmul.mubr.bf16.gmra.mrb[104].mxu0 %v5472_v32 }
 0x1d2   :  { %5124 = vmatpush3.bf16.msra.mxu0 %v5749_v12  ;;  %5079 = vmatprep.mubr.bf16.mxu0 %v5473_v33  ;;  %v5512_v33 = vld [vmem:[%s6739_s4 + $0x230] sm:$0xff]  }
 0x1d3   :  { %5125 = vmatprep.subr.bf16.mxu0 %v5744_v9 }
 0x1d6   :  { %5126 = vmatpush3.bf16.msra.mxu0 %v5744_v9 }
 0x1d7   :  { %5127 = vmatprep.subr.bf16.mxu0 %v5768_v28 }
 0x1d9   :  { %5080 = vmatmul.mubr.bf16.gmra.mrb[108].mxu0 %v5474_v34 }
 0x1da   :  { %5128 = vmatpush3.bf16.msra.mxu0 %v5768_v28  ;;  %5131 = vmatprep.mubr.bf16.mxu0 %v5477_v35 }
 0x1db   :  { %5129 = vmatprep.subr.bf16.mxu0 %v5764_v27 }
 0x1de   :  { %5130 = vmatpush3.bf16.msra.mxu0 %v5764_v27 }
 0x1df   :  { %5179 = vmatprep.subr.bf16.mxu0 %v5709_v40 }
 0x1e1   :  { %5132 = vmatmul.mubr.bf16.vlgmr.msra.gmra.mrb[112].mxu0 %v5478_v36 }
 0x1e2   :  { %5180 = vmatpush3.bf16.msra.mxu0 %v5709_v40  ;;  %5135 = vmatprep.mubr.bf16.mxu0 %v5488_v38  ;;  %v5494_v40 = vld [vmem:[%s6739_s4 + $0x1e8] sm:$0xff]  }
 0x1e3   :  { %5181 = vmatprep.subr.bf16.mxu0 %v5706_v37 }
 0x1e6   :  { %5182 = vmatpush3.bf16.msra.mxu0 %v5706_v37  ;;  %v5496_v37 = vld [vmem:[%s6739_s4 + $0x1f0] sm:$0xff]  }
 0x1e7   :  { %5183 = vmatprep.subr.bf16.mxu0 %v5729_v58 }
 0x1e9   :  { %5136 = vmatmul.mubr.bf16.gmra.mrb[116].mxu0 %v5490_v39 }
 0x1ea   :  { %5184 = vmatpush3.bf16.msra.mxu0 %v5729_v58  ;;  %5139 = vmatprep.mubr.bf16.mxu0 %v5492_v41 }
 0x1eb   :  { %5185 = vmatprep.subr.bf16.mxu0 %v5724_v55 }
 0x1ee   :  { %5186 = vmatpush3.bf16.msra.mxu0 %v5724_v55  ;;  %v5498_v55 = vld [vmem:[%s6739_s4 + $0x1f8] sm:$0xff]  }
 0x1ef   :  { %5187 = vmatprep.subr.bf16.mxu0 %v5749_v12 }
 0x1f1   :  { %5140 = vmatmul.mubr.bf16.gmra.mrb[120].mxu0 %v5494_v40  ;;  %v5497_v40 = vld [vmem:[%s6742_s5 + $0x38] sm:$0xff]  }
 0x1f2   :  { %5188 = vmatpush3.bf16.msra.mxu0 %v5749_v12  ;;  %5143 = vmatprep.mubr.bf16.mxu0 %v5496_v37 }
 0x1f3   :  { %5189 = vmatprep.subr.bf16.mxu0 %v5744_v9 }
 0x1f4   :  { %v4717_v58 = vpop.f32.mrb[16].mxu0  ;;  %v6098_v42 = vpop.f32.mrb[0].mxu1 }
 0x1f5   :  { %v615_v43 = vpop.f32.mrb[17].mxu0  ;;  %v6100_v44 = vpop.f32.mrb[1].mxu1 }
 0x1f6   :  { %v4718_v45 = vpop.f32.mrb[18].mxu0  ;;  %5190 = vmatpush3.bf16.msra.mxu0 %v5744_v9  ;;  %v6106_v46 = vpop.f32.mrb[2].mxu1  ;;  %v5486_v9 = vld [vmem:[%s6742_s5 + $0x8] sm:$0xff]  }
 0x1f7   :  { %v679_v47 = vpack.c.bf16 %v4718_v45, %v4717_v58  ;;  %v618_v12 = vpop.f32.mrb[19].mxu0  ;;  %5191 = vmatprep.subr.bf16.mxu0 %v5768_v28  ;;  %v493_v48 = vpack.c.bf16 %v6106_v46, %v6098_v42  ;;  %v6111_v49 = vpop.f32.mrb[3].mxu1  ;;  %v5499_v58 = vld [vmem:[%s6742_s5 + $0x80] sm:$0xff]  }
 0x1f8   :  { %v678_v50 = vpack.c.bf16 %v618_v12, %v615_v43  ;;  %v492_v51 = vpack.c.bf16 %v6111_v49, %v6100_v44  ;;  %v5501_v49 = vld [vmem:[%s6742_s5 + $0x88] sm:$0xff]  }
 0x1f9   :  { %5144 = vmatmul.mubr.bf16.gmra.mrb[124].mxu0 %v5498_v55  ;;  %v5514_v55 = vld [vmem:[%s6739_s4 + $0x238] sm:$0xff]  }
 0x1fa   :  { %4747 = vmatprep.mubr.bf16.mxu1 %v678_v50  ;;  %5192 = vmatpush3.bf16.msra.mxu0 %v5768_v28  ;;  %v5502_v28 = vld [vmem:[%s6739_s4 + $0x208] sm:$0xff]  }
 0x1fb   :  { %4748 = vmatmul.mubr.bf16.vlgmr.msra.gmra.mrb[16].mxu1 %v679_v47  ;;  %5193 = vmatprep.subr.bf16.mxu0 %v5764_v27 }
 0x1fc   :  { %v4721_v53 = vpop.f32.mrb[20].mxu0  ;;  %4764 = vmatpush3.bf16.msra.mxu1 %v5943_v7  ;;  %v6124_v54 = vpop.f32.mrb[4].mxu1  ;;  %5195 = vmatprep.mubr.bf16.mxu0 %v5500_v52 }
 0x1fd   :  { %v631_v56 = vpop.f32.mrb[21].mxu0  ;;  %4765 = vmatprep.subr.bf16.mxu1 %v5486_v9  ;;  %v6129_v59 = vpop.f32.mrb[5].mxu1 }
 0x1fe   :  { %v4722_v60 = vpop.f32.mrb[22].mxu0  ;;  %5194 = vmatpush3.bf16.msra.mxu0 %v5764_v27  ;;  %v6135_v61 = vpop.f32.mrb[6].mxu1  ;;  %v5489_v27 = vld [vmem:[%s6742_s5 + $0x18] sm:$0xff]  }
 0x1ff   :  { %v681_v63 = vpack.c.bf16 %v4722_v60, %v4721_v53  ;;  %v634_v0 = vpop.f32.mrb[23].mxu0  ;;  %v495_v1 = vpack.c.bf16 %v6135_v61, %v6124_v54  ;;  %v6142_v2 = vpop.f32.mrb[7].mxu1  ;;  %v5509_v54 = vld [vmem:[%s6742_s5 + $0xa8] sm:$0xff]  }
 0x200   :  { %v680_v3 = vpack.c.bf16 %v634_v0, %v631_v56  ;;  %4766 = vmatpush3.bf16.msra.mxu1 %v5486_v9  ;;  %v494_v4 = vpack.c.bf16 %v6142_v2, %v6129_v59  ;;  %v5511_v0 = vld [vmem:[%s6742_s5 + $0xb0] sm:$0xff]  }
 0x201   :  { %4767 = vmatprep.subr.bf16.mxu1 %v5487_v57  ;;  %5196 = vmatmul.mubr.bf16.vlgmr.msra.gmra.mrb[128].mxu0 %v5502_v28 }
 0x202   :  { %4751 = vmatprep.mubr.bf16.mxu1 %v680_v3  ;;  %5199 = vmatprep.mubr.bf16.mxu0 %v5504_v62 }
 0x203   :  { %4752 = vmatmul.mubr.bf16.gmra.mrb[20].mxu1 %v681_v63 }
 0x204   :  { %v4725_v5 = vpop.f32.mrb[24].mxu0  ;;  %4768 = vmatpush3.bf16.msra.mxu1 %v5487_v57  ;;  %v6149_v6 = vpop.f32.mrb[8].mxu1  ;;  %v5507_v57 = vld [vmem:[%s6742_s5 + $0xa0] sm:$0xff]  }
 0x205   :  { %v647_v7 = vpop.f32.mrb[25].mxu0  ;;  %4769 = vmatprep.subr.bf16.mxu1 %v5489_v27  ;;  %v6154_v10 = vpop.f32.mrb[9].mxu1 }
 0x206   :  { %v4726_v13 = vpop.f32.mrb[26].mxu0  ;;  %v6159_v14 = vpop.f32.mrb[10].mxu1 }
 0x207   :  { %v683_v16 = vpack.c.bf16 %v4726_v13, %v4725_v5  ;;  %v650_v17 = vpop.f32.mrb[27].mxu0  ;;  %v497_v19 = vpack.c.bf16 %v6159_v14, %v6149_v6  ;;  %v6166_v21 = vpop.f32.mrb[11].mxu1  ;;  %v5513_v5 = vld [vmem:[%s6742_s5 + $0xb8] sm:$0xff]  }
 0x208   :  { %v682_v22 = vpack.c.bf16 %v650_v17, %v647_v7  ;;  %4770 = vmatpush3.bf16.msra.mxu1 %v5489_v27  ;;  %v496_v23 = vpack.c.bf16 %v6166_v21, %v6154_v10  ;;  %v5515_v7 = vld [vmem:[%s6742_s5 + $0xc0] sm:$0xff]   ;;  %v5517_v17 = vld [vmem:[%s6742_s5 + $0xd0] sm:$0xff]  }
 0x209   :  { %4771 = vmatprep.subr.bf16.mxu1 %v5491_v8  ;;  %5200 = vmatmul.mubr.bf16.gmra.mrb[132].mxu0 %v5506_v11 }
 0x20a   :  { %4755 = vmatprep.mubr.bf16.mxu1 %v682_v22  ;;  %5203 = vmatprep.mubr.bf16.mxu0 %v5508_v15  ;;  %v5516_v15 = vld [vmem:[%s6742_s5 + $0xc8] sm:$0xff]  }
 0x20b   :  { %4756 = vmatmul.mubr.bf16.gmra.mrb[24].mxu1 %v683_v16 }
 0x20c   :  { %v4729_v25 = vpop.f32.mrb[28].mxu0  ;;  %4772 = vmatpush3.bf16.msra.mxu1 %v5491_v8  ;;  %v6173_v26 = vpop.f32.mrb[12].mxu1 }
 0x20d   :  { %v663_v18 = vpop.f32.mrb[29].mxu0  ;;  %4773 = vmatprep.subr.bf16.mxu1 %v5493_v24  ;;  %v6178_v29 = vpop.f32.mrb[13].mxu1 }
 0x20e   :  { %v4730_v31 = vpop.f32.mrb[30].mxu0  ;;  %v6183_v32 = vpop.f32.mrb[14].mxu1 }
 0x20f   :  { %v685_v34 = vpack.c.bf16 %v4730_v31, %v4729_v25  ;;  %v666_v35 = vpop.f32.mrb[31].mxu0  ;;  %v499_v36 = vpack.c.bf16 %v6183_v32, %v6173_v26  ;;  %v480_v38 = vpop.f32.mrb[15].mxu1  ;;  %v5518_v25 = vld [vmem:[%s6742_s5 + $0xd8] sm:$0xff]  }
 0x210   :  { %v684_v39 = vpack.c.bf16 %v666_v35, %v663_v18  ;;  %4774 = vmatpush3.bf16.msra.mxu1 %v5493_v24  ;;  %v498_v41 = vpack.c.bf16 %v480_v38, %v6178_v29  ;;  %v5519_v18 = vld [vmem:[%s6742_s5 + $0xe0] sm:$0xff]   ;;  %v5521_v35 = vld [vmem:[%s6742_s5 + $0xf0] sm:$0xff]  }
 0x211   :  { %4775 = vmatprep.subr.bf16.mxu1 %v5495_v20  ;;  %5204 = vmatmul.mubr.bf16.gmra.mrb[136].mxu0 %v5510_v30 }
 0x212   :  { %4759 = vmatprep.mubr.bf16.mxu1 %v684_v39  ;;  %5207 = vmatprep.mubr.bf16.mxu0 %v5512_v33  ;;  %v5520_v33 = vld [vmem:[%s6742_s5 + $0xe8] sm:$0xff]  }
 0x213   :  { %4760 = vmatmul.mubr.bf16.gmra.mrb[28].mxu1 %v685_v34 }
 0x214   :  { %4776 = vmatpush3.bf16.msra.mxu1 %v5495_v20  ;;  %4779 = vmatprep.mubr.bf16.mxu1 %v492_v51  ;;  %v6197_v37 = vpop.f32.mrb[32].mxu0  ;;  %v5503_v51 = vld [vmem:[%s6742_s5 + $0x90] sm:$0xff]  }
 0x215   :  { %4777 = vmatprep.subr.bf16.mxu1 %v5497_v40  ;;  %v1092_v43 = vpop.f32.mrb[33].mxu0 }
 0x216   :  { %v6205_v45 = vpop.f32.mrb[34].mxu0 }
 0x217   :  { %v1156_v47 = vpack.c.bf16 %v6205_v45, %v6197_v37  ;;  %v1095_v12 = vpop.f32.mrb[35].mxu0  ;;  %v5522_v37 = vld [vmem:[%s6742_s5 + $0xf8] sm:$0xff]  }
 0x218   :  { %4778 = vmatpush3.bf16.msra.mxu1 %v5497_v40  ;;  %v1155_v44 = vpack.c.bf16 %v1095_v12, %v1092_v43  ;;  %v5556_v12 = vld [vmem:[%s6743_s7 + $0x8] sm:$0xff]  }
 0x219   :  { %4827 = vmatprep.subr.bf16.mxu1 %v5499_v58  ;;  %5208 = vmatmul.mubr.bf16.gmra.mrb[140].mxu0 %v5514_v55  ;;  %v5523_v55 = vld [vmem:[%s6742_s5 + $0x100] sm:$0xff]  }
 0x21b   :  { %4780 = vmatmul.mubr.bf16.vlgmr.msra.gmra.mrb[16].mxu1 %v493_v48  ;;  %v5505_v48 = vld [vmem:[%s6742_s5 + $0x98] sm:$0xff]  }
 0x21c   :  { %4828 = vmatpush3.bf16.msra.mxu1 %v5499_v58  ;;  %4783 = vmatprep.mubr.bf16.mxu1 %v494_v4  ;;  %v6218_v50 = vpop.f32.mrb[36].mxu0  ;;  %v5554_v58 = vld [vmem:[%s6743_s7] sm:$0xff]  }
 0x21d   :  { %4829 = vmatprep.subr.bf16.mxu1 %v5501_v49  ;;  %v1108_v52 = vpop.f32.mrb[37].mxu0  ;;  %5243 = vmatprep.subr.bf16.mxu0 %v5554_v58 }
 0x21e   :  { %v6223_v9 = vpop.f32.mrb[38].mxu0  ;;  %5244 = vmatpush3.bf16.msra.mxu0 %v5554_v58 }
 0x21f   :  { %v1158_v53 = vpack.c.bf16 %v6223_v9, %v6218_v50  ;;  %v1111_v42 = vpop.f32.mrb[39].mxu0  ;;  %5245 = vmatprep.subr.bf16.mxu0 %v5556_v12 }
 0x220   :  { %4830 = vmatpush3.bf16.msra.mxu1 %v5501_v49  ;;  %v1157_v46 = vpack.c.bf16 %v1111_v42, %v1108_v52  ;;  %v5558_v52 = vld [vmem:[%s6743_s7 + $0x10] sm:$0xff]  }
 0x221   :  { %4831 = vmatprep.subr.bf16.mxu1 %v5503_v51 }
 0x222   :  { %5246 = vmatpush3.bf16.msra.mxu0 %v5556_v12  ;;  %v5536_v12 = vld [vmem:[%s6742_s5 + $0x168] sm:$0xff]  }
 0x223   :  { %4784 = vmatmul.mubr.bf16.gmra.mrb[20].mxu1 %v495_v1  ;;  %5247 = vmatprep.subr.bf16.mxu0 %v5558_v52 }
 0x224   :  { %4832 = vmatpush3.bf16.msra.mxu1 %v5503_v51  ;;  %4787 = vmatprep.mubr.bf16.mxu1 %v496_v23  ;;  %v6233_v56 = vpop.f32.mrb[40].mxu0  ;;  %v5524_v51 = vld [vmem:[%s6742_s5 + $0x108] sm:$0xff]  }
 0x225   :  { %4833 = vmatprep.subr.bf16.mxu1 %v5505_v48  ;;  %v1124_v59 = vpop.f32.mrb[41].mxu0 }
 0x226   :  { %v6238_v28 = vpop.f32.mrb[42].mxu0  ;;  %5248 = vmatpush3.bf16.msra.mxu0 %v5558_v52 }
 0x227   :  { %v1160_v60 = vpack.c.bf16 %v6238_v28, %v6233_v56  ;;  %v1127_v62 = vpop.f32.mrb[43].mxu0  ;;  %v5526_v28 = vld [vmem:[%s6742_s5 + $0x118] sm:$0xff]  }
 0x228   :  { %4834 = vmatpush3.bf16.msra.mxu1 %v5505_v48  ;;  %v1159_v63 = vpack.c.bf16 %v1127_v62, %v1124_v59  ;;  %v5560_v48 = vld [vmem:[%s6743_s7 + $0x18] sm:$0xff]  }
 0x229   :  { %4835 = vmatprep.subr.bf16.mxu1 %v5507_v57  ;;  %5249 = vmatprep.subr.bf16.mxu0 %v5560_v48 }
 0x22a   :  { %5250 = vmatpush3.bf16.msra.mxu0 %v5560_v48  ;;  %v5538_v48 = vld [vmem:[%s6742_s5 + $0x178] sm:$0xff]  }
 0x22b   :  { %4788 = vmatmul.mubr.bf16.gmra.mrb[24].mxu1 %v497_v19 }
 0x22c   :  { %4836 = vmatpush3.bf16.msra.mxu1 %v5507_v57  ;;  %4791 = vmatprep.mubr.bf16.mxu1 %v498_v41  ;;  %v6248_v61 = vpop.f32.mrb[44].mxu0 }
 0x22d   :  { %4837 = vmatprep.subr.bf16.mxu1 %v5509_v54  ;;  %v1140_v1 = vpop.f32.mrb[45].mxu0 }
 0x22e   :  { %v6253_v2 = vpop.f32.mrb[46].mxu0 }
 0x22f   :  { %v1162_v3 = vpack.c.bf16 %v6253_v2, %v6248_v61  ;;  %v1143_v4 = vpop.f32.mrb[47].mxu0 }
 0x230   :  { %4838 = vmatpush3.bf16.msra.mxu1 %v5509_v54  ;;  %v1161_v27 = vpack.c.bf16 %v1143_v4, %v1140_v1  ;;  %v5528_v4 = vld [vmem:[%s6742_s5 + $0x128] sm:$0xff]  }
 0x231   :  { %4839 = vmatprep.subr.bf16.mxu1 %v5511_v0 }
 0x233   :  { %4792 = vmatmul.mubr.bf16.gmra.mrb[28].mxu1 %v499_v36 }
 0x234   :  { %4840 = vmatpush3.bf16.msra.mxu1 %v5511_v0  ;;  %4843 = vmatprep.mubr.bf16.mxu1 %v1155_v44  ;;  %v6263_v6 = vpop.f32.mrb[48].mxu0  ;;  %v5564_v0 = vld [vmem:[%s6743_s7 + $0x28] sm:$0xff]  }
 0x235   :  { %4841 = vmatprep.subr.bf16.mxu1 %v5513_v5  ;;  %v1440_v8 = vpop.f32.mrb[49].mxu0 }
 0x236   :  { %v6268_v10 = vpop.f32.mrb[50].mxu0 }
 0x237   :  { %v1504_v11 = vpack.c.bf16 %v6268_v10, %v6263_v6  ;;  %v1443_v13 = vpop.f32.mrb[51].mxu0  ;;  %v5529_v6 = vld [vmem:[%s6742_s5 + $0x130] sm:$0xff]   ;;  %v5568_v10 = vld [vmem:[%s6743_s7 + $0x38] sm:$0xff]  }
 0x238   :  { %4842 = vmatpush3.bf16.msra.mxu1 %v5513_v5  ;;  %v1503_v14 = vpack.c.bf16 %v1443_v13, %v1440_v8 }
 0x239   :  { %4891 = vmatprep.subr.bf16.mxu1 %v5515_v7 }
 0x23b   :  { %4844 = vmatmul.mubr.bf16.vlgmr.msra.gmra.mrb[16].mxu1 %v1156_v47 }
 0x23c   :  { %4892 = vmatpush3.bf16.msra.mxu1 %v5515_v7  ;;  %4847 = vmatprep.mubr.bf16.mxu1 %v1157_v46  ;;  %v6275_v16 = vpop.f32.mrb[52].mxu0 }
 0x23d   :  { %4893 = vmatprep.subr.bf16.mxu1 %v5516_v15  ;;  %v1456_v19 = vpop.f32.mrb[53].mxu0 }
 0x23e   :  { %v6280_v21 = vpop.f32.mrb[54].mxu0 }
 0x23f   :  { %v1506_v22 = vpack.c.bf16 %v6280_v21, %v6275_v16  ;;  %v1459_v23 = vpop.f32.mrb[55].mxu0  ;;  %v5570_v16 = vld [vmem:[%s6744_s6] sm:$0xff]  }
 0x240   :  { %4894 = vmatpush3.bf16.msra.mxu1 %v5516_v15  ;;  %v1505_v24 = vpack.c.bf16 %v1459_v23, %v1456_v19  ;;  %v5530_v15 = vld [vmem:[%s6742_s5 + $0x138] sm:$0xff]   ;;  %v5531_v21 = vld [vmem:[%s6742_s5 + $0x140] sm:$0xff]   ;;  %5259 = vmatprep.mubr.bf16.mxu0 %v5570_v16 }
 0x241   :  { %4895 = vmatprep.subr.bf16.mxu1 %v5517_v17 }
 0x243   :  { %4848 = vmatmul.mubr.bf16.gmra.mrb[20].mxu1 %v1158_v53  ;;  %v5525_v53 = vld [vmem:[%s6742_s5 + $0x110] sm:$0xff]  }
 0x244   :  { %4896 = vmatpush3.bf16.msra.mxu1 %v5517_v17  ;;  %4851 = vmatprep.mubr.bf16.mxu1 %v1159_v63  ;;  %v6287_v26 = vpop.f32.mrb[56].mxu0  ;;  %v5527_v63 = vld [vmem:[%s6742_s5 + $0x120] sm:$0xff]   ;;  %v5571_v17 = vld [vmem:[%s6744_s6 + $0x8] sm:$0xff]  }
 0x245   :  { %4897 = vmatprep.subr.bf16.mxu1 %v5518_v25  ;;  %v6292_v20 = vpop.f32.mrb[57].mxu0 }
 0x246   :  { %v6294_v29 = vpop.f32.mrb[58].mxu0 }
 0x247   :  { %v1508_v30 = vpack.c.bf16 %v6294_v29, %v6287_v26  ;;  %v6298_v31 = vpop.f32.mrb[59].mxu0  ;;  %v5574_v29 = vld [vmem:[%s6744_s6 + $0x18] sm:$0xff]  }
 0x248   :  { %4898 = vmatpush3.bf16.msra.mxu1 %v5518_v25  ;;  %v1507_v32 = vpack.c.bf16 %v6298_v31, %v6292_v20  ;;  %v5573_v20 = vld [vmem:[%s6744_s6 + $0x10] sm:$0xff]  }
 0x249   :  { %4899 = vmatprep.subr.bf16.mxu1 %v5519_v18  ;;  %v5533_v31 = vld [vmem:[%s6742_s5 + $0x150] sm:$0xff]  }
 0x24b   :  { %4852 = vmatmul.mubr.bf16.gmra.mrb[24].mxu1 %v1160_v60  ;;  %v5562_v60 = vld [vmem:[%s6743_s7 + $0x20] sm:$0xff]  }
 0x24c   :  { %4900 = vmatpush3.bf16.msra.mxu1 %v5519_v18  ;;  %4855 = vmatprep.mubr.bf16.mxu1 %v1161_v27  ;;  %v6305_v34 = vpop.f32.mrb[60].mxu0  ;;  %v5566_v27 = vld [vmem:[%s6743_s7 + $0x30] sm:$0xff]   ;;  %v5532_v18 = vld [vmem:[%s6742_s5 + $0x148] sm:$0xff]  }
 0x24d   :  { %4901 = vmatprep.subr.bf16.mxu1 %v5520_v33  ;;  %v6310_v36 = vpop.f32.mrb[61].mxu0  ;;  %5251 = vmatprep.subr.bf16.mxu0 %v5562_v60 }
 0x24e   :  { %v6312_v38 = vpop.f32.mrb[62].mxu0  ;;  %5252 = vmatpush3.bf16.msra.mxu0 %v5562_v60 }
 0x24f   :  { %v1510_v39 = vpack.c.bf16 %v6312_v38, %v6305_v34  ;;  %v6316_v41 = vpop.f32.mrb[63].mxu0  ;;  %5253 = vmatprep.subr.bf16.mxu0 %v5564_v0  ;;  %v5534_v38 = vld [vmem:[%s6742_s5 + $0x158] sm:$0xff]  }
 0x250   :  { %4902 = vmatpush3.bf16.msra.mxu1 %v5520_v33  ;;  %v1509_v40 = vpack.c.bf16 %v6316_v41, %v6310_v36  ;;  %v5576_v41 = vld [vmem:[%s6744_s6 + $0x28] sm:$0xff]  }
 0x251   :  { %4903 = vmatprep.subr.bf16.mxu1 %v5521_v35 }
 0x252   :  { %5254 = vmatpush3.bf16.msra.mxu0 %v5564_v0  ;;  %v5541_v0 = vld [vmem:[%s6742_s5 + $0x190] sm:$0xff]  }
 0x253   :  { %4856 = vmatmul.mubr.bf16.gmra.mrb[28].mxu1 %v1162_v3  ;;  %5255 = vmatprep.subr.bf16.mxu0 %v5566_v27 }
 0x254   :  { %4904 = vmatpush3.bf16.msra.mxu1 %v5521_v35  ;;  %4907 = vmatprep.mubr.bf16.mxu1 %v1503_v14  ;;  %v6329_v43 = vpop.f32.mrb[64].mxu0 }
 0x255   :  { %4905 = vmatprep.subr.bf16.mxu1 %v5522_v37  ;;  %v6334_v45 = vpop.f32.mrb[65].mxu0 }
 0x256   :  { %v6336_v47 = vpop.f32.mrb[66].mxu0  ;;  %5256 = vmatpush3.bf16.msra.mxu0 %v5566_v27 }
 0x257   :  { %v1852_v44 = vpack.c.bf16 %v6336_v47, %v6329_v43  ;;  %v6343_v49 = vpop.f32.mrb[67].mxu0  ;;  %5257 = vmatprep.subr.bf16.mxu0 %v5568_v10 }
 0x258   :  { %4906 = vmatpush3.bf16.msra.mxu1 %v5522_v37  ;;  %v1851_v50 = vpack.c.bf16 %v6343_v49, %v6334_v45  ;;  %v5535_v37 = vld [vmem:[%s6742_s5 + $0x160] sm:$0xff]   ;;  %v5578_v49 = vld [vmem:[%s6744_s6 + $0x38] sm:$0xff]  }
 0x259   :  { %4955 = vmatprep.subr.bf16.mxu1 %v5523_v55 }
 0x25a   :  { %5258 = vmatpush3.bf16.msra.mxu0 %v5568_v10 }
 0x25b   :  { %4908 = vmatmul.mubr.bf16.vlgmr.msra.gmra.mrb[16].mxu1 %v1504_v11 }
 0x25c   :  { %4956 = vmatpush3.bf16.msra.mxu1 %v5523_v55  ;;  %4911 = vmatprep.mubr.bf16.mxu1 %v1505_v24  ;;  %v6356_v9 = vpop.f32.mrb[68].mxu0 }
 0x25d   :  { %4957 = vmatprep.subr.bf16.mxu1 %v5524_v51  ;;  %v6361_v42 = vpop.f32.mrb[69].mxu0  ;;  %5260 = vmatmul.mubr.bf16.vlgmr.msra.gmra.mrb[144].mxu0 %v5571_v17  ;;  %v5545_v17 = vld [vmem:[%s6742_s5 + $0x1b0] sm:$0xff]  }
 0x25e   :  { %v6363_v46 = vpop.f32.mrb[70].mxu0  ;;  %5263 = vmatprep.mubr.bf16.mxu0 %v5573_v20 }
 0x25f   :  { %v1854_v56 = vpack.c.bf16 %v6363_v46, %v6356_v9  ;;  %v6370_v57 = vpop.f32.mrb[71].mxu0 }
 0x260   :  { %4958 = vmatpush3.bf16.msra.mxu1 %v5524_v51  ;;  %v1853_v59 = vpack.c.bf16 %v6370_v57, %v6361_v42  ;;  %v5537_v51 = vld [vmem:[%s6742_s5 + $0x170] sm:$0xff]   ;;  %v5539_v57 = vld [vmem:[%s6742_s5 + $0x180] sm:$0xff]  }
 0x261   :  { %4959 = vmatprep.subr.bf16.mxu1 %v5525_v53 }
 0x263   :  { %4912 = vmatmul.mubr.bf16.gmra.mrb[20].mxu1 %v1506_v22 }
 0x264   :  { %4960 = vmatpush3.bf16.msra.mxu1 %v5525_v53  ;;  %4915 = vmatprep.mubr.bf16.mxu1 %v1507_v32  ;;  %v6383_v62 = vpop.f32.mrb[72].mxu0 }
 0x265   :  { %4961 = vmatprep.subr.bf16.mxu1 %v5526_v28  ;;  %v6388_v54 = vpop.f32.mrb[73].mxu0  ;;  %5264 = vmatmul.mubr.bf16.gmra.mrb[148].mxu0 %v5574_v29 }
 0x266   :  { %v6390_v61 = vpop.f32.mrb[74].mxu0 }
 0x267   :  { %v1856_v1 = vpack.c.bf16 %v6390_v61, %v6383_v62  ;;  %v6397_v2 = vpop.f32.mrb[75].mxu0 }
 0x268   :  { %4962 = vmatpush3.bf16.msra.mxu1 %v5526_v28  ;;  %v1855_v3 = vpack.c.bf16 %v6397_v2, %v6388_v54  ;;  %v5540_v54 = vld [vmem:[%s6742_s5 + $0x188] sm:$0xff]  }
 0x269   :  { %4963 = vmatprep.subr.bf16.mxu1 %v5527_v63 }
 0x26b   :  { %4916 = vmatmul.mubr.bf16.gmra.mrb[24].mxu1 %v1508_v30 }
 0x26c   :  { %4964 = vmatpush3.bf16.msra.mxu1 %v5527_v63  ;;  %4919 = vmatprep.mubr.bf16.mxu1 %v1509_v40  ;;  %v6413_v5 = vpop.f32.mrb[76].mxu0 }
 0x26d   :  { %4965 = vmatprep.subr.bf16.mxu1 %v5528_v4  ;;  %v6418_v7 = vpop.f32.mrb[77].mxu0 }
 0x26e   :  { %v6420_v8 = vpop.f32.mrb[78].mxu0 }
 0x26f   :  { %v1858_v11 = vpack.c.bf16 %v6420_v8, %v6413_v5  ;;  %v6427_v13 = vpop.f32.mrb[79].mxu0  ;;  %v5542_v5 = vld [vmem:[%s6742_s5 + $0x198] sm:$0xff]  }
 0x270   :  { %4966 = vmatpush3.bf16.msra.mxu1 %v5528_v4  ;;  %v1857_v14 = vpack.c.bf16 %v6427_v13, %v6418_v7  ;;  %v5543_v7 = vld [vmem:[%s6742_s5 + $0x1a0] sm:$0xff]  }
 0x271   :  { %4967 = vmatprep.subr.bf16.mxu1 %v5529_v6 }
 0x273   :  { %4920 = vmatmul.mubr.bf16.gmra.mrb[28].mxu1 %v1510_v39  ;;  %v5575_v39 = vld [vmem:[%s6744_s6 + $0x20] sm:$0xff]  }
 0x274   :  { %4968 = vmatpush3.bf16.msra.mxu1 %v5529_v6  ;;  %4971 = vmatprep.mubr.bf16.mxu1 %v1851_v50  ;;  %v6446_v19 = vpop.f32.mrb[80].mxu0 }
 0x275   :  { %4969 = vmatprep.subr.bf16.mxu1 %v5530_v15  ;;  %v6451_v22 = vpop.f32.mrb[81].mxu0  ;;  %5267 = vmatprep.mubr.bf16.mxu0 %v5575_v39 }
 0x276   :  { %v6453_v23 = vpop.f32.mrb[82].mxu0  ;;  %5268 = vmatmul.mubr.bf16.gmra.mrb[152].mxu0 %v5576_v41 }
 0x277   :  { %v2200_v24 = vpack.c.bf16 %v6453_v23, %v6446_v19  ;;  %v2139_v25 = vpop.f32.mrb[83].mxu0 }
 0x278   :  { %4970 = vmatpush3.bf16.msra.mxu1 %v5530_v15  ;;  %v2199_v26 = vpack.c.bf16 %v2139_v25, %v6451_v22  ;;  %v5544_v15 = vld [vmem:[%s6742_s5 + $0x1a8] sm:$0xff]   ;;  %v5546_v25 = vld [vmem:[%s6742_s5 + $0x1b8] sm:$0xff]  }
 0x279   :  { %5019 = vmatprep.subr.bf16.mxu1 %v5531_v21 }
 0x27b   :  { %4972 = vmatmul.mubr.bf16.vlgmr.msra.gmra.mrb[16].mxu1 %v1852_v44  ;;  %v5577_v44 = vld [vmem:[%s6744_s6 + $0x30] sm:$0xff]  }
 0x27c   :  { %5020 = vmatpush3.bf16.msra.mxu1 %v5531_v21  ;;  %4975 = vmatprep.mubr.bf16.mxu1 %v1853_v59  ;;  %v6473_v30 = vpop.f32.mrb[84].mxu0 }
 0x27d   :  { %5021 = vmatprep.subr.bf16.mxu1 %v5532_v18  ;;  %v2152_v32 = vpop.f32.mrb[85].mxu0  ;;  %5271 = vmatprep.mubr.bf16.mxu0 %v5577_v44 }
 0x27e   :  { %v6478_v33 = vpop.f32.mrb[86].mxu0  ;;  %5272 = vmatmul.mubr.bf16.gmra.mrb[156].mxu0 %v5578_v49  ;;  %v5552_v49 = vld [vmem:[%s6742_s5 + $0x1e8] sm:$0xff]  }
 0x27f   :  { %v2202_v34 = vpack.c.bf16 %v6478_v33, %v6473_v30  ;;  %v2155_v35 = vpop.f32.mrb[87].mxu0  ;;  %v5548_v33 = vld [vmem:[%s6742_s5 + $0x1c8] sm:$0xff]  }
 0x280   :  { %5022 = vmatpush3.bf16.msra.mxu1 %v5532_v18  ;;  %v2201_v36 = vpack.c.bf16 %v2155_v35, %v2152_v32  ;;  %v5547_v18 = vld [vmem:[%s6742_s5 + $0x1c0] sm:$0xff]   ;;  %v5549_v35 = vld [vmem:[%s6742_s5 + $0x1d0] sm:$0xff]  }
 0x281   :  { %5023 = vmatprep.subr.bf16.mxu1 %v5533_v31 }
 0x283   :  { %4976 = vmatmul.mubr.bf16.gmra.mrb[20].mxu1 %v1854_v56 }
 0x284   :  { %5024 = vmatpush3.bf16.msra.mxu1 %v5533_v31  ;;  %4979 = vmatprep.mubr.bf16.mxu1 %v1855_v3  ;;  %v6497_v40 = vpop.f32.mrb[88].mxu0 }
 0x285   :  { %5025 = vmatprep.subr.bf16.mxu1 %v5534_v38  ;;  %v2168_v58 = vpop.f32.mrb[89].mxu0 }
 0x286   :  { %v6502_v43 = vpop.f32.mrb[90].mxu0 }
 0x287   :  { %v2204_v55 = vpack.c.bf16 %v6502_v43, %v6497_v40  ;;  %v2171_v45 = vpop.f32.mrb[91].mxu0  ;;  %v5551_v43 = vld [vmem:[%s6742_s5 + $0x1e0] sm:$0xff]  }
 0x288   :  { %5026 = vmatpush3.bf16.msra.mxu1 %v5534_v38  ;;  %v2203_v47 = vpack.c.bf16 %v2171_v45, %v2168_v58 }
 0x289   :  { %5027 = vmatprep.subr.bf16.mxu1 %v5535_v37 }
 0x28b   :  { %4980 = vmatmul.mubr.bf16.gmra.mrb[24].mxu1 %v1856_v1 }
 0x28c   :  { %5028 = vmatpush3.bf16.msra.mxu1 %v5535_v37  ;;  %4983 = vmatprep.mubr.bf16.mxu1 %v1857_v14  ;;  %v6521_v50 = vpop.f32.mrb[92].mxu0  ;;  %v5550_v37 = vld [vmem:[%s6742_s5 + $0x1d8] sm:$0xff]  }
 0x28d   :  { %5029 = vmatprep.subr.bf16.mxu1 %v5536_v12  ;;  %v2184_v52 = vpop.f32.mrb[93].mxu0 }
 0x28e   :  { %v6526_v9 = vpop.f32.mrb[94].mxu0 }
 0x28f   :  { %v2206_v53 = vpack.c.bf16 %v6526_v9, %v6521_v50  ;;  %v2187_v42 = vpop.f32.mrb[95].mxu0 }
 0x290   :  { %5030 = vmatpush3.bf16.msra.mxu1 %v5536_v12  ;;  %v2205_v46 = vpack.c.bf16 %v2187_v42, %v2184_v52 }
 0x291   :  { %5031 = vmatprep.subr.bf16.mxu1 %v5537_v51 }
 0x293   :  { %4984 = vmatmul.mubr.bf16.gmra.mrb[28].mxu1 %v1858_v11 }
 0x294   :  { %5032 = vmatpush3.bf16.msra.mxu1 %v5537_v51  ;;  %5035 = vmatprep.mubr.bf16.mxu1 %v2199_v26  ;;  %v6536_v56 = vpop.f32.mrb[96].mxu0  ;;  %v5553_v51 = vld [vmem:[%s6742_s5 + $0x1f0] sm:$0xff]  }
 0x295   :  { %5033 = vmatprep.subr.bf16.mxu1 %v5538_v48  ;;  %v2484_v59 = vpop.f32.mrb[97].mxu0 }
 0x296   :  { %v6541_v28 = vpop.f32.mrb[98].mxu0 }
 0x297   :  { %v2548_v60 = vpack.c.bf16 %v6541_v28, %v6536_v56  ;;  %v2487_v62 = vpop.f32.mrb[99].mxu0 }
 0x298   :  { %5034 = vmatpush3.bf16.msra.mxu1 %v5538_v48  ;;  %v2547_v63 = vpack.c.bf16 %v2487_v62, %v2484_v59  ;;  %v5555_v48 = vld [vmem:[%s6742_s5 + $0x1f8] sm:$0xff]  }
 0x299   :  { %5083 = vmatprep.subr.bf16.mxu1 %v5539_v57 }
 0x29b   :  { %5036 = vmatmul.mubr.bf16.vlgmr.msra.gmra.mrb[16].mxu1 %v2200_v24 }
 0x29c   :  { %5084 = vmatpush3.bf16.msra.mxu1 %v5539_v57  ;;  %5039 = vmatprep.mubr.bf16.mxu1 %v2201_v36  ;;  %v6551_v61 = vpop.f32.mrb[100].mxu0  ;;  %v5557_v57 = vld [vmem:[%s6742_s5 + $0x200] sm:$0xff]  }
 0x29d   :  { %5085 = vmatprep.subr.bf16.mxu1 %v5540_v54  ;;  %v2500_v1 = vpop.f32.mrb[101].mxu0 }
 0x29e   :  { %v6556_v2 = vpop.f32.mrb[102].mxu0 }
 0x29f   :  { %v2550_v3 = vpack.c.bf16 %v6556_v2, %v6551_v61  ;;  %v2503_v4 = vpop.f32.mrb[103].mxu0 }
 0x2a0   :  { %5086 = vmatpush3.bf16.msra.mxu1 %v5540_v54  ;;  %v2549_v27 = vpack.c.bf16 %v2503_v4, %v2500_v1  ;;  %v5559_v54 = vld [vmem:[%s6742_s5 + $0x208] sm:$0xff]  }
 0x2a1   :  { %5087 = vmatprep.subr.bf16.mxu1 %v5541_v0 }
 0x2a3   :  { %5040 = vmatmul.mubr.bf16.gmra.mrb[20].mxu1 %v2202_v34 }
 0x2a4   :  { %5088 = vmatpush3.bf16.msra.mxu1 %v5541_v0  ;;  %5043 = vmatprep.mubr.bf16.mxu1 %v2203_v47  ;;  %v6566_v6 = vpop.f32.mrb[104].mxu0  ;;  %v5561_v0 = vld [vmem:[%s6742_s5 + $0x210] sm:$0xff]  }
 0x2a5   :  { %5089 = vmatprep.subr.bf16.mxu1 %v5542_v5  ;;  %v2516_v8 = vpop.f32.mrb[105].mxu0 }
 0x2a6   :  { %v6571_v10 = vpop.f32.mrb[106].mxu0 }
 0x2a7   :  { %v2552_v11 = vpack.c.bf16 %v6571_v10, %v6566_v6  ;;  %v2519_v13 = vpop.f32.mrb[107].mxu0 }
 0x2a8   :  { %5090 = vmatpush3.bf16.msra.mxu1 %v5542_v5  ;;  %v2551_v14 = vpack.c.bf16 %v2519_v13, %v2516_v8  ;;  %v5563_v5 = vld [vmem:[%s6742_s5 + $0x218] sm:$0xff]  }
 0x2a9   :  { %5091 = vmatprep.subr.bf16.mxu1 %v5543_v7 }
 0x2ab   :  { %5044 = vmatmul.mubr.bf16.gmra.mrb[24].mxu1 %v2204_v55 }
 0x2ac   :  { %5092 = vmatpush3.bf16.msra.mxu1 %v5543_v7  ;;  %5047 = vmatprep.mubr.bf16.mxu1 %v2205_v46  ;;  %v6581_v16 = vpop.f32.mrb[108].mxu0  ;;  %v5565_v7 = vld [vmem:[%s6742_s5 + $0x220] sm:$0xff]  }
 0x2ad   :  { %5093 = vmatprep.subr.bf16.mxu1 %v5544_v15  ;;  %v2532_v19 = vpop.f32.mrb[109].mxu0 }
 0x2ae   :  { %v6586_v21 = vpop.f32.mrb[110].mxu0 }
 0x2af   :  { %v2554_v22 = vpack.c.bf16 %v6586_v21, %v6581_v16  ;;  %v2535_v23 = vpop.f32.mrb[111].mxu0 }
 0x2b0   :  { %5094 = vmatpush3.bf16.msra.mxu1 %v5544_v15  ;;  %v2553_v24 = vpack.c.bf16 %v2535_v23, %v2532_v19  ;;  %v5567_v15 = vld [vmem:[%s6742_s5 + $0x228] sm:$0xff]  }
 0x2b1   :  { %5095 = vmatprep.subr.bf16.mxu1 %v5545_v17 }
 0x2b3   :  { %5048 = vmatmul.mubr.bf16.gmra.mrb[28].mxu1 %v2206_v53 }
 0x2b4   :  { %5096 = vmatpush3.bf16.msra.mxu1 %v5545_v17  ;;  %5099 = vmatprep.mubr.bf16.mxu1 %v2547_v63  ;;  %v6593_v26 = vpop.f32.mrb[112].mxu0  ;;  %v5569_v17 = vld [vmem:[%s6742_s5 + $0x230] sm:$0xff]  }
 0x2b5   :  { %5097 = vmatprep.subr.bf16.mxu1 %v5546_v25  ;;  %v2832_v20 = vpop.f32.mrb[113].mxu0 }
 0x2b6   :  { %v6598_v29 = vpop.f32.mrb[114].mxu0 }
 0x2b7   :  { %v2896_v30 = vpack.c.bf16 %v6598_v29, %v6593_v26  ;;  %v2835_v31 = vpop.f32.mrb[115].mxu0 }
 0x2b8   :  { %5098 = vmatpush3.bf16.msra.mxu1 %v5546_v25  ;;  %v2895_v32 = vpack.c.bf16 %v2835_v31, %v2832_v20  ;;  %v5572_v25 = vld [vmem:[%s6742_s5 + $0x238] sm:$0xff]  }
 0x2b9   :  { %5147 = vmatprep.subr.bf16.mxu1 %v5547_v18 }
 0x2bb   :  { %5100 = vmatmul.mubr.bf16.vlgmr.msra.gmra.mrb[16].mxu1 %v2548_v60 }
 0x2bc   :  { %5148 = vmatpush3.bf16.msra.mxu1 %v5547_v18  ;;  %5103 = vmatprep.mubr.bf16.mxu1 %v2549_v27  ;;  %v6605_v34 = vpop.f32.mrb[116].mxu0 }
 0x2bd   :  { %5149 = vmatprep.subr.bf16.mxu1 %v5548_v33  ;;  %v2848_v36 = vpop.f32.mrb[117].mxu0 }
 0x2be   :  { %v6610_v38 = vpop.f32.mrb[118].mxu0 }
 0x2bf   :  { %v2898_v39 = vpack.c.bf16 %v6610_v38, %v6605_v34  ;;  %v2851_v41 = vpop.f32.mrb[119].mxu0 }
 0x2c0   :  { %5150 = vmatpush3.bf16.msra.mxu1 %v5548_v33  ;;  %v2897_v40 = vpack.c.bf16 %v2851_v41, %v2848_v36 }
 0x2c1   :  { %5151 = vmatprep.subr.bf16.mxu1 %v5549_v35 }
 0x2c3   :  { %5104 = vmatmul.mubr.bf16.gmra.mrb[20].mxu1 %v2550_v3 }
 0x2c4   :  { %5152 = vmatpush3.bf16.msra.mxu1 %v5549_v35  ;;  %5107 = vmatprep.mubr.bf16.mxu1 %v2551_v14  ;;  %v6617_v58 = vpop.f32.mrb[120].mxu0 }
 0x2c5   :  { %5153 = vmatprep.subr.bf16.mxu1 %v5550_v37  ;;  %v2864_v55 = vpop.f32.mrb[121].mxu0 }
 0x2c6   :  { %v6622_v45 = vpop.f32.mrb[122].mxu0 }
 0x2c7   :  { %v2900_v47 = vpack.c.bf16 %v6622_v45, %v6617_v58  ;;  %v2867_v12 = vpop.f32.mrb[123].mxu0  ;;  %v6672_v58 = vld [vmem:[%s6745_s8] ss:$0 sm:$0xff] }
 0x2c8   :  { %5154 = vmatpush3.bf16.msra.mxu1 %v5550_v37  ;;  %v2899_v44 = vpack.c.bf16 %v2867_v12, %v2864_v55  ;;  %v6679_v45 = vld [vmem:[%s6746_s9] ss:$0 sm:$0xff] }
 0x2c9   :  { %5155 = vmatprep.subr.bf16.mxu1 %v5551_v43 }
 0x2cb   :  { %5108 = vmatmul.mubr.bf16.gmra.mrb[24].mxu1 %v2552_v11 }
 0x2cc   :  { %5156 = vmatpush3.bf16.msra.mxu1 %v5551_v43  ;;  %5111 = vmatprep.mubr.bf16.mxu1 %v2553_v24  ;;  %v6629_v50 = vpop.f32.mrb[124].mxu0 }
 0x2cd   :  { %5157 = vmatprep.subr.bf16.mxu1 %v5552_v49  ;;  %v2880_v52 = vpop.f32.mrb[125].mxu0 }
 0x2ce   :  { %v6634_v9 = vpop.f32.mrb[126].mxu0 }
 0x2cf   :  { %v2902_v53 = vpack.c.bf16 %v6634_v9, %v6629_v50  ;;  %v2883_v42 = vpop.f32.mrb[127].mxu0 }
 0x2d0   :  { %5158 = vmatpush3.bf16.msra.mxu1 %v5552_v49  ;;  %v2901_v46 = vpack.c.bf16 %v2883_v42, %v2880_v52 }
 0x2d1   :  { %5159 = vmatprep.subr.bf16.mxu1 %v5553_v51 }
 0x2d3   :  { %5112 = vmatmul.mubr.bf16.gmra.mrb[28].mxu1 %v2554_v22 }
 0x2d4   :  { %5160 = vmatpush3.bf16.msra.mxu1 %v5553_v51  ;;  %5163 = vmatprep.mubr.bf16.mxu1 %v2895_v32  ;;  %v5197_v56 = vpop.f32.mrb[128].mxu0 }
 0x2d5   :  { %5161 = vmatprep.subr.bf16.mxu1 %v5555_v48  ;;  %v3180_v59 = vpop.f32.mrb[129].mxu0 }
 0x2d6   :  { %v5198_v28 = vpop.f32.mrb[130].mxu0 }
 0x2d7   :  { %v3244_v60 = vpack.c.bf16 %v5198_v28, %v5197_v56  ;;  %v3183_v62 = vpop.f32.mrb[131].mxu0 }
 0x2d8   :  { %5162 = vmatpush3.bf16.msra.mxu1 %v5555_v48  ;;  %v3243_v63 = vpack.c.bf16 %v3183_v62, %v3180_v59 }
 0x2d9   :  { %5211 = vmatprep.subr.bf16.mxu1 %v5557_v57 }
 0x2db   :  { %5164 = vmatmul.mubr.bf16.vlgmr.msra.gmra.mrb[16].mxu1 %v2896_v30 }
 0x2dc   :  { %5212 = vmatpush3.bf16.msra.mxu1 %v5557_v57  ;;  %5167 = vmatprep.mubr.bf16.mxu1 %v2897_v40  ;;  %v5201_v61 = vpop.f32.mrb[132].mxu0 }
 0x2dd   :  { %5213 = vmatprep.subr.bf16.mxu1 %v5559_v54  ;;  %v3196_v1 = vpop.f32.mrb[133].mxu0 }
 0x2de   :  { %v5202_v2 = vpop.f32.mrb[134].mxu0 }
 0x2df   :  { %v3246_v3 = vpack.c.bf16 %v5202_v2, %v5201_v61  ;;  %v3199_v4 = vpop.f32.mrb[135].mxu0 }
 0x2e0   :  { %5214 = vmatpush3.bf16.msra.mxu1 %v5559_v54  ;;  %v3245_v27 = vpack.c.bf16 %v3199_v4, %v3196_v1 }
 0x2e1   :  { %5215 = vmatprep.subr.bf16.mxu1 %v5561_v0 }
 0x2e3   :  { %5168 = vmatmul.mubr.bf16.gmra.mrb[20].mxu1 %v2898_v39 }
 0x2e4   :  { %5216 = vmatpush3.bf16.msra.mxu1 %v5561_v0  ;;  %5171 = vmatprep.mubr.bf16.mxu1 %v2899_v44  ;;  %v5205_v6 = vpop.f32.mrb[136].mxu0 }
 0x2e5   :  { %5217 = vmatprep.subr.bf16.mxu1 %v5563_v5  ;;  %v3212_v8 = vpop.f32.mrb[137].mxu0 }
 0x2e6   :  { %v5206_v10 = vpop.f32.mrb[138].mxu0 }
 0x2e7   :  { %v3248_v11 = vpack.c.bf16 %v5206_v10, %v5205_v6  ;;  %v3215_v13 = vpop.f32.mrb[139].mxu0 }
 0x2e8   :  { %5218 = vmatpush3.bf16.msra.mxu1 %v5563_v5  ;;  %v3247_v14 = vpack.c.bf16 %v3215_v13, %v3212_v8 }
 0x2e9   :  { %5219 = vmatprep.subr.bf16.mxu1 %v5565_v7 }
 0x2eb   :  { %5172 = vmatmul.mubr.bf16.gmra.mrb[24].mxu1 %v2900_v47 }
 0x2ec   :  { %5220 = vmatpush3.bf16.msra.mxu1 %v5565_v7  ;;  %5175 = vmatprep.mubr.bf16.mxu1 %v2901_v46  ;;  %v5209_v16 = vpop.f32.mrb[140].mxu0 }
 0x2ed   :  { %5221 = vmatprep.subr.bf16.mxu1 %v5567_v15  ;;  %v3228_v19 = vpop.f32.mrb[141].mxu0 }
 0x2ee   :  { %v5210_v21 = vpop.f32.mrb[142].mxu0 }
 0x2ef   :  { %v3250_v22 = vpack.c.bf16 %v5210_v21, %v5209_v16  ;;  %v3231_v23 = vpop.f32.mrb[143].mxu0 }
 0x2f0   :  { %5222 = vmatpush3.bf16.msra.mxu1 %v5567_v15  ;;  %v3249_v24 = vpack.c.bf16 %v3231_v23, %v3228_v19 }
 0x2f1   :  { %5223 = vmatprep.subr.bf16.mxu1 %v5569_v17 }
 0x2f3   :  { %5176 = vmatmul.mubr.bf16.gmra.mrb[28].mxu1 %v2902_v53 }
 0x2f4   :  { %5224 = vmatpush3.bf16.msra.mxu1 %v5569_v17  ;;  %5227 = vmatprep.mubr.bf16.mxu1 %v3243_v63 }
 0x2f5   :  { %5225 = vmatprep.subr.bf16.mxu1 %v5572_v25 }
 0x2f8   :  { %5226 = vmatpush3.bf16.msra.mxu1 %v5572_v25 }
 0x2fb   :  { %5228 = vmatmul.mubr.bf16.vlgmr.msra.gmra.mrb[16].mxu1 %v3244_v60 }
 0x2fc   :  { %5231 = vmatprep.mubr.bf16.mxu1 %v3245_v27 }
 0x303   :  { %5232 = vmatmul.mubr.bf16.gmra.mrb[20].mxu1 %v3246_v3 }
 0x304   :  { %5235 = vmatprep.mubr.bf16.mxu1 %v3247_v14 }
 0x30b   :  { %5236 = vmatmul.mubr.bf16.gmra.mrb[24].mxu1 %v3248_v11 }
 0x30c   :  { %5239 = vmatprep.mubr.bf16.mxu1 %v3249_v24 }
 0x313   :  { %5240 = vmatmul.mubr.bf16.gmra.mrb[28].mxu1 %v3250_v22 }
 0x330   :  { %v5261_v26 = vpop.f32.mrb[144].mxu0 }
 0x331   :  { %v3591_v18 = vpop.f32.mrb[145].mxu0  ;;  %v3663_v43 = vmul.f32 %v5261_v26, %v6672_v58 }
 0x332   :  { %v5262_v20 = vpop.f32.mrb[146].mxu0  ;;  %v3661_v55 = vmul.f32 %v6672_v58, %v3591_v18 }
 0x333   :  { %v3594_v29 = vpop.f32.mrb[147].mxu0  ;;  %v3664_v47 = vmul.f32 %v5262_v20, %v6672_v58  ;;  %v3686_v12 = vadd.f32 %v6679_v45, %v3663_v43 }
 0x334   :  { %v3662_v44 = vmul.f32 %v6672_v58, %v3594_v29  ;;  %v3684_v49 = vadd.f32 %v6679_v45, %v3661_v55 }
 0x335   :  { %v3687_v9 = vadd.f32 %v6679_v45, %v3664_v47 }
 0x336   :  { %v3685_v48 = vadd.f32 %v6679_v45, %v3662_v44 }
 0x338   :  { %v5265_v30 = vpop.f32.mrb[148].mxu0 }
 0x339   :  { %v3607_v31 = vpop.f32.mrb[149].mxu0  ;;  %v3667_v53 = vmul.f32 %v5265_v30, %v6672_v58 }
 0x33a   :  { %v5266_v32 = vpop.f32.mrb[150].mxu0  ;;  %v3665_v56 = vmul.f32 %v6672_v58, %v3607_v31 }
 0x33b   :  { %v3610_v33 = vpop.f32.mrb[151].mxu0  ;;  %v3668_v62 = vmul.f32 %v5266_v32, %v6672_v58  ;;  %v3690_v63 = vadd.f32 %v6679_v45, %v3667_v53 }
 0x33c   :  { %v3666_v61 = vmul.f32 %v6672_v58, %v3610_v33  ;;  %v3688_v0 = vadd.f32 %v6679_v45, %v3665_v56 }
 0x33d   :  { %v3691_v4 = vadd.f32 %v6679_v45, %v3668_v62 }
 0x33e   :  { %v3689_v7 = vadd.f32 %v6679_v45, %v3666_v61 }
 0x349   :  { %v5269_v34 = vpop.f32.mrb[152].mxu0 }
 0x34a   :  { %v3623_v35 = vpop.f32.mrb[153].mxu0  ;;  %v3671_v27 = vmul.f32 %v5269_v34, %v6672_v58 }
 0x34b   :  { %v5270_v36 = vpop.f32.mrb[154].mxu0  ;;  %v3669_v8 = vmul.f32 %v6672_v58, %v3623_v35 }
 0x34c   :  { %v3626_v38 = vpop.f32.mrb[155].mxu0  ;;  %v3672_v15 = vmul.f32 %v5270_v36, %v6672_v58  ;;  %v3694_v16 = vadd.f32 %v6679_v45, %v3671_v27 }
 0x34d   :  { %v3670_v19 = vmul.f32 %v6672_v58, %v3626_v38  ;;  %v3692_v21 = vadd.f32 %v6679_v45, %v3669_v8 }
 0x34e   :  { %v3695_v25 = vadd.f32 %v6679_v45, %v3672_v15 }
 0x34f   :  { %v3693_v29 = vadd.f32 %v6679_v45, %v3670_v19 }
 0x351   :  { %v5273_v39 = vpop.f32.mrb[156].mxu0 }
 0x352   :  { %v3639_v41 = vpop.f32.mrb[157].mxu0  ;;  %v3675_v26 = vmul.f32 %v5273_v39, %v6672_v58 }
 0x353   :  { %v6665_v40 = vpop.f32.mrb[158].mxu0  ;;  %v3673_v30 = vmul.f32 %v6672_v58, %v3639_v41 }
 0x354   :  { %v6667_v37 = vpop.f32.mrb[159].mxu0  ;;  %v3676_v35 = vmul.f32 %v6665_v40, %v6672_v58  ;;  %v3698_v36 = vadd.f32 %v6679_v45, %v3675_v26 }
 0x355   :  { %v3674_v43 = vmul.f32 %v6672_v58, %v6667_v37  ;;  %v3696_v39 = vadd.f32 %v6679_v45, %v3673_v30 }
 0x356   :  { %v3699_v40 = vadd.f32 %v6679_v45, %v3676_v35 }
 0x3ce   :  { %v5229_v50 = vpop.f32.mrb[16].mxu1 }
 0x3cf   :  { %v3702_v51 = vadd.f32 %v5229_v50, %v3686_v12  ;;  %v3350_v52 = vpop.f32.mrb[17].mxu1 }
 0x3d0   :  { %v3700_v42 = vadd.f32 %v3684_v49, %v3350_v52  ;;  %v5230_v46 = vpop.f32.mrb[18].mxu1  ;;  %v3697_v49 = vadd.f32 %v6679_v45, %v3674_v43 }
 0x3d1   :  { %v3703_v57 = vadd.f32 %v5230_v46, %v3687_v9  ;;  %v3353_v59 = vpop.f32.mrb[19].mxu1 }
 0x3d2   :  { %v3701_v28 = vadd.f32 %v3685_v48, %v3353_v59 }
 0x3d3   :  { %v4276_v60 = vpack.c.bf16 %v3703_v57, %v3702_v51 }
 0x3d4   :  { %v4271_v54 = vpack.c.bf16 %v3701_v28, %v3700_v42 }
 0x3d5   :  { %4308 = vst [vmem:[%s6747_s10 + $0x8] sm:$0xff] %v4276_v60  }
 0x3d6   :  { %4272 = vst [vmem:[%s6747_s10] sm:$0xff] %v4271_v54   ;;  %v5233_v1 = vpop.f32.mrb[20].mxu1 }
 0x3d7   :  { %v3706_v2 = vadd.f32 %v5233_v1, %v3690_v63  ;;  %v3366_v3 = vpop.f32.mrb[21].mxu1 }
 0x3d8   :  { %v3704_v5 = vadd.f32 %v3688_v0, %v3366_v3  ;;  %v5234_v6 = vpop.f32.mrb[22].mxu1 }
 0x3d9   :  { %v3707_v10 = vadd.f32 %v5234_v6, %v3691_v4  ;;  %v3369_v11 = vpop.f32.mrb[23].mxu1 }
 0x3da   :  { %v3705_v13 = vadd.f32 %v3689_v7, %v3369_v11 }
 0x3db   :  { %v4286_v14 = vpack.c.bf16 %v3707_v10, %v3706_v2 }
 0x3dc   :  { %v4281_v17 = vpack.c.bf16 %v3705_v13, %v3704_v5 }
 0x3dd   :  { %4310 = vst [vmem:[%s6747_s10 + $0x18] sm:$0xff] %v4286_v14  }
 0x3de   :  { %4309 = vst [vmem:[%s6747_s10 + $0x10] sm:$0xff] %v4281_v17   ;;  %v5237_v22 = vpop.f32.mrb[24].mxu1 }
 0x3df   :  { %v3710_v23 = vadd.f32 %v5237_v22, %v3694_v16  ;;  %v3382_v24 = vpop.f32.mrb[25].mxu1 }
 0x3e0   :  { %v3708_v18 = vadd.f32 %v3692_v21, %v3382_v24  ;;  %v5238_v20 = vpop.f32.mrb[26].mxu1 }
 0x3e1   :  { %v3711_v31 = vadd.f32 %v5238_v20, %v3695_v25  ;;  %v3385_v32 = vpop.f32.mrb[27].mxu1 }
 0x3e2   :  { %v3709_v33 = vadd.f32 %v3693_v29, %v3385_v32 }
 0x3e3   :  { %v4296_v34 = vpack.c.bf16 %v3711_v31, %v3710_v23 }
 0x3e4   :  { %v4291_v38 = vpack.c.bf16 %v3709_v33, %v3708_v18 }
 0x3e5   :  { %4312 = vst [vmem:[%s6747_s10 + $0x28] sm:$0xff] %v4296_v34  }
 0x3e6   :  { %4311 = vst [vmem:[%s6747_s10 + $0x20] sm:$0xff] %v4291_v38   ;;  %v5241_v41 = vpop.f32.mrb[28].mxu1 }
 0x3e7   :  { %v3714_v55 = vadd.f32 %v5241_v41, %v3698_v36  ;;  %v3398_v47 = vpop.f32.mrb[29].mxu1 }
 0x3e8   :  { %v3712_v12 = vadd.f32 %v3696_v39, %v3398_v47  ;;  %v5242_v44 = vpop.f32.mrb[30].mxu1 }
 0x3e9   :  { %v3715_v37 = vadd.f32 %v5242_v44, %v3699_v40  ;;  %v3401_v58 = vpop.f32.mrb[31].mxu1 }
 0x3ea   :  { %v3713_v50 = vadd.f32 %v3697_v49, %v3401_v58 }
 0x3eb   :  { %v4306_v51 = vpack.c.bf16 %v3715_v37, %v3714_v55 }
 0x3ec   :  { %v4301_v52 = vpack.c.bf16 %v3713_v50, %v3712_v12 }
 0x3ed   :  { %4314 = vst [vmem:[%s6747_s10 + $0x38] sm:$0xff] %v4306_v51  }
 0x3ee   :  { %4313 = vst [vmem:[%s6747_s10 + $0x30] sm:$0xff] %v4301_v52  }

// kernel: resnet_v2_forward.9
= control target key start
LH: loop header
LB: loop body
LE: loop exit
PB: predicated region body
PF: predicated region fallthrough
CT: control target
= control target key end

     0   :  { %s6369_s1 = inlined_call_operand.vmem [shape: bf16[128,128], index: 1, kind: input, shape index: {}]   ;;  %s6370_s0 = inlined_call_operand.vmem [shape: bf16[128,128], index: 0, kind: input, shape index: {}]   ;;  %s6371_s4 = inlined_call_operand.vmem [shape: bf16[9,128,128], index: 4, kind: input, shape index: {}]   ;;  %s6372_s2 = inlined_call_operand.vmem [shape: f32[1,128], index: 2, kind: input, shape index: {}]   ;;  %s6373_s3 = inlined_call_operand.vmem [shape: f32[1,128], index: 3, kind: input, shape index: {}]   ;;  %s6374_s5 = inlined_call_operand.vmem [shape: bf16[9,128,128], index: 5, kind: input, shape index: {}]   ;;  %s6375_s6 = inlined_call_operand.vmem [shape: bf16[128,128], index: 6, kind: input, shape index: {}]   ;;  %s6376_s7 = inlined_call_operand.vmem [shape: bf16[128,128], index: 7, kind: output, shape index: {}]  }
   0x1   :  { %v5144_v0 = vld [vmem:[%s6369_s1] sm:$0xff]   ;;  %v5145_v1 = vld [vmem:[%s6369_s1 + $0x8] sm:$0xff]   ;;  %v5146_v2 = vld [vmem:[%s6369_s1 + $0x10] sm:$0xff]  }
   0x2   :  { %4392 = vmatprep.subr.bf16.mxu0 %v5144_v0  ;;  %v5147_v3 = vld [vmem:[%s6369_s1 + $0x18] sm:$0xff]   ;;  %v5152_v4 = vld [vmem:[%s6370_s0] sm:$0xff]   ;;  %v5149_v6 = vld [vmem:[%s6369_s1 + $0x28] sm:$0xff]  }
   0x3   :  { %4393 = vmatpush3.bf16.msra.mxu0 %v5144_v0  ;;  %4408 = vmatprep.mubr.bf16.mxu0 %v5152_v4  ;;  %v5148_v5 = vld [vmem:[%s6369_s1 + $0x20] sm:$0xff]   ;;  %v5150_v7 = vld [vmem:[%s6369_s1 + $0x30] sm:$0xff]   ;;  %v5151_v8 = vld [vmem:[%s6369_s1 + $0x38] sm:$0xff]  }
   0x4   :  { %4394 = vmatprep.subr.bf16.mxu0 %v5145_v1  ;;  %v5153_v9 = vld [vmem:[%s6370_s0 + $0x8] sm:$0xff]   ;;  %v5154_v10 = vld [vmem:[%s6370_s0 + $0x10] sm:$0xff]   ;;  %v5155_v11 = vld [vmem:[%s6370_s0 + $0x18] sm:$0xff]  }
   0x5   :  { %v5156_v12 = vld [vmem:[%s6370_s0 + $0x20] sm:$0xff]   ;;  %v5157_v13 = vld [vmem:[%s6370_s0 + $0x28] sm:$0xff]   ;;  %v5158_v14 = vld [vmem:[%s6370_s0 + $0x30] sm:$0xff]  }
   0x6   :  { %v5159_v15 = vld [vmem:[%s6370_s0 + $0x38] sm:$0xff]   ;;  %v5160_v16 = vld [vmem:[%s6371_s4 + $0x40] sm:$0xff]  }
   0x7   :  { %4395 = vmatpush3.bf16.msra.mxu0 %v5145_v1  ;;  %v5168_v17 = vld [vmem:[%s6371_s4] sm:$0xff]  }
   0x8   :  { %4396 = vmatprep.subr.bf16.mxu0 %v5146_v2  ;;  %4440 = vmatprep.mubr.bf16.mxu1 %v5168_v17  ;;  %v5401_v18 = vld [vmem:[%s6372_s2] ss:$0 sm:$0xff] }
   0x9   :  { %v5406_v20 = vld [vmem:[%s6373_s3] ss:$0 sm:$0xff] }
   0xb   :  { %4397 = vmatpush3.bf16.msra.mxu0 %v5146_v2 }
   0xc   :  { %4398 = vmatprep.subr.bf16.mxu0 %v5147_v3 }
   0xf   :  { %4399 = vmatpush3.bf16.msra.mxu0 %v5147_v3 }
  0x10   :  { %4400 = vmatprep.subr.bf16.mxu0 %v5148_v5 }
  0x13   :  { %4401 = vmatpush3.bf16.msra.mxu0 %v5148_v5 }
  0x14   :  { %4402 = vmatprep.subr.bf16.mxu0 %v5149_v6 }
  0x17   :  { %4403 = vmatpush3.bf16.msra.mxu0 %v5149_v6 }
  0x18   :  { %4404 = vmatprep.subr.bf16.mxu0 %v5150_v7 }
  0x1b   :  { %4405 = vmatpush3.bf16.msra.mxu0 %v5150_v7 }
  0x1c   :  { %4406 = vmatprep.subr.bf16.mxu0 %v5151_v8 }
  0x1f   :  { %4407 = vmatpush3.bf16.msra.mxu0 %v5151_v8 }
  0x22   :  { %4409 = vmatmul.mubr.bf16.vlgmr.msra.gmra.mrb[0].mxu0 %v5153_v9 }
  0x23   :  { %4412 = vmatprep.mubr.bf16.mxu0 %v5154_v10 }
  0x2a   :  { %4413 = vmatmul.mubr.bf16.gmra.mrb[4].mxu0 %v5155_v11 }
  0x2b   :  { %4416 = vmatprep.mubr.bf16.mxu0 %v5156_v12 }
  0x32   :  { %4417 = vmatmul.mubr.bf16.gmra.mrb[8].mxu0 %v5157_v13 }
  0x33   :  { %4420 = vmatprep.mubr.bf16.mxu0 %v5158_v14 }
  0x3a   :  { %4421 = vmatmul.mubr.bf16.gmra.mrb[12].mxu0 %v5159_v15 }
  0x3b   :  { %4472 = vmatprep.mubr.bf16.mxu0 %v5160_v16 }
  0xf5   :  { %v4410_v19 = vpop.f32.mrb[0].mxu0 }
  0xf6   :  { %v261_v21 = vmul.f32 %v4410_v19, %v5401_v18  ;;  %v189_v22 = vpop.f32.mrb[1].mxu0 }
  0xf7   :  { %v259_v23 = vmul.f32 %v5401_v18, %v189_v22  ;;  %v4411_v24 = vpop.f32.mrb[2].mxu0 }
  0xf8   :  { %v284_v25 = vadd.f32 %v5406_v20, %v261_v21  ;;  %v262_v26 = vmul.f32 %v4411_v24, %v5401_v18  ;;  %v192_v27 = vpop.f32.mrb[3].mxu0 }
  0xf9   :  { %v282_v28 = vadd.f32 %v5406_v20, %v259_v23  ;;  %v260_v29 = vmul.f32 %v5401_v18, %v192_v27 }
  0xfa   :  { %v285_v30 = vadd.f32 %v5406_v20, %v262_v26  ;;  %v300_v32 = vmax.f32 %v284_v25, 0.0 }
  0xfb   :  { %v283_v31 = vadd.f32 %v5406_v20, %v260_v29  ;;  %v298_v34 = vmax.f32 %v282_v28, 0.0  ;;  %v5169_v29 = vld [vmem:[%s6371_s4 + $0x8] sm:$0xff]  }
  0xfc   :  { %v301_v33 = vmax.f32 %v285_v30, 0.0  ;;  %v5162_v30 = vld [vmem:[%s6371_s4 + $0x50] sm:$0xff]  }
  0xfd   :  { %v299_v35 = vmax.f32 %v283_v31, 0.0  ;;  %v4414_v36 = vpop.f32.mrb[4].mxu0  ;;  %v5172_v31 = vld [vmem:[%s6371_s4 + $0x10] sm:$0xff]  }
  0xfe   :  { %v5416_v37 = vpack.c.bf16 %v301_v33, %v300_v32  ;;  %v265_v38 = vmul.f32 %v4414_v36, %v5401_v18  ;;  %v205_v39 = vpop.f32.mrb[5].mxu0  ;;  %v5163_v32 = vld [vmem:[%s6371_s4 + $0x58] sm:$0xff]   ;;  %v5165_v36 = vld [vmem:[%s6371_s4 + $0x68] sm:$0xff]  }
  0xff   :  { %v5419_v40 = vpack.c.bf16 %v299_v35, %v298_v34  ;;  %v263_v41 = vmul.f32 %v5401_v18, %v205_v39  ;;  %v4415_v42 = vpop.f32.mrb[6].mxu0  ;;  %v5173_v33 = vld [vmem:[%s6371_s4 + $0x18] sm:$0xff]   ;;  %v5164_v34 = vld [vmem:[%s6371_s4 + $0x60] sm:$0xff]   ;;  %v5166_v39 = vld [vmem:[%s6371_s4 + $0x70] sm:$0xff]  }
 0x100   :  { %v288_v43 = vadd.f32 %v5406_v20, %v265_v38  ;;  %v266_v44 = vmul.f32 %v4415_v42, %v5401_v18  ;;  %v208_v45 = vpop.f32.mrb[7].mxu0  ;;  %v5176_v35 = vld [vmem:[%s6371_s4 + $0x20] sm:$0xff]   ;;  %v5177_v38 = vld [vmem:[%s6371_s4 + $0x28] sm:$0xff]   ;;  %v5167_v42 = vld [vmem:[%s6371_s4 + $0x78] sm:$0xff]  }
 0x101   :  { %v286_v46 = vadd.f32 %v5406_v20, %v263_v41  ;;  %v264_v47 = vmul.f32 %v5401_v18, %v208_v45  ;;  %4424 = vmatprep.subr.bf16.mxu1 %v5419_v40  ;;  %4456 = vmatprep.subr.bf16.mxu0 %v5419_v40  ;;  %v5180_v41 = vld [vmem:[%s6371_s4 + $0x30] sm:$0xff]   ;;  %v5171_v45 = vld [vmem:[%s6371_s4 + $0x88] sm:$0xff]  }
 0x102   :  { %v289_v48 = vadd.f32 %v5406_v20, %v266_v44  ;;  %4425 = vmatpush3.bf16.msra.mxu1 %v5419_v40  ;;  %4457 = vmatpush3.bf16.msra.mxu0 %v5419_v40  ;;  %v304_v50 = vmax.f32 %v288_v43, 0.0  ;;  %v5181_v43 = vld [vmem:[%s6371_s4 + $0x38] sm:$0xff]   ;;  %v5170_v44 = vld [vmem:[%s6371_s4 + $0x80] sm:$0xff]  }
 0x103   :  { %v287_v49 = vadd.f32 %v5406_v20, %v264_v47  ;;  %4426 = vmatprep.subr.bf16.mxu1 %v5416_v37  ;;  %4458 = vmatprep.subr.bf16.mxu0 %v5416_v37  ;;  %v302_v52 = vmax.f32 %v286_v46, 0.0  ;;  %v5174_v46 = vld [vmem:[%s6371_s4 + $0x90] sm:$0xff]   ;;  %v5175_v47 = vld [vmem:[%s6371_s4 + $0x98] sm:$0xff]  }
 0x104   :  { %v305_v51 = vmax.f32 %v289_v48, 0.0  ;;  %v5178_v48 = vld [vmem:[%s6371_s4 + $0xa0] sm:$0xff]  }
 0x105   :  { %v303_v53 = vmax.f32 %v287_v49, 0.0  ;;  %v4418_v54 = vpop.f32.mrb[8].mxu0  ;;  %v5179_v49 = vld [vmem:[%s6371_s4 + $0xa8] sm:$0xff]  }
 0x106   :  { %v5434_v55 = vpack.c.bf16 %v305_v51, %v304_v50  ;;  %v269_v56 = vmul.f32 %v4418_v54, %v5401_v18  ;;  %v221_v57 = vpop.f32.mrb[9].mxu0  ;;  %4427 = vmatpush3.bf16.msra.mxu1 %v5416_v37  ;;  %4459 = vmatpush3.bf16.msra.mxu0 %v5416_v37  ;;  %v5182_v50 = vld [vmem:[%s6371_s4 + $0xb0] sm:$0xff]   ;;  %v5183_v51 = vld [vmem:[%s6371_s4 + $0xb8] sm:$0xff]   ;;  %v5185_v54 = vld [vmem:[%s6371_s4 + $0xc8] sm:$0xff]  }
 0x107   :  { %v5439_v58 = vpack.c.bf16 %v303_v53, %v302_v52  ;;  %v267_v59 = vmul.f32 %v5401_v18, %v221_v57  ;;  %v4419_v60 = vpop.f32.mrb[10].mxu0  ;;  %v5184_v52 = vld [vmem:[%s6371_s4 + $0xc0] sm:$0xff]   ;;  %v5186_v57 = vld [vmem:[%s6371_s4 + $0xd0] sm:$0xff]  }
 0x108   :  { %v292_v61 = vadd.f32 %v5406_v20, %v269_v56  ;;  %v270_v62 = vmul.f32 %v4419_v60, %v5401_v18  ;;  %v224_v63 = vpop.f32.mrb[11].mxu0  ;;  %v5216_v53 = vld [vmem:[%s6374_s5 + $0x40] sm:$0xff]   ;;  %v5217_v56 = vld [vmem:[%s6374_s5 + $0x48] sm:$0xff]   ;;  %v5187_v60 = vld [vmem:[%s6371_s4 + $0xd8] sm:$0xff]  }
 0x109   :  { %v290_v0 = vadd.f32 %v5406_v20, %v267_v59  ;;  %v268_v1 = vmul.f32 %v5401_v18, %v224_v63  ;;  %4428 = vmatprep.subr.bf16.mxu1 %v5439_v58  ;;  %4460 = vmatprep.subr.bf16.mxu0 %v5439_v58  ;;  %v5220_v59 = vld [vmem:[%s6374_s5 + $0x50] sm:$0xff]   ;;  %v5224_v63 = vld [vmem:[%s6374_s5 + $0x60] sm:$0xff]  }
 0x10a   :  { %v293_v2 = vadd.f32 %v5406_v20, %v270_v62  ;;  %4429 = vmatpush3.bf16.msra.mxu1 %v5439_v58  ;;  %4461 = vmatpush3.bf16.msra.mxu0 %v5439_v58  ;;  %v308_v4 = vmax.f32 %v292_v61, 0.0  ;;  %v5221_v61 = vld [vmem:[%s6374_s5 + $0x58] sm:$0xff]   ;;  %v5188_v62 = vld [vmem:[%s6371_s4 + $0xe0] sm:$0xff]  }
 0x10b   :  { %v291_v3 = vadd.f32 %v5406_v20, %v268_v1  ;;  %4430 = vmatprep.subr.bf16.mxu1 %v5434_v55  ;;  %4462 = vmatprep.subr.bf16.mxu0 %v5434_v55  ;;  %v306_v6 = vmax.f32 %v290_v0, 0.0  ;;  %v5189_v0 = vld [vmem:[%s6371_s4 + $0xe8] sm:$0xff]  }
 0x10c   :  { %v309_v5 = vmax.f32 %v293_v2, 0.0  ;;  %v5225_v1 = vld [vmem:[%s6374_s5 + $0x68] sm:$0xff]   ;;  %v5190_v2 = vld [vmem:[%s6371_s4 + $0xf0] sm:$0xff]  }
 0x10d   :  { %v307_v7 = vmax.f32 %v291_v3, 0.0  ;;  %v4422_v8 = vpop.f32.mrb[12].mxu0  ;;  %v5228_v3 = vld [vmem:[%s6374_s5 + $0x70] sm:$0xff]  }
 0x10e   :  { %v5454_v9 = vpack.c.bf16 %v309_v5, %v308_v4  ;;  %v273_v10 = vmul.f32 %v4422_v8, %v5401_v18  ;;  %v237_v11 = vpop.f32.mrb[13].mxu0  ;;  %4431 = vmatpush3.bf16.msra.mxu1 %v5434_v55  ;;  %4463 = vmatpush3.bf16.msra.mxu0 %v5434_v55  ;;  %v5191_v4 = vld [vmem:[%s6371_s4 + $0xf8] sm:$0xff]   ;;  %v5193_v8 = vld [vmem:[%s6371_s4 + $0x108] sm:$0xff]  }
 0x10f   :  { %v5459_v12 = vpack.c.bf16 %v307_v7, %v306_v6  ;;  %v271_v13 = vmul.f32 %v5401_v18, %v237_v11  ;;  %v4423_v14 = vpop.f32.mrb[14].mxu0  ;;  %v5229_v5 = vld [vmem:[%s6374_s5 + $0x78] sm:$0xff]   ;;  %v5192_v6 = vld [vmem:[%s6371_s4 + $0x100] sm:$0xff]  }
 0x110   :  { %v296_v15 = vadd.f32 %v5406_v20, %v273_v10  ;;  %v274_v16 = vmul.f32 %v4423_v14, %v5401_v18  ;;  %v240_v17 = vpop.f32.mrb[15].mxu0  ;;  %v5653_v7 = vld [vmem:[%s6374_s5] sm:$0xff]   ;;  %v5194_v10 = vld [vmem:[%s6371_s4 + $0x110] sm:$0xff]   ;;  %v5195_v11 = vld [vmem:[%s6371_s4 + $0x118] sm:$0xff]  }
 0x111   :  { %v294_v19 = vadd.f32 %v5406_v20, %v271_v13  ;;  %v272_v21 = vmul.f32 %v5401_v18, %v240_v17  ;;  %4432 = vmatprep.subr.bf16.mxu1 %v5459_v12  ;;  %4464 = vmatprep.subr.bf16.mxu0 %v5459_v12  ;;  %v5196_v13 = vld [vmem:[%s6371_s4 + $0x120] sm:$0xff]   ;;  %v5197_v14 = vld [vmem:[%s6371_s4 + $0x128] sm:$0xff]  }
 0x112   :  { %v297_v22 = vadd.f32 %v5406_v20, %v274_v16  ;;  %4433 = vmatpush3.bf16.msra.mxu1 %v5459_v12  ;;  %4465 = vmatpush3.bf16.msra.mxu0 %v5459_v12  ;;  %v312_v24 = vmax.f32 %v296_v15, 0.0  ;;  %v5198_v15 = vld [vmem:[%s6371_s4 + $0x130] sm:$0xff]   ;;  %v5199_v16 = vld [vmem:[%s6371_s4 + $0x138] sm:$0xff]   ;;  %v5200_v17 = vld [vmem:[%s6371_s4 + $0x140] sm:$0xff]  }
 0x113   :  { %v295_v23 = vadd.f32 %v5406_v20, %v272_v21  ;;  %4434 = vmatprep.subr.bf16.mxu1 %v5454_v9  ;;  %4466 = vmatprep.subr.bf16.mxu0 %v5454_v9  ;;  %v310_v26 = vmax.f32 %v294_v19, 0.0  ;;  %v5161_v20 = vld [vmem:[%s6371_s4 + $0x48] sm:$0xff]   ;;  %v5202_v21 = vld [vmem:[%s6371_s4 + $0x150] sm:$0xff]  }
 0x114   :  { %v313_v25 = vmax.f32 %v297_v22, 0.0  ;;  %v5201_v19 = vld [vmem:[%s6371_s4 + $0x148] sm:$0xff]   ;;  %v5203_v22 = vld [vmem:[%s6371_s4 + $0x158] sm:$0xff]  }
 0x115   :  { %v311_v18 = vmax.f32 %v295_v23, 0.0  ;;  %v5204_v23 = vld [vmem:[%s6371_s4 + $0x160] sm:$0xff]  }
 0x116   :  { %v5474_v27 = vpack.c.bf16 %v313_v25, %v312_v24  ;;  %4435 = vmatpush3.bf16.msra.mxu1 %v5454_v9  ;;  %4467 = vmatpush3.bf16.msra.mxu0 %v5454_v9  ;;  %v5205_v24 = vld [vmem:[%s6371_s4 + $0x168] sm:$0xff]   ;;  %v5206_v25 = vld [vmem:[%s6371_s4 + $0x170] sm:$0xff]  }
 0x117   :  { %v5478_v28 = vpack.c.bf16 %v311_v18, %v310_v26  ;;  %v5207_v26 = vld [vmem:[%s6371_s4 + $0x178] sm:$0xff]   ;;  %v5208_v18 = vld [vmem:[%s6371_s4 + $0x180] sm:$0xff]  }
 0x119   :  { %4436 = vmatprep.subr.bf16.mxu1 %v5478_v28  ;;  %4468 = vmatprep.subr.bf16.mxu0 %v5478_v28 }
 0x11a   :  { %4437 = vmatpush3.bf16.msra.mxu1 %v5478_v28  ;;  %4469 = vmatpush3.bf16.msra.mxu0 %v5478_v28 }
 0x11b   :  { %4438 = vmatprep.subr.bf16.mxu1 %v5474_v27  ;;  %4470 = vmatprep.subr.bf16.mxu0 %v5474_v27 }
 0x11e   :  { %4439 = vmatpush3.bf16.msra.mxu1 %v5474_v27  ;;  %4471 = vmatpush3.bf16.msra.mxu0 %v5474_v27 }
 0x11f   :  { %4552 = vmatprep.subr.bf16.mxu0 %v5419_v40  ;;  %4488 = vmatprep.subr.bf16.mxu1 %v5216_v53 }
 0x121   :  { %4473 = vmatmul.mubr.bf16.vlgmr.msra.gmra.mrb[16].mxu0 %v5161_v20  ;;  %4441 = vmatmul.mubr.bf16.vlgmr.msra.gmra.mrb[0].mxu1 %v5169_v29  ;;  %v5209_v20 = vld [vmem:[%s6371_s4 + $0x188] sm:$0xff]   ;;  %v5210_v29 = vld [vmem:[%s6371_s4 + $0x190] sm:$0xff]  }
 0x122   :  { %4553 = vmatpush3.bf16.msra.mxu0 %v5419_v40  ;;  %4476 = vmatprep.mubr.bf16.mxu0 %v5162_v30  ;;  %v5211_v30 = vld [vmem:[%s6371_s4 + $0x198] sm:$0xff]  }
 0x123   :  { %4554 = vmatprep.subr.bf16.mxu0 %v5416_v37  ;;  %4444 = vmatprep.mubr.bf16.mxu1 %v5172_v31  ;;  %v5212_v31 = vld [vmem:[%s6371_s4 + $0x1a0] sm:$0xff]  }
 0x124   :  { %4489 = vmatpush3.bf16.msra.mxu1 %v5216_v53 }
 0x125   :  { %4490 = vmatprep.subr.bf16.mxu1 %v5217_v56 }
 0x126   :  { %4555 = vmatpush3.bf16.msra.mxu0 %v5416_v37 }
 0x127   :  { %4556 = vmatprep.subr.bf16.mxu0 %v5439_v58 }
 0x128   :  { %4491 = vmatpush3.bf16.msra.mxu1 %v5217_v56 }
 0x129   :  { %4477 = vmatmul.mubr.bf16.gmra.mrb[20].mxu0 %v5163_v32  ;;  %4445 = vmatmul.mubr.bf16.gmra.mrb[4].mxu1 %v5173_v33  ;;  %v5213_v32 = vld [vmem:[%s6371_s4 + $0x1a8] sm:$0xff]   ;;  %v5214_v33 = vld [vmem:[%s6371_s4 + $0x1b0] sm:$0xff]  }
 0x12a   :  { %4557 = vmatpush3.bf16.msra.mxu0 %v5439_v58  ;;  %4480 = vmatprep.mubr.bf16.mxu0 %v5164_v34  ;;  %v5215_v34 = vld [vmem:[%s6371_s4 + $0x1b8] sm:$0xff]  }
 0x12b   :  { %4558 = vmatprep.subr.bf16.mxu0 %v5434_v55  ;;  %4448 = vmatprep.mubr.bf16.mxu1 %v5176_v35  ;;  %v5218_v35 = vld [vmem:[%s6371_s4 + $0x1c0] sm:$0xff]  }
 0x12c   :  { %4492 = vmatprep.subr.bf16.mxu1 %v5220_v59 }
 0x12d   :  { %4493 = vmatpush3.bf16.msra.mxu1 %v5220_v59  ;;  %v5236_v59 = vld [vmem:[%s6374_s5 + $0x10] sm:$0xff]  }
 0x12e   :  { %4559 = vmatpush3.bf16.msra.mxu0 %v5434_v55  ;;  %4494 = vmatprep.subr.bf16.mxu1 %v5221_v61 }
 0x12f   :  { %4560 = vmatprep.subr.bf16.mxu0 %v5459_v12 }
 0x131   :  { %4481 = vmatmul.mubr.bf16.gmra.mrb[24].mxu0 %v5165_v36  ;;  %4449 = vmatmul.mubr.bf16.gmra.mrb[8].mxu1 %v5177_v38  ;;  %v5219_v36 = vld [vmem:[%s6371_s4 + $0x1c8] sm:$0xff]   ;;  %v5222_v38 = vld [vmem:[%s6371_s4 + $0x1d0] sm:$0xff]  }
 0x132   :  { %4561 = vmatpush3.bf16.msra.mxu0 %v5459_v12  ;;  %4484 = vmatprep.mubr.bf16.mxu0 %v5166_v39  ;;  %v5223_v39 = vld [vmem:[%s6371_s4 + $0x1d8] sm:$0xff]  }
 0x133   :  { %4562 = vmatprep.subr.bf16.mxu0 %v5454_v9  ;;  %4452 = vmatprep.mubr.bf16.mxu1 %v5180_v41  ;;  %v5226_v41 = vld [vmem:[%s6371_s4 + $0x1e0] sm:$0xff]  }
 0x134   :  { %4495 = vmatpush3.bf16.msra.mxu1 %v5221_v61  ;;  %v5238_v61 = vld [vmem:[%s6371_s4 + $0x210] sm:$0xff]  }
 0x135   :  { %4496 = vmatprep.subr.bf16.mxu1 %v5224_v63 }
 0x136   :  { %4563 = vmatpush3.bf16.msra.mxu0 %v5454_v9 }
 0x137   :  { %4564 = vmatprep.subr.bf16.mxu0 %v5478_v28 }
 0x138   :  { %4497 = vmatpush3.bf16.msra.mxu1 %v5224_v63 }
 0x139   :  { %4485 = vmatmul.mubr.bf16.gmra.mrb[28].mxu0 %v5167_v42  ;;  %4453 = vmatmul.mubr.bf16.gmra.mrb[12].mxu1 %v5181_v43 }
 0x13a   :  { %4565 = vmatpush3.bf16.msra.mxu0 %v5478_v28  ;;  %4568 = vmatprep.mubr.bf16.mxu0 %v5170_v44 }
 0x13b   :  { %4566 = vmatprep.subr.bf16.mxu0 %v5474_v27  ;;  %4498 = vmatprep.subr.bf16.mxu1 %v5225_v1 }
 0x13c   :  { %4499 = vmatpush3.bf16.msra.mxu1 %v5225_v1 }
 0x13d   :  { %4500 = vmatprep.subr.bf16.mxu1 %v5228_v3 }
 0x13e   :  { %4567 = vmatpush3.bf16.msra.mxu0 %v5474_v27 }
 0x13f   :  { %4616 = vmatprep.subr.bf16.mxu0 %v5419_v40 }
 0x140   :  { %4501 = vmatpush3.bf16.msra.mxu1 %v5228_v3 }
 0x141   :  { %4569 = vmatmul.mubr.bf16.vlgmr.msra.gmra.mrb[32].mxu0 %v5171_v45  ;;  %4502 = vmatprep.subr.bf16.mxu1 %v5229_v5 }
 0x142   :  { %4617 = vmatpush3.bf16.msra.mxu0 %v5419_v40  ;;  %4572 = vmatprep.mubr.bf16.mxu0 %v5174_v46 }
 0x143   :  { %4618 = vmatprep.subr.bf16.mxu0 %v5416_v37 }
 0x144   :  { %4503 = vmatpush3.bf16.msra.mxu1 %v5229_v5 }
 0x145   :  { %4520 = vmatprep.subr.bf16.mxu1 %v5653_v7 }
 0x146   :  { %4619 = vmatpush3.bf16.msra.mxu0 %v5416_v37 }
 0x147   :  { %4620 = vmatprep.subr.bf16.mxu0 %v5439_v58 }
 0x149   :  { %4573 = vmatmul.mubr.bf16.gmra.mrb[36].mxu0 %v5175_v47 }
 0x14a   :  { %4621 = vmatpush3.bf16.msra.mxu0 %v5439_v58  ;;  %4576 = vmatprep.mubr.bf16.mxu0 %v5178_v48 }
 0x14b   :  { %4622 = vmatprep.subr.bf16.mxu0 %v5434_v55 }
 0x14e   :  { %4623 = vmatpush3.bf16.msra.mxu0 %v5434_v55 }
 0x14f   :  { %4624 = vmatprep.subr.bf16.mxu0 %v5459_v12 }
 0x151   :  { %4577 = vmatmul.mubr.bf16.gmra.mrb[40].mxu0 %v5179_v49 }
 0x152   :  { %4625 = vmatpush3.bf16.msra.mxu0 %v5459_v12  ;;  %4580 = vmatprep.mubr.bf16.mxu0 %v5182_v50 }
 0x153   :  { %4626 = vmatprep.subr.bf16.mxu0 %v5454_v9 }
 0x156   :  { %4627 = vmatpush3.bf16.msra.mxu0 %v5454_v9 }
 0x157   :  { %4628 = vmatprep.subr.bf16.mxu0 %v5478_v28 }
 0x159   :  { %4581 = vmatmul.mubr.bf16.gmra.mrb[44].mxu0 %v5183_v51  ;;  %v5234_v51 = vld [vmem:[%s6371_s4 + $0x200] sm:$0xff]  }
 0x15a   :  { %4629 = vmatpush3.bf16.msra.mxu0 %v5478_v28  ;;  %4632 = vmatprep.mubr.bf16.mxu0 %v5184_v52 }
 0x15b   :  { %4630 = vmatprep.subr.bf16.mxu0 %v5474_v27 }
 0x15e   :  { %4631 = vmatpush3.bf16.msra.mxu0 %v5474_v27 }
 0x15f   :  { %4680 = vmatprep.subr.bf16.mxu0 %v5419_v40 }
 0x161   :  { %4633 = vmatmul.mubr.bf16.vlgmr.msra.gmra.mrb[48].mxu0 %v5185_v54 }
 0x162   :  { %4681 = vmatpush3.bf16.msra.mxu0 %v5419_v40  ;;  %4636 = vmatprep.mubr.bf16.mxu0 %v5186_v57  ;;  %v5235_v57 = vld [vmem:[%s6371_s4 + $0x208] sm:$0xff]  }
 0x163   :  { %4682 = vmatprep.subr.bf16.mxu0 %v5416_v37 }
 0x166   :  { %4683 = vmatpush3.bf16.msra.mxu0 %v5416_v37 }
 0x167   :  { %4684 = vmatprep.subr.bf16.mxu0 %v5439_v58 }
 0x169   :  { %4637 = vmatmul.mubr.bf16.gmra.mrb[52].mxu0 %v5187_v60 }
 0x16a   :  { %4685 = vmatpush3.bf16.msra.mxu0 %v5439_v58  ;;  %4640 = vmatprep.mubr.bf16.mxu0 %v5188_v62 }
 0x16b   :  { %4686 = vmatprep.subr.bf16.mxu0 %v5434_v55 }
 0x16e   :  { %4687 = vmatpush3.bf16.msra.mxu0 %v5434_v55 }
 0x16f   :  { %4688 = vmatprep.subr.bf16.mxu0 %v5459_v12 }
 0x171   :  { %4641 = vmatmul.mubr.bf16.gmra.mrb[56].mxu0 %v5189_v0 }
 0x172   :  { %4689 = vmatpush3.bf16.msra.mxu0 %v5459_v12  ;;  %4644 = vmatprep.mubr.bf16.mxu0 %v5190_v2 }
 0x173   :  { %4690 = vmatprep.subr.bf16.mxu0 %v5454_v9 }
 0x176   :  { %4691 = vmatpush3.bf16.msra.mxu0 %v5454_v9 }
 0x177   :  { %4692 = vmatprep.subr.bf16.mxu0 %v5478_v28 }
 0x179   :  { %4645 = vmatmul.mubr.bf16.gmra.mrb[60].mxu0 %v5191_v4 }
 0x17a   :  { %4693 = vmatpush3.bf16.msra.mxu0 %v5478_v28  ;;  %4696 = vmatprep.mubr.bf16.mxu0 %v5192_v6 }
 0x17b   :  { %4694 = vmatprep.subr.bf16.mxu0 %v5474_v27 }
 0x17e   :  { %4695 = vmatpush3.bf16.msra.mxu0 %v5474_v27 }
 0x17f   :  { %4744 = vmatprep.subr.bf16.mxu0 %v5419_v40 }
 0x181   :  { %4697 = vmatmul.mubr.bf16.vlgmr.msra.gmra.mrb[64].mxu0 %v5193_v8  ;;  %v5239_v8 = vld [vmem:[%s6371_s4 + $0x218] sm:$0xff]  }
 0x182   :  { %4745 = vmatpush3.bf16.msra.mxu0 %v5419_v40  ;;  %4700 = vmatprep.mubr.bf16.mxu0 %v5194_v10  ;;  %v5240_v10 = vld [vmem:[%s6374_s5 + $0x20] sm:$0xff]  }
 0x183   :  { %4746 = vmatprep.subr.bf16.mxu0 %v5416_v37 }
 0x186   :  { %4747 = vmatpush3.bf16.msra.mxu0 %v5416_v37 }
 0x187   :  { %4748 = vmatprep.subr.bf16.mxu0 %v5439_v58 }
 0x189   :  { %4701 = vmatmul.mubr.bf16.gmra.mrb[68].mxu0 %v5195_v11 }
 0x18a   :  { %4749 = vmatpush3.bf16.msra.mxu0 %v5439_v58  ;;  %4704 = vmatprep.mubr.bf16.mxu0 %v5196_v13 }
 0x18b   :  { %4750 = vmatprep.subr.bf16.mxu0 %v5434_v55 }
 0x18e   :  { %4751 = vmatpush3.bf16.msra.mxu0 %v5434_v55 }
 0x18f   :  { %4752 = vmatprep.subr.bf16.mxu0 %v5459_v12 }
 0x191   :  { %4705 = vmatmul.mubr.bf16.gmra.mrb[72].mxu0 %v5197_v14  ;;  %v5245_v14 = vld [vmem:[%s6371_s4 + $0x220] sm:$0xff]  }
 0x192   :  { %4753 = vmatpush3.bf16.msra.mxu0 %v5459_v12  ;;  %4708 = vmatprep.mubr.bf16.mxu0 %v5198_v15 }
 0x193   :  { %4754 = vmatprep.subr.bf16.mxu0 %v5454_v9 }
 0x196   :  { %4755 = vmatpush3.bf16.msra.mxu0 %v5454_v9 }
 0x197   :  { %4756 = vmatprep.subr.bf16.mxu0 %v5478_v28 }
 0x199   :  { %4709 = vmatmul.mubr.bf16.gmra.mrb[76].mxu0 %v5199_v16 }
 0x19a   :  { %4757 = vmatpush3.bf16.msra.mxu0 %v5478_v28  ;;  %4760 = vmatprep.mubr.bf16.mxu0 %v5200_v17 }
 0x19b   :  { %4758 = vmatprep.subr.bf16.mxu0 %v5474_v27 }
 0x19e   :  { %4759 = vmatpush3.bf16.msra.mxu0 %v5474_v27 }
 0x19f   :  { %4808 = vmatprep.subr.bf16.mxu0 %v5419_v40 }
 0x1a1   :  { %4761 = vmatmul.mubr.bf16.vlgmr.msra.gmra.mrb[80].mxu0 %v5201_v19 }
 0x1a2   :  { %4809 = vmatpush3.bf16.msra.mxu0 %v5419_v40  ;;  %4764 = vmatprep.mubr.bf16.mxu0 %v5202_v21 }
 0x1a3   :  { %4810 = vmatprep.subr.bf16.mxu0 %v5416_v37 }
 0x1a6   :  { %4811 = vmatpush3.bf16.msra.mxu0 %v5416_v37 }
 0x1a7   :  { %4812 = vmatprep.subr.bf16.mxu0 %v5439_v58 }
 0x1a9   :  { %4765 = vmatmul.mubr.bf16.gmra.mrb[84].mxu0 %v5203_v22 }
 0x1aa   :  { %4813 = vmatpush3.bf16.msra.mxu0 %v5439_v58  ;;  %4768 = vmatprep.mubr.bf16.mxu0 %v5204_v23 }
 0x1ab   :  { %4814 = vmatprep.subr.bf16.mxu0 %v5434_v55 }
 0x1ae   :  { %4815 = vmatpush3.bf16.msra.mxu0 %v5434_v55 }
 0x1af   :  { %4816 = vmatprep.subr.bf16.mxu0 %v5459_v12 }
 0x1b1   :  { %4769 = vmatmul.mubr.bf16.gmra.mrb[88].mxu0 %v5205_v24  ;;  %v5241_v24 = vld [vmem:[%s6374_s5 + $0x28] sm:$0xff]  }
 0x1b2   :  { %4817 = vmatpush3.bf16.msra.mxu0 %v5459_v12  ;;  %4772 = vmatprep.mubr.bf16.mxu0 %v5206_v25 }
 0x1b3   :  { %4818 = vmatprep.subr.bf16.mxu0 %v5454_v9 }
 0x1b6   :  { %4819 = vmatpush3.bf16.msra.mxu0 %v5454_v9 }
 0x1b7   :  { %4820 = vmatprep.subr.bf16.mxu0 %v5478_v28 }
 0x1b9   :  { %4773 = vmatmul.mubr.bf16.gmra.mrb[92].mxu0 %v5207_v26 }
 0x1ba   :  { %4821 = vmatpush3.bf16.msra.mxu0 %v5478_v28  ;;  %4824 = vmatprep.mubr.bf16.mxu0 %v5208_v18 }
 0x1bb   :  { %4822 = vmatprep.subr.bf16.mxu0 %v5474_v27 }
 0x1be   :  { %4823 = vmatpush3.bf16.msra.mxu0 %v5474_v27 }
 0x1bf   :  { %4872 = vmatprep.subr.bf16.mxu0 %v5419_v40 }
 0x1c1   :  { %4825 = vmatmul.mubr.bf16.vlgmr.msra.gmra.mrb[96].mxu0 %v5209_v20  ;;  %v5242_v20 = vld [vmem:[%s6374_s5 + $0x30] sm:$0xff]  }
 0x1c2   :  { %4873 = vmatpush3.bf16.msra.mxu0 %v5419_v40  ;;  %4828 = vmatprep.mubr.bf16.mxu0 %v5210_v29  ;;  %v5247_v29 = vld [vmem:[%s6371_s4 + $0x228] sm:$0xff]  }
 0x1c3   :  { %4874 = vmatprep.subr.bf16.mxu0 %v5416_v37 }
 0x1c6   :  { %4875 = vmatpush3.bf16.msra.mxu0 %v5416_v37 }
 0x1c7   :  { %4876 = vmatprep.subr.bf16.mxu0 %v5439_v58 }
 0x1c9   :  { %4829 = vmatmul.mubr.bf16.gmra.mrb[100].mxu0 %v5211_v30 }
 0x1ca   :  { %4877 = vmatpush3.bf16.msra.mxu0 %v5439_v58  ;;  %4832 = vmatprep.mubr.bf16.mxu0 %v5212_v31 }
 0x1cb   :  { %4878 = vmatprep.subr.bf16.mxu0 %v5434_v55 }
 0x1ce   :  { %4879 = vmatpush3.bf16.msra.mxu0 %v5434_v55 }
 0x1cf   :  { %4880 = vmatprep.subr.bf16.mxu0 %v5459_v12 }
 0x1d1   :  { %4833 = vmatmul.mubr.bf16.gmra.mrb[104].mxu0 %v5213_v32  ;;  %v5249_v32 = vld [vmem:[%s6371_s4 + $0x230] sm:$0xff]  }
 0x1d2   :  { %4881 = vmatpush3.bf16.msra.mxu0 %v5459_v12  ;;  %4836 = vmatprep.mubr.bf16.mxu0 %v5214_v33 }
 0x1d3   :  { %4882 = vmatprep.subr.bf16.mxu0 %v5454_v9 }
 0x1d6   :  { %4883 = vmatpush3.bf16.msra.mxu0 %v5454_v9 }
 0x1d7   :  { %4884 = vmatprep.subr.bf16.mxu0 %v5478_v28 }
 0x1d9   :  { %4837 = vmatmul.mubr.bf16.gmra.mrb[108].mxu0 %v5215_v34 }
 0x1da   :  { %4885 = vmatpush3.bf16.msra.mxu0 %v5478_v28  ;;  %4888 = vmatprep.mubr.bf16.mxu0 %v5218_v35 }
 0x1db   :  { %4886 = vmatprep.subr.bf16.mxu0 %v5474_v27 }
 0x1de   :  { %4887 = vmatpush3.bf16.msra.mxu0 %v5474_v27 }
 0x1df   :  { %4936 = vmatprep.subr.bf16.mxu0 %v5419_v40 }
 0x1e1   :  { %4889 = vmatmul.mubr.bf16.vlgmr.msra.gmra.mrb[112].mxu0 %v5219_v36 }
 0x1e2   :  { %4937 = vmatpush3.bf16.msra.mxu0 %v5419_v40  ;;  %4892 = vmatprep.mubr.bf16.mxu0 %v5222_v38  ;;  %v5227_v40 = vld [vmem:[%s6371_s4 + $0x1e8] sm:$0xff]  }
 0x1e3   :  { %4938 = vmatprep.subr.bf16.mxu0 %v5416_v37 }
 0x1e6   :  { %4939 = vmatpush3.bf16.msra.mxu0 %v5416_v37  ;;  %v5230_v37 = vld [vmem:[%s6371_s4 + $0x1f0] sm:$0xff]  }
 0x1e7   :  { %4940 = vmatprep.subr.bf16.mxu0 %v5439_v58 }
 0x1e9   :  { %4893 = vmatmul.mubr.bf16.gmra.mrb[116].mxu0 %v5223_v39 }
 0x1ea   :  { %4941 = vmatpush3.bf16.msra.mxu0 %v5439_v58  ;;  %4896 = vmatprep.mubr.bf16.mxu0 %v5226_v41 }
 0x1eb   :  { %4942 = vmatprep.subr.bf16.mxu0 %v5434_v55 }
 0x1ee   :  { %4943 = vmatpush3.bf16.msra.mxu0 %v5434_v55  ;;  %v5231_v55 = vld [vmem:[%s6371_s4 + $0x1f8] sm:$0xff]  }
 0x1ef   :  { %4944 = vmatprep.subr.bf16.mxu0 %v5459_v12 }
 0x1f1   :  { %4897 = vmatmul.mubr.bf16.gmra.mrb[120].mxu0 %v5227_v40  ;;  %v5243_v40 = vld [vmem:[%s6374_s5 + $0x38] sm:$0xff]  }
 0x1f2   :  { %4945 = vmatpush3.bf16.msra.mxu0 %v5459_v12  ;;  %4900 = vmatprep.mubr.bf16.mxu0 %v5230_v37 }
 0x1f3   :  { %4946 = vmatprep.subr.bf16.mxu0 %v5454_v9 }
 0x1f4   :  { %v4474_v58 = vpop.f32.mrb[16].mxu0  ;;  %v5808_v42 = vpop.f32.mrb[0].mxu1 }
 0x1f5   :  { %v606_v43 = vpop.f32.mrb[17].mxu0  ;;  %v5813_v44 = vpop.f32.mrb[1].mxu1 }
 0x1f6   :  { %v4475_v45 = vpop.f32.mrb[18].mxu0  ;;  %4947 = vmatpush3.bf16.msra.mxu0 %v5454_v9  ;;  %v5816_v46 = vpop.f32.mrb[2].mxu1  ;;  %v5233_v9 = vld [vmem:[%s6374_s5 + $0x8] sm:$0xff]  }
 0x1f7   :  { %v670_v47 = vpack.c.bf16 %v4475_v45, %v4474_v58  ;;  %v609_v12 = vpop.f32.mrb[19].mxu0  ;;  %4948 = vmatprep.subr.bf16.mxu0 %v5478_v28  ;;  %v484_v48 = vpack.c.bf16 %v5816_v46, %v5808_v42  ;;  %v5821_v49 = vpop.f32.mrb[3].mxu1  ;;  %v5244_v58 = vld [vmem:[%s6374_s5 + $0x80] sm:$0xff]  }
 0x1f8   :  { %v669_v50 = vpack.c.bf16 %v609_v12, %v606_v43  ;;  %v483_v52 = vpack.c.bf16 %v5821_v49, %v5813_v44  ;;  %v5246_v49 = vld [vmem:[%s6374_s5 + $0x88] sm:$0xff]  }
 0x1f9   :  { %4901 = vmatmul.mubr.bf16.gmra.mrb[124].mxu0 %v5231_v55  ;;  %v5251_v55 = vld [vmem:[%s6371_s4 + $0x238] sm:$0xff]  }
 0x1fa   :  { %4504 = vmatprep.mubr.bf16.mxu1 %v669_v50  ;;  %4949 = vmatpush3.bf16.msra.mxu0 %v5478_v28 }
 0x1fb   :  { %4505 = vmatmul.mubr.bf16.vlgmr.msra.gmra.mrb[16].mxu1 %v670_v47  ;;  %4950 = vmatprep.subr.bf16.mxu0 %v5474_v27 }
 0x1fc   :  { %v4478_v53 = vpop.f32.mrb[20].mxu0  ;;  %4521 = vmatpush3.bf16.msra.mxu1 %v5653_v7  ;;  %4952 = vmatprep.mubr.bf16.mxu0 %v5234_v51  ;;  %v5834_v54 = vpop.f32.mrb[4].mxu1  ;;  %v5248_v51 = vld [vmem:[%s6374_s5 + $0x90] sm:$0xff]  }
 0x1fd   :  { %v622_v56 = vpop.f32.mrb[21].mxu0  ;;  %4522 = vmatprep.subr.bf16.mxu1 %v5233_v9  ;;  %v5842_v28 = vpop.f32.mrb[5].mxu1 }
 0x1fe   :  { %v4479_v60 = vpop.f32.mrb[22].mxu0  ;;  %4951 = vmatpush3.bf16.msra.mxu0 %v5474_v27  ;;  %v5848_v62 = vpop.f32.mrb[6].mxu1  ;;  %v5237_v27 = vld [vmem:[%s6374_s5 + $0x18] sm:$0xff]  }
 0x1ff   :  { %v672_v63 = vpack.c.bf16 %v4479_v60, %v4478_v53  ;;  %v625_v0 = vpop.f32.mrb[23].mxu0  ;;  %v486_v1 = vpack.c.bf16 %v5848_v62, %v5834_v54  ;;  %v5852_v2 = vpop.f32.mrb[7].mxu1  ;;  %v5253_v54 = vld [vmem:[%s6374_s5 + $0xa8] sm:$0xff]  }
 0x200   :  { %v671_v3 = vpack.c.bf16 %v625_v0, %v622_v56  ;;  %4523 = vmatpush3.bf16.msra.mxu1 %v5233_v9  ;;  %v485_v4 = vpack.c.bf16 %v5852_v2, %v5842_v28  ;;  %v5254_v0 = vld [vmem:[%s6374_s5 + $0xb0] sm:$0xff]  }
 0x201   :  { %4953 = vmatmul.mubr.bf16.vlgmr.msra.gmra.mrb[128].mxu0 %v5235_v57  ;;  %4524 = vmatprep.subr.bf16.mxu1 %v5236_v59  ;;  %v5252_v57 = vld [vmem:[%s6374_s5 + $0xa0] sm:$0xff]  }
 0x202   :  { %4508 = vmatprep.mubr.bf16.mxu1 %v671_v3  ;;  %4956 = vmatprep.mubr.bf16.mxu0 %v5238_v61 }
 0x203   :  { %4509 = vmatmul.mubr.bf16.gmra.mrb[20].mxu1 %v672_v63 }
 0x204   :  { %v4482_v5 = vpop.f32.mrb[24].mxu0  ;;  %4525 = vmatpush3.bf16.msra.mxu1 %v5236_v59  ;;  %v5859_v6 = vpop.f32.mrb[8].mxu1 }
 0x205   :  { %v638_v7 = vpop.f32.mrb[25].mxu0  ;;  %4526 = vmatprep.subr.bf16.mxu1 %v5237_v27  ;;  %v5867_v11 = vpop.f32.mrb[9].mxu1 }
 0x206   :  { %v4483_v13 = vpop.f32.mrb[26].mxu0  ;;  %v5872_v15 = vpop.f32.mrb[10].mxu1 }
 0x207   :  { %v674_v16 = vpack.c.bf16 %v4483_v13, %v4482_v5  ;;  %v641_v17 = vpop.f32.mrb[27].mxu0  ;;  %v488_v19 = vpack.c.bf16 %v5872_v15, %v5859_v6  ;;  %v5876_v21 = vpop.f32.mrb[11].mxu1  ;;  %v5255_v5 = vld [vmem:[%s6374_s5 + $0xb8] sm:$0xff]   ;;  %v5257_v15 = vld [vmem:[%s6374_s5 + $0xc8] sm:$0xff]  }
 0x208   :  { %v673_v22 = vpack.c.bf16 %v641_v17, %v638_v7  ;;  %4527 = vmatpush3.bf16.msra.mxu1 %v5237_v27  ;;  %v487_v23 = vpack.c.bf16 %v5876_v21, %v5867_v11  ;;  %v5256_v7 = vld [vmem:[%s6374_s5 + $0xc0] sm:$0xff]  }
 0x209   :  { %4957 = vmatmul.mubr.bf16.gmra.mrb[132].mxu0 %v5239_v8  ;;  %4528 = vmatprep.subr.bf16.mxu1 %v5240_v10 }
 0x20a   :  { %4512 = vmatprep.mubr.bf16.mxu1 %v673_v22  ;;  %4960 = vmatprep.mubr.bf16.mxu0 %v5245_v14  ;;  %v6011_v22 = vld [vmem:[%s6374_s5 + $0x208] sm:$0xff]  }
 0x20b   :  { %4513 = vmatmul.mubr.bf16.gmra.mrb[24].mxu1 %v674_v16  ;;  %v5994_v16 = vld [vmem:[%s6374_s5 + $0x200] sm:$0xff]  }
 0x20c   :  { %v4486_v25 = vpop.f32.mrb[28].mxu0  ;;  %4529 = vmatpush3.bf16.msra.mxu1 %v5240_v10  ;;  %v5883_v26 = vpop.f32.mrb[12].mxu1  ;;  %4968 = vmatprep.subr.bf16.mxu0 %v5994_v16 }
 0x20d   :  { %v654_v18 = vpop.f32.mrb[29].mxu0  ;;  %4530 = vmatprep.subr.bf16.mxu1 %v5241_v24  ;;  %v468_v30 = vpop.f32.mrb[13].mxu1  ;;  %4969 = vmatpush3.bf16.msra.mxu0 %v5994_v16 }
 0x20e   :  { %v4487_v31 = vpop.f32.mrb[30].mxu0  ;;  %v5894_v33 = vpop.f32.mrb[14].mxu1  ;;  %4970 = vmatprep.subr.bf16.mxu0 %v6011_v22 }
 0x20f   :  { %v676_v34 = vpack.c.bf16 %v4487_v31, %v4486_v25  ;;  %v657_v35 = vpop.f32.mrb[31].mxu0  ;;  %v490_v36 = vpack.c.bf16 %v5894_v33, %v5883_v26  ;;  %v471_v38 = vpop.f32.mrb[15].mxu1 }
 0x210   :  { %v675_v39 = vpack.c.bf16 %v657_v35, %v654_v18  ;;  %4531 = vmatpush3.bf16.msra.mxu1 %v5241_v24  ;;  %v489_v41 = vpack.c.bf16 %v471_v38, %v468_v30  ;;  %v5259_v18 = vld [vmem:[%s6374_s5 + $0xd8] sm:$0xff]   ;;  %v5260_v30 = vld [vmem:[%s6374_s5 + $0xe0] sm:$0xff]   ;;  %v5261_v38 = vld [vmem:[%s6374_s5 + $0xe8] sm:$0xff]  }
 0x211   :  { %4532 = vmatprep.subr.bf16.mxu1 %v5242_v20  ;;  %4961 = vmatmul.mubr.bf16.gmra.mrb[136].mxu0 %v5247_v29 }
 0x212   :  { %4516 = vmatprep.mubr.bf16.mxu1 %v675_v39  ;;  %4964 = vmatprep.mubr.bf16.mxu0 %v5249_v32  ;;  %v6046_v32 = vld [vmem:[%s6374_s5 + $0x218] sm:$0xff]   ;;  %v6061_v39 = vld [vmem:[%s6374_s5 + $0x220] sm:$0xff]  }
 0x213   :  { %4517 = vmatmul.mubr.bf16.gmra.mrb[28].mxu1 %v676_v34  ;;  %4971 = vmatpush3.bf16.msra.mxu0 %v6011_v22 }
 0x214   :  { %4533 = vmatpush3.bf16.msra.mxu1 %v5242_v20  ;;  %4536 = vmatprep.mubr.bf16.mxu1 %v483_v52  ;;  %v5904_v37 = vpop.f32.mrb[32].mxu0  ;;  %v6029_v20 = vld [vmem:[%s6374_s5 + $0x210] sm:$0xff]  }
 0x215   :  { %4534 = vmatprep.subr.bf16.mxu1 %v5243_v40  ;;  %v1083_v43 = vpop.f32.mrb[33].mxu0  ;;  %4972 = vmatprep.subr.bf16.mxu0 %v6029_v20 }
 0x216   :  { %v5912_v45 = vpop.f32.mrb[34].mxu0 }
 0x217   :  { %v1147_v47 = vpack.c.bf16 %v5912_v45, %v5904_v37  ;;  %v1086_v12 = vpop.f32.mrb[35].mxu0  ;;  %4973 = vmatpush3.bf16.msra.mxu0 %v6029_v20 }
 0x218   :  { %4535 = vmatpush3.bf16.msra.mxu1 %v5243_v40  ;;  %v1146_v44 = vpack.c.bf16 %v1086_v12, %v1083_v43  ;;  %4974 = vmatprep.subr.bf16.mxu0 %v6046_v32  ;;  %v5262_v40 = vld [vmem:[%s6374_s5 + $0xf0] sm:$0xff]   ;;  %v5263_v12 = vld [vmem:[%s6374_s5 + $0xf8] sm:$0xff]  }
 0x219   :  { %4584 = vmatprep.subr.bf16.mxu1 %v5244_v58  ;;  %4965 = vmatmul.mubr.bf16.gmra.mrb[140].mxu0 %v5251_v55 }
 0x21b   :  { %4537 = vmatmul.mubr.bf16.vlgmr.msra.gmra.mrb[16].mxu1 %v484_v48  ;;  %v5250_v48 = vld [vmem:[%s6374_s5 + $0x98] sm:$0xff]   ;;  %4975 = vmatpush3.bf16.msra.mxu0 %v6046_v32 }
 0x21c   :  { %4585 = vmatpush3.bf16.msra.mxu1 %v5244_v58  ;;  %4540 = vmatprep.mubr.bf16.mxu1 %v485_v4  ;;  %v5925_v50 = vpop.f32.mrb[36].mxu0  ;;  %v6076_v58 = vld [vmem:[%s6374_s5 + $0x228] sm:$0xff]  }
 0x21d   :  { %4586 = vmatprep.subr.bf16.mxu1 %v5246_v49  ;;  %v1099_v52 = vpop.f32.mrb[37].mxu0  ;;  %4976 = vmatprep.subr.bf16.mxu0 %v6061_v39 }
 0x21e   :  { %v5930_v9 = vpop.f32.mrb[38].mxu0 }
 0x21f   :  { %v1149_v53 = vpack.c.bf16 %v5930_v9, %v5925_v50  ;;  %v1102_v42 = vpop.f32.mrb[39].mxu0  ;;  %4977 = vmatpush3.bf16.msra.mxu0 %v6061_v39  ;;  %v5264_v50 = vld [vmem:[%s6374_s5 + $0x100] sm:$0xff]  }
 0x220   :  { %4587 = vmatpush3.bf16.msra.mxu1 %v5246_v49  ;;  %v1148_v46 = vpack.c.bf16 %v1102_v42, %v1099_v52  ;;  %4978 = vmatprep.subr.bf16.mxu0 %v6076_v58  ;;  %v6108_v52 = vld [vmem:[%s6374_s5 + $0x238] sm:$0xff]  }
 0x221   :  { %4588 = vmatprep.subr.bf16.mxu1 %v5248_v51 }
 0x223   :  { %4541 = vmatmul.mubr.bf16.gmra.mrb[20].mxu1 %v486_v1  ;;  %4979 = vmatpush3.bf16.msra.mxu0 %v6076_v58 }
 0x224   :  { %4589 = vmatpush3.bf16.msra.mxu1 %v5248_v51  ;;  %4544 = vmatprep.mubr.bf16.mxu1 %v487_v23  ;;  %v5940_v56 = vpop.f32.mrb[40].mxu0 }
 0x225   :  { %4590 = vmatprep.subr.bf16.mxu1 %v5250_v48  ;;  %v1115_v59 = vpop.f32.mrb[41].mxu0 }
 0x226   :  { %v5945_v28 = vpop.f32.mrb[42].mxu0 }
 0x227   :  { %v1151_v60 = vpack.c.bf16 %v5945_v28, %v5940_v56  ;;  %v1118_v61 = vpop.f32.mrb[43].mxu0 }
 0x228   :  { %4591 = vmatpush3.bf16.msra.mxu1 %v5250_v48  ;;  %v1150_v63 = vpack.c.bf16 %v1118_v61, %v1115_v59  ;;  %v5265_v48 = vld [vmem:[%s6374_s5 + $0x108] sm:$0xff]  }
 0x229   :  { %4592 = vmatprep.subr.bf16.mxu1 %v5252_v57 }
 0x22b   :  { %4545 = vmatmul.mubr.bf16.gmra.mrb[24].mxu1 %v488_v19  ;;  %v5258_v19 = vld [vmem:[%s6374_s5 + $0xd0] sm:$0xff]  }
 0x22c   :  { %4593 = vmatpush3.bf16.msra.mxu1 %v5252_v57  ;;  %4548 = vmatprep.mubr.bf16.mxu1 %v489_v41  ;;  %v5955_v62 = vpop.f32.mrb[44].mxu0  ;;  %v5266_v57 = vld [vmem:[%s6374_s5 + $0x110] sm:$0xff]  }
 0x22d   :  { %4594 = vmatprep.subr.bf16.mxu1 %v5253_v54  ;;  %v5960_v1 = vpop.f32.mrb[45].mxu0 }
 0x22e   :  { %v5962_v2 = vpop.f32.mrb[46].mxu0 }
 0x22f   :  { %v1153_v3 = vpack.c.bf16 %v5962_v2, %v5955_v62  ;;  %v1134_v4 = vpop.f32.mrb[47].mxu0 }
 0x230   :  { %4595 = vmatpush3.bf16.msra.mxu1 %v5253_v54  ;;  %v1152_v27 = vpack.c.bf16 %v1134_v4, %v5960_v1  ;;  %v5267_v54 = vld [vmem:[%s6374_s5 + $0x118] sm:$0xff]  }
 0x231   :  { %4596 = vmatprep.subr.bf16.mxu1 %v5254_v0 }
 0x233   :  { %4549 = vmatmul.mubr.bf16.gmra.mrb[28].mxu1 %v490_v36 }
 0x234   :  { %4597 = vmatpush3.bf16.msra.mxu1 %v5254_v0  ;;  %4600 = vmatprep.mubr.bf16.mxu1 %v1146_v44  ;;  %v5973_v6 = vpop.f32.mrb[48].mxu0  ;;  %v6090_v44 = vld [vmem:[%s6374_s5 + $0x230] sm:$0xff]   ;;  %v5268_v0 = vld [vmem:[%s6374_s5 + $0x120] sm:$0xff]  }
 0x235   :  { %4598 = vmatprep.subr.bf16.mxu1 %v5255_v5  ;;  %v5978_v8 = vpop.f32.mrb[49].mxu0  ;;  %4980 = vmatprep.subr.bf16.mxu0 %v6090_v44 }
 0x236   :  { %v5980_v10 = vpop.f32.mrb[50].mxu0  ;;  %4981 = vmatpush3.bf16.msra.mxu0 %v6090_v44 }
 0x237   :  { %v1495_v11 = vpack.c.bf16 %v5980_v10, %v5973_v6  ;;  %v5984_v13 = vpop.f32.mrb[51].mxu0  ;;  %4982 = vmatprep.subr.bf16.mxu0 %v6108_v52 }
 0x238   :  { %4599 = vmatpush3.bf16.msra.mxu1 %v5255_v5  ;;  %v1494_v14 = vpack.c.bf16 %v5984_v13, %v5978_v8  ;;  %v5269_v5 = vld [vmem:[%s6374_s5 + $0x128] sm:$0xff]  }
 0x239   :  { %4648 = vmatprep.subr.bf16.mxu1 %v5256_v7 }
 0x23a   :  { %4983 = vmatpush3.bf16.msra.mxu0 %v6108_v52 }
 0x23b   :  { %4601 = vmatmul.mubr.bf16.vlgmr.msra.gmra.mrb[16].mxu1 %v1147_v47 }
 0x23c   :  { %4604 = vmatprep.mubr.bf16.mxu1 %v1148_v46  ;;  %4649 = vmatpush3.bf16.msra.mxu1 %v5256_v7  ;;  %v6000_v17 = vpop.f32.mrb[52].mxu0  ;;  %v5270_v7 = vld [vmem:[%s6374_s5 + $0x130] sm:$0xff]  }
 0x23d   :  { %4650 = vmatprep.subr.bf16.mxu1 %v5257_v15  ;;  %v6005_v21 = vpop.f32.mrb[53].mxu0 }
 0x23e   :  { %v6013_v23 = vpop.f32.mrb[54].mxu0 }
 0x23f   :  { %v1497_v24 = vpack.c.bf16 %v6013_v23, %v6000_v17  ;;  %v6017_v25 = vpop.f32.mrb[55].mxu0 }
 0x240   :  { %4651 = vmatpush3.bf16.msra.mxu1 %v5257_v15  ;;  %v1496_v26 = vpack.c.bf16 %v6017_v25, %v6005_v21  ;;  %v5271_v15 = vld [vmem:[%s6374_s5 + $0x138] sm:$0xff]  }
 0x241   :  { %4652 = vmatprep.subr.bf16.mxu1 %v5258_v19 }
 0x243   :  { %4605 = vmatmul.mubr.bf16.gmra.mrb[20].mxu1 %v1149_v53 }
 0x244   :  { %4608 = vmatprep.mubr.bf16.mxu1 %v1150_v63  ;;  %4653 = vmatpush3.bf16.msra.mxu1 %v5258_v19  ;;  %v6035_v29 = vpop.f32.mrb[56].mxu0  ;;  %v5272_v19 = vld [vmem:[%s6374_s5 + $0x140] sm:$0xff]  }
 0x245   :  { %4654 = vmatprep.subr.bf16.mxu1 %v5259_v18  ;;  %v6040_v31 = vpop.f32.mrb[57].mxu0 }
 0x246   :  { %v6048_v33 = vpop.f32.mrb[58].mxu0 }
 0x247   :  { %v1499_v34 = vpack.c.bf16 %v6048_v33, %v6035_v29  ;;  %v1466_v35 = vpop.f32.mrb[59].mxu0 }
 0x248   :  { %4655 = vmatpush3.bf16.msra.mxu1 %v5259_v18  ;;  %v1498_v36 = vpack.c.bf16 %v1466_v35, %v6040_v31  ;;  %v5273_v18 = vld [vmem:[%s6374_s5 + $0x148] sm:$0xff]  }
 0x249   :  { %4656 = vmatprep.subr.bf16.mxu1 %v5260_v30 }
 0x24b   :  { %4609 = vmatmul.mubr.bf16.gmra.mrb[24].mxu1 %v1151_v60 }
 0x24c   :  { %4612 = vmatprep.mubr.bf16.mxu1 %v1152_v27  ;;  %4657 = vmatpush3.bf16.msra.mxu1 %v5260_v30  ;;  %v6067_v41 = vpop.f32.mrb[60].mxu0  ;;  %v5274_v30 = vld [vmem:[%s6374_s5 + $0x150] sm:$0xff]  }
 0x24d   :  { %4658 = vmatprep.subr.bf16.mxu1 %v5261_v38  ;;  %v1479_v37 = vpop.f32.mrb[61].mxu0 }
 0x24e   :  { %v6078_v43 = vpop.f32.mrb[62].mxu0 }
 0x24f   :  { %v1501_v55 = vpack.c.bf16 %v6078_v43, %v6067_v41  ;;  %v1482_v45 = vpop.f32.mrb[63].mxu0 }
 0x250   :  { %4659 = vmatpush3.bf16.msra.mxu1 %v5261_v38  ;;  %v1500_v47 = vpack.c.bf16 %v1482_v45, %v1479_v37  ;;  %v5275_v38 = vld [vmem:[%s6374_s5 + $0x158] sm:$0xff]  }
 0x251   :  { %4660 = vmatprep.subr.bf16.mxu1 %v5262_v40 }
 0x253   :  { %4613 = vmatmul.mubr.bf16.gmra.mrb[28].mxu1 %v1153_v3 }
 0x254   :  { %4661 = vmatpush3.bf16.msra.mxu1 %v5262_v40  ;;  %4664 = vmatprep.mubr.bf16.mxu1 %v1494_v14  ;;  %v6099_v49 = vpop.f32.mrb[64].mxu0  ;;  %v5276_v40 = vld [vmem:[%s6374_s5 + $0x160] sm:$0xff]  }
 0x255   :  { %4662 = vmatprep.subr.bf16.mxu1 %v5263_v12  ;;  %v1779_v51 = vpop.f32.mrb[65].mxu0 }
 0x256   :  { %v6110_v9 = vpop.f32.mrb[66].mxu0 }
 0x257   :  { %v1843_v53 = vpack.c.bf16 %v6110_v9, %v6099_v49  ;;  %v1782_v42 = vpop.f32.mrb[67].mxu0 }
 0x258   :  { %4663 = vmatpush3.bf16.msra.mxu1 %v5263_v12  ;;  %v1842_v46 = vpack.c.bf16 %v1782_v42, %v1779_v51  ;;  %v5277_v12 = vld [vmem:[%s6374_s5 + $0x168] sm:$0xff]  }
 0x259   :  { %4712 = vmatprep.subr.bf16.mxu1 %v5264_v50 }
 0x25b   :  { %4665 = vmatmul.mubr.bf16.vlgmr.msra.gmra.mrb[16].mxu1 %v1495_v11 }
 0x25c   :  { %4668 = vmatprep.mubr.bf16.mxu1 %v1496_v26  ;;  %4713 = vmatpush3.bf16.msra.mxu1 %v5264_v50  ;;  %v6125_v56 = vpop.f32.mrb[68].mxu0  ;;  %v5278_v50 = vld [vmem:[%s6374_s5 + $0x170] sm:$0xff]  }
 0x25d   :  { %4714 = vmatprep.subr.bf16.mxu1 %v5265_v48  ;;  %v1795_v59 = vpop.f32.mrb[69].mxu0 }
 0x25e   :  { %v6130_v28 = vpop.f32.mrb[70].mxu0 }
 0x25f   :  { %v1845_v60 = vpack.c.bf16 %v6130_v28, %v6125_v56  ;;  %v1798_v61 = vpop.f32.mrb[71].mxu0 }
 0x260   :  { %4715 = vmatpush3.bf16.msra.mxu1 %v5265_v48  ;;  %v1844_v63 = vpack.c.bf16 %v1798_v61, %v1795_v59  ;;  %v5279_v48 = vld [vmem:[%s6374_s5 + $0x178] sm:$0xff]  }
 0x261   :  { %4716 = vmatprep.subr.bf16.mxu1 %v5266_v57 }
 0x263   :  { %4669 = vmatmul.mubr.bf16.gmra.mrb[20].mxu1 %v1497_v24 }
 0x264   :  { %4672 = vmatprep.mubr.bf16.mxu1 %v1498_v36  ;;  %4717 = vmatpush3.bf16.msra.mxu1 %v5266_v57  ;;  %v6140_v62 = vpop.f32.mrb[72].mxu0  ;;  %v5280_v57 = vld [vmem:[%s6374_s5 + $0x180] sm:$0xff]  }
 0x265   :  { %4718 = vmatprep.subr.bf16.mxu1 %v5267_v54  ;;  %v1811_v1 = vpop.f32.mrb[73].mxu0 }
 0x266   :  { %v6145_v2 = vpop.f32.mrb[74].mxu0 }
 0x267   :  { %v1847_v3 = vpack.c.bf16 %v6145_v2, %v6140_v62  ;;  %v1814_v4 = vpop.f32.mrb[75].mxu0 }
 0x268   :  { %4719 = vmatpush3.bf16.msra.mxu1 %v5267_v54  ;;  %v1846_v27 = vpack.c.bf16 %v1814_v4, %v1811_v1  ;;  %v5281_v54 = vld [vmem:[%s6374_s5 + $0x188] sm:$0xff]  }
 0x269   :  { %4720 = vmatprep.subr.bf16.mxu1 %v5268_v0 }
 0x26b   :  { %4673 = vmatmul.mubr.bf16.gmra.mrb[24].mxu1 %v1499_v34 }
 0x26c   :  { %4676 = vmatprep.mubr.bf16.mxu1 %v1500_v47  ;;  %4721 = vmatpush3.bf16.msra.mxu1 %v5268_v0  ;;  %v6155_v6 = vpop.f32.mrb[76].mxu0  ;;  %v5282_v0 = vld [vmem:[%s6374_s5 + $0x190] sm:$0xff]  }
 0x26d   :  { %4722 = vmatprep.subr.bf16.mxu1 %v5269_v5  ;;  %v1827_v8 = vpop.f32.mrb[77].mxu0 }
 0x26e   :  { %v6160_v10 = vpop.f32.mrb[78].mxu0 }
 0x26f   :  { %v1849_v11 = vpack.c.bf16 %v6160_v10, %v6155_v6  ;;  %v1830_v13 = vpop.f32.mrb[79].mxu0 }
 0x270   :  { %4723 = vmatpush3.bf16.msra.mxu1 %v5269_v5  ;;  %v1848_v14 = vpack.c.bf16 %v1830_v13, %v1827_v8  ;;  %v5283_v5 = vld [vmem:[%s6374_s5 + $0x198] sm:$0xff]  }
 0x271   :  { %4724 = vmatprep.subr.bf16.mxu1 %v5270_v7 }
 0x273   :  { %4677 = vmatmul.mubr.bf16.gmra.mrb[28].mxu1 %v1501_v55 }
 0x274   :  { %4725 = vmatpush3.bf16.msra.mxu1 %v5270_v7  ;;  %4728 = vmatprep.mubr.bf16.mxu1 %v1842_v46  ;;  %v6170_v17 = vpop.f32.mrb[80].mxu0  ;;  %v5284_v7 = vld [vmem:[%s6374_s5 + $0x1a0] sm:$0xff]  }
 0x275   :  { %4726 = vmatprep.subr.bf16.mxu1 %v5271_v15  ;;  %v2127_v21 = vpop.f32.mrb[81].mxu0 }
 0x276   :  { %v6175_v23 = vpop.f32.mrb[82].mxu0 }
 0x277   :  { %v2191_v24 = vpack.c.bf16 %v6175_v23, %v6170_v17  ;;  %v2130_v25 = vpop.f32.mrb[83].mxu0 }
 0x278   :  { %4727 = vmatpush3.bf16.msra.mxu1 %v5271_v15  ;;  %v2190_v26 = vpack.c.bf16 %v2130_v25, %v2127_v21  ;;  %v5285_v15 = vld [vmem:[%s6374_s5 + $0x1a8] sm:$0xff]  }
 0x279   :  { %4776 = vmatprep.subr.bf16.mxu1 %v5272_v19 }
 0x27b   :  { %4729 = vmatmul.mubr.bf16.vlgmr.msra.gmra.mrb[16].mxu1 %v1843_v53 }
 0x27c   :  { %4732 = vmatprep.mubr.bf16.mxu1 %v1844_v63  ;;  %4777 = vmatpush3.bf16.msra.mxu1 %v5272_v19  ;;  %v6185_v29 = vpop.f32.mrb[84].mxu0  ;;  %v5286_v19 = vld [vmem:[%s6374_s5 + $0x1b0] sm:$0xff]  }
 0x27d   :  { %4778 = vmatprep.subr.bf16.mxu1 %v5273_v18  ;;  %v2143_v31 = vpop.f32.mrb[85].mxu0 }
 0x27e   :  { %v6190_v33 = vpop.f32.mrb[86].mxu0 }
 0x27f   :  { %v2193_v34 = vpack.c.bf16 %v6190_v33, %v6185_v29  ;;  %v2146_v35 = vpop.f32.mrb[87].mxu0 }
 0x280   :  { %4779 = vmatpush3.bf16.msra.mxu1 %v5273_v18  ;;  %v2192_v36 = vpack.c.bf16 %v2146_v35, %v2143_v31  ;;  %v5287_v18 = vld [vmem:[%s6374_s5 + $0x1b8] sm:$0xff]  }
 0x281   :  { %4780 = vmatprep.subr.bf16.mxu1 %v5274_v30 }
 0x283   :  { %4733 = vmatmul.mubr.bf16.gmra.mrb[20].mxu1 %v1845_v60 }
 0x284   :  { %4736 = vmatprep.mubr.bf16.mxu1 %v1846_v27  ;;  %4781 = vmatpush3.bf16.msra.mxu1 %v5274_v30  ;;  %v6197_v41 = vpop.f32.mrb[88].mxu0  ;;  %v5288_v30 = vld [vmem:[%s6374_s5 + $0x1c0] sm:$0xff]  }
 0x285   :  { %4782 = vmatprep.subr.bf16.mxu1 %v5275_v38  ;;  %v2159_v37 = vpop.f32.mrb[89].mxu0 }
 0x286   :  { %v6202_v43 = vpop.f32.mrb[90].mxu0 }
 0x287   :  { %v2195_v55 = vpack.c.bf16 %v6202_v43, %v6197_v41  ;;  %v2162_v45 = vpop.f32.mrb[91].mxu0 }
 0x288   :  { %4783 = vmatpush3.bf16.msra.mxu1 %v5275_v38  ;;  %v2194_v47 = vpack.c.bf16 %v2162_v45, %v2159_v37  ;;  %v5290_v38 = vld [vmem:[%s6374_s5 + $0x1c8] sm:$0xff]  }
 0x289   :  { %4784 = vmatprep.subr.bf16.mxu1 %v5276_v40 }
 0x28b   :  { %4737 = vmatmul.mubr.bf16.gmra.mrb[24].mxu1 %v1847_v3 }
 0x28c   :  { %4740 = vmatprep.mubr.bf16.mxu1 %v1848_v14  ;;  %4785 = vmatpush3.bf16.msra.mxu1 %v5276_v40  ;;  %v6209_v49 = vpop.f32.mrb[92].mxu0  ;;  %v5292_v40 = vld [vmem:[%s6374_s5 + $0x1d0] sm:$0xff]  }
 0x28d   :  { %4786 = vmatprep.subr.bf16.mxu1 %v5277_v12  ;;  %v2175_v51 = vpop.f32.mrb[93].mxu0 }
 0x28e   :  { %v6214_v9 = vpop.f32.mrb[94].mxu0 }
 0x28f   :  { %v2197_v53 = vpack.c.bf16 %v6214_v9, %v6209_v49  ;;  %v2178_v42 = vpop.f32.mrb[95].mxu0 }
 0x290   :  { %4787 = vmatpush3.bf16.msra.mxu1 %v5277_v12  ;;  %v2196_v46 = vpack.c.bf16 %v2178_v42, %v2175_v51  ;;  %v5294_v12 = vld [vmem:[%s6374_s5 + $0x1d8] sm:$0xff]  }
 0x291   :  { %4788 = vmatprep.subr.bf16.mxu1 %v5278_v50 }
 0x293   :  { %4741 = vmatmul.mubr.bf16.gmra.mrb[28].mxu1 %v1849_v11 }
 0x294   :  { %4789 = vmatpush3.bf16.msra.mxu1 %v5278_v50  ;;  %4792 = vmatprep.mubr.bf16.mxu1 %v2190_v26  ;;  %v6221_v56 = vpop.f32.mrb[96].mxu0  ;;  %v5296_v50 = vld [vmem:[%s6374_s5 + $0x1e0] sm:$0xff]  }
 0x295   :  { %4790 = vmatprep.subr.bf16.mxu1 %v5279_v48  ;;  %v2475_v59 = vpop.f32.mrb[97].mxu0 }
 0x296   :  { %v6226_v28 = vpop.f32.mrb[98].mxu0 }
 0x297   :  { %v2539_v60 = vpack.c.bf16 %v6226_v28, %v6221_v56  ;;  %v2478_v61 = vpop.f32.mrb[99].mxu0 }
 0x298   :  { %4791 = vmatpush3.bf16.msra.mxu1 %v5279_v48  ;;  %v2538_v63 = vpack.c.bf16 %v2478_v61, %v2475_v59  ;;  %v5298_v48 = vld [vmem:[%s6374_s5 + $0x1e8] sm:$0xff]   ;;  %v5300_v59 = vld [vmem:[%s6374_s5 + $0x1f0] sm:$0xff]  }
 0x299   :  { %4840 = vmatprep.subr.bf16.mxu1 %v5280_v57 }
 0x29b   :  { %4793 = vmatmul.mubr.bf16.vlgmr.msra.gmra.mrb[16].mxu1 %v2191_v24 }
 0x29c   :  { %4796 = vmatprep.mubr.bf16.mxu1 %v2192_v36  ;;  %4841 = vmatpush3.bf16.msra.mxu1 %v5280_v57  ;;  %v6233_v62 = vpop.f32.mrb[100].mxu0 }
 0x29d   :  { %4842 = vmatprep.subr.bf16.mxu1 %v5281_v54  ;;  %v2491_v1 = vpop.f32.mrb[101].mxu0 }
 0x29e   :  { %v6238_v2 = vpop.f32.mrb[102].mxu0 }
 0x29f   :  { %v2541_v3 = vpack.c.bf16 %v6238_v2, %v6233_v62  ;;  %v2494_v4 = vpop.f32.mrb[103].mxu0 }
 0x2a0   :  { %4843 = vmatpush3.bf16.msra.mxu1 %v5281_v54  ;;  %v2540_v27 = vpack.c.bf16 %v2494_v4, %v2491_v1  ;;  %v5302_v54 = vld [vmem:[%s6374_s5 + $0x1f8] sm:$0xff]  }
 0x2a1   :  { %4844 = vmatprep.subr.bf16.mxu1 %v5282_v0 }
 0x2a3   :  { %4797 = vmatmul.mubr.bf16.gmra.mrb[20].mxu1 %v2193_v34 }
 0x2a4   :  { %4800 = vmatprep.mubr.bf16.mxu1 %v2194_v47  ;;  %4845 = vmatpush3.bf16.msra.mxu1 %v5282_v0  ;;  %v6245_v6 = vpop.f32.mrb[104].mxu0 }
 0x2a5   :  { %4846 = vmatprep.subr.bf16.mxu1 %v5283_v5  ;;  %v2507_v8 = vpop.f32.mrb[105].mxu0 }
 0x2a6   :  { %v6250_v10 = vpop.f32.mrb[106].mxu0 }
 0x2a7   :  { %v2543_v11 = vpack.c.bf16 %v6250_v10, %v6245_v6  ;;  %v2510_v13 = vpop.f32.mrb[107].mxu0 }
 0x2a8   :  { %4847 = vmatpush3.bf16.msra.mxu1 %v5283_v5  ;;  %v2542_v14 = vpack.c.bf16 %v2510_v13, %v2507_v8 }
 0x2a9   :  { %4848 = vmatprep.subr.bf16.mxu1 %v5284_v7 }
 0x2ab   :  { %4801 = vmatmul.mubr.bf16.gmra.mrb[24].mxu1 %v2195_v55 }
 0x2ac   :  { %4804 = vmatprep.mubr.bf16.mxu1 %v2196_v46  ;;  %4849 = vmatpush3.bf16.msra.mxu1 %v5284_v7  ;;  %v6257_v17 = vpop.f32.mrb[108].mxu0 }
 0x2ad   :  { %4850 = vmatprep.subr.bf16.mxu1 %v5285_v15  ;;  %v2523_v21 = vpop.f32.mrb[109].mxu0 }
 0x2ae   :  { %v6262_v23 = vpop.f32.mrb[110].mxu0 }
 0x2af   :  { %v2545_v24 = vpack.c.bf16 %v6262_v23, %v6257_v17  ;;  %v2526_v25 = vpop.f32.mrb[111].mxu0 }
 0x2b0   :  { %4851 = vmatpush3.bf16.msra.mxu1 %v5285_v15  ;;  %v2544_v26 = vpack.c.bf16 %v2526_v25, %v2523_v21 }
 0x2b1   :  { %4852 = vmatprep.subr.bf16.mxu1 %v5286_v19 }
 0x2b3   :  { %4805 = vmatmul.mubr.bf16.gmra.mrb[28].mxu1 %v2197_v53 }
 0x2b4   :  { %4853 = vmatpush3.bf16.msra.mxu1 %v5286_v19  ;;  %4856 = vmatprep.mubr.bf16.mxu1 %v2538_v63  ;;  %v6269_v29 = vpop.f32.mrb[112].mxu0 }
 0x2b5   :  { %4854 = vmatprep.subr.bf16.mxu1 %v5287_v18  ;;  %v2823_v31 = vpop.f32.mrb[113].mxu0 }
 0x2b6   :  { %v4891_v33 = vpop.f32.mrb[114].mxu0 }
 0x2b7   :  { %v2887_v34 = vpack.c.bf16 %v4891_v33, %v6269_v29  ;;  %v2826_v35 = vpop.f32.mrb[115].mxu0 }
 0x2b8   :  { %4855 = vmatpush3.bf16.msra.mxu1 %v5287_v18  ;;  %v2886_v36 = vpack.c.bf16 %v2826_v35, %v2823_v31 }
 0x2b9   :  { %4904 = vmatprep.subr.bf16.mxu1 %v5288_v30 }
 0x2bb   :  { %4857 = vmatmul.mubr.bf16.vlgmr.msra.gmra.mrb[16].mxu1 %v2539_v60 }
 0x2bc   :  { %4860 = vmatprep.mubr.bf16.mxu1 %v2540_v27  ;;  %4905 = vmatpush3.bf16.msra.mxu1 %v5288_v30  ;;  %v6278_v41 = vpop.f32.mrb[116].mxu0 }
 0x2bd   :  { %4906 = vmatprep.subr.bf16.mxu1 %v5290_v38  ;;  %v2839_v37 = vpop.f32.mrb[117].mxu0 }
 0x2be   :  { %v4895_v43 = vpop.f32.mrb[118].mxu0 }
 0x2bf   :  { %v2889_v55 = vpack.c.bf16 %v4895_v43, %v6278_v41  ;;  %v2842_v45 = vpop.f32.mrb[119].mxu0 }
 0x2c0   :  { %4907 = vmatpush3.bf16.msra.mxu1 %v5290_v38  ;;  %v2888_v47 = vpack.c.bf16 %v2842_v45, %v2839_v37 }
 0x2c1   :  { %4908 = vmatprep.subr.bf16.mxu1 %v5292_v40 }
 0x2c3   :  { %4861 = vmatmul.mubr.bf16.gmra.mrb[20].mxu1 %v2541_v3 }
 0x2c4   :  { %4864 = vmatprep.mubr.bf16.mxu1 %v2542_v14  ;;  %4909 = vmatpush3.bf16.msra.mxu1 %v5292_v40  ;;  %v6287_v49 = vpop.f32.mrb[120].mxu0 }
 0x2c5   :  { %4910 = vmatprep.subr.bf16.mxu1 %v5294_v12  ;;  %v2855_v51 = vpop.f32.mrb[121].mxu0 }
 0x2c6   :  { %v4899_v9 = vpop.f32.mrb[122].mxu0 }
 0x2c7   :  { %v2891_v53 = vpack.c.bf16 %v4899_v9, %v6287_v49  ;;  %v2858_v42 = vpop.f32.mrb[123].mxu0  ;;  %v4075_v49 = vld [vmem:[%s6375_s6 + $0x10] sm:$0xff]  }
 0x2c8   :  { %4911 = vmatpush3.bf16.msra.mxu1 %v5294_v12  ;;  %v2890_v46 = vpack.c.bf16 %v2858_v42, %v2855_v51 }
 0x2c9   :  { %4912 = vmatprep.subr.bf16.mxu1 %v5296_v50 }
 0x2cb   :  { %4865 = vmatmul.mubr.bf16.gmra.mrb[24].mxu1 %v2543_v11 }
 0x2cc   :  { %4868 = vmatprep.mubr.bf16.mxu1 %v2544_v26  ;;  %4913 = vmatpush3.bf16.msra.mxu1 %v5296_v50  ;;  %v6296_v56 = vpop.f32.mrb[124].mxu0 }
 0x2cd   :  { %4914 = vmatprep.subr.bf16.mxu1 %v5298_v48  ;;  %v2871_v57 = vpop.f32.mrb[125].mxu0 }
 0x2ce   :  { %v4903_v28 = vpop.f32.mrb[126].mxu0 }
 0x2cf   :  { %v2893_v60 = vpack.c.bf16 %v4903_v28, %v6296_v56  ;;  %v2874_v61 = vpop.f32.mrb[127].mxu0 }
 0x2d0   :  { %4915 = vmatpush3.bf16.msra.mxu1 %v5298_v48  ;;  %v2892_v63 = vpack.c.bf16 %v2874_v61, %v2871_v57  ;;  %v4013_v61 = vunpack.c.h.bf16 %v4075_v49 }
 0x2d1   :  { %4916 = vmatprep.subr.bf16.mxu1 %v5300_v59 }
 0x2d3   :  { %4869 = vmatmul.mubr.bf16.gmra.mrb[28].mxu1 %v2545_v24 }
 0x2d4   :  { %4917 = vmatpush3.bf16.msra.mxu1 %v5300_v59  ;;  %4920 = vmatprep.mubr.bf16.mxu1 %v2886_v36  ;;  %v4954_v62 = vpop.f32.mrb[128].mxu0  ;;  %v4012_v59 = vunpack.c.l.bf16 %v4075_v49 }
 0x2d5   :  { %v3171_v0 = vpop.f32.mrb[129].mxu0  ;;  %4918 = vmatprep.subr.bf16.mxu1 %v5302_v54 }
 0x2d6   :  { %v4955_v1 = vpop.f32.mrb[130].mxu0 }
 0x2d7   :  { %v3235_v2 = vpack.c.bf16 %v4955_v1, %v4954_v62  ;;  %v3174_v3 = vpop.f32.mrb[131].mxu0 }
 0x2d8   :  { %v3234_v4 = vpack.c.bf16 %v3174_v3, %v3171_v0  ;;  %4919 = vmatpush3.bf16.msra.mxu1 %v5302_v54 }
 0x2d9   :  { %5000 = vmatprep.subr.bf16.mxu1 %v5994_v16 }
 0x2da   :  { %4984 = vmatprep.mubr.bf16.mxu0 %v3234_v4 }
 0x2db   :  { %4921 = vmatmul.mubr.bf16.vlgmr.msra.gmra.mrb[16].mxu1 %v2887_v34  ;;  %4985 = vmatmul.mubr.bf16.vlgmr.msra.gmra.mrb[144].mxu0 %v3235_v2 }
 0x2dc   :  { %4924 = vmatprep.mubr.bf16.mxu1 %v2888_v47  ;;  %v4958_v27 = vpop.f32.mrb[132].mxu0  ;;  %5008 = vmatpush3.bf16.msra.mxu1 %v5994_v16  ;;  %v4076_v47 = vld [vmem:[%s6375_s6 + $0x18] sm:$0xff]  }
 0x2dd   :  { %v3187_v5 = vpop.f32.mrb[133].mxu0  ;;  %5001 = vmatprep.subr.bf16.mxu1 %v6011_v22  ;;  %v4016_v42 = vunpack.c.l.bf16 %v4076_v47  ;;  %v4017_v56 = vunpack.c.h.bf16 %v4076_v47 }
 0x2de   :  { %v4959_v6 = vpop.f32.mrb[134].mxu0 }
 0x2df   :  { %v3237_v7 = vpack.c.bf16 %v4959_v6, %v4958_v27  ;;  %v3190_v8 = vpop.f32.mrb[135].mxu0  ;;  %v4078_v6 = vld [vmem:[%s6375_s6 + $0x28] sm:$0xff]  }
 0x2e0   :  { %v3236_v10 = vpack.c.bf16 %v3190_v8, %v3187_v5  ;;  %5009 = vmatpush3.bf16.msra.mxu1 %v6011_v22  ;;  %v4024_v8 = vunpack.c.l.bf16 %v4078_v6 }
 0x2e1   :  { %5002 = vmatprep.subr.bf16.mxu1 %v6029_v20 }
 0x2e2   :  { %4988 = vmatprep.mubr.bf16.mxu0 %v3236_v10  ;;  %v4025_v10 = vunpack.c.h.bf16 %v4078_v6 }
 0x2e3   :  { %4925 = vmatmul.mubr.bf16.gmra.mrb[20].mxu1 %v2889_v55  ;;  %4989 = vmatmul.mubr.bf16.gmra.mrb[148].mxu0 %v3237_v7  ;;  %v4077_v7 = vld [vmem:[%s6375_s6 + $0x20] sm:$0xff]  }
 0x2e4   :  { %4928 = vmatprep.mubr.bf16.mxu1 %v2890_v46  ;;  %5010 = vmatpush3.bf16.msra.mxu1 %v6029_v20  ;;  %v4962_v11 = vpop.f32.mrb[136].mxu0 }
 0x2e5   :  { %5003 = vmatprep.subr.bf16.mxu1 %v6046_v32  ;;  %v3203_v16 = vpop.f32.mrb[137].mxu0 }
 0x2e6   :  { %v4963_v13 = vpop.f32.mrb[138].mxu0 }
 0x2e7   :  { %v3239_v14 = vpack.c.bf16 %v4963_v13, %v4962_v11  ;;  %v3206_v15 = vpop.f32.mrb[139].mxu0  ;;  %v4021_v13 = vunpack.c.h.bf16 %v4077_v7 }
 0x2e8   :  { %5011 = vmatpush3.bf16.msra.mxu1 %v6046_v32  ;;  %v3238_v17 = vpack.c.bf16 %v3206_v15, %v3203_v16  ;;  %v4074_v32 = vld [vmem:[%s6375_s6 + $0x8] sm:$0xff]   ;;  %v4020_v16 = vunpack.c.l.bf16 %v4077_v7 }
 0x2e9   :  { %5004 = vmatprep.subr.bf16.mxu1 %v6061_v39  ;;  %v4009_v30 = vunpack.c.h.bf16 %v4074_v32 }
 0x2eb   :  { %4929 = vmatmul.mubr.bf16.gmra.mrb[24].mxu1 %v2891_v53 }
 0x2ec   :  { %4932 = vmatprep.mubr.bf16.mxu1 %v2892_v63  ;;  %5012 = vmatpush3.bf16.msra.mxu1 %v6061_v39  ;;  %v4966_v22 = vpop.f32.mrb[140].mxu0  ;;  %v4003_v39 = vld [vmem:[%s6375_s6] sm:$0xff]  }
 0x2ed   :  { %5005 = vmatprep.subr.bf16.mxu1 %v6076_v58  ;;  %v3219_v20 = vpop.f32.mrb[141].mxu0  ;;  %v4005_v35 = vunpack.c.h.bf16 %v4003_v39 }
 0x2ee   :  { %v4967_v19 = vpop.f32.mrb[142].mxu0 }
 0x2ef   :  { %v3241_v21 = vpack.c.bf16 %v4967_v19, %v4966_v22  ;;  %v3222_v23 = vpop.f32.mrb[143].mxu0 }
 0x2f0   :  { %5013 = vmatpush3.bf16.msra.mxu1 %v6076_v58  ;;  %v3240_v24 = vpack.c.bf16 %v3222_v23, %v3219_v20  ;;  %v4080_v23 = vld [vmem:[%s6375_s6 + $0x38] sm:$0xff]  }
 0x2f1   :  { %5006 = vmatprep.subr.bf16.mxu1 %v6090_v44 }
 0x2f3   :  { %4933 = vmatmul.mubr.bf16.gmra.mrb[28].mxu1 %v2893_v60 }
 0x2f4   :  { %5014 = vmatpush3.bf16.msra.mxu1 %v6090_v44  ;;  %4992 = vmatprep.mubr.bf16.mxu1 %v3238_v17  ;;  %v4008_v44 = vunpack.c.l.bf16 %v4074_v32  ;;  %v4079_v32 = vld [vmem:[%s6375_s6 + $0x30] sm:$0xff]  }
 0x2f5   :  { %5007 = vmatprep.subr.bf16.mxu1 %v6108_v52 }
 0x2f8   :  { %5015 = vmatpush3.bf16.msra.mxu1 %v6108_v52  ;;  %v4004_v52 = vunpack.c.l.bf16 %v4003_v39 }
 0x2fb   :  { %4993 = vmatmul.mubr.bf16.vlgmr.msra.gmra.mrb[24].mxu1 %v3239_v14 }
 0x2fc   :  { %4996 = vmatprep.mubr.bf16.mxu1 %v3240_v24 }
 0x303   :  { %4997 = vmatmul.mubr.bf16.gmra.mrb[28].mxu1 %v3241_v21 }
 0x3ae   :  { %v4922_v58 = vpop.f32.mrb[16].mxu1  ;;  %v4986_v25 = vpop.f32.mrb[144].mxu0 }
 0x3af   :  { %v5016_v26 = vadd.f32 %v4986_v25, %v4922_v58  ;;  %v2993_v18 = vpop.f32.mrb[17].mxu1  ;;  %v3341_v29 = vpop.f32.mrb[145].mxu0  ;;  %v4032_v58 = vunpack.c.l.bf16 %v4080_v23  ;;  %v4033_v25 = vunpack.c.h.bf16 %v4080_v23 }
 0x3b0   :  { %v5017_v31 = vadd.f32 %v3341_v29, %v2993_v18  ;;  %v4923_v33 = vpop.f32.mrb[18].mxu1  ;;  %v4987_v34 = vpop.f32.mrb[146].mxu0  ;;  %v4029_v18 = vunpack.c.h.bf16 %v4079_v32 }
 0x3b1   :  { %v5018_v36 = vadd.f32 %v4987_v34, %v4923_v33  ;;  %v2996_v38 = vpop.f32.mrb[19].mxu1  ;;  %v3344_v41 = vpop.f32.mrb[147].mxu0  ;;  %v3454_v37 = vadd.f32 %v5016_v26, %v4008_v44  ;;  %v4028_v44 = vunpack.c.l.bf16 %v4079_v32 }
 0x3b2   :  { %v5019_v40 = vadd.f32 %v3344_v41, %v2996_v38  ;;  %v3452_v55 = vadd.f32 %v5017_v31, %v4004_v52 }
 0x3b3   :  { %v3455_v43 = vadd.f32 %v5018_v36, %v4009_v30 }
 0x3b4   :  { %v3453_v45 = vadd.f32 %v5019_v40, %v4005_v35 }
 0x3b5   :  { %v4042_v12 = vpack.c.bf16 %v3455_v43, %v3454_v37 }
 0x3b6   :  { %v4037_v50 = vpack.c.bf16 %v3453_v45, %v3452_v55  ;;  %v4926_v51 = vpop.f32.mrb[20].mxu1  ;;  %v4990_v9 = vpop.f32.mrb[148].mxu0 }
 0x3b7   :  { %4081 = vst [vmem:[%s6376_s7 + $0x8] sm:$0xff] %v4042_v12   ;;  %v5020_v53 = vadd.f32 %v4990_v9, %v4926_v51  ;;  %v3009_v46 = vpop.f32.mrb[21].mxu1  ;;  %v3357_v48 = vpop.f32.mrb[149].mxu0 }
 0x3b8   :  { %4038 = vst [vmem:[%s6376_s7] sm:$0xff] %v4037_v50   ;;  %v5021_v57 = vadd.f32 %v3357_v48, %v3009_v46  ;;  %v4927_v28 = vpop.f32.mrb[22].mxu1  ;;  %v4991_v60 = vpop.f32.mrb[150].mxu0 }
 0x3b9   :  { %v5022_v63 = vadd.f32 %v4991_v60, %v4927_v28  ;;  %v3012_v54 = vpop.f32.mrb[23].mxu1  ;;  %v3360_v62 = vpop.f32.mrb[151].mxu0  ;;  %v3458_v1 = vadd.f32 %v5020_v53, %v4016_v42 }
 0x3ba   :  { %v5023_v0 = vadd.f32 %v3360_v62, %v3012_v54  ;;  %v3456_v3 = vadd.f32 %v5021_v57, %v4012_v59 }
 0x3bb   :  { %v3459_v2 = vadd.f32 %v5022_v63, %v4017_v56 }
 0x3bc   :  { %v3457_v4 = vadd.f32 %v5023_v0, %v4013_v61 }
 0x3bd   :  { %v4052_v27 = vpack.c.bf16 %v3459_v2, %v3458_v1 }
 0x3be   :  { %v4047_v5 = vpack.c.bf16 %v3457_v4, %v3456_v3 }
 0x3bf   :  { %4083 = vst [vmem:[%s6376_s7 + $0x18] sm:$0xff] %v4052_v27  }
 0x3c0   :  { %4082 = vst [vmem:[%s6376_s7 + $0x10] sm:$0xff] %v4047_v5  }
 0x3ce   :  { %v4994_v11 = vpop.f32.mrb[24].mxu1 }
 0x3cf   :  { %v3373_v14 = vpop.f32.mrb[25].mxu1  ;;  %v3462_v17 = vadd.f32 %v4994_v11, %v4024_v8 }
 0x3d0   :  { %v4995_v15 = vpop.f32.mrb[26].mxu1  ;;  %v3460_v19 = vadd.f32 %v4020_v16, %v3373_v14 }
 0x3d1   :  { %v3463_v22 = vadd.f32 %v4995_v15, %v4025_v10  ;;  %v3376_v20 = vpop.f32.mrb[27].mxu1 }
 0x3d2   :  { %v3461_v21 = vadd.f32 %v4021_v13, %v3376_v20 }
 0x3d3   :  { %v4062_v24 = vpack.c.bf16 %v3463_v22, %v3462_v17 }
 0x3d4   :  { %v4057_v39 = vpack.c.bf16 %v3461_v21, %v3460_v19 }
 0x3d5   :  { %4085 = vst [vmem:[%s6376_s7 + $0x28] sm:$0xff] %v4062_v24  }
 0x3d6   :  { %4084 = vst [vmem:[%s6376_s7 + $0x20] sm:$0xff] %v4057_v39   ;;  %v4998_v26 = vpop.f32.mrb[28].mxu1 }
 0x3d7   :  { %v3389_v29 = vpop.f32.mrb[29].mxu1  ;;  %v3466_v31 = vadd.f32 %v4998_v26, %v4032_v58 }
 0x3d8   :  { %v4999_v30 = vpop.f32.mrb[30].mxu1  ;;  %v3464_v34 = vadd.f32 %v4028_v44, %v3389_v29 }
 0x3d9   :  { %v3467_v52 = vadd.f32 %v4999_v30, %v4033_v25  ;;  %v3392_v33 = vpop.f32.mrb[31].mxu1 }
 0x3da   :  { %v3465_v35 = vadd.f32 %v4029_v18, %v3392_v33 }
 0x3db   :  { %v4072_v36 = vpack.c.bf16 %v3467_v52, %v3466_v31 }
 0x3dc   :  { %v4067_v38 = vpack.c.bf16 %v3465_v35, %v3464_v34 }
 0x3dd   :  { %4087 = vst [vmem:[%s6376_s7 + $0x38] sm:$0xff] %v4072_v36  }
 0x3de   :  { %4086 = vst [vmem:[%s6376_s7 + $0x30] sm:$0xff] %v4067_v38  }

// kernel: resnet_v2_forward.11
= control target key start
LH: loop header
LB: loop body
LE: loop exit
PB: predicated region body
PF: predicated region fallthrough
CT: control target
= control target key end

     0   :  { %v2374_v0 = vmov 0.0   ;;  %vm2375_vm0 = vmmov 0   ;;  %vm164_vm1 = vcmask 1043456   ;;  %vm160_vm2 = vcmask 64512   ;;  %s2906_s1 = inlined_call_operand.vmem [shape: bf16[128,128], index: 1, kind: input, shape index: {}]   ;;  %s2907_s0 = inlined_call_operand.vmem [shape: bf16[8,128], index: 0, kind: input, shape index: {}]   ;;  %s2908_s5 = inlined_call_operand.vmem [shape: bf16[9,128,128], index: 5, kind: input, shape index: {}]   ;;  %s2909_s2 = inlined_call_operand.vmem [shape: f32[1,128], index: 2, kind: input, shape index: {}]   ;;  %s2910_s3 = inlined_call_operand.vmem [shape: f32[1,128], index: 3, kind: input, shape index: {}]   ;;  %s2911_s4 = inlined_call_operand.vmem [shape: bf16[9,8,8], index: 4, kind: input, shape index: {}]   ;;  %s2912_s7 = inlined_call_operand.vmem [shape: bf16[128,128], index: 7, kind: input, shape index: {}]   ;;  %s2913_s6 = inlined_call_operand.vmem [shape: bf16[8,128], index: 6, kind: input, shape index: {}]   ;;  %s2914_s8 = inlined_call_operand.vmem [shape: f32[1,128], index: 8, kind: input, shape index: {}]   ;;  %s2915_s9 = inlined_call_operand.vmem [shape: f32[1,128], index: 9, kind: input, shape index: {}]   ;;  %s2916_s10 = inlined_call_operand.vmem [shape: bf16[8,128], index: 10, kind: output, shape index: {}]  }
   0x1   :  { %2010 = vmatprep.subr.bf16.mxu0 %v2374_v0  ;;  %v2286_v1 = vld [vmem:[%s2906_s1] sm:$0xff]   ;;  %2026 = vmatprep.mubr.msk.bf16.mxu0 %vm2375_vm0, %v2374_v0  ;;  %v2287_v2 = vld [vmem:[%s2906_s1 + $0x8] sm:$0xff]   ;;  %v2288_v3 = vld [vmem:[%s2906_s1 + $0x10] sm:$0xff]  }
   0x2   :  { %2030 = vmatprep.subr.bf16.mxu1 %v2374_v0  ;;  %2032 = vmatprep.mubr.msk.bf16.mxu1 %vm2375_vm0, %v2374_v0  ;;  %v2289_v4 = vld [vmem:[%s2906_s1 + $0x18] sm:$0xff]   ;;  %v2290_v5 = vld [vmem:[%s2906_s1 + $0x20] sm:$0xff]   ;;  %v2291_v6 = vld [vmem:[%s2906_s1 + $0x28] sm:$0xff]  }
   0x3   :  { %2011 = vmatpush3.bf16.msra.mxu0 %v2286_v1  ;;  %v2292_v7 = vld [vmem:[%s2906_s1 + $0x30] sm:$0xff]   ;;  %v2293_v8 = vld [vmem:[%s2906_s1 + $0x38] sm:$0xff]   ;;  %v36_v9 = vld [vmem:[%s2907_s0] sm:$0xf] }
   0x4   :  { %2012 = vmatprep.subr.bf16.mxu0 %v2374_v0  ;;  %v2294_v10 = vld [vmem:[%s2908_s5] sm:$0xff]   ;;  %v2295_v11 = vld [vmem:[%s2908_s5 + $0x8] sm:$0xff]   ;;  %v2297_v12 = vld [vmem:[%s2908_s5 + $0x10] sm:$0xff]  }
   0x5   :  { %v2299_v13 = vld [vmem:[%s2908_s5 + $0x18] sm:$0xff]   ;;  %v2301_v14 = vld [vmem:[%s2908_s5 + $0x20] sm:$0xff]   ;;  %v2303_v15 = vld [vmem:[%s2908_s5 + $0x28] sm:$0xff]  }
   0x6   :  { %v2305_v16 = vld [vmem:[%s2908_s5 + $0x30] sm:$0xff]   ;;  %v1664_v17 = vld [vmem:[%s2909_s2] ss:$0 sm:$0xff]  ;;  %v1667_v29 = vld [vmem:[%s2911_s4 + $0x4] sm:$0xf] }
   0x7   :  { %2013 = vmatpush3.bf16.msra.mxu0 %v2287_v2  ;;  %v1665_v19 = vld [vmem:[%s2910_s3] ss:$0 sm:$0xff]  ;;  %v2298_v31 = vld [vmem:[%s2908_s5 + $0x48] sm:$0xff]   ;;  %v2300_v32 = vld [vmem:[%s2908_s5 + $0x50] sm:$0xff]  }
   0x8   :  { %2014 = vmatprep.subr.bf16.mxu0 %v2374_v0  ;;  %v159_v28 = vld [vmem:[%s2911_s4] sm:$0xf]  ;;  %v2302_v33 = vld [vmem:[%s2908_s5 + $0x58] sm:$0xff]   ;;  %v2306_v35 = vld [vmem:[%s2908_s5 + $0x68] sm:$0xff]  }
   0x9   :  { %v2296_v30 = vld [vmem:[%s2908_s5 + $0x40] sm:$0xff]   ;;  %v2307_v36 = vld [vmem:[%s2908_s5 + $0x38] sm:$0xff]   ;;  %v2308_v37 = vld [vmem:[%s2908_s5 + $0x70] sm:$0xff]  }
   0xa   :  { %v2304_v34 = vld [vmem:[%s2908_s5 + $0x60] sm:$0xff]   ;;  %v2309_v38 = vld [vmem:[%s2908_s5 + $0x78] sm:$0xff]   ;;  %v1701_v49 = vld [vmem:[%s2911_s4 + $0x8] sm:$0xf] }
   0xb   :  { %2015 = vmatpush3.bf16.msra.mxu0 %v2288_v3  ;;  %v2310_v50 = vld [vmem:[%s2908_s5 + $0x80] sm:$0xff]   ;;  %v2311_v51 = vld [vmem:[%s2908_s5 + $0x88] sm:$0xff]   ;;  %v2312_v52 = vld [vmem:[%s2908_s5 + $0x90] sm:$0xff]  }
   0xc   :  { %2016 = vmatprep.subr.bf16.mxu0 %v2374_v0  ;;  %v2313_v53 = vld [vmem:[%s2908_s5 + $0x98] sm:$0xff]   ;;  %v2314_v54 = vld [vmem:[%s2908_s5 + $0xa0] sm:$0xff]   ;;  %v2315_v55 = vld [vmem:[%s2908_s5 + $0xa8] sm:$0xff]  }
   0xd   :  { %v2316_v56 = vld [vmem:[%s2908_s5 + $0xb0] sm:$0xff]   ;;  %v2317_v57 = vld [vmem:[%s2908_s5 + $0xb8] sm:$0xff]   ;;  %v2318_v58 = vld [vmem:[%s2908_s5 + $0xc0] sm:$0xff]  }
   0xe   :  { %v2319_v59 = vld [vmem:[%s2908_s5 + $0xc8] sm:$0xff]   ;;  %v2320_v60 = vld [vmem:[%s2908_s5 + $0xd0] sm:$0xff]   ;;  %v2322_v61 = vld [vmem:[%s2908_s5 + $0xd8] sm:$0xff]  }
   0xf   :  { %2017 = vmatpush3.bf16.msra.mxu0 %v2289_v4  ;;  %v2324_v62 = vld [vmem:[%s2908_s5 + $0xe0] sm:$0xff]   ;;  %v2326_v63 = vld [vmem:[%s2908_s5 + $0xe8] sm:$0xff]  }
  0x10   :  { %2018 = vmatprep.subr.bf16.mxu0 %v2374_v0 }
  0x13   :  { %2019 = vmatpush3.bf16.msra.mxu0 %v2290_v5 }
  0x14   :  { %2020 = vmatprep.subr.bf16.mxu0 %v2374_v0 }
  0x17   :  { %2021 = vmatpush3.bf16.msra.mxu0 %v2291_v6 }
  0x18   :  { %2022 = vmatprep.subr.bf16.mxu0 %v2374_v0 }
  0x1b   :  { %2023 = vmatpush3.bf16.msra.mxu0 %v2292_v7 }
  0x1c   :  { %2024 = vmatprep.subr.bf16.mxu0 %v2374_v0 }
  0x1f   :  { %2025 = vmatpush3.bf16.msra.mxu0 %v2293_v8 }
  0x20   :  { %2062 = vmatprep.subr.bf16.mxu0 %v2374_v0 }
  0x22   :  { %2027 = vmatmul.mubr.bf16.vlgmr.msra.gmra.mrb[0].mxu0 %v36_v9 }
  0x23   :  { %2078 = vmatprep.mubr.msk.bf16.mxu0 %vm2375_vm0, %v2374_v0  ;;  %2063 = vmatpush3.bf16.msra.mxu0 %v2294_v10 }
  0x24   :  { %2064 = vmatprep.subr.bf16.mxu0 %v2374_v0 }
  0x27   :  { %2065 = vmatpush3.bf16.msra.mxu0 %v2295_v11 }
  0x28   :  { %2066 = vmatprep.subr.bf16.mxu0 %v2374_v0 }
  0x2b   :  { %2067 = vmatpush3.bf16.msra.mxu0 %v2297_v12 }
  0x2c   :  { %2068 = vmatprep.subr.bf16.mxu0 %v2374_v0 }
  0x2f   :  { %2069 = vmatpush3.bf16.msra.mxu0 %v2299_v13 }
  0x30   :  { %2070 = vmatprep.subr.bf16.mxu0 %v2374_v0 }
  0x33   :  { %2071 = vmatpush3.bf16.msra.mxu0 %v2301_v14 }
  0x34   :  { %2072 = vmatprep.subr.bf16.mxu0 %v2374_v0 }
  0x37   :  { %2073 = vmatpush3.bf16.msra.mxu0 %v2303_v15  ;;  %v1727_v15 = vld [vmem:[%s2911_s4 + $0xc] sm:$0xf] }
  0x38   :  { %2074 = vmatprep.subr.bf16.mxu0 %v2374_v0 }
  0x3b   :  { %2075 = vmatpush3.bf16.msra.mxu0 %v2305_v16  ;;  %v1753_v16 = vld [vmem:[%s2911_s4 + $0x10] sm:$0xf] }
  0x3c   :  { %2076 = vmatprep.subr.bf16.mxu0 %v2374_v0 }
  0x3f   :  { %2077 = vmatpush3.bf16.msra.mxu0 %v2307_v36 }
  0x40   :  { %2114 = vmatprep.subr.bf16.mxu0 %v2374_v0 }
  0xf5   :  { %v135_v18 = vpop.f32.mrb[0].mxu0 }
  0xf6   :  { %v148_v20 = vmul.f32 %v1664_v17, %v135_v18  ;;  %v2028_v21 = vpop.f32.mrb[1].mxu0  ;;  %v2321_v17 = vld [vmem:[%s2908_s5 + $0x100] sm:$0xff]   ;;  %v2323_v18 = vld [vmem:[%s2908_s5 + $0x108] sm:$0xff]  }
  0xf7   :  { %v138_v22 = vpop.f32.mrb[2].mxu0  ;;  %v2328_v21 = vld [vmem:[%s2908_s5 + $0xf0] sm:$0xff]  }
  0xf8   :  { %v156_v23 = vadd.f32 %v1665_v19, %v148_v20  ;;  %v2029_v24 = vpop.f32.mrb[3].mxu0  ;;  %v2325_v19 = vld [vmem:[%s2908_s5 + $0x110] sm:$0xff]   ;;  %v2327_v20 = vld [vmem:[%s2908_s5 + $0x118] sm:$0xff]   ;;  %v2329_v22 = vld [vmem:[%s2908_s5 + $0x120] sm:$0xff]  }
  0xf9   :  { %v2331_v24 = vld [vmem:[%s2908_s5 + $0x128] sm:$0xff]  }
  0xfa   :  { %v157_v25 = vmax.f32 %v156_v23, 0.0  ;;  %v2330_v23 = vld [vmem:[%s2908_s5 + $0xf8] sm:$0xff]  }
  0xfc   :  { %v158_v26 = vpack.c.bf16 %v157_v25, %v157_v25  ;;  %v2332_v25 = vld [vmem:[%s2908_s5 + $0x130] sm:$0xff]  }
  0xfe   :  { %v2508_v27 = vsel %vm164_vm1, %v158_v26, 0  ;;  %v2333_v26 = vld [vmem:[%s2908_s5 + $0x138] sm:$0xff]  }
  0xff   :  { %2031 = vmatpush3.bf16.msra.mxu1 %v2508_v27 }
 0x100   :  { %2036 = vmatprep.subr.bf16.mxu1 %v2374_v0 }
 0x102   :  { %2033 = vmatmul.mubr.msk.bf16.vlgmr.msra.gmra.mrb[0].mxu1 %vm160_vm2, %v159_v28 }
 0x103   :  { %2037 = vmatpush3.bf16.msra.mxu1 %v2508_v27  ;;  %2038 = vmatprep.mubr.msk.bf16.mxu1 %vm2375_vm0, %v2374_v0 }
 0x104   :  { %2042 = vmatprep.subr.bf16.mxu1 %v2374_v0 }
 0x10a   :  { %2039 = vmatmul.mubr.msk.bf16.vlgmr.msra.gmra.mrb[4].mxu1 %vm160_vm2, %v1667_v29 }
 0x10b   :  { %2043 = vmatpush3.bf16.msra.mxu1 %v2296_v30  ;;  %2058 = vmatprep.mubr.msk.bf16.mxu1 %vm2375_vm0, %v2374_v0 }
 0x10c   :  { %2044 = vmatprep.subr.bf16.mxu1 %v2374_v0 }
 0x10f   :  { %2045 = vmatpush3.bf16.msra.mxu1 %v2298_v31 }
 0x110   :  { %2046 = vmatprep.subr.bf16.mxu1 %v2374_v0 }
 0x113   :  { %2047 = vmatpush3.bf16.msra.mxu1 %v2300_v32 }
 0x114   :  { %2048 = vmatprep.subr.bf16.mxu1 %v2374_v0 }
 0x117   :  { %2049 = vmatpush3.bf16.msra.mxu1 %v2302_v33 }
 0x118   :  { %2050 = vmatprep.subr.bf16.mxu1 %v2374_v0 }
 0x11b   :  { %2051 = vmatpush3.bf16.msra.mxu1 %v2304_v34 }
 0x11c   :  { %2052 = vmatprep.subr.bf16.mxu1 %v2374_v0 }
 0x11f   :  { %2053 = vmatpush3.bf16.msra.mxu1 %v2306_v35 }
 0x120   :  { %2054 = vmatprep.subr.bf16.mxu1 %v2374_v0 }
 0x123   :  { %2055 = vmatpush3.bf16.msra.mxu1 %v2308_v37 }
 0x124   :  { %2056 = vmatprep.subr.bf16.mxu1 %v2374_v0 }
 0x127   :  { %2057 = vmatpush3.bf16.msra.mxu1 %v2309_v38 }
 0x128   :  { %2082 = vmatprep.subr.bf16.mxu1 %v2374_v0 }
 0x1d5   :  { %v202_v39 = vpop.f32.mrb[0].mxu1 }
 0x1d6   :  { %v208_v40 = vpack.c.bf16 %v202_v39, %v202_v39  ;;  %v2034_v41 = vpop.f32.mrb[1].mxu1  ;;  %v1779_v39 = vld [vmem:[%s2911_s4 + $0x14] sm:$0xf] }
 0x1d7   :  { %v205_v42 = vpop.f32.mrb[2].mxu1 }
 0x1d8   :  { %v2035_v43 = vpop.f32.mrb[3].mxu1  ;;  %2079 = vmatmul.mubr.bf16.vlgmr.msra.gmra.mrb[4].mxu0 %v208_v40  ;;  %v2334_v42 = vld [vmem:[%s2908_s5 + $0x140] sm:$0xff]  }
 0x1d9   :  { %2130 = vmatprep.mubr.msk.bf16.mxu0 %vm2375_vm0, %v2374_v0  ;;  %2115 = vmatpush3.bf16.msra.mxu0 %v2318_v58  ;;  %v2347_v58 = vld [vmem:[%s2908_s5 + $0x1a8] sm:$0xff]  }
 0x1da   :  { %2116 = vmatprep.subr.bf16.mxu0 %v2374_v0 }
 0x1dd   :  { %v264_v44 = vpop.f32.mrb[4].mxu1  ;;  %2117 = vmatpush3.bf16.msra.mxu0 %v2319_v59  ;;  %v2348_v59 = vld [vmem:[%s2908_s5 + $0x1b0] sm:$0xff]  }
 0x1de   :  { %v270_v45 = vpack.c.bf16 %v264_v44, %v264_v44  ;;  %v2040_v46 = vpop.f32.mrb[5].mxu1  ;;  %2118 = vmatprep.subr.bf16.mxu0 %v2374_v0 }
 0x1df   :  { %v267_v47 = vpop.f32.mrb[6].mxu1  ;;  %v1805_v46 = vld [vmem:[%s2911_s4 + $0x18] sm:$0xf] }
 0x1e0   :  { %v2041_v48 = vpop.f32.mrb[7].mxu1  ;;  %2059 = vmatmul.mubr.bf16.vlgmr.msra.gmra.mrb[8].mxu1 %v270_v45  ;;  %v2335_v45 = vld [vmem:[%s2908_s5 + $0x148] sm:$0xff]   ;;  %v2337_v47 = vld [vmem:[%s2908_s5 + $0x180] sm:$0xff]  }
 0x1e1   :  { %2083 = vmatpush3.bf16.msra.mxu1 %v2508_v27  ;;  %2084 = vmatprep.mubr.msk.bf16.mxu1 %vm2375_vm0, %v2374_v0  ;;  %v2336_v48 = vld [vmem:[%s2908_s5 + $0x150] sm:$0xff]  }
 0x1e2   :  { %2088 = vmatprep.subr.bf16.mxu1 %v2374_v0  ;;  %2119 = vmatpush3.bf16.msra.mxu0 %v2320_v60  ;;  %v2349_v60 = vld [vmem:[%s2908_s5 + $0x1b8] sm:$0xff]  }
 0x1e3   :  { %2120 = vmatprep.subr.bf16.mxu0 %v2374_v0 }
 0x1e6   :  { %2121 = vmatpush3.bf16.msra.mxu0 %v2322_v61 }
 0x1e7   :  { %2122 = vmatprep.subr.bf16.mxu0 %v2374_v0 }
 0x1e8   :  { %2085 = vmatmul.mubr.msk.bf16.vlgmr.msra.gmra.mrb[12].mxu1 %vm160_vm2, %v1701_v49  ;;  %v2339_v49 = vld [vmem:[%s2908_s5 + $0x188] sm:$0xff]  }
 0x1e9   :  { %2089 = vmatpush3.bf16.msra.mxu1 %v2310_v50  ;;  %2104 = vmatprep.mubr.msk.bf16.mxu1 %vm2375_vm0, %v2374_v0  ;;  %v2338_v50 = vld [vmem:[%s2908_s5 + $0x158] sm:$0xff]  }
 0x1ea   :  { %2090 = vmatprep.subr.bf16.mxu1 %v2374_v0  ;;  %2123 = vmatpush3.bf16.msra.mxu0 %v2324_v62 }
 0x1eb   :  { %2124 = vmatprep.subr.bf16.mxu0 %v2374_v0 }
 0x1ed   :  { %2091 = vmatpush3.bf16.msra.mxu1 %v2311_v51  ;;  %v2341_v51 = vld [vmem:[%s2908_s5 + $0x190] sm:$0xff]  }
 0x1ee   :  { %2092 = vmatprep.subr.bf16.mxu1 %v2374_v0  ;;  %2125 = vmatpush3.bf16.msra.mxu0 %v2326_v63 }
 0x1ef   :  { %2126 = vmatprep.subr.bf16.mxu0 %v2374_v0 }
 0x1f1   :  { %2093 = vmatpush3.bf16.msra.mxu1 %v2312_v52  ;;  %v2340_v52 = vld [vmem:[%s2908_s5 + $0x160] sm:$0xff]  }
 0x1f2   :  { %2094 = vmatprep.subr.bf16.mxu1 %v2374_v0  ;;  %2127 = vmatpush3.bf16.msra.mxu0 %v2328_v21  ;;  %v1857_v21 = vld [vmem:[%s2911_s4 + $0x20] sm:$0xf] }
 0x1f3   :  { %2128 = vmatprep.subr.bf16.mxu0 %v2374_v0 }
 0x1f5   :  { %2095 = vmatpush3.bf16.msra.mxu1 %v2313_v53  ;;  %v2343_v53 = vld [vmem:[%s2908_s5 + $0x198] sm:$0xff]  }
 0x1f6   :  { %2096 = vmatprep.subr.bf16.mxu1 %v2374_v0  ;;  %2129 = vmatpush3.bf16.msra.mxu0 %v2330_v23  ;;  %v2355_v23 = vld [vmem:[%s2908_s5 + $0x208] sm:$0xff]  }
 0x1f7   :  { %2160 = vmatprep.subr.bf16.mxu0 %v2374_v0 }
 0x1f9   :  { %2097 = vmatpush3.bf16.msra.mxu1 %v2314_v54  ;;  %v2342_v54 = vld [vmem:[%s2908_s5 + $0x168] sm:$0xff]  }
 0x1fa   :  { %2098 = vmatprep.subr.bf16.mxu1 %v2374_v0 }
 0x1fd   :  { %2099 = vmatpush3.bf16.msra.mxu1 %v2315_v55  ;;  %v2344_v55 = vld [vmem:[%s2908_s5 + $0x170] sm:$0xff]  }
 0x1fe   :  { %2100 = vmatprep.subr.bf16.mxu1 %v2374_v0 }
 0x201   :  { %2101 = vmatpush3.bf16.msra.mxu1 %v2316_v56  ;;  %v2345_v56 = vld [vmem:[%s2908_s5 + $0x1a0] sm:$0xff]  }
 0x202   :  { %2102 = vmatprep.subr.bf16.mxu1 %v2374_v0 }
 0x205   :  { %2103 = vmatpush3.bf16.msra.mxu1 %v2317_v57  ;;  %v2346_v57 = vld [vmem:[%s2908_s5 + $0x178] sm:$0xff]  }
 0x206   :  { %2108 = vmatprep.subr.bf16.mxu1 %v2374_v0 }
 0x2ab   :  { %v458_v1 = vpop.f32.mrb[4].mxu0 }
 0x2ac   :  { %v2080_v2 = vpop.f32.mrb[5].mxu0 }
 0x2ad   :  { %v461_v3 = vpop.f32.mrb[6].mxu0 }
 0x2ae   :  { %v2081_v4 = vpop.f32.mrb[7].mxu0 }
 0x2b3   :  { %v370_v5 = vpop.f32.mrb[8].mxu1 }
 0x2b4   :  { %v459_v6 = vadd.f32 %v458_v1, %v370_v5  ;;  %v2060_v7 = vpop.f32.mrb[9].mxu1 }
 0x2b5   :  { %v373_v8 = vpop.f32.mrb[10].mxu1 }
 0x2b6   :  { %v2061_v9 = vpop.f32.mrb[11].mxu1 }
 0x2bb   :  { %v503_v10 = vpop.f32.mrb[12].mxu1 }
 0x2bc   :  { %v509_v11 = vpack.c.bf16 %v503_v10, %v503_v10  ;;  %v2086_v12 = vpop.f32.mrb[13].mxu1 }
 0x2bd   :  { %v506_v13 = vpop.f32.mrb[14].mxu1 }
 0x2be   :  { %v2087_v14 = vpop.f32.mrb[15].mxu1  ;;  %2105 = vmatmul.mubr.bf16.vlgmr.msra.gmra.mrb[16].mxu1 %v509_v11 }
 0x2bf   :  { %2109 = vmatpush3.bf16.msra.mxu1 %v2508_v27  ;;  %2110 = vmatprep.mubr.msk.bf16.mxu1 %vm2375_vm0, %v2374_v0  ;;  %v1831_v14 = vld [vmem:[%s2911_s4 + $0x1c] sm:$0xf] }
 0x2c0   :  { %2134 = vmatprep.subr.bf16.mxu1 %v2374_v0 }
 0x2c6   :  { %2111 = vmatmul.mubr.msk.bf16.vlgmr.msra.gmra.mrb[20].mxu1 %vm160_vm2, %v1727_v15 }
 0x2c7   :  { %2135 = vmatpush3.bf16.msra.mxu1 %v2508_v27  ;;  %2136 = vmatprep.mubr.msk.bf16.mxu1 %vm2375_vm0, %v2374_v0 }
 0x2c8   :  { %2140 = vmatprep.subr.bf16.mxu1 %v2374_v0 }
 0x2ce   :  { %2137 = vmatmul.mubr.msk.bf16.vlgmr.msra.gmra.mrb[24].mxu1 %vm160_vm2, %v1753_v16 }
 0x2cf   :  { %2141 = vmatpush3.bf16.msra.mxu1 %v2321_v17  ;;  %2156 = vmatprep.mubr.msk.bf16.mxu1 %vm2375_vm0, %v2374_v0  ;;  %v2350_v17 = vld [vmem:[%s2908_s5 + $0x1c0] sm:$0xff]  }
 0x2d0   :  { %2142 = vmatprep.subr.bf16.mxu1 %v2374_v0 }
 0x2d3   :  { %2143 = vmatpush3.bf16.msra.mxu1 %v2323_v18 }
 0x2d4   :  { %2144 = vmatprep.subr.bf16.mxu1 %v2374_v0 }
 0x2d7   :  { %2145 = vmatpush3.bf16.msra.mxu1 %v2325_v19 }
 0x2d8   :  { %2146 = vmatprep.subr.bf16.mxu1 %v2374_v0 }
 0x2db   :  { %2147 = vmatpush3.bf16.msra.mxu1 %v2327_v20  ;;  %v2351_v20 = vld [vmem:[%s2908_s5 + $0x1c8] sm:$0xff]  }
 0x2dc   :  { %2148 = vmatprep.subr.bf16.mxu1 %v2374_v0 }
 0x2df   :  { %2149 = vmatpush3.bf16.msra.mxu1 %v2329_v22  ;;  %v2352_v22 = vld [vmem:[%s2908_s5 + $0x1d0] sm:$0xff]  }
 0x2e0   :  { %2150 = vmatprep.subr.bf16.mxu1 %v2374_v0 }
 0x2e3   :  { %2151 = vmatpush3.bf16.msra.mxu1 %v2331_v24  ;;  %v2354_v24 = vld [vmem:[%s2908_s5 + $0x1d8] sm:$0xff]  }
 0x2e4   :  { %2152 = vmatprep.subr.bf16.mxu1 %v2374_v0 }
 0x2e7   :  { %2153 = vmatpush3.bf16.msra.mxu1 %v2332_v25  ;;  %v2357_v25 = vld [vmem:[%s2908_s5 + $0x210] sm:$0xff]  }
 0x2e8   :  { %2154 = vmatprep.subr.bf16.mxu1 %v2374_v0 }
 0x2eb   :  { %2155 = vmatpush3.bf16.msra.mxu1 %v2333_v26  ;;  %v2356_v26 = vld [vmem:[%s2908_s5 + $0x1e0] sm:$0xff]  }
 0x2ec   :  { %2186 = vmatprep.subr.bf16.mxu1 %v2374_v0 }
 0x391   :  { %v609_v28 = vpop.f32.mrb[16].mxu1 }
 0x392   :  { %v2688_v29 = vadd.f32 %v609_v28, %v459_v6  ;;  %v2106_v30 = vpop.f32.mrb[17].mxu1  ;;  %v2358_v28 = vld [vmem:[%s2908_s5 + $0x1e8] sm:$0xff]  }
 0x393   :  { %v612_v31 = vpop.f32.mrb[18].mxu1  ;;  %v2360_v30 = vld [vmem:[%s2908_s5 + $0x1f0] sm:$0xff]  }
 0x394   :  { %v2107_v32 = vpop.f32.mrb[19].mxu1  ;;  %v2361_v31 = vld [vmem:[%s2908_s5 + $0x220] sm:$0xff]  }
 0x395   :  { %v2362_v32 = vld [vmem:[%s2908_s5 + $0x1f8] sm:$0xff]  }
 0x399   :  { %v655_v33 = vpop.f32.mrb[20].mxu1 }
 0x39a   :  { %v661_v34 = vpack.c.bf16 %v655_v33, %v655_v33  ;;  %v2112_v35 = vpop.f32.mrb[21].mxu1  ;;  %v2363_v33 = vld [vmem:[%s2908_s5 + $0x228] sm:$0xff]  }
 0x39b   :  { %v658_v36 = vpop.f32.mrb[22].mxu1  ;;  %v2367_v35 = vld [vmem:[%s2908_s5 + $0x238] sm:$0xff]  }
 0x39c   :  { %v2113_v37 = vpop.f32.mrb[23].mxu1  ;;  %2131 = vmatmul.mubr.bf16.vlgmr.msra.gmra.mrb[8].mxu0 %v661_v34  ;;  %v2365_v34 = vld [vmem:[%s2908_s5 + $0x230] sm:$0xff]  }
 0x39d   :  { %2161 = vmatpush3.bf16.msra.mxu0 %v2508_v27  ;;  %2162 = vmatprep.mubr.msk.bf16.mxu0 %vm2375_vm0, %v2374_v0 }
 0x39e   :  { %2166 = vmatprep.subr.bf16.mxu0 %v2374_v0 }
 0x3a1   :  { %v807_v38 = vpop.f32.mrb[24].mxu1 }
 0x3a2   :  { %v813_v40 = vpack.c.bf16 %v807_v38, %v807_v38  ;;  %v2138_v41 = vpop.f32.mrb[25].mxu1 }
 0x3a3   :  { %v810_v43 = vpop.f32.mrb[26].mxu1 }
 0x3a4   :  { %2157 = vmatmul.mubr.bf16.vlgmr.msra.gmra.mrb[28].mxu1 %v813_v40  ;;  %2163 = vmatmul.mubr.msk.bf16.vlgmr.msra.gmra.mrb[12].mxu0 %vm160_vm2, %v1779_v39  ;;  %v2139_v44 = vpop.f32.mrb[27].mxu1  ;;  %v2364_v43 = vld [vmem:[%s2912_s7] sm:$0xff]  }
 0x3a5   :  { %2187 = vmatpush3.bf16.msra.mxu1 %v2508_v27  ;;  %2188 = vmatprep.mubr.msk.bf16.mxu1 %vm2375_vm0, %v2374_v0 }
 0x3a6   :  { %2167 = vmatpush3.bf16.msra.mxu0 %v2334_v42  ;;  %2192 = vmatprep.subr.bf16.mxu1 %v2374_v0 }
 0x3a7   :  { %2168 = vmatprep.subr.bf16.mxu0 %v2374_v0  ;;  %2182 = vmatprep.mubr.msk.bf16.mxu0 %vm2375_vm0, %v2374_v0 }
 0x3aa   :  { %2169 = vmatpush3.bf16.msra.mxu0 %v2335_v45 }
 0x3ab   :  { %2170 = vmatprep.subr.bf16.mxu0 %v2374_v0 }
 0x3ac   :  { %2189 = vmatmul.mubr.msk.bf16.vlgmr.msra.gmra.mrb[32].mxu1 %vm160_vm2, %v1805_v46 }
 0x3ad   :  { %2193 = vmatpush3.bf16.msra.mxu1 %v2337_v47  ;;  %2208 = vmatprep.mubr.msk.bf16.mxu1 %vm2375_vm0, %v2374_v0 }
 0x3ae   :  { %2171 = vmatpush3.bf16.msra.mxu0 %v2336_v48  ;;  %2194 = vmatprep.subr.bf16.mxu1 %v2374_v0 }
 0x3af   :  { %2172 = vmatprep.subr.bf16.mxu0 %v2374_v0 }
 0x3b1   :  { %2195 = vmatpush3.bf16.msra.mxu1 %v2339_v49 }
 0x3b2   :  { %2173 = vmatpush3.bf16.msra.mxu0 %v2338_v50  ;;  %2196 = vmatprep.subr.bf16.mxu1 %v2374_v0 }
 0x3b3   :  { %2174 = vmatprep.subr.bf16.mxu0 %v2374_v0 }
 0x3b5   :  { %2197 = vmatpush3.bf16.msra.mxu1 %v2341_v51 }
 0x3b6   :  { %2175 = vmatpush3.bf16.msra.mxu0 %v2340_v52  ;;  %2198 = vmatprep.subr.bf16.mxu1 %v2374_v0  ;;  %v2366_v52 = vld [vmem:[%s2912_s7 + $0x8] sm:$0xff]  }
 0x3b7   :  { %2176 = vmatprep.subr.bf16.mxu0 %v2374_v0 }
 0x3b9   :  { %2199 = vmatpush3.bf16.msra.mxu1 %v2343_v53 }
 0x3ba   :  { %2177 = vmatpush3.bf16.msra.mxu0 %v2342_v54  ;;  %2200 = vmatprep.subr.bf16.mxu1 %v2374_v0  ;;  %v2368_v54 = vld [vmem:[%s2912_s7 + $0x10] sm:$0xff]  }
 0x3bb   :  { %2178 = vmatprep.subr.bf16.mxu0 %v2374_v0 }
 0x3bd   :  { %2201 = vmatpush3.bf16.msra.mxu1 %v2345_v56 }
 0x3be   :  { %2179 = vmatpush3.bf16.msra.mxu0 %v2344_v55  ;;  %2202 = vmatprep.subr.bf16.mxu1 %v2374_v0 }
 0x3bf   :  { %2180 = vmatprep.subr.bf16.mxu0 %v2374_v0 }
 0x3c1   :  { %2203 = vmatpush3.bf16.msra.mxu1 %v2347_v58 }
 0x3c2   :  { %2181 = vmatpush3.bf16.msra.mxu0 %v2346_v57  ;;  %2204 = vmatprep.subr.bf16.mxu1 %v2374_v0 }
 0x3c3   :  { %2212 = vmatprep.subr.bf16.mxu0 %v2374_v0 }
 0x3c5   :  { %2205 = vmatpush3.bf16.msra.mxu1 %v2348_v59  ;;  %v2369_v59 = vld [vmem:[%s2912_s7 + $0x18] sm:$0xff]  }
 0x3c6   :  { %2206 = vmatprep.subr.bf16.mxu1 %v2374_v0 }
 0x3c9   :  { %2207 = vmatpush3.bf16.msra.mxu1 %v2349_v60  ;;  %v2370_v60 = vld [vmem:[%s2912_s7 + $0x20] sm:$0xff]  }
 0x3ca   :  { %2238 = vmatprep.subr.bf16.mxu1 %v2374_v0 }
 0x46f   :  { %v761_v61 = vpop.f32.mrb[8].mxu0 }
 0x470   :  { %v767_v62 = vadd.f32 %v761_v61, %v2688_v29  ;;  %v2132_v63 = vpop.f32.mrb[9].mxu0  ;;  %v2359_v29 = vld [vmem:[%s2908_s5 + $0x218] sm:$0xff]   ;;  %v2371_v61 = vld [vmem:[%s2912_s7 + $0x28] sm:$0xff]  }
 0x471   :  { %v764_v1 = vpop.f32.mrb[10].mxu0  ;;  %v2373_v63 = vld [vmem:[%s2912_s7 + $0x38] sm:$0xff]  }
 0x472   :  { %v2133_v2 = vpop.f32.mrb[11].mxu0  ;;  %v1528_v1 = vld [vmem:[%s2913_s6] sm:$0xf] }
 0x477   :  { %v913_v3 = vpop.f32.mrb[28].mxu1  ;;  %v959_v4 = vpop.f32.mrb[12].mxu0 }
 0x478   :  { %v2775_v5 = vadd.f32 %v913_v3, %v767_v62  ;;  %v965_v6 = vpack.c.bf16 %v959_v4, %v959_v4  ;;  %v2164_v7 = vpop.f32.mrb[13].mxu0  ;;  %v2158_v8 = vpop.f32.mrb[29].mxu1  ;;  %v2372_v62 = vld [vmem:[%s2912_s7 + $0x30] sm:$0xff]  }
 0x479   :  { %v962_v9 = vpop.f32.mrb[14].mxu0  ;;  %v916_v10 = vpop.f32.mrb[30].mxu1 }
 0x47a   :  { %v2165_v11 = vpop.f32.mrb[15].mxu0  ;;  %2183 = vmatmul.mubr.bf16.vlgmr.msra.gmra.mrb[16].mxu0 %v965_v6  ;;  %v2159_v12 = vpop.f32.mrb[31].mxu1 }
 0x47b   :  { %2213 = vmatpush3.bf16.msra.mxu0 %v2508_v27  ;;  %2214 = vmatprep.mubr.msk.bf16.mxu0 %vm2375_vm0, %v2374_v0 }
 0x47c   :  { %2218 = vmatprep.subr.bf16.mxu0 %v2374_v0 }
 0x47f   :  { %v1111_v13 = vpop.f32.mrb[32].mxu1 }
 0x480   :  { %v1117_v15 = vpack.c.bf16 %v1111_v13, %v1111_v13  ;;  %v2190_v16 = vpop.f32.mrb[33].mxu1  ;;  %v1892_v13 = vld [vmem:[%s2915_s9] ss:$0 sm:$0xff] }
 0x481   :  { %v1114_v18 = vpop.f32.mrb[34].mxu1 }
 0x482   :  { %2209 = vmatmul.mubr.bf16.vlgmr.msra.gmra.mrb[36].mxu1 %v1117_v15  ;;  %2215 = vmatmul.mubr.msk.bf16.vlgmr.msra.gmra.mrb[20].mxu0 %vm160_vm2, %v1831_v14  ;;  %v2191_v19 = vpop.f32.mrb[35].mxu1 }
 0x483   :  { %2239 = vmatpush3.bf16.msra.mxu1 %v2508_v27  ;;  %2240 = vmatprep.mubr.msk.bf16.mxu1 %vm2375_vm0, %v2374_v0  ;;  %v2353_v27 = vld [vmem:[%s2908_s5 + $0x200] sm:$0xff]  }
 0x484   :  { %2219 = vmatpush3.bf16.msra.mxu0 %v2350_v17  ;;  %2244 = vmatprep.subr.bf16.mxu1 %v2374_v0 }
 0x485   :  { %2220 = vmatprep.subr.bf16.mxu0 %v2374_v0  ;;  %2234 = vmatprep.mubr.msk.bf16.mxu0 %vm2375_vm0, %v2374_v0 }
 0x488   :  { %2221 = vmatpush3.bf16.msra.mxu0 %v2351_v20 }
 0x489   :  { %2222 = vmatprep.subr.bf16.mxu0 %v2374_v0 }
 0x48a   :  { %2241 = vmatmul.mubr.msk.bf16.vlgmr.msra.gmra.mrb[40].mxu1 %vm160_vm2, %v1857_v21 }
 0x48b   :  { %2245 = vmatpush3.bf16.msra.mxu1 %v2353_v27  ;;  %2260 = vmatprep.mubr.msk.bf16.mxu1 %vm2375_vm0, %v2374_v0 }
 0x48c   :  { %2223 = vmatpush3.bf16.msra.mxu0 %v2352_v22  ;;  %2246 = vmatprep.subr.bf16.mxu1 %v2374_v0 }
 0x48d   :  { %2224 = vmatprep.subr.bf16.mxu0 %v2374_v0 }
 0x48f   :  { %2247 = vmatpush3.bf16.msra.mxu1 %v2355_v23 }
 0x490   :  { %2225 = vmatpush3.bf16.msra.mxu0 %v2354_v24  ;;  %2248 = vmatprep.subr.bf16.mxu1 %v2374_v0 }
 0x491   :  { %2226 = vmatprep.subr.bf16.mxu0 %v2374_v0 }
 0x493   :  { %2249 = vmatpush3.bf16.msra.mxu1 %v2357_v25 }
 0x494   :  { %2227 = vmatpush3.bf16.msra.mxu0 %v2356_v26  ;;  %2250 = vmatprep.subr.bf16.mxu1 %v2374_v0 }
 0x495   :  { %2228 = vmatprep.subr.bf16.mxu0 %v2374_v0 }
 0x497   :  { %2251 = vmatpush3.bf16.msra.mxu1 %v2359_v29 }
 0x498   :  { %2229 = vmatpush3.bf16.msra.mxu0 %v2358_v28  ;;  %2252 = vmatprep.subr.bf16.mxu1 %v2374_v0 }
 0x499   :  { %2230 = vmatprep.subr.bf16.mxu0 %v2374_v0 }
 0x49b   :  { %2253 = vmatpush3.bf16.msra.mxu1 %v2361_v31 }
 0x49c   :  { %2231 = vmatpush3.bf16.msra.mxu0 %v2360_v30  ;;  %2254 = vmatprep.subr.bf16.mxu1 %v2374_v0 }
 0x49d   :  { %2232 = vmatprep.subr.bf16.mxu0 %v2374_v0 }
 0x49f   :  { %2255 = vmatpush3.bf16.msra.mxu1 %v2363_v33 }
 0x4a0   :  { %2233 = vmatpush3.bf16.msra.mxu0 %v2362_v32  ;;  %2256 = vmatprep.subr.bf16.mxu1 %v2374_v0 }
 0x4a1   :  { %2264 = vmatprep.subr.bf16.mxu0 %v2374_v0 }
 0x4a3   :  { %2257 = vmatpush3.bf16.msra.mxu1 %v2365_v34 }
 0x4a4   :  { %2258 = vmatprep.subr.bf16.mxu1 %v2374_v0 }
 0x4a7   :  { %2259 = vmatpush3.bf16.msra.mxu1 %v2367_v35 }
 0x54d   :  { %v1065_v36 = vpop.f32.mrb[16].mxu0 }
 0x54e   :  { %v1071_v37 = vadd.f32 %v1065_v36, %v2775_v5  ;;  %v2184_v38 = vpop.f32.mrb[17].mxu0 }
 0x54f   :  { %v1068_v39 = vpop.f32.mrb[18].mxu0 }
 0x550   :  { %v2185_v40 = vpop.f32.mrb[19].mxu0 }
 0x555   :  { %v1217_v41 = vpop.f32.mrb[36].mxu1  ;;  %v1263_v42 = vpop.f32.mrb[20].mxu0 }
 0x556   :  { %v1223_v44 = vadd.f32 %v1217_v41, %v1071_v37  ;;  %v1269_v45 = vpack.c.bf16 %v1263_v42, %v1263_v42  ;;  %v2216_v46 = vpop.f32.mrb[21].mxu0  ;;  %v2210_v47 = vpop.f32.mrb[37].mxu1 }
 0x557   :  { %v1266_v48 = vpop.f32.mrb[22].mxu0  ;;  %v1220_v49 = vpop.f32.mrb[38].mxu1 }
 0x558   :  { %v2217_v50 = vpop.f32.mrb[23].mxu0  ;;  %2235 = vmatmul.mubr.bf16.vlgmr.msra.gmra.mrb[24].mxu0 %v1269_v45  ;;  %v2211_v51 = vpop.f32.mrb[39].mxu1 }
 0x559   :  { %2265 = vmatpush3.bf16.msra.mxu0 %v2364_v43  ;;  %2280 = vmatprep.mubr.msk.bf16.mxu0 %vm2375_vm0, %v2374_v0 }
 0x55a   :  { %2266 = vmatprep.subr.bf16.mxu0 %v2374_v0 }
 0x55d   :  { %2267 = vmatpush3.bf16.msra.mxu0 %v2366_v52  ;;  %v1415_v53 = vpop.f32.mrb[40].mxu1 }
 0x55e   :  { %v1421_v55 = vpack.c.bf16 %v1415_v53, %v1415_v53  ;;  %2268 = vmatprep.subr.bf16.mxu0 %v2374_v0  ;;  %v2242_v56 = vpop.f32.mrb[41].mxu1 }
 0x55f   :  { %v1418_v57 = vpop.f32.mrb[42].mxu1 }
 0x560   :  { %2261 = vmatmul.mubr.bf16.vlgmr.msra.gmra.mrb[44].mxu1 %v1421_v55  ;;  %v2243_v58 = vpop.f32.mrb[43].mxu1 }
 0x561   :  { %2269 = vmatpush3.bf16.msra.mxu0 %v2368_v54 }
 0x562   :  { %2270 = vmatprep.subr.bf16.mxu0 %v2374_v0 }
 0x565   :  { %2271 = vmatpush3.bf16.msra.mxu0 %v2369_v59 }
 0x566   :  { %2272 = vmatprep.subr.bf16.mxu0 %v2374_v0 }
 0x569   :  { %2273 = vmatpush3.bf16.msra.mxu0 %v2370_v60 }
 0x56a   :  { %2274 = vmatprep.subr.bf16.mxu0 %v2374_v0 }
 0x56d   :  { %2275 = vmatpush3.bf16.msra.mxu0 %v2371_v61 }
 0x56e   :  { %2276 = vmatprep.subr.bf16.mxu0 %v2374_v0 }
 0x571   :  { %2277 = vmatpush3.bf16.msra.mxu0 %v2372_v62 }
 0x572   :  { %2278 = vmatprep.subr.bf16.mxu0 %v2374_v0  ;;  %v1891_v0 = vld [vmem:[%s2914_s8] ss:$0 sm:$0xff] }
 0x575   :  { %2279 = vmatpush3.bf16.msra.mxu0 %v2373_v63 }
 0x578   :  { %2281 = vmatmul.mubr.bf16.vlgmr.msra.gmra.mrb[28].mxu0 %v1528_v1 }
 0x62b   :  { %v1369_v2 = vpop.f32.mrb[24].mxu0 }
 0x62c   :  { %v1375_v3 = vadd.f32 %v1369_v2, %v1223_v44  ;;  %v2236_v4 = vpop.f32.mrb[25].mxu0 }
 0x62d   :  { %v1372_v5 = vpop.f32.mrb[26].mxu0 }
 0x62e   :  { %v2237_v6 = vpop.f32.mrb[27].mxu0 }
 0x633   :  { %v1521_v7 = vpop.f32.mrb[44].mxu1 }
 0x634   :  { %v1527_v8 = vadd.f32 %v1521_v7, %v1375_v3  ;;  %v2262_v9 = vpop.f32.mrb[45].mxu1 }
 0x635   :  { %v1524_v10 = vpop.f32.mrb[46].mxu1 }
 0x636   :  { %v2263_v11 = vpop.f32.mrb[47].mxu1 }
 0x64b   :  { %v1627_v12 = vpop.f32.mrb[28].mxu0 }
 0x64c   :  { %v1640_v14 = vmul.f32 %v1891_v0, %v1627_v12  ;;  %v2282_v15 = vpop.f32.mrb[29].mxu0 }
 0x64d   :  { %v1630_v16 = vpop.f32.mrb[30].mxu0 }
 0x64e   :  { %v1648_v17 = vadd.f32 %v1892_v13, %v1640_v14  ;;  %v2283_v18 = vpop.f32.mrb[31].mxu0 }
 0x650   :  { %v1649_v19 = vadd.f32 %v1648_v17, %v1527_v8 }
 0x652   :  { %v1650_v20 = vpack.c.bf16 %v1649_v19, %v1649_v19 }
 0x654   :  { %1651 = vst [vmem:[%s2916_s10] sm:$0xf] %v1650_v20 }

// kernel: resnet_v2_forward.12
= control target key start
LH: loop header
LB: loop body
LE: loop exit
PB: predicated region body
PF: predicated region fallthrough
CT: control target
= control target key end

     0   :  { %v2542_v19 = vmov 0.0   ;;  %vm2543_vm0 = vmmov 0   ;;  %vm235_vm1 = vcmask 1043456   ;;  %vm231_vm2 = vcmask 64512   ;;  %s3102_s1 = inlined_call_operand.vmem [shape: bf16[256,128], index: 1, kind: input, shape index: {}]   ;;  %s3103_s0 = inlined_call_operand.vmem [shape: bf16[8,256], index: 0, kind: input, shape index: {}]   ;;  %s3104_s5 = inlined_call_operand.vmem [shape: bf16[9,128,128], index: 5, kind: input, shape index: {}]   ;;  %s3105_s2 = inlined_call_operand.vmem [shape: f32[1,128], index: 2, kind: input, shape index: {}]   ;;  %s3106_s3 = inlined_call_operand.vmem [shape: f32[1,128], index: 3, kind: input, shape index: {}]   ;;  %s3107_s4 = inlined_call_operand.vmem [shape: bf16[9,8,8], index: 4, kind: input, shape index: {}]   ;;  %s3108_s7 = inlined_call_operand.vmem [shape: bf16[256,128], index: 7, kind: input, shape index: {}]   ;;  %s3109_s6 = inlined_call_operand.vmem [shape: bf16[8,256], index: 6, kind: input, shape index: {}]   ;;  %s3110_s8 = inlined_call_operand.vmem [shape: f32[1,128], index: 8, kind: input, shape index: {}]   ;;  %s3111_s9 = inlined_call_operand.vmem [shape: f32[1,128], index: 9, kind: input, shape index: {}]   ;;  %s3112_s10 = inlined_call_operand.vmem [shape: bf16[8,128], index: 10, kind: output, shape index: {}]  }
   0x1   :  { %v2434_v0 = vld [vmem:[%s3102_s1 + $0x40] sm:$0xff]   ;;  %v2436_v2 = vld [vmem:[%s3102_s1 + $0x48] sm:$0xff]   ;;  %v2438_v4 = vld [vmem:[%s3102_s1 + $0x50] sm:$0xff]   ;;  %2198 = vmatprep.subr.bf16.mxu1 %v2542_v19  ;;  %2200 = vmatprep.mubr.msk.bf16.mxu1 %vm2543_vm0, %v2542_v19 }
   0x2   :  { %v2435_v1 = vld [vmem:[%s3102_s1] sm:$0xff]   ;;  %2055 = vmatprep.subr.bf16.mxu0 %v2434_v0  ;;  %v2437_v3 = vld [vmem:[%s3102_s1 + $0x8] sm:$0xff]   ;;  %v2439_v5 = vld [vmem:[%s3102_s1 + $0x10] sm:$0xff]  }
   0x3   :  { %2056 = vmatpush3.bf16.msra.mxu0 %v2435_v1  ;;  %v2440_v6 = vld [vmem:[%s3102_s1 + $0x58] sm:$0xff]   ;;  %v2442_v8 = vld [vmem:[%s3102_s1 + $0x60] sm:$0xff]   ;;  %v2444_v10 = vld [vmem:[%s3102_s1 + $0x68] sm:$0xff]  }
   0x4   :  { %2057 = vmatprep.subr.bf16.mxu0 %v2436_v2  ;;  %v2441_v7 = vld [vmem:[%s3102_s1 + $0x18] sm:$0xff]   ;;  %v2443_v9 = vld [vmem:[%s3102_s1 + $0x20] sm:$0xff]   ;;  %v2445_v13 = vld [vmem:[%s3102_s1 + $0x28] sm:$0xff]  }
   0x5   :  { %v36_v11 = vld [vmem:[%s3103_s0] sm:$0xff]  ;;  %v2446_v14 = vld [vmem:[%s3102_s1 + $0x70] sm:$0xff]   ;;  %v2448_v16 = vld [vmem:[%s3102_s1 + $0x78] sm:$0xff]  }
   0x6   :  { %v1799_v12 = vcombine.high %v36_v11, %v36_v11  ;;  %v2447_v15 = vld [vmem:[%s3102_s1 + $0x30] sm:$0xff]   ;;  %v2449_v17 = vld [vmem:[%s3102_s1 + $0x38] sm:$0xff]   ;;  %v1798_v18 = vcombine.low %v36_v11, %v36_v11  ;;  %v2452_v20 = vld [vmem:[%s3104_s5] sm:$0xff]  }
   0x7   :  { %2058 = vmatpush3.bf16.msra.mxu0 %v2437_v3  ;;  %v2453_v21 = vld [vmem:[%s3104_s5 + $0x8] sm:$0xff]   ;;  %v2455_v22 = vld [vmem:[%s3104_s5 + $0x10] sm:$0xff]   ;;  %v2457_v23 = vld [vmem:[%s3104_s5 + $0x18] sm:$0xff]  }
   0x8   :  { %2059 = vmatprep.subr.bf16.mxu0 %v2438_v4  ;;  %204 = vmatprep.mubr.bf16.mxu0 %v1799_v12  ;;  %v2459_v24 = vld [vmem:[%s3104_s5 + $0x20] sm:$0xff]   ;;  %v2461_v25 = vld [vmem:[%s3104_s5 + $0x28] sm:$0xff]   ;;  %v2463_v26 = vld [vmem:[%s3104_s5 + $0x30] sm:$0xff]  }
   0x9   :  { %v1816_v29 = vld [vmem:[%s3105_s2] ss:$0 sm:$0xff]  ;;  %v1819_v40 = vld [vmem:[%s3107_s4 + $0x4] sm:$0xf]  ;;  %v2456_v42 = vld [vmem:[%s3104_s5 + $0x48] sm:$0xff]  }
   0xa   :  { %v1817_v32 = vld [vmem:[%s3106_s3] ss:$0 sm:$0xff]  ;;  %v2458_v43 = vld [vmem:[%s3104_s5 + $0x50] sm:$0xff]   ;;  %v2460_v44 = vld [vmem:[%s3104_s5 + $0x58] sm:$0xff]  }
   0xb   :  { %2060 = vmatpush3.bf16.msra.mxu0 %v2439_v5  ;;  %v230_v39 = vld [vmem:[%s3107_s4] sm:$0xf]  ;;  %v2464_v46 = vld [vmem:[%s3104_s5 + $0x68] sm:$0xff]   ;;  %v2465_v47 = vld [vmem:[%s3104_s5 + $0x38] sm:$0xff]  }
   0xc   :  { %2061 = vmatprep.subr.bf16.mxu0 %v2440_v6  ;;  %v2454_v41 = vld [vmem:[%s3104_s5 + $0x40] sm:$0xff]   ;;  %v2466_v48 = vld [vmem:[%s3104_s5 + $0x70] sm:$0xff]   ;;  %v2467_v49 = vld [vmem:[%s3104_s5 + $0x78] sm:$0xff]  }
   0xd   :  { %v2462_v45 = vld [vmem:[%s3104_s5 + $0x60] sm:$0xff]   ;;  %v1853_v60 = vld [vmem:[%s3107_s4 + $0x8] sm:$0xf]  ;;  %v2470_v63 = vld [vmem:[%s3104_s5 + $0x90] sm:$0xff]  }
   0xe   :  { %v2468_v61 = vld [vmem:[%s3104_s5 + $0x80] sm:$0xff]   ;;  %v2469_v62 = vld [vmem:[%s3104_s5 + $0x88] sm:$0xff]   ;;  %v2471_v0 = vld [vmem:[%s3104_s5 + $0x98] sm:$0xff]  }
   0xf   :  { %2062 = vmatpush3.bf16.msra.mxu0 %v2441_v7  ;;  %v2472_v1 = vld [vmem:[%s3104_s5 + $0xa0] sm:$0xff]   ;;  %v2473_v2 = vld [vmem:[%s3104_s5 + $0xa8] sm:$0xff]   ;;  %v2474_v3 = vld [vmem:[%s3104_s5 + $0xb0] sm:$0xff]  }
  0x10   :  { %2063 = vmatprep.subr.bf16.mxu0 %v2442_v8  ;;  %v2475_v4 = vld [vmem:[%s3104_s5 + $0xb8] sm:$0xff]   ;;  %v2476_v5 = vld [vmem:[%s3104_s5 + $0xc0] sm:$0xff]   ;;  %v2477_v6 = vld [vmem:[%s3104_s5 + $0xc8] sm:$0xff]  }
  0x11   :  { %v2478_v7 = vld [vmem:[%s3104_s5 + $0xd0] sm:$0xff]   ;;  %v2480_v8 = vld [vmem:[%s3104_s5 + $0xd8] sm:$0xff]  }
  0x13   :  { %2064 = vmatpush3.bf16.msra.mxu0 %v2443_v9  ;;  %v2482_v9 = vld [vmem:[%s3104_s5 + $0xe0] sm:$0xff]  }
  0x14   :  { %2065 = vmatprep.subr.bf16.mxu0 %v2444_v10  ;;  %v2484_v10 = vld [vmem:[%s3104_s5 + $0xe8] sm:$0xff]  }
  0x17   :  { %2066 = vmatpush3.bf16.msra.mxu0 %v2445_v13 }
  0x18   :  { %2067 = vmatprep.subr.bf16.mxu0 %v2446_v14 }
  0x1b   :  { %2068 = vmatpush3.bf16.msra.mxu0 %v2447_v15 }
  0x1c   :  { %2069 = vmatprep.subr.bf16.mxu0 %v2448_v16 }
  0x1f   :  { %2070 = vmatpush3.bf16.msra.mxu0 %v2449_v17 }
  0x20   :  { %2230 = vmatprep.subr.bf16.mxu0 %v2542_v19 }
  0x22   :  { %205 = vmatmul.mubr.bf16.vlgmr.msra.gmra.mrb[0].mxu0 %v1798_v18 }
  0x23   :  { %2246 = vmatprep.mubr.msk.bf16.mxu0 %vm2543_vm0, %v2542_v19  ;;  %2231 = vmatpush3.bf16.msra.mxu0 %v2452_v20 }
  0x24   :  { %2232 = vmatprep.subr.bf16.mxu0 %v2542_v19 }
  0x27   :  { %2233 = vmatpush3.bf16.msra.mxu0 %v2453_v21 }
  0x28   :  { %2234 = vmatprep.subr.bf16.mxu0 %v2542_v19 }
  0x2b   :  { %2235 = vmatpush3.bf16.msra.mxu0 %v2455_v22 }
  0x2c   :  { %2236 = vmatprep.subr.bf16.mxu0 %v2542_v19 }
  0x2f   :  { %2237 = vmatpush3.bf16.msra.mxu0 %v2457_v23 }
  0x30   :  { %2238 = vmatprep.subr.bf16.mxu0 %v2542_v19 }
  0x33   :  { %2239 = vmatpush3.bf16.msra.mxu0 %v2459_v24 }
  0x34   :  { %2240 = vmatprep.subr.bf16.mxu0 %v2542_v19 }
  0x37   :  { %2241 = vmatpush3.bf16.msra.mxu0 %v2461_v25 }
  0x38   :  { %2242 = vmatprep.subr.bf16.mxu0 %v2542_v19 }
  0x3b   :  { %2243 = vmatpush3.bf16.msra.mxu0 %v2463_v26  ;;  %v1879_v26 = vld [vmem:[%s3107_s4 + $0xc] sm:$0xf] }
  0x3c   :  { %2244 = vmatprep.subr.bf16.mxu0 %v2542_v19 }
  0x3f   :  { %2245 = vmatpush3.bf16.msra.mxu0 %v2465_v47 }
  0x40   :  { %2282 = vmatprep.subr.bf16.mxu0 %v2542_v19 }
  0xf5   :  { %v2071_v27 = vpop.f32.mrb[0].mxu0 }
  0xf6   :  { %v2072_v28 = vpop.f32.mrb[1].mxu0 }
  0xf7   :  { %v2073_v30 = vadd.f32 %v2072_v28, %v2071_v27  ;;  %v2074_v31 = vpop.f32.mrb[2].mxu0  ;;  %v1905_v27 = vld [vmem:[%s3107_s4 + $0x10] sm:$0xf]  ;;  %v2479_v28 = vld [vmem:[%s3104_s5 + $0x100] sm:$0xff]  }
  0xf8   :  { %v2075_v33 = vpop.f32.mrb[3].mxu0  ;;  %v2485_v31 = vld [vmem:[%s3104_s5 + $0x118] sm:$0xff]  }
  0xf9   :  { %v219_v34 = vmul.f32 %v2073_v30, %v1816_v29  ;;  %v2481_v29 = vld [vmem:[%s3104_s5 + $0x108] sm:$0xff]   ;;  %v2483_v30 = vld [vmem:[%s3104_s5 + $0x110] sm:$0xff]   ;;  %v2487_v33 = vld [vmem:[%s3104_s5 + $0x120] sm:$0xff]  }
  0xfb   :  { %v227_v35 = vadd.f32 %v1817_v32, %v219_v34  ;;  %v2486_v32 = vld [vmem:[%s3104_s5 + $0xf0] sm:$0xff]   ;;  %v2488_v34 = vld [vmem:[%s3104_s5 + $0xf8] sm:$0xff]  }
  0xfd   :  { %v228_v36 = vmax.f32 %v227_v35, 0.0  ;;  %v2489_v35 = vld [vmem:[%s3104_s5 + $0x128] sm:$0xff]  }
  0xff   :  { %v229_v37 = vpack.c.bf16 %v228_v36, %v228_v36  ;;  %v2490_v36 = vld [vmem:[%s3104_s5 + $0x130] sm:$0xff]  }
 0x101   :  { %v2690_v38 = vsel %vm235_vm1, %v229_v37, 0  ;;  %v2491_v37 = vld [vmem:[%s3104_s5 + $0x138] sm:$0xff]  }
 0x102   :  { %2199 = vmatpush3.bf16.msra.mxu1 %v2690_v38 }
 0x103   :  { %2204 = vmatprep.subr.bf16.mxu1 %v2542_v19 }
 0x105   :  { %2201 = vmatmul.mubr.msk.bf16.vlgmr.msra.gmra.mrb[0].mxu1 %vm231_vm2, %v230_v39 }
 0x106   :  { %2205 = vmatpush3.bf16.msra.mxu1 %v2690_v38  ;;  %2206 = vmatprep.mubr.msk.bf16.mxu1 %vm2543_vm0, %v2542_v19 }
 0x107   :  { %2210 = vmatprep.subr.bf16.mxu1 %v2542_v19 }
 0x10d   :  { %2207 = vmatmul.mubr.msk.bf16.vlgmr.msra.gmra.mrb[4].mxu1 %vm231_vm2, %v1819_v40 }
 0x10e   :  { %2211 = vmatpush3.bf16.msra.mxu1 %v2454_v41  ;;  %2226 = vmatprep.mubr.msk.bf16.mxu1 %vm2543_vm0, %v2542_v19 }
 0x10f   :  { %2212 = vmatprep.subr.bf16.mxu1 %v2542_v19 }
 0x112   :  { %2213 = vmatpush3.bf16.msra.mxu1 %v2456_v42 }
 0x113   :  { %2214 = vmatprep.subr.bf16.mxu1 %v2542_v19 }
 0x116   :  { %2215 = vmatpush3.bf16.msra.mxu1 %v2458_v43 }
 0x117   :  { %2216 = vmatprep.subr.bf16.mxu1 %v2542_v19 }
 0x11a   :  { %2217 = vmatpush3.bf16.msra.mxu1 %v2460_v44 }
 0x11b   :  { %2218 = vmatprep.subr.bf16.mxu1 %v2542_v19 }
 0x11e   :  { %2219 = vmatpush3.bf16.msra.mxu1 %v2462_v45 }
 0x11f   :  { %2220 = vmatprep.subr.bf16.mxu1 %v2542_v19 }
 0x122   :  { %2221 = vmatpush3.bf16.msra.mxu1 %v2464_v46 }
 0x123   :  { %2222 = vmatprep.subr.bf16.mxu1 %v2542_v19 }
 0x126   :  { %2223 = vmatpush3.bf16.msra.mxu1 %v2466_v48 }
 0x127   :  { %2224 = vmatprep.subr.bf16.mxu1 %v2542_v19 }
 0x12a   :  { %2225 = vmatpush3.bf16.msra.mxu1 %v2467_v49 }
 0x12b   :  { %2250 = vmatprep.subr.bf16.mxu1 %v2542_v19 }
 0x1d8   :  { %v273_v50 = vpop.f32.mrb[0].mxu1 }
 0x1d9   :  { %v279_v51 = vpack.c.bf16 %v273_v50, %v273_v50  ;;  %v2202_v52 = vpop.f32.mrb[1].mxu1  ;;  %v1931_v50 = vld [vmem:[%s3107_s4 + $0x14] sm:$0xf] }
 0x1da   :  { %v276_v53 = vpop.f32.mrb[2].mxu1 }
 0x1db   :  { %v2203_v54 = vpop.f32.mrb[3].mxu1  ;;  %2247 = vmatmul.mubr.bf16.vlgmr.msra.gmra.mrb[4].mxu0 %v279_v51  ;;  %v2492_v53 = vld [vmem:[%s3104_s5 + $0x140] sm:$0xff]  }
 0x1dc   :  { %2298 = vmatprep.mubr.msk.bf16.mxu0 %vm2543_vm0, %v2542_v19  ;;  %2283 = vmatpush3.bf16.msra.mxu0 %v2476_v5  ;;  %v2505_v5 = vld [vmem:[%s3104_s5 + $0x1a8] sm:$0xff]  }
 0x1dd   :  { %2284 = vmatprep.subr.bf16.mxu0 %v2542_v19 }
 0x1e0   :  { %v335_v55 = vpop.f32.mrb[4].mxu1  ;;  %2285 = vmatpush3.bf16.msra.mxu0 %v2477_v6  ;;  %v2506_v6 = vld [vmem:[%s3104_s5 + $0x1b0] sm:$0xff]  }
 0x1e1   :  { %v341_v56 = vpack.c.bf16 %v335_v55, %v335_v55  ;;  %v2208_v57 = vpop.f32.mrb[5].mxu1  ;;  %2286 = vmatprep.subr.bf16.mxu0 %v2542_v19 }
 0x1e2   :  { %v338_v58 = vpop.f32.mrb[6].mxu1  ;;  %v1957_v57 = vld [vmem:[%s3107_s4 + $0x18] sm:$0xf] }
 0x1e3   :  { %v2209_v59 = vpop.f32.mrb[7].mxu1  ;;  %2227 = vmatmul.mubr.bf16.vlgmr.msra.gmra.mrb[8].mxu1 %v341_v56  ;;  %v2493_v56 = vld [vmem:[%s3104_s5 + $0x148] sm:$0xff]   ;;  %v2495_v58 = vld [vmem:[%s3104_s5 + $0x180] sm:$0xff]  }
 0x1e4   :  { %2251 = vmatpush3.bf16.msra.mxu1 %v2690_v38  ;;  %2252 = vmatprep.mubr.msk.bf16.mxu1 %vm2543_vm0, %v2542_v19  ;;  %v2494_v59 = vld [vmem:[%s3104_s5 + $0x150] sm:$0xff]  }
 0x1e5   :  { %2256 = vmatprep.subr.bf16.mxu1 %v2542_v19  ;;  %2287 = vmatpush3.bf16.msra.mxu0 %v2478_v7  ;;  %v2507_v7 = vld [vmem:[%s3104_s5 + $0x1b8] sm:$0xff]  }
 0x1e6   :  { %2288 = vmatprep.subr.bf16.mxu0 %v2542_v19 }
 0x1e9   :  { %2289 = vmatpush3.bf16.msra.mxu0 %v2480_v8 }
 0x1ea   :  { %2290 = vmatprep.subr.bf16.mxu0 %v2542_v19 }
 0x1eb   :  { %2253 = vmatmul.mubr.msk.bf16.vlgmr.msra.gmra.mrb[12].mxu1 %vm231_vm2, %v1853_v60  ;;  %v2497_v60 = vld [vmem:[%s3104_s5 + $0x188] sm:$0xff]  }
 0x1ec   :  { %2257 = vmatpush3.bf16.msra.mxu1 %v2468_v61  ;;  %2272 = vmatprep.mubr.msk.bf16.mxu1 %vm2543_vm0, %v2542_v19  ;;  %v2496_v61 = vld [vmem:[%s3104_s5 + $0x158] sm:$0xff]  }
 0x1ed   :  { %2258 = vmatprep.subr.bf16.mxu1 %v2542_v19  ;;  %2291 = vmatpush3.bf16.msra.mxu0 %v2482_v9 }
 0x1ee   :  { %2292 = vmatprep.subr.bf16.mxu0 %v2542_v19 }
 0x1f0   :  { %2259 = vmatpush3.bf16.msra.mxu1 %v2469_v62  ;;  %v2499_v62 = vld [vmem:[%s3104_s5 + $0x190] sm:$0xff]  }
 0x1f1   :  { %2260 = vmatprep.subr.bf16.mxu1 %v2542_v19  ;;  %2293 = vmatpush3.bf16.msra.mxu0 %v2484_v10 }
 0x1f2   :  { %2294 = vmatprep.subr.bf16.mxu0 %v2542_v19 }
 0x1f4   :  { %2261 = vmatpush3.bf16.msra.mxu1 %v2470_v63  ;;  %v2498_v63 = vld [vmem:[%s3104_s5 + $0x160] sm:$0xff]  }
 0x1f5   :  { %2262 = vmatprep.subr.bf16.mxu1 %v2542_v19  ;;  %2295 = vmatpush3.bf16.msra.mxu0 %v2486_v32  ;;  %v2009_v32 = vld [vmem:[%s3107_s4 + $0x20] sm:$0xf] }
 0x1f6   :  { %2296 = vmatprep.subr.bf16.mxu0 %v2542_v19 }
 0x1f8   :  { %2263 = vmatpush3.bf16.msra.mxu1 %v2471_v0  ;;  %v2501_v0 = vld [vmem:[%s3104_s5 + $0x198] sm:$0xff]  }
 0x1f9   :  { %2264 = vmatprep.subr.bf16.mxu1 %v2542_v19  ;;  %2297 = vmatpush3.bf16.msra.mxu0 %v2488_v34  ;;  %v2513_v34 = vld [vmem:[%s3104_s5 + $0x208] sm:$0xff]  }
 0x1fa   :  { %2328 = vmatprep.subr.bf16.mxu0 %v2542_v19 }
 0x1fc   :  { %2265 = vmatpush3.bf16.msra.mxu1 %v2472_v1  ;;  %v2500_v1 = vld [vmem:[%s3104_s5 + $0x168] sm:$0xff]  }
 0x1fd   :  { %2266 = vmatprep.subr.bf16.mxu1 %v2542_v19 }
 0x200   :  { %2267 = vmatpush3.bf16.msra.mxu1 %v2473_v2  ;;  %v2502_v2 = vld [vmem:[%s3104_s5 + $0x170] sm:$0xff]  }
 0x201   :  { %2268 = vmatprep.subr.bf16.mxu1 %v2542_v19 }
 0x204   :  { %2269 = vmatpush3.bf16.msra.mxu1 %v2474_v3  ;;  %v2503_v3 = vld [vmem:[%s3104_s5 + $0x1a0] sm:$0xff]  }
 0x205   :  { %2270 = vmatprep.subr.bf16.mxu1 %v2542_v19 }
 0x208   :  { %2271 = vmatpush3.bf16.msra.mxu1 %v2475_v4  ;;  %v2504_v4 = vld [vmem:[%s3104_s5 + $0x178] sm:$0xff]  }
 0x209   :  { %2276 = vmatprep.subr.bf16.mxu1 %v2542_v19 }
 0x2ae   :  { %v529_v11 = vpop.f32.mrb[4].mxu0 }
 0x2af   :  { %v2248_v12 = vpop.f32.mrb[5].mxu0 }
 0x2b0   :  { %v532_v13 = vpop.f32.mrb[6].mxu0 }
 0x2b1   :  { %v2249_v14 = vpop.f32.mrb[7].mxu0 }
 0x2b6   :  { %v441_v15 = vpop.f32.mrb[8].mxu1 }
 0x2b7   :  { %v530_v16 = vadd.f32 %v529_v11, %v441_v15  ;;  %v2228_v17 = vpop.f32.mrb[9].mxu1 }
 0x2b8   :  { %v444_v18 = vpop.f32.mrb[10].mxu1 }
 0x2b9   :  { %v2229_v20 = vpop.f32.mrb[11].mxu1 }
 0x2be   :  { %v574_v21 = vpop.f32.mrb[12].mxu1 }
 0x2bf   :  { %v580_v22 = vpack.c.bf16 %v574_v21, %v574_v21  ;;  %v2254_v23 = vpop.f32.mrb[13].mxu1 }
 0x2c0   :  { %v577_v24 = vpop.f32.mrb[14].mxu1 }
 0x2c1   :  { %v2255_v25 = vpop.f32.mrb[15].mxu1  ;;  %2273 = vmatmul.mubr.bf16.vlgmr.msra.gmra.mrb[16].mxu1 %v580_v22 }
 0x2c2   :  { %2277 = vmatpush3.bf16.msra.mxu1 %v2690_v38  ;;  %2278 = vmatprep.mubr.msk.bf16.mxu1 %vm2543_vm0, %v2542_v19  ;;  %v1983_v25 = vld [vmem:[%s3107_s4 + $0x1c] sm:$0xf] }
 0x2c3   :  { %2302 = vmatprep.subr.bf16.mxu1 %v2542_v19 }
 0x2c9   :  { %2279 = vmatmul.mubr.msk.bf16.vlgmr.msra.gmra.mrb[20].mxu1 %vm231_vm2, %v1879_v26 }
 0x2ca   :  { %2303 = vmatpush3.bf16.msra.mxu1 %v2690_v38  ;;  %2304 = vmatprep.mubr.msk.bf16.mxu1 %vm2543_vm0, %v2542_v19 }
 0x2cb   :  { %2308 = vmatprep.subr.bf16.mxu1 %v2542_v19 }
 0x2d1   :  { %2305 = vmatmul.mubr.msk.bf16.vlgmr.msra.gmra.mrb[24].mxu1 %vm231_vm2, %v1905_v27 }
 0x2d2   :  { %2309 = vmatpush3.bf16.msra.mxu1 %v2479_v28  ;;  %2324 = vmatprep.mubr.msk.bf16.mxu1 %vm2543_vm0, %v2542_v19  ;;  %v2508_v28 = vld [vmem:[%s3104_s5 + $0x1c0] sm:$0xff]  }
 0x2d3   :  { %2310 = vmatprep.subr.bf16.mxu1 %v2542_v19 }
 0x2d6   :  { %2311 = vmatpush3.bf16.msra.mxu1 %v2481_v29 }
 0x2d7   :  { %2312 = vmatprep.subr.bf16.mxu1 %v2542_v19 }
 0x2da   :  { %2313 = vmatpush3.bf16.msra.mxu1 %v2483_v30 }
 0x2db   :  { %2314 = vmatprep.subr.bf16.mxu1 %v2542_v19 }
 0x2de   :  { %2315 = vmatpush3.bf16.msra.mxu1 %v2485_v31  ;;  %v2509_v31 = vld [vmem:[%s3104_s5 + $0x1c8] sm:$0xff]  }
 0x2df   :  { %2316 = vmatprep.subr.bf16.mxu1 %v2542_v19 }
 0x2e2   :  { %2317 = vmatpush3.bf16.msra.mxu1 %v2487_v33  ;;  %v2510_v33 = vld [vmem:[%s3104_s5 + $0x1d0] sm:$0xff]  }
 0x2e3   :  { %2318 = vmatprep.subr.bf16.mxu1 %v2542_v19 }
 0x2e6   :  { %2319 = vmatpush3.bf16.msra.mxu1 %v2489_v35  ;;  %v2512_v35 = vld [vmem:[%s3104_s5 + $0x1d8] sm:$0xff]  }
 0x2e7   :  { %2320 = vmatprep.subr.bf16.mxu1 %v2542_v19 }
 0x2ea   :  { %2321 = vmatpush3.bf16.msra.mxu1 %v2490_v36  ;;  %v2515_v36 = vld [vmem:[%s3104_s5 + $0x210] sm:$0xff]  }
 0x2eb   :  { %2322 = vmatprep.subr.bf16.mxu1 %v2542_v19 }
 0x2ee   :  { %2323 = vmatpush3.bf16.msra.mxu1 %v2491_v37  ;;  %v2514_v37 = vld [vmem:[%s3104_s5 + $0x1e0] sm:$0xff]  }
 0x2ef   :  { %2354 = vmatprep.subr.bf16.mxu1 %v2542_v19 }
 0x394   :  { %v680_v39 = vpop.f32.mrb[16].mxu1 }
 0x395   :  { %v2870_v40 = vadd.f32 %v680_v39, %v530_v16  ;;  %v2274_v41 = vpop.f32.mrb[17].mxu1  ;;  %v2516_v39 = vld [vmem:[%s3104_s5 + $0x1e8] sm:$0xff]  }
 0x396   :  { %v683_v42 = vpop.f32.mrb[18].mxu1  ;;  %v2518_v41 = vld [vmem:[%s3104_s5 + $0x1f0] sm:$0xff]  }
 0x397   :  { %v2275_v43 = vpop.f32.mrb[19].mxu1  ;;  %v2519_v42 = vld [vmem:[%s3104_s5 + $0x220] sm:$0xff]  }
 0x398   :  { %v2520_v43 = vld [vmem:[%s3104_s5 + $0x1f8] sm:$0xff]  }
 0x39c   :  { %v726_v44 = vpop.f32.mrb[20].mxu1 }
 0x39d   :  { %v732_v45 = vpack.c.bf16 %v726_v44, %v726_v44  ;;  %v2280_v46 = vpop.f32.mrb[21].mxu1  ;;  %v2521_v44 = vld [vmem:[%s3104_s5 + $0x228] sm:$0xff]  }
 0x39e   :  { %v729_v47 = vpop.f32.mrb[22].mxu1  ;;  %v2524_v46 = vld [vmem:[%s3104_s5 + $0x230] sm:$0xff]  }
 0x39f   :  { %v2281_v48 = vpop.f32.mrb[23].mxu1  ;;  %2299 = vmatmul.mubr.bf16.vlgmr.msra.gmra.mrb[8].mxu0 %v732_v45  ;;  %v2522_v45 = vld [vmem:[%s3108_s7 + $0x40] sm:$0xff]   ;;  %v2527_v47 = vld [vmem:[%s3104_s5 + $0x238] sm:$0xff]  }
 0x3a0   :  { %2329 = vmatpush3.bf16.msra.mxu0 %v2690_v38  ;;  %2330 = vmatprep.mubr.msk.bf16.mxu0 %vm2543_vm0, %v2542_v19 }
 0x3a1   :  { %2334 = vmatprep.subr.bf16.mxu0 %v2542_v19 }
 0x3a4   :  { %v878_v49 = vpop.f32.mrb[24].mxu1 }
 0x3a5   :  { %v884_v51 = vpack.c.bf16 %v878_v49, %v878_v49  ;;  %v2306_v52 = vpop.f32.mrb[25].mxu1 }
 0x3a6   :  { %v881_v54 = vpop.f32.mrb[26].mxu1 }
 0x3a7   :  { %2325 = vmatmul.mubr.bf16.vlgmr.msra.gmra.mrb[28].mxu1 %v884_v51  ;;  %2331 = vmatmul.mubr.msk.bf16.vlgmr.msra.gmra.mrb[12].mxu0 %vm231_vm2, %v1931_v50  ;;  %v2307_v55 = vpop.f32.mrb[27].mxu1 }
 0x3a8   :  { %2355 = vmatpush3.bf16.msra.mxu1 %v2690_v38  ;;  %2356 = vmatprep.mubr.msk.bf16.mxu1 %vm2543_vm0, %v2542_v19 }
 0x3a9   :  { %2335 = vmatpush3.bf16.msra.mxu0 %v2492_v53  ;;  %2360 = vmatprep.subr.bf16.mxu1 %v2542_v19  ;;  %v1599_v53 = vld [vmem:[%s3109_s6] sm:$0xff] }
 0x3aa   :  { %2336 = vmatprep.subr.bf16.mxu0 %v2542_v19  ;;  %2350 = vmatprep.mubr.msk.bf16.mxu0 %vm2543_vm0, %v2542_v19 }
 0x3ad   :  { %2337 = vmatpush3.bf16.msra.mxu0 %v2493_v56  ;;  %v2036_v56 = vcombine.high %v1599_v53, %v1599_v53 }
 0x3ae   :  { %2338 = vmatprep.subr.bf16.mxu0 %v2542_v19 }
 0x3af   :  { %2357 = vmatmul.mubr.msk.bf16.vlgmr.msra.gmra.mrb[32].mxu1 %vm231_vm2, %v1957_v57 }
 0x3b0   :  { %2361 = vmatpush3.bf16.msra.mxu1 %v2495_v58  ;;  %2376 = vmatprep.mubr.msk.bf16.mxu1 %vm2543_vm0, %v2542_v19 }
 0x3b1   :  { %2339 = vmatpush3.bf16.msra.mxu0 %v2494_v59  ;;  %2362 = vmatprep.subr.bf16.mxu1 %v2542_v19 }
 0x3b2   :  { %2340 = vmatprep.subr.bf16.mxu0 %v2542_v19 }
 0x3b4   :  { %2363 = vmatpush3.bf16.msra.mxu1 %v2497_v60 }
 0x3b5   :  { %2341 = vmatpush3.bf16.msra.mxu0 %v2496_v61  ;;  %2364 = vmatprep.subr.bf16.mxu1 %v2542_v19  ;;  %v2525_v61 = vld [vmem:[%s3108_s7 + $0x48] sm:$0xff]  }
 0x3b6   :  { %2342 = vmatprep.subr.bf16.mxu0 %v2542_v19 }
 0x3b8   :  { %2365 = vmatpush3.bf16.msra.mxu1 %v2499_v62 }
 0x3b9   :  { %2343 = vmatpush3.bf16.msra.mxu0 %v2498_v63  ;;  %2366 = vmatprep.subr.bf16.mxu1 %v2542_v19 }
 0x3ba   :  { %2344 = vmatprep.subr.bf16.mxu0 %v2542_v19 }
 0x3bc   :  { %2367 = vmatpush3.bf16.msra.mxu1 %v2501_v0 }
 0x3bd   :  { %2345 = vmatpush3.bf16.msra.mxu0 %v2500_v1  ;;  %2368 = vmatprep.subr.bf16.mxu1 %v2542_v19 }
 0x3be   :  { %2346 = vmatprep.subr.bf16.mxu0 %v2542_v19 }
 0x3c0   :  { %2369 = vmatpush3.bf16.msra.mxu1 %v2503_v3  ;;  %v2528_v3 = vld [vmem:[%s3108_s7 + $0x50] sm:$0xff]  }
 0x3c1   :  { %2347 = vmatpush3.bf16.msra.mxu0 %v2502_v2  ;;  %2370 = vmatprep.subr.bf16.mxu1 %v2542_v19  ;;  %v2526_v2 = vld [vmem:[%s3108_s7 + $0x8] sm:$0xff]  }
 0x3c2   :  { %2348 = vmatprep.subr.bf16.mxu0 %v2542_v19 }
 0x3c4   :  { %2371 = vmatpush3.bf16.msra.mxu1 %v2505_v5  ;;  %v2529_v5 = vld [vmem:[%s3108_s7 + $0x10] sm:$0xff]  }
 0x3c5   :  { %2349 = vmatpush3.bf16.msra.mxu0 %v2504_v4  ;;  %2372 = vmatprep.subr.bf16.mxu1 %v2542_v19 }
 0x3c6   :  { %2380 = vmatprep.subr.bf16.mxu0 %v2542_v19 }
 0x3c8   :  { %2373 = vmatpush3.bf16.msra.mxu1 %v2506_v6 }
 0x3c9   :  { %2374 = vmatprep.subr.bf16.mxu1 %v2542_v19 }
 0x3cc   :  { %2375 = vmatpush3.bf16.msra.mxu1 %v2507_v7  ;;  %v2530_v7 = vld [vmem:[%s3108_s7 + $0x58] sm:$0xff]  }
 0x3cd   :  { %2406 = vmatprep.subr.bf16.mxu1 %v2542_v19 }
 0x472   :  { %v832_v8 = vpop.f32.mrb[8].mxu0 }
 0x473   :  { %v838_v9 = vadd.f32 %v832_v8, %v2870_v40  ;;  %v2300_v10 = vpop.f32.mrb[9].mxu0  ;;  %v2517_v40 = vld [vmem:[%s3104_s5 + $0x218] sm:$0xff]  }
 0x474   :  { %v835_v11 = vpop.f32.mrb[10].mxu0 }
 0x475   :  { %v2301_v12 = vpop.f32.mrb[11].mxu0  ;;  %v2531_v11 = vld [vmem:[%s3108_s7 + $0x18] sm:$0xff]  }
 0x476   :  { %v2532_v12 = vld [vmem:[%s3108_s7 + $0x60] sm:$0xff]  }
 0x47a   :  { %v984_v13 = vpop.f32.mrb[28].mxu1  ;;  %v1030_v14 = vpop.f32.mrb[12].mxu0 }
 0x47b   :  { %v2957_v15 = vadd.f32 %v984_v13, %v838_v9  ;;  %v1036_v16 = vpack.c.bf16 %v1030_v14, %v1030_v14  ;;  %v2332_v17 = vpop.f32.mrb[13].mxu0  ;;  %v2326_v18 = vpop.f32.mrb[29].mxu1  ;;  %v2533_v13 = vld [vmem:[%s3108_s7 + $0x20] sm:$0xff]   ;;  %v2534_v14 = vld [vmem:[%s3108_s7 + $0x68] sm:$0xff]  }
 0x47c   :  { %v1033_v20 = vpop.f32.mrb[14].mxu0  ;;  %v987_v21 = vpop.f32.mrb[30].mxu1  ;;  %v2537_v17 = vld [vmem:[%s3108_s7 + $0x30] sm:$0xff]   ;;  %v2538_v18 = vld [vmem:[%s3108_s7 + $0x78] sm:$0xff]  }
 0x47d   :  { %v2333_v22 = vpop.f32.mrb[15].mxu0  ;;  %2351 = vmatmul.mubr.bf16.vlgmr.msra.gmra.mrb[16].mxu0 %v1036_v16  ;;  %v2327_v23 = vpop.f32.mrb[31].mxu1  ;;  %v2536_v16 = vld [vmem:[%s3108_s7 + $0x70] sm:$0xff]   ;;  %v2539_v20 = vld [vmem:[%s3108_s7 + $0x38] sm:$0xff]   ;;  %v2035_v21 = vcombine.low %v1599_v53, %v1599_v53 }
 0x47e   :  { %2381 = vmatpush3.bf16.msra.mxu0 %v2690_v38  ;;  %2382 = vmatprep.mubr.msk.bf16.mxu0 %vm2543_vm0, %v2542_v19 }
 0x47f   :  { %2386 = vmatprep.subr.bf16.mxu0 %v2542_v19 }
 0x482   :  { %v1182_v24 = vpop.f32.mrb[32].mxu1 }
 0x483   :  { %v1188_v26 = vpack.c.bf16 %v1182_v24, %v1182_v24  ;;  %v2358_v27 = vpop.f32.mrb[33].mxu1 }
 0x484   :  { %v1185_v29 = vpop.f32.mrb[34].mxu1 }
 0x485   :  { %2377 = vmatmul.mubr.bf16.vlgmr.msra.gmra.mrb[36].mxu1 %v1188_v26  ;;  %2383 = vmatmul.mubr.msk.bf16.vlgmr.msra.gmra.mrb[20].mxu0 %vm231_vm2, %v1983_v25  ;;  %v2359_v30 = vpop.f32.mrb[35].mxu1 }
 0x486   :  { %2407 = vmatpush3.bf16.msra.mxu1 %v2690_v38  ;;  %2408 = vmatprep.mubr.msk.bf16.mxu1 %vm2543_vm0, %v2542_v19  ;;  %v2511_v38 = vld [vmem:[%s3104_s5 + $0x200] sm:$0xff]  }
 0x487   :  { %2387 = vmatpush3.bf16.msra.mxu0 %v2508_v28  ;;  %2412 = vmatprep.subr.bf16.mxu1 %v2542_v19 }
 0x488   :  { %2388 = vmatprep.subr.bf16.mxu0 %v2542_v19  ;;  %2402 = vmatprep.mubr.msk.bf16.mxu0 %vm2543_vm0, %v2542_v19 }
 0x48b   :  { %2389 = vmatpush3.bf16.msra.mxu0 %v2509_v31 }
 0x48c   :  { %2390 = vmatprep.subr.bf16.mxu0 %v2542_v19 }
 0x48d   :  { %2409 = vmatmul.mubr.msk.bf16.vlgmr.msra.gmra.mrb[40].mxu1 %vm231_vm2, %v2009_v32 }
 0x48e   :  { %2413 = vmatpush3.bf16.msra.mxu1 %v2511_v38  ;;  %2428 = vmatprep.mubr.msk.bf16.mxu1 %vm2543_vm0, %v2542_v19 }
 0x48f   :  { %2391 = vmatpush3.bf16.msra.mxu0 %v2510_v33  ;;  %2414 = vmatprep.subr.bf16.mxu1 %v2542_v19  ;;  %v2053_v33 = vld [vmem:[%s3110_s8] ss:$0 sm:$0xff] }
 0x490   :  { %2392 = vmatprep.subr.bf16.mxu0 %v2542_v19 }
 0x492   :  { %2415 = vmatpush3.bf16.msra.mxu1 %v2513_v34 }
 0x493   :  { %2393 = vmatpush3.bf16.msra.mxu0 %v2512_v35  ;;  %2416 = vmatprep.subr.bf16.mxu1 %v2542_v19 }
 0x494   :  { %2394 = vmatprep.subr.bf16.mxu0 %v2542_v19 }
 0x496   :  { %2417 = vmatpush3.bf16.msra.mxu1 %v2515_v36  ;;  %v2054_v36 = vld [vmem:[%s3111_s9] ss:$0 sm:$0xff] }
 0x497   :  { %2395 = vmatpush3.bf16.msra.mxu0 %v2514_v37  ;;  %2418 = vmatprep.subr.bf16.mxu1 %v2542_v19 }
 0x498   :  { %2396 = vmatprep.subr.bf16.mxu0 %v2542_v19 }
 0x49a   :  { %2419 = vmatpush3.bf16.msra.mxu1 %v2517_v40 }
 0x49b   :  { %2397 = vmatpush3.bf16.msra.mxu0 %v2516_v39  ;;  %2420 = vmatprep.subr.bf16.mxu1 %v2542_v19 }
 0x49c   :  { %2398 = vmatprep.subr.bf16.mxu0 %v2542_v19 }
 0x49e   :  { %2421 = vmatpush3.bf16.msra.mxu1 %v2519_v42 }
 0x49f   :  { %2399 = vmatpush3.bf16.msra.mxu0 %v2518_v41  ;;  %2422 = vmatprep.subr.bf16.mxu1 %v2542_v19 }
 0x4a0   :  { %2400 = vmatprep.subr.bf16.mxu0 %v2542_v19 }
 0x4a2   :  { %2423 = vmatpush3.bf16.msra.mxu1 %v2521_v44 }
 0x4a3   :  { %2401 = vmatpush3.bf16.msra.mxu0 %v2520_v43  ;;  %2424 = vmatprep.subr.bf16.mxu1 %v2542_v19 }
 0x4a4   :  { %2176 = vmatprep.subr.bf16.mxu0 %v2522_v45 }
 0x4a6   :  { %2425 = vmatpush3.bf16.msra.mxu1 %v2524_v46 }
 0x4a7   :  { %2426 = vmatprep.subr.bf16.mxu1 %v2542_v19  ;;  %v2523_v19 = vld [vmem:[%s3108_s7] sm:$0xff]  }
 0x4aa   :  { %2427 = vmatpush3.bf16.msra.mxu1 %v2527_v47 }
 0x550   :  { %v1136_v48 = vpop.f32.mrb[16].mxu0 }
 0x551   :  { %v1142_v49 = vadd.f32 %v1136_v48, %v2957_v15  ;;  %v2352_v50 = vpop.f32.mrb[17].mxu0  ;;  %v2535_v15 = vld [vmem:[%s3108_s7 + $0x28] sm:$0xff]  }
 0x552   :  { %v1139_v51 = vpop.f32.mrb[18].mxu0 }
 0x553   :  { %v2353_v52 = vpop.f32.mrb[19].mxu0 }
 0x558   :  { %v1288_v54 = vpop.f32.mrb[36].mxu1  ;;  %v1334_v55 = vpop.f32.mrb[20].mxu0 }
 0x559   :  { %v1294_v57 = vadd.f32 %v1288_v54, %v1142_v49  ;;  %v1340_v58 = vpack.c.bf16 %v1334_v55, %v1334_v55  ;;  %v2384_v59 = vpop.f32.mrb[21].mxu0  ;;  %v2378_v60 = vpop.f32.mrb[37].mxu1 }
 0x55a   :  { %v1337_v62 = vpop.f32.mrb[22].mxu0  ;;  %v1291_v63 = vpop.f32.mrb[38].mxu1 }
 0x55b   :  { %v2385_v0 = vpop.f32.mrb[23].mxu0  ;;  %2403 = vmatmul.mubr.bf16.vlgmr.msra.gmra.mrb[24].mxu0 %v1340_v58  ;;  %v2379_v1 = vpop.f32.mrb[39].mxu1 }
 0x55c   :  { %2177 = vmatpush3.bf16.msra.mxu0 %v2523_v19  ;;  %1767 = vmatprep.mubr.bf16.mxu0 %v2036_v56 }
 0x55d   :  { %2178 = vmatprep.subr.bf16.mxu0 %v2525_v61 }
 0x560   :  { %2179 = vmatpush3.bf16.msra.mxu0 %v2526_v2  ;;  %v1486_v4 = vpop.f32.mrb[40].mxu1 }
 0x561   :  { %v1492_v6 = vpack.c.bf16 %v1486_v4, %v1486_v4  ;;  %2180 = vmatprep.subr.bf16.mxu0 %v2528_v3  ;;  %v2410_v8 = vpop.f32.mrb[41].mxu1 }
 0x562   :  { %v1489_v9 = vpop.f32.mrb[42].mxu1 }
 0x563   :  { %2429 = vmatmul.mubr.bf16.vlgmr.msra.gmra.mrb[44].mxu1 %v1492_v6  ;;  %v2411_v10 = vpop.f32.mrb[43].mxu1 }
 0x564   :  { %2181 = vmatpush3.bf16.msra.mxu0 %v2529_v5 }
 0x565   :  { %2182 = vmatprep.subr.bf16.mxu0 %v2530_v7 }
 0x568   :  { %2183 = vmatpush3.bf16.msra.mxu0 %v2531_v11 }
 0x569   :  { %2184 = vmatprep.subr.bf16.mxu0 %v2532_v12 }
 0x56c   :  { %2185 = vmatpush3.bf16.msra.mxu0 %v2533_v13 }
 0x56d   :  { %2186 = vmatprep.subr.bf16.mxu0 %v2534_v14 }
 0x570   :  { %2187 = vmatpush3.bf16.msra.mxu0 %v2535_v15 }
 0x571   :  { %2188 = vmatprep.subr.bf16.mxu0 %v2536_v16 }
 0x574   :  { %2189 = vmatpush3.bf16.msra.mxu0 %v2537_v17 }
 0x575   :  { %2190 = vmatprep.subr.bf16.mxu0 %v2538_v18 }
 0x578   :  { %2191 = vmatpush3.bf16.msra.mxu0 %v2539_v20 }
 0x57b   :  { %1768 = vmatmul.mubr.bf16.vlgmr.msra.gmra.mrb[28].mxu0 %v2035_v21 }
 0x62e   :  { %v1440_v22 = vpop.f32.mrb[24].mxu0 }
 0x62f   :  { %v1446_v23 = vadd.f32 %v1440_v22, %v1294_v57  ;;  %v2404_v24 = vpop.f32.mrb[25].mxu0 }
 0x630   :  { %v1443_v25 = vpop.f32.mrb[26].mxu0 }
 0x631   :  { %v2405_v26 = vpop.f32.mrb[27].mxu0 }
 0x636   :  { %v1592_v27 = vpop.f32.mrb[44].mxu1 }
 0x637   :  { %v1598_v28 = vadd.f32 %v1592_v27, %v1446_v23  ;;  %v2430_v29 = vpop.f32.mrb[45].mxu1 }
 0x638   :  { %v1595_v30 = vpop.f32.mrb[46].mxu1 }
 0x639   :  { %v2431_v31 = vpop.f32.mrb[47].mxu1 }
 0x64e   :  { %v2192_v32 = vpop.f32.mrb[28].mxu0 }
 0x64f   :  { %v2193_v38 = vpop.f32.mrb[29].mxu0 }
 0x650   :  { %v2194_v34 = vadd.f32 %v2193_v38, %v2192_v32  ;;  %v2195_v35 = vpop.f32.mrb[30].mxu0 }
 0x651   :  { %v2196_v37 = vpop.f32.mrb[31].mxu0 }
 0x652   :  { %v1782_v39 = vmul.f32 %v2194_v34, %v2053_v33 }
 0x654   :  { %v1790_v40 = vadd.f32 %v2054_v36, %v1782_v39 }
 0x656   :  { %v1791_v41 = vadd.f32 %v1790_v40, %v1598_v28 }
 0x658   :  { %v1792_v42 = vpack.c.bf16 %v1791_v41, %v1791_v41 }
 0x65a   :  { %1793 = vst [vmem:[%s3112_s10] sm:$0xf] %v1792_v42 }

// kernel: resnet_v2_forward.13
= control target key start
LH: loop header
LB: loop body
LE: loop exit
PB: predicated region body
PF: predicated region fallthrough
CT: control target
= control target key end

     0   :  { %v2658_v19 = vmov 0.0   ;;  %vm2659_vm0 = vmmov 0   ;;  %vm244_vm1 = vcmask 1043456   ;;  %vm240_vm2 = vcmask 64512   ;;  %s3249_s1 = inlined_call_operand.vmem [shape: bf16[256,128], index: 1, kind: input, shape index: {}]   ;;  %s3250_s0 = inlined_call_operand.vmem [shape: bf16[8,256], index: 0, kind: input, shape index: {}]   ;;  %s3251_s5 = inlined_call_operand.vmem [shape: bf16[9,128,128], index: 5, kind: input, shape index: {}]   ;;  %s3252_s2 = inlined_call_operand.vmem [shape: f32[1,128], index: 2, kind: input, shape index: {}]   ;;  %s3253_s3 = inlined_call_operand.vmem [shape: f32[1,128], index: 3, kind: input, shape index: {}]   ;;  %s3254_s4 = inlined_call_operand.vmem [shape: bf16[9,8,8], index: 4, kind: input, shape index: {}]   ;;  %s3255_s7 = inlined_call_operand.vmem [shape: bf16[256,128], index: 7, kind: input, shape index: {}]   ;;  %s3256_s6 = inlined_call_operand.vmem [shape: bf16[8,256], index: 6, kind: input, shape index: {}]   ;;  %s3257_s8 = inlined_call_operand.vmem [shape: f32[1,128], index: 8, kind: input, shape index: {}]   ;;  %s3258_s9 = inlined_call_operand.vmem [shape: f32[1,128], index: 9, kind: input, shape index: {}]   ;;  %s3259_s10 = inlined_call_operand.vmem [shape: f32[8,8], index: 10, kind: input, shape index: {}]   ;;  %s3260_s11 = inlined_call_operand.vmem [shape: f32[1,128], index: 11, kind: input, shape index: {}]   ;;  %s3261_s12 = inlined_call_operand.vmem [shape: f32[1,128], index: 12, kind: input, shape index: {}]   ;;  %s3262_s13 = inlined_call_operand.vmem [shape: f32[8,128], index: 13, kind: output, shape index: {}]  }
   0x1   :  { %v2548_v0 = vld [vmem:[%s3249_s1 + $0x40] sm:$0xff]   ;;  %v2550_v2 = vld [vmem:[%s3249_s1 + $0x48] sm:$0xff]   ;;  %v2552_v4 = vld [vmem:[%s3249_s1 + $0x50] sm:$0xff]   ;;  %2307 = vmatprep.subr.bf16.mxu1 %v2658_v19  ;;  %2309 = vmatprep.mubr.msk.bf16.mxu1 %vm2659_vm0, %v2658_v19 }
   0x2   :  { %v2549_v1 = vld [vmem:[%s3249_s1] sm:$0xff]   ;;  %2162 = vmatprep.subr.bf16.mxu0 %v2548_v0  ;;  %v2551_v3 = vld [vmem:[%s3249_s1 + $0x8] sm:$0xff]   ;;  %v2553_v5 = vld [vmem:[%s3249_s1 + $0x10] sm:$0xff]  }
   0x3   :  { %2163 = vmatpush3.bf16.msra.mxu0 %v2549_v1  ;;  %v2554_v6 = vld [vmem:[%s3249_s1 + $0x58] sm:$0xff]   ;;  %v2556_v8 = vld [vmem:[%s3249_s1 + $0x60] sm:$0xff]   ;;  %v2558_v10 = vld [vmem:[%s3249_s1 + $0x68] sm:$0xff]  }
   0x4   :  { %2164 = vmatprep.subr.bf16.mxu0 %v2550_v2  ;;  %v2555_v7 = vld [vmem:[%s3249_s1 + $0x18] sm:$0xff]   ;;  %v2557_v9 = vld [vmem:[%s3249_s1 + $0x20] sm:$0xff]   ;;  %v2559_v13 = vld [vmem:[%s3249_s1 + $0x28] sm:$0xff]  }
   0x5   :  { %v45_v11 = vld [vmem:[%s3250_s0] sm:$0xff]  ;;  %v2560_v14 = vld [vmem:[%s3249_s1 + $0x70] sm:$0xff]   ;;  %v2562_v16 = vld [vmem:[%s3249_s1 + $0x78] sm:$0xff]  }
   0x6   :  { %v1903_v12 = vcombine.high %v45_v11, %v45_v11  ;;  %v2561_v15 = vld [vmem:[%s3249_s1 + $0x30] sm:$0xff]   ;;  %v2563_v17 = vld [vmem:[%s3249_s1 + $0x38] sm:$0xff]   ;;  %v1902_v18 = vcombine.low %v45_v11, %v45_v11  ;;  %v2566_v20 = vld [vmem:[%s3251_s5] sm:$0xff]  }
   0x7   :  { %2165 = vmatpush3.bf16.msra.mxu0 %v2551_v3  ;;  %v2567_v21 = vld [vmem:[%s3251_s5 + $0x8] sm:$0xff]   ;;  %v2569_v22 = vld [vmem:[%s3251_s5 + $0x10] sm:$0xff]   ;;  %v2571_v23 = vld [vmem:[%s3251_s5 + $0x18] sm:$0xff]  }
   0x8   :  { %2166 = vmatprep.subr.bf16.mxu0 %v2552_v4  ;;  %213 = vmatprep.mubr.bf16.mxu0 %v1903_v12  ;;  %v2573_v24 = vld [vmem:[%s3251_s5 + $0x20] sm:$0xff]   ;;  %v2575_v25 = vld [vmem:[%s3251_s5 + $0x28] sm:$0xff]   ;;  %v2577_v26 = vld [vmem:[%s3251_s5 + $0x30] sm:$0xff]  }
   0x9   :  { %v2579_v27 = vld [vmem:[%s3251_s5 + $0x38] sm:$0xff]   ;;  %v1920_v30 = vld [vmem:[%s3252_s2] ss:$0 sm:$0xff]  ;;  %v1923_v41 = vld [vmem:[%s3254_s4 + $0x4] sm:$0xf] }
   0xa   :  { %v1921_v33 = vld [vmem:[%s3253_s3] ss:$0 sm:$0xff]  ;;  %v2570_v43 = vld [vmem:[%s3251_s5 + $0x48] sm:$0xff]   ;;  %v2572_v44 = vld [vmem:[%s3251_s5 + $0x50] sm:$0xff]  }
   0xb   :  { %2167 = vmatpush3.bf16.msra.mxu0 %v2553_v5  ;;  %v239_v40 = vld [vmem:[%s3254_s4] sm:$0xf]  ;;  %v2574_v45 = vld [vmem:[%s3251_s5 + $0x58] sm:$0xff]   ;;  %v2578_v47 = vld [vmem:[%s3251_s5 + $0x68] sm:$0xff]  }
   0xc   :  { %2168 = vmatprep.subr.bf16.mxu0 %v2554_v6  ;;  %v2568_v42 = vld [vmem:[%s3251_s5 + $0x40] sm:$0xff]   ;;  %v2580_v48 = vld [vmem:[%s3251_s5 + $0x70] sm:$0xff]   ;;  %v2581_v49 = vld [vmem:[%s3251_s5 + $0x78] sm:$0xff]  }
   0xd   :  { %v2576_v46 = vld [vmem:[%s3251_s5 + $0x60] sm:$0xff]   ;;  %v1983_v56 = vld [vmem:[%s3254_s4 + $0xc] sm:$0xf]  ;;  %v1957_v63 = vld [vmem:[%s3254_s4 + $0x8] sm:$0xf] }
   0xe   :  { %v2582_v59 = vld [vmem:[%s3251_s5 + $0xc0] sm:$0xff]   ;;  %v2583_v62 = vld [vmem:[%s3251_s5 + $0xc8] sm:$0xff]   ;;  %v2585_v1 = vld [vmem:[%s3251_s5 + $0xd0] sm:$0xff]  }
   0xf   :  { %2169 = vmatpush3.bf16.msra.mxu0 %v2555_v7  ;;  %v2584_v0 = vld [vmem:[%s3251_s5 + $0x80] sm:$0xff]   ;;  %v2586_v2 = vld [vmem:[%s3251_s5 + $0x88] sm:$0xff]   ;;  %v2587_v3 = vld [vmem:[%s3251_s5 + $0xd8] sm:$0xff]  }
  0x10   :  { %2170 = vmatprep.subr.bf16.mxu0 %v2556_v8  ;;  %v2588_v4 = vld [vmem:[%s3251_s5 + $0x90] sm:$0xff]   ;;  %v2589_v5 = vld [vmem:[%s3251_s5 + $0xe0] sm:$0xff]   ;;  %v2590_v6 = vld [vmem:[%s3251_s5 + $0x98] sm:$0xff]  }
  0x11   :  { %v2591_v7 = vld [vmem:[%s3251_s5 + $0xe8] sm:$0xff]   ;;  %v2592_v8 = vld [vmem:[%s3251_s5 + $0xa0] sm:$0xff]   ;;  %v2595_v11 = vld [vmem:[%s3251_s5 + $0xf8] sm:$0xff]  }
  0x12   :  { %v2596_v12 = vld [vmem:[%s3251_s5 + $0xb0] sm:$0xff]  }
  0x13   :  { %2171 = vmatpush3.bf16.msra.mxu0 %v2557_v9  ;;  %v2593_v9 = vld [vmem:[%s3251_s5 + $0xf0] sm:$0xff]  }
  0x14   :  { %2172 = vmatprep.subr.bf16.mxu0 %v2558_v10  ;;  %v2594_v10 = vld [vmem:[%s3251_s5 + $0xa8] sm:$0xff]  }
  0x17   :  { %2173 = vmatpush3.bf16.msra.mxu0 %v2559_v13  ;;  %v2597_v13 = vld [vmem:[%s3251_s5 + $0xb8] sm:$0xff]  }
  0x18   :  { %2174 = vmatprep.subr.bf16.mxu0 %v2560_v14 }
  0x1b   :  { %2175 = vmatpush3.bf16.msra.mxu0 %v2561_v15 }
  0x1c   :  { %2176 = vmatprep.subr.bf16.mxu0 %v2562_v16 }
  0x1f   :  { %2177 = vmatpush3.bf16.msra.mxu0 %v2563_v17 }
  0x20   :  { %2339 = vmatprep.subr.bf16.mxu0 %v2658_v19 }
  0x22   :  { %214 = vmatmul.mubr.bf16.vlgmr.msra.gmra.mrb[0].mxu0 %v1902_v18 }
  0x23   :  { %2355 = vmatprep.mubr.msk.bf16.mxu0 %vm2659_vm0, %v2658_v19  ;;  %2340 = vmatpush3.bf16.msra.mxu0 %v2566_v20 }
  0x24   :  { %2341 = vmatprep.subr.bf16.mxu0 %v2658_v19 }
  0x27   :  { %2342 = vmatpush3.bf16.msra.mxu0 %v2567_v21 }
  0x28   :  { %2343 = vmatprep.subr.bf16.mxu0 %v2658_v19 }
  0x2b   :  { %2344 = vmatpush3.bf16.msra.mxu0 %v2569_v22 }
  0x2c   :  { %2345 = vmatprep.subr.bf16.mxu0 %v2658_v19 }
  0x2f   :  { %2346 = vmatpush3.bf16.msra.mxu0 %v2571_v23 }
  0x30   :  { %2347 = vmatprep.subr.bf16.mxu0 %v2658_v19 }
  0x33   :  { %2348 = vmatpush3.bf16.msra.mxu0 %v2573_v24 }
  0x34   :  { %2349 = vmatprep.subr.bf16.mxu0 %v2658_v19 }
  0x37   :  { %2350 = vmatpush3.bf16.msra.mxu0 %v2575_v25 }
  0x38   :  { %2351 = vmatprep.subr.bf16.mxu0 %v2658_v19 }
  0x3b   :  { %2352 = vmatpush3.bf16.msra.mxu0 %v2577_v26 }
  0x3c   :  { %2353 = vmatprep.subr.bf16.mxu0 %v2658_v19 }
  0x3f   :  { %2354 = vmatpush3.bf16.msra.mxu0 %v2579_v27 }
  0x40   :  { %2385 = vmatprep.subr.bf16.mxu0 %v2658_v19 }
  0xf5   :  { %v2178_v28 = vpop.f32.mrb[0].mxu0 }
  0xf6   :  { %v2179_v29 = vpop.f32.mrb[1].mxu0 }
  0xf7   :  { %v2180_v31 = vadd.f32 %v2179_v29, %v2178_v28  ;;  %v2181_v32 = vpop.f32.mrb[2].mxu0 }
  0xf8   :  { %v2182_v34 = vpop.f32.mrb[3].mxu0 }
  0xf9   :  { %v228_v35 = vmul.f32 %v2180_v31, %v1920_v30  ;;  %v2035_v30 = vld [vmem:[%s3254_s4 + $0x14] sm:$0xf] }
  0xfb   :  { %v236_v36 = vadd.f32 %v1921_v33, %v228_v35  ;;  %v2598_v33 = vld [vmem:[%s3251_s5 + $0x140] sm:$0xff]  }
  0xfd   :  { %v237_v37 = vmax.f32 %v236_v36, 0.0  ;;  %v2599_v36 = vld [vmem:[%s3251_s5 + $0x148] sm:$0xff]  }
  0xff   :  { %v238_v38 = vpack.c.bf16 %v237_v37, %v237_v37  ;;  %v2009_v37 = vld [vmem:[%s3254_s4 + $0x10] sm:$0xf] }
 0x101   :  { %v2825_v39 = vsel %vm244_vm1, %v238_v38, 0  ;;  %v2600_v38 = vld [vmem:[%s3251_s5 + $0x100] sm:$0xff]  }
 0x102   :  { %2308 = vmatpush3.bf16.msra.mxu1 %v2825_v39 }
 0x103   :  { %2313 = vmatprep.subr.bf16.mxu1 %v2658_v19 }
 0x105   :  { %2310 = vmatmul.mubr.msk.bf16.vlgmr.msra.gmra.mrb[0].mxu1 %vm240_vm2, %v239_v40  ;;  %v2601_v40 = vld [vmem:[%s3251_s5 + $0x150] sm:$0xff]  }
 0x106   :  { %2314 = vmatpush3.bf16.msra.mxu1 %v2825_v39  ;;  %2315 = vmatprep.mubr.msk.bf16.mxu1 %vm2659_vm0, %v2658_v19 }
 0x107   :  { %2319 = vmatprep.subr.bf16.mxu1 %v2658_v19 }
 0x10d   :  { %2316 = vmatmul.mubr.msk.bf16.vlgmr.msra.gmra.mrb[4].mxu1 %vm240_vm2, %v1923_v41  ;;  %v2602_v41 = vld [vmem:[%s3251_s5 + $0x108] sm:$0xff]  }
 0x10e   :  { %2320 = vmatpush3.bf16.msra.mxu1 %v2568_v42  ;;  %2335 = vmatprep.mubr.msk.bf16.mxu1 %vm2659_vm0, %v2658_v19  ;;  %v2603_v42 = vld [vmem:[%s3251_s5 + $0x158] sm:$0xff]  }
 0x10f   :  { %2321 = vmatprep.subr.bf16.mxu1 %v2658_v19 }
 0x112   :  { %2322 = vmatpush3.bf16.msra.mxu1 %v2570_v43  ;;  %v2604_v43 = vld [vmem:[%s3251_s5 + $0x110] sm:$0xff]  }
 0x113   :  { %2323 = vmatprep.subr.bf16.mxu1 %v2658_v19 }
 0x116   :  { %2324 = vmatpush3.bf16.msra.mxu1 %v2572_v44  ;;  %v2605_v44 = vld [vmem:[%s3251_s5 + $0x160] sm:$0xff]  }
 0x117   :  { %2325 = vmatprep.subr.bf16.mxu1 %v2658_v19 }
 0x11a   :  { %2326 = vmatpush3.bf16.msra.mxu1 %v2574_v45  ;;  %v2606_v45 = vld [vmem:[%s3251_s5 + $0x118] sm:$0xff]  }
 0x11b   :  { %2327 = vmatprep.subr.bf16.mxu1 %v2658_v19 }
 0x11e   :  { %2328 = vmatpush3.bf16.msra.mxu1 %v2576_v46  ;;  %v2607_v46 = vld [vmem:[%s3251_s5 + $0x168] sm:$0xff]  }
 0x11f   :  { %2329 = vmatprep.subr.bf16.mxu1 %v2658_v19 }
 0x122   :  { %2330 = vmatpush3.bf16.msra.mxu1 %v2578_v47  ;;  %v2608_v47 = vld [vmem:[%s3251_s5 + $0x120] sm:$0xff]  }
 0x123   :  { %2331 = vmatprep.subr.bf16.mxu1 %v2658_v19 }
 0x126   :  { %2332 = vmatpush3.bf16.msra.mxu1 %v2580_v48  ;;  %v2609_v48 = vld [vmem:[%s3251_s5 + $0x170] sm:$0xff]  }
 0x127   :  { %2333 = vmatprep.subr.bf16.mxu1 %v2658_v19 }
 0x12a   :  { %2334 = vmatpush3.bf16.msra.mxu1 %v2581_v49  ;;  %v2610_v49 = vld [vmem:[%s3251_s5 + $0x128] sm:$0xff]  }
 0x12b   :  { %2359 = vmatprep.subr.bf16.mxu1 %v2658_v19 }
 0x1d8   :  { %v282_v50 = vpop.f32.mrb[0].mxu1 }
 0x1d9   :  { %v288_v51 = vpack.c.bf16 %v282_v50, %v282_v50  ;;  %v2311_v52 = vpop.f32.mrb[1].mxu1  ;;  %v2611_v50 = vld [vmem:[%s3251_s5 + $0x178] sm:$0xff]  }
 0x1da   :  { %v285_v53 = vpop.f32.mrb[2].mxu1  ;;  %v2613_v52 = vld [vmem:[%s3251_s5 + $0x138] sm:$0xff]  }
 0x1db   :  { %v2312_v54 = vpop.f32.mrb[3].mxu1  ;;  %2356 = vmatmul.mubr.bf16.vlgmr.msra.gmra.mrb[4].mxu0 %v288_v51  ;;  %v2612_v51 = vld [vmem:[%s3251_s5 + $0x130] sm:$0xff]  }
 0x1dc   :  { %2386 = vmatpush3.bf16.msra.mxu0 %v2825_v39  ;;  %2387 = vmatprep.mubr.msk.bf16.mxu0 %vm2659_vm0, %v2658_v19 }
 0x1dd   :  { %2391 = vmatprep.subr.bf16.mxu0 %v2658_v19 }
 0x1e0   :  { %v344_v55 = vpop.f32.mrb[4].mxu1 }
 0x1e1   :  { %v350_v57 = vpack.c.bf16 %v344_v55, %v344_v55  ;;  %v2317_v58 = vpop.f32.mrb[5].mxu1 }
 0x1e2   :  { %v347_v60 = vpop.f32.mrb[6].mxu1 }
 0x1e3   :  { %v2318_v61 = vpop.f32.mrb[7].mxu1  ;;  %2336 = vmatmul.mubr.bf16.vlgmr.msra.gmra.mrb[8].mxu1 %v350_v57  ;;  %2388 = vmatmul.mubr.msk.bf16.vlgmr.msra.gmra.mrb[8].mxu0 %vm240_vm2, %v1983_v56 }
 0x1e4   :  { %2360 = vmatpush3.bf16.msra.mxu1 %v2825_v39  ;;  %2361 = vmatprep.mubr.msk.bf16.mxu1 %vm2659_vm0, %v2658_v19 }
 0x1e5   :  { %2392 = vmatpush3.bf16.msra.mxu0 %v2582_v59  ;;  %2365 = vmatprep.subr.bf16.mxu1 %v2658_v19 }
 0x1e6   :  { %2393 = vmatprep.subr.bf16.mxu0 %v2658_v19  ;;  %2407 = vmatprep.mubr.msk.bf16.mxu0 %vm2659_vm0, %v2658_v19 }
 0x1e9   :  { %2394 = vmatpush3.bf16.msra.mxu0 %v2583_v62 }
 0x1ea   :  { %2395 = vmatprep.subr.bf16.mxu0 %v2658_v19 }
 0x1eb   :  { %2362 = vmatmul.mubr.msk.bf16.vlgmr.msra.gmra.mrb[12].mxu1 %vm240_vm2, %v1957_v63 }
 0x1ec   :  { %2366 = vmatpush3.bf16.msra.mxu1 %v2584_v0  ;;  %2381 = vmatprep.mubr.msk.bf16.mxu1 %vm2659_vm0, %v2658_v19 }
 0x1ed   :  { %2396 = vmatpush3.bf16.msra.mxu0 %v2585_v1  ;;  %2367 = vmatprep.subr.bf16.mxu1 %v2658_v19 }
 0x1ee   :  { %2397 = vmatprep.subr.bf16.mxu0 %v2658_v19 }
 0x1f0   :  { %2368 = vmatpush3.bf16.msra.mxu1 %v2586_v2 }
 0x1f1   :  { %2398 = vmatpush3.bf16.msra.mxu0 %v2587_v3  ;;  %2369 = vmatprep.subr.bf16.mxu1 %v2658_v19 }
 0x1f2   :  { %2399 = vmatprep.subr.bf16.mxu0 %v2658_v19 }
 0x1f4   :  { %2370 = vmatpush3.bf16.msra.mxu1 %v2588_v4 }
 0x1f5   :  { %2400 = vmatpush3.bf16.msra.mxu0 %v2589_v5  ;;  %2371 = vmatprep.subr.bf16.mxu1 %v2658_v19  ;;  %v2087_v5 = vld [vmem:[%s3254_s4 + $0x1c] sm:$0xf] }
 0x1f6   :  { %2401 = vmatprep.subr.bf16.mxu0 %v2658_v19 }
 0x1f8   :  { %2372 = vmatpush3.bf16.msra.mxu1 %v2590_v6 }
 0x1f9   :  { %2402 = vmatpush3.bf16.msra.mxu0 %v2591_v7  ;;  %2373 = vmatprep.subr.bf16.mxu1 %v2658_v19 }
 0x1fa   :  { %2403 = vmatprep.subr.bf16.mxu0 %v2658_v19 }
 0x1fc   :  { %2374 = vmatpush3.bf16.msra.mxu1 %v2592_v8  ;;  %v2615_v8 = vld [vmem:[%s3251_s5 + $0x1c0] sm:$0xff]  }
 0x1fd   :  { %2404 = vmatpush3.bf16.msra.mxu0 %v2593_v9  ;;  %2375 = vmatprep.subr.bf16.mxu1 %v2658_v19 }
 0x1fe   :  { %2405 = vmatprep.subr.bf16.mxu0 %v2658_v19 }
 0x200   :  { %2376 = vmatpush3.bf16.msra.mxu1 %v2594_v10 }
 0x201   :  { %2406 = vmatpush3.bf16.msra.mxu0 %v2595_v11  ;;  %2377 = vmatprep.subr.bf16.mxu1 %v2658_v19  ;;  %v2617_v11 = vld [vmem:[%s3251_s5 + $0x1c8] sm:$0xff]  }
 0x202   :  { %2437 = vmatprep.subr.bf16.mxu0 %v2658_v19 }
 0x204   :  { %2378 = vmatpush3.bf16.msra.mxu1 %v2596_v12  ;;  %v2061_v12 = vld [vmem:[%s3254_s4 + $0x18] sm:$0xf] }
 0x205   :  { %2379 = vmatprep.subr.bf16.mxu1 %v2658_v19 }
 0x208   :  { %2380 = vmatpush3.bf16.msra.mxu1 %v2597_v13  ;;  %v2614_v13 = vld [vmem:[%s3251_s5 + $0x180] sm:$0xff]  }
 0x209   :  { %2411 = vmatprep.subr.bf16.mxu1 %v2658_v19 }
 0x2ae   :  { %v538_v14 = vpop.f32.mrb[4].mxu0 }
 0x2af   :  { %v2357_v15 = vpop.f32.mrb[5].mxu0 }
 0x2b0   :  { %v541_v16 = vpop.f32.mrb[6].mxu0  ;;  %v2616_v15 = vld [vmem:[%s3251_s5 + $0x188] sm:$0xff]  }
 0x2b1   :  { %v2358_v17 = vpop.f32.mrb[7].mxu0  ;;  %v2621_v16 = vld [vmem:[%s3251_s5 + $0x1d8] sm:$0xff]  }
 0x2b2   :  { %v2618_v17 = vld [vmem:[%s3251_s5 + $0x190] sm:$0xff]  }
 0x2b6   :  { %v450_v18 = vpop.f32.mrb[8].mxu1  ;;  %v735_v20 = vpop.f32.mrb[8].mxu0 }
 0x2b7   :  { %v2959_v21 = vadd.f32 %v538_v14, %v450_v18  ;;  %v741_v22 = vpack.c.bf16 %v735_v20, %v735_v20  ;;  %v2337_v23 = vpop.f32.mrb[9].mxu1  ;;  %v2389_v24 = vpop.f32.mrb[9].mxu0  ;;  %v2619_v14 = vld [vmem:[%s3251_s5 + $0x1d0] sm:$0xff]   ;;  %v2623_v18 = vld [vmem:[%s3251_s5 + $0x1e0] sm:$0xff]   ;;  %v2620_v20 = vld [vmem:[%s3251_s5 + $0x198] sm:$0xff]  }
 0x2b8   :  { %v453_v25 = vpop.f32.mrb[10].mxu1  ;;  %v738_v26 = vpop.f32.mrb[10].mxu0  ;;  %v2625_v23 = vld [vmem:[%s3251_s5 + $0x1e8] sm:$0xff]   ;;  %v2626_v24 = vld [vmem:[%s3251_s5 + $0x1b0] sm:$0xff]  }
 0x2b9   :  { %v2338_v27 = vpop.f32.mrb[11].mxu1  ;;  %2408 = vmatmul.mubr.bf16.vlgmr.msra.gmra.mrb[12].mxu0 %v741_v22  ;;  %v2390_v28 = vpop.f32.mrb[11].mxu0  ;;  %v2624_v22 = vld [vmem:[%s3251_s5 + $0x1a8] sm:$0xff]   ;;  %v2627_v25 = vld [vmem:[%s3251_s5 + $0x1f0] sm:$0xff]   ;;  %v2628_v26 = vld [vmem:[%s3251_s5 + $0x1b8] sm:$0xff]  }
 0x2ba   :  { %2438 = vmatpush3.bf16.msra.mxu0 %v2825_v39  ;;  %2439 = vmatprep.mubr.msk.bf16.mxu0 %vm2659_vm0, %v2658_v19  ;;  %v2629_v27 = vld [vmem:[%s3251_s5 + $0x1f8] sm:$0xff]   ;;  %v2630_v28 = vld [vmem:[%s3255_s7 + $0x40] sm:$0xff]  }
 0x2bb   :  { %2443 = vmatprep.subr.bf16.mxu0 %v2658_v19 }
 0x2be   :  { %v583_v29 = vpop.f32.mrb[12].mxu1 }
 0x2bf   :  { %v589_v31 = vpack.c.bf16 %v583_v29, %v583_v29  ;;  %v2363_v32 = vpop.f32.mrb[13].mxu1 }
 0x2c0   :  { %v586_v34 = vpop.f32.mrb[14].mxu1 }
 0x2c1   :  { %v2364_v35 = vpop.f32.mrb[15].mxu1  ;;  %2382 = vmatmul.mubr.bf16.vlgmr.msra.gmra.mrb[16].mxu1 %v589_v31  ;;  %2440 = vmatmul.mubr.msk.bf16.vlgmr.msra.gmra.mrb[16].mxu0 %vm240_vm2, %v2035_v30 }
 0x2c2   :  { %2412 = vmatpush3.bf16.msra.mxu1 %v2825_v39  ;;  %2413 = vmatprep.mubr.msk.bf16.mxu1 %vm2659_vm0, %v2658_v19  ;;  %v2631_v35 = vld [vmem:[%s3255_s7] sm:$0xff]  }
 0x2c3   :  { %2444 = vmatpush3.bf16.msra.mxu0 %v2598_v33  ;;  %2417 = vmatprep.subr.bf16.mxu1 %v2658_v19 }
 0x2c4   :  { %2445 = vmatprep.subr.bf16.mxu0 %v2658_v19  ;;  %2459 = vmatprep.mubr.msk.bf16.mxu0 %vm2659_vm0, %v2658_v19 }
 0x2c7   :  { %2446 = vmatpush3.bf16.msra.mxu0 %v2599_v36 }
 0x2c8   :  { %2447 = vmatprep.subr.bf16.mxu0 %v2658_v19 }
 0x2c9   :  { %2414 = vmatmul.mubr.msk.bf16.vlgmr.msra.gmra.mrb[20].mxu1 %vm240_vm2, %v2009_v37 }
 0x2ca   :  { %2418 = vmatpush3.bf16.msra.mxu1 %v2600_v38  ;;  %2433 = vmatprep.mubr.msk.bf16.mxu1 %vm2659_vm0, %v2658_v19 }
 0x2cb   :  { %2448 = vmatpush3.bf16.msra.mxu0 %v2601_v40  ;;  %2419 = vmatprep.subr.bf16.mxu1 %v2658_v19 }
 0x2cc   :  { %2449 = vmatprep.subr.bf16.mxu0 %v2658_v19 }
 0x2ce   :  { %2420 = vmatpush3.bf16.msra.mxu1 %v2602_v41  ;;  %v2632_v41 = vld [vmem:[%s3255_s7 + $0x48] sm:$0xff]  }
 0x2cf   :  { %2450 = vmatpush3.bf16.msra.mxu0 %v2603_v42  ;;  %2421 = vmatprep.subr.bf16.mxu1 %v2658_v19 }
 0x2d0   :  { %2451 = vmatprep.subr.bf16.mxu0 %v2658_v19 }
 0x2d2   :  { %2422 = vmatpush3.bf16.msra.mxu1 %v2604_v43 }
 0x2d3   :  { %2452 = vmatpush3.bf16.msra.mxu0 %v2605_v44  ;;  %2423 = vmatprep.subr.bf16.mxu1 %v2658_v19 }
 0x2d4   :  { %2453 = vmatprep.subr.bf16.mxu0 %v2658_v19 }
 0x2d6   :  { %2424 = vmatpush3.bf16.msra.mxu1 %v2606_v45 }
 0x2d7   :  { %2454 = vmatpush3.bf16.msra.mxu0 %v2607_v46  ;;  %2425 = vmatprep.subr.bf16.mxu1 %v2658_v19 }
 0x2d8   :  { %2455 = vmatprep.subr.bf16.mxu0 %v2658_v19 }
 0x2da   :  { %2426 = vmatpush3.bf16.msra.mxu1 %v2608_v47  ;;  %v2633_v47 = vld [vmem:[%s3255_s7 + $0x8] sm:$0xff]  }
 0x2db   :  { %2456 = vmatpush3.bf16.msra.mxu0 %v2609_v48  ;;  %2427 = vmatprep.subr.bf16.mxu1 %v2658_v19  ;;  %v2634_v48 = vld [vmem:[%s3255_s7 + $0x50] sm:$0xff]  }
 0x2dc   :  { %2457 = vmatprep.subr.bf16.mxu0 %v2658_v19 }
 0x2de   :  { %2428 = vmatpush3.bf16.msra.mxu1 %v2610_v49 }
 0x2df   :  { %2458 = vmatpush3.bf16.msra.mxu0 %v2611_v50  ;;  %2429 = vmatprep.subr.bf16.mxu1 %v2658_v19 }
 0x2e0   :  { %2489 = vmatprep.subr.bf16.mxu0 %v2658_v19 }
 0x2e2   :  { %2430 = vmatpush3.bf16.msra.mxu1 %v2612_v51 }
 0x2e3   :  { %2431 = vmatprep.subr.bf16.mxu1 %v2658_v19 }
 0x2e6   :  { %2432 = vmatpush3.bf16.msra.mxu1 %v2613_v52  ;;  %v2636_v52 = vld [vmem:[%s3255_s7 + $0x10] sm:$0xff]  }
 0x2e7   :  { %2463 = vmatprep.subr.bf16.mxu1 %v2658_v19 }
 0x38c   :  { %v841_v53 = vpop.f32.mrb[12].mxu0 }
 0x38d   :  { %v2409_v54 = vpop.f32.mrb[13].mxu0 }
 0x38e   :  { %v844_v55 = vpop.f32.mrb[14].mxu0  ;;  %v2637_v54 = vld [vmem:[%s3255_s7 + $0x58] sm:$0xff]  }
 0x38f   :  { %v2410_v56 = vpop.f32.mrb[15].mxu0 }
 0x390   :  { %v2639_v56 = vld [vmem:[%s3255_s7 + $0x18] sm:$0xff]  }
 0x394   :  { %v689_v57 = vpop.f32.mrb[16].mxu1  ;;  %v1039_v58 = vpop.f32.mrb[16].mxu0 }
 0x395   :  { %v695_v59 = vadd.f32 %v689_v57, %v2959_v21  ;;  %v1045_v60 = vpack.c.bf16 %v1039_v58, %v1039_v58  ;;  %v2383_v61 = vpop.f32.mrb[17].mxu1  ;;  %v2441_v62 = vpop.f32.mrb[17].mxu0  ;;  %v2622_v21 = vld [vmem:[%s3251_s5 + $0x1a0] sm:$0xff]  }
 0x396   :  { %v692_v63 = vpop.f32.mrb[18].mxu1  ;;  %v1042_v0 = vpop.f32.mrb[18].mxu0  ;;  %v2640_v57 = vld [vmem:[%s3255_s7 + $0x60] sm:$0xff]   ;;  %v2638_v61 = vld [vmem:[%s3251_s5 + $0x208] sm:$0xff]  }
 0x397   :  { %v2384_v1 = vpop.f32.mrb[19].mxu1  ;;  %2460 = vmatmul.mubr.bf16.vlgmr.msra.gmra.mrb[20].mxu0 %v1045_v60  ;;  %v2442_v2 = vpop.f32.mrb[19].mxu0  ;;  %v3046_v3 = vadd.f32 %v841_v53, %v695_v59  ;;  %v2113_v58 = vld [vmem:[%s3254_s4 + $0x20] sm:$0xf]  ;;  %v2643_v60 = vld [vmem:[%s3255_s7 + $0x68] sm:$0xff]   ;;  %v2646_v63 = vld [vmem:[%s3255_s7 + $0x70] sm:$0xff]  }
 0x398   :  { %2490 = vmatpush3.bf16.msra.mxu0 %v2825_v39  ;;  %2491 = vmatprep.mubr.msk.bf16.mxu0 %vm2659_vm0, %v2658_v19  ;;  %v2642_v59 = vld [vmem:[%s3255_s7 + $0x20] sm:$0xff]   ;;  %v2645_v62 = vld [vmem:[%s3255_s7 + $0x28] sm:$0xff]   ;;  %v2641_v0 = vld [vmem:[%s3251_s5 + $0x210] sm:$0xff]  }
 0x399   :  { %2495 = vmatprep.subr.bf16.mxu0 %v2658_v19  ;;  %v2648_v1 = vld [vmem:[%s3255_s7 + $0x30] sm:$0xff]   ;;  %v2649_v2 = vld [vmem:[%s3255_s7 + $0x78] sm:$0xff]  }
 0x39c   :  { %v887_v4 = vpop.f32.mrb[20].mxu1 }
 0x39d   :  { %v893_v6 = vpack.c.bf16 %v887_v4, %v887_v4  ;;  %v2415_v7 = vpop.f32.mrb[21].mxu1  ;;  %v2647_v4 = vld [vmem:[%s3251_s5 + $0x220] sm:$0xff]  }
 0x39e   :  { %v890_v9 = vpop.f32.mrb[22].mxu1  ;;  %v1608_v7 = vld [vmem:[%s3256_s6] sm:$0xff] }
 0x39f   :  { %v2416_v10 = vpop.f32.mrb[23].mxu1  ;;  %2434 = vmatmul.mubr.bf16.vlgmr.msra.gmra.mrb[24].mxu1 %v893_v6  ;;  %2492 = vmatmul.mubr.msk.bf16.vlgmr.msra.gmra.mrb[24].mxu0 %vm240_vm2, %v2087_v5  ;;  %v2650_v5 = vld [vmem:[%s3251_s5 + $0x228] sm:$0xff]   ;;  %v2651_v6 = vld [vmem:[%s3255_s7 + $0x38] sm:$0xff]   ;;  %v2139_v9 = vcombine.low %v1608_v7, %v1608_v7 }
 0x3a0   :  { %2464 = vmatpush3.bf16.msra.mxu1 %v2825_v39  ;;  %2465 = vmatprep.mubr.msk.bf16.mxu1 %vm2659_vm0, %v2658_v19  ;;  %v2654_v10 = vld [vmem:[%s3251_s5 + $0x230] sm:$0xff]  }
 0x3a1   :  { %2469 = vmatprep.subr.bf16.mxu1 %v2658_v19  ;;  %2496 = vmatpush3.bf16.msra.mxu0 %v2615_v8  ;;  %v2140_v8 = vcombine.high %v1608_v7, %v1608_v7 }
 0x3a2   :  { %2497 = vmatprep.subr.bf16.mxu0 %v2658_v19  ;;  %2511 = vmatprep.mubr.msk.bf16.mxu0 %vm2659_vm0, %v2658_v19 }
 0x3a5   :  { %2498 = vmatpush3.bf16.msra.mxu0 %v2617_v11  ;;  %v2655_v11 = vld [vmem:[%s3251_s5 + $0x238] sm:$0xff]  }
 0x3a6   :  { %2499 = vmatprep.subr.bf16.mxu0 %v2658_v19 }
 0x3a7   :  { %2466 = vmatmul.mubr.msk.bf16.vlgmr.msra.gmra.mrb[28].mxu1 %vm240_vm2, %v2061_v12 }
 0x3a8   :  { %2470 = vmatpush3.bf16.msra.mxu1 %v2614_v13  ;;  %2485 = vmatprep.mubr.msk.bf16.mxu1 %vm2659_vm0, %v2658_v19 }
 0x3a9   :  { %2471 = vmatprep.subr.bf16.mxu1 %v2658_v19  ;;  %2500 = vmatpush3.bf16.msra.mxu0 %v2619_v14 }
 0x3aa   :  { %2501 = vmatprep.subr.bf16.mxu0 %v2658_v19 }
 0x3ac   :  { %2472 = vmatpush3.bf16.msra.mxu1 %v2616_v15 }
 0x3ad   :  { %2473 = vmatprep.subr.bf16.mxu1 %v2658_v19  ;;  %2502 = vmatpush3.bf16.msra.mxu0 %v2621_v16 }
 0x3ae   :  { %2503 = vmatprep.subr.bf16.mxu0 %v2658_v19 }
 0x3b0   :  { %2474 = vmatpush3.bf16.msra.mxu1 %v2618_v17 }
 0x3b1   :  { %2475 = vmatprep.subr.bf16.mxu1 %v2658_v19  ;;  %2504 = vmatpush3.bf16.msra.mxu0 %v2623_v18 }
 0x3b2   :  { %2505 = vmatprep.subr.bf16.mxu0 %v2658_v19 }
 0x3b4   :  { %2476 = vmatpush3.bf16.msra.mxu1 %v2620_v20 }
 0x3b5   :  { %2477 = vmatprep.subr.bf16.mxu1 %v2658_v19  ;;  %2506 = vmatpush3.bf16.msra.mxu0 %v2625_v23 }
 0x3b6   :  { %2507 = vmatprep.subr.bf16.mxu0 %v2658_v19 }
 0x3b8   :  { %2478 = vmatpush3.bf16.msra.mxu1 %v2622_v21 }
 0x3b9   :  { %2479 = vmatprep.subr.bf16.mxu1 %v2658_v19  ;;  %2508 = vmatpush3.bf16.msra.mxu0 %v2627_v25 }
 0x3ba   :  { %2509 = vmatprep.subr.bf16.mxu0 %v2658_v19 }
 0x3bc   :  { %2480 = vmatpush3.bf16.msra.mxu1 %v2624_v22 }
 0x3bd   :  { %2481 = vmatprep.subr.bf16.mxu1 %v2658_v19  ;;  %2510 = vmatpush3.bf16.msra.mxu0 %v2629_v27 }
 0x3be   :  { %2283 = vmatprep.subr.bf16.mxu0 %v2630_v28 }
 0x3c0   :  { %2482 = vmatpush3.bf16.msra.mxu1 %v2626_v24 }
 0x3c1   :  { %2483 = vmatprep.subr.bf16.mxu1 %v2658_v19 }
 0x3c4   :  { %2484 = vmatpush3.bf16.msra.mxu1 %v2628_v26 }
 0x3c5   :  { %2515 = vmatprep.subr.bf16.mxu1 %v2658_v19 }
 0x46a   :  { %v1145_v29 = vpop.f32.mrb[20].mxu0 }
 0x46b   :  { %v2461_v30 = vpop.f32.mrb[21].mxu0 }
 0x46c   :  { %v1148_v31 = vpop.f32.mrb[22].mxu0 }
 0x46d   :  { %v2462_v32 = vpop.f32.mrb[23].mxu0 }
 0x472   :  { %v993_v33 = vpop.f32.mrb[24].mxu1  ;;  %v1343_v34 = vpop.f32.mrb[24].mxu0 }
 0x473   :  { %v999_v36 = vadd.f32 %v993_v33, %v3046_v3  ;;  %v2435_v37 = vpop.f32.mrb[25].mxu1  ;;  %v1349_v38 = vpack.c.bf16 %v1343_v34, %v1343_v34  ;;  %v2493_v40 = vpop.f32.mrb[25].mxu0  ;;  %v2644_v3 = vld [vmem:[%s3251_s5 + $0x218] sm:$0xff]   ;;  %v2157_v33 = vld [vmem:[%s3257_s8] ss:$0 sm:$0xff] }
 0x474   :  { %v996_v42 = vpop.f32.mrb[26].mxu1  ;;  %v1346_v43 = vpop.f32.mrb[26].mxu0 }
 0x475   :  { %v3141_v44 = vadd.f32 %v1145_v29, %v999_v36  ;;  %v2436_v45 = vpop.f32.mrb[27].mxu1  ;;  %2512 = vmatmul.mubr.bf16.vlgmr.msra.gmra.mrb[28].mxu0 %v1349_v38  ;;  %v2494_v46 = vpop.f32.mrb[27].mxu0  ;;  %v1801_v43 = vld [vmem:[%s3259_s10] sm:$0xff] }
 0x476   :  { %2284 = vmatpush3.bf16.msra.mxu0 %v2631_v35  ;;  %1776 = vmatprep.mubr.bf16.mxu0 %v2140_v8  ;;  %v2158_v35 = vld [vmem:[%s3258_s9] ss:$0 sm:$0xff] }
 0x477   :  { %2285 = vmatprep.subr.bf16.mxu0 %v2632_v41  ;;  %v2161_v46 = vld [vmem:[%s3261_s12] ss:$0 sm:$0xff] }
 0x47a   :  { %v1191_v49 = vpop.f32.mrb[28].mxu1  ;;  %2286 = vmatpush3.bf16.msra.mxu0 %v2633_v47 }
 0x47b   :  { %v1197_v50 = vpack.c.bf16 %v1191_v49, %v1191_v49  ;;  %v2467_v51 = vpop.f32.mrb[29].mxu1  ;;  %2287 = vmatprep.subr.bf16.mxu0 %v2634_v48 }
 0x47c   :  { %v1194_v53 = vpop.f32.mrb[30].mxu1 }
 0x47d   :  { %v2468_v55 = vpop.f32.mrb[31].mxu1  ;;  %2486 = vmatmul.mubr.bf16.vlgmr.msra.gmra.mrb[32].mxu1 %v1197_v50 }
 0x47e   :  { %2516 = vmatpush3.bf16.msra.mxu1 %v2825_v39  ;;  %2517 = vmatprep.mubr.msk.bf16.mxu1 %vm2659_vm0, %v2658_v19  ;;  %v2635_v39 = vld [vmem:[%s3251_s5 + $0x200] sm:$0xff]  }
 0x47f   :  { %2521 = vmatprep.subr.bf16.mxu1 %v2658_v19  ;;  %2288 = vmatpush3.bf16.msra.mxu0 %v2636_v52 }
 0x480   :  { %2289 = vmatprep.subr.bf16.mxu0 %v2637_v54 }
 0x483   :  { %2290 = vmatpush3.bf16.msra.mxu0 %v2639_v56 }
 0x484   :  { %2291 = vmatprep.subr.bf16.mxu0 %v2640_v57 }
 0x485   :  { %2518 = vmatmul.mubr.msk.bf16.vlgmr.msra.gmra.mrb[36].mxu1 %vm240_vm2, %v2113_v58 }
 0x486   :  { %2522 = vmatpush3.bf16.msra.mxu1 %v2635_v39  ;;  %2537 = vmatprep.mubr.msk.bf16.mxu1 %vm2659_vm0, %v2658_v19 }
 0x487   :  { %2523 = vmatprep.subr.bf16.mxu1 %v2658_v19  ;;  %2292 = vmatpush3.bf16.msra.mxu0 %v2642_v59 }
 0x488   :  { %2293 = vmatprep.subr.bf16.mxu0 %v2643_v60 }
 0x48a   :  { %2524 = vmatpush3.bf16.msra.mxu1 %v2638_v61 }
 0x48b   :  { %2525 = vmatprep.subr.bf16.mxu1 %v2658_v19  ;;  %2294 = vmatpush3.bf16.msra.mxu0 %v2645_v62 }
 0x48c   :  { %2295 = vmatprep.subr.bf16.mxu0 %v2646_v63 }
 0x48e   :  { %2526 = vmatpush3.bf16.msra.mxu1 %v2641_v0 }
 0x48f   :  { %2527 = vmatprep.subr.bf16.mxu1 %v2658_v19  ;;  %2296 = vmatpush3.bf16.msra.mxu0 %v2648_v1 }
 0x490   :  { %2297 = vmatprep.subr.bf16.mxu0 %v2649_v2 }
 0x492   :  { %2528 = vmatpush3.bf16.msra.mxu1 %v2644_v3 }
 0x493   :  { %2529 = vmatprep.subr.bf16.mxu1 %v2658_v19  ;;  %2298 = vmatpush3.bf16.msra.mxu0 %v2651_v6 }
 0x496   :  { %2530 = vmatpush3.bf16.msra.mxu1 %v2647_v4  ;;  %1777 = vmatmul.mubr.bf16.vlgmr.msra.gmra.mrb[32].mxu0 %v2139_v9 }
 0x497   :  { %2531 = vmatprep.subr.bf16.mxu1 %v2658_v19 }
 0x49a   :  { %2532 = vmatpush3.bf16.msra.mxu1 %v2650_v5 }
 0x49b   :  { %2533 = vmatprep.subr.bf16.mxu1 %v2658_v19 }
 0x49e   :  { %2534 = vmatpush3.bf16.msra.mxu1 %v2654_v10 }
 0x49f   :  { %2535 = vmatprep.subr.bf16.mxu1 %v2658_v19 }
 0x4a2   :  { %2536 = vmatpush3.bf16.msra.mxu1 %v2655_v11 }
 0x4a3   :  { %2541 = vmatprep.subr.mxu1 %v2658_v19 }
 0x548   :  { %v1449_v12 = vpop.f32.mrb[28].mxu0 }
 0x549   :  { %v2513_v13 = vpop.f32.mrb[29].mxu0 }
 0x54a   :  { %v1452_v14 = vpop.f32.mrb[30].mxu0 }
 0x54b   :  { %v2514_v15 = vpop.f32.mrb[31].mxu0 }
 0x550   :  { %v1297_v16 = vpop.f32.mrb[32].mxu1 }
 0x551   :  { %v1303_v17 = vadd.f32 %v1297_v16, %v3141_v44  ;;  %v2487_v18 = vpop.f32.mrb[33].mxu1  ;;  %v2160_v44 = vld [vmem:[%s3260_s11] ss:$0 sm:$0xff] }
 0x552   :  { %v1300_v20 = vpop.f32.mrb[34].mxu1 }
 0x553   :  { %v1455_v21 = vadd.f32 %v1449_v12, %v1303_v17  ;;  %v2488_v22 = vpop.f32.mrb[35].mxu1 }
 0x558   :  { %v1495_v23 = vpop.f32.mrb[36].mxu1 }
 0x559   :  { %v1501_v24 = vpack.c.bf16 %v1495_v23, %v1495_v23  ;;  %v2519_v25 = vpop.f32.mrb[37].mxu1 }
 0x55a   :  { %v1498_v26 = vpop.f32.mrb[38].mxu1 }
 0x55b   :  { %v2520_v27 = vpop.f32.mrb[39].mxu1  ;;  %2538 = vmatmul.mubr.bf16.vlgmr.msra.gmra.mrb[40].mxu1 %v1501_v24 }
 0x55c   :  { %2543 = vmatprep.mubr.msk.f32.mxu1 %vm2659_vm0, %v2658_v19 }
 0x569   :  { %v2299_v28 = vpop.f32.mrb[32].mxu0 }
 0x56a   :  { %v2300_v29 = vpop.f32.mrb[33].mxu0 }
 0x56b   :  { %v2301_v30 = vadd.f32 %v2300_v29, %v2299_v28  ;;  %v2302_v31 = vpop.f32.mrb[34].mxu0 }
 0x56c   :  { %v2303_v32 = vpop.f32.mrb[35].mxu0 }
 0x56d   :  { %v1791_v34 = vmul.f32 %v2301_v30, %v2157_v33 }
 0x56f   :  { %v1799_v36 = vadd.f32 %v2158_v35, %v1791_v34 }
 0x62e   :  { %v1601_v37 = vpop.f32.mrb[40].mxu1 }
 0x62f   :  { %v1607_v38 = vadd.f32 %v1601_v37, %v1455_v21  ;;  %v2539_v40 = vpop.f32.mrb[41].mxu1 }
 0x630   :  { %v1604_v41 = vpop.f32.mrb[42].mxu1 }
 0x631   :  { %v1800_v19 = vadd.f32 %v1799_v36, %v1607_v38  ;;  %v2540_v42 = vpop.f32.mrb[43].mxu1 }
 0x633   :  { %2542 = vmatpush3.msra.mxu1 %v1800_v19 }
 0x634   :  { %2544 = vmatmul.mubr.msk.f32.vlgmr.msra.gmra.mrb[44].mxu1 %vm240_vm2, %v1801_v43 }
 0x707   :  { %v1871_v45 = vpop.f32.mrb[44].mxu1 }
 0x708   :  { %v1882_v47 = vmul.f32 %v2160_v44, %v1871_v45  ;;  %v2545_v48 = vpop.f32.mrb[45].mxu1 }
 0x70a   :  { %v1890_v49 = vadd.f32 %v2161_v46, %v1882_v47 }
 0x70c   :  { %v1891_v50 = vmul.f32 %v1890_v49, %v1890_v49 }
 0x70e   :  { %1892 = vadd.xlane.f32.xlu0 %v1891_v50 }
 0x79b   :  { %v1893_v51 = vpop.xlane.xlu0 %1892 }
 0x79c   :  { %v1894_v52 = vadd.f32 1e-10, %v1893_v51 }
 0x79e   :  { %2656 = vrsqrt.f32 %v1894_v52 }
 0x7a8   :  { %v2657_v53 = vpop.eup %2656 }
 0x7a9   :  { %v1896_v54 = vmul.f32 %v2657_v53, %v1890_v49 }
 0x7ab   :  { %1897 = vst [vmem:[%s3262_s13] sm:$0xff] %v1896_v54 }

</bundles_post_ra>
